<compile_context>
chip_gen: v6e
topology: v6e:2x2x1
jax: 0.10.0
libtpu: 0.0.40
codegen_flags: <defaults>
</compile_context>

<pallas_src>
import functools

import jax
import jax.numpy as jnp
from jax.experimental import pallas as pl
from jax.experimental.pallas import tpu as pltpu


_VMEM_BUDGET = 24 * 1024 * 1024   # target for the double-buffered working set
_VMEM_LIMIT = 32 * 1024 * 1024    # explicit scoped-VMEM limit (ok on v5e/v6e/v7x)
_TM_CAP = 2048                    # max rows per activation tile


def _round_up(x, m):
    return ((x + m - 1) // m) * m


@functools.lru_cache(maxsize=None)
def _num_megacore_tcs():
    """2 on v7x-style chips (2 TensorCores/chip), else 1. Safe fallback = 1."""
    try:
        kind = jax.devices()[0].device_kind.lower()
        if "v7" in kind or "7x" in kind or kind.startswith("tpu7"):
            return 2
    except Exception:
        pass
    return 1


def _choose_tm(M, per_row_bytes, fixed_bytes, *, min_blocks=1):
    """Pick an M-tile: VMEM-budgeted, 8-aligned (or full-M), pad-avoiding."""
    avail = max(_VMEM_BUDGET - fixed_bytes, 8 * per_row_bytes)
    tm_cap = max(8, min(_TM_CAP, int(avail // per_row_bytes)) // 8 * 8)
    if M <= tm_cap:
        if min_blocks >= 2 and M >= 16:
            tm = _round_up(-(-M // 2), 8)          # ceil(M/2), 8-aligned
            return tm, 2 * tm
        return M, M                                 # full-M block, no padding
    # M > tm_cap: prefer an 8-aligned divisor of M in [tm_cap/2, tm_cap] -> no pad
    for cand in range(tm_cap, max(tm_cap // 2, 8) - 1, -8):
        if M % cand == 0:
            return cand, M
    return tm_cap, _round_up(M, tm_cap)


# ----------------------------------------------------------------------------
# Pallas kernel: single-shot matmul (full-K block) + fused bias + optional ReLU
# ----------------------------------------------------------------------------
def _matmul_bias_act_kernel(a_ref, b_ref, bias_ref, o_ref, *, apply_relu):
    a = a_ref[...]
    if a.dtype != jnp.bfloat16:            # inputs are pre-cast; kept for safety
        a = a.astype(jnp.bfloat16)
    acc = jnp.dot(a, b_ref[...], preferred_element_type=jnp.float32)  # f32 accum
    r = acc + bias_ref[...]                # f32 epilogue (v5e has no bf16 VALU)
    if apply_relu:
        r = jnp.maximum(r, 0.0)
    o_ref[...] = r.astype(o_ref.dtype)     # down-cast only at the store


def matmul_bias_act(a, b, bias, *, apply_relu, out_n, out_dtype=jnp.float32):
    """relu(a @ b + bias)[:M, :out_n] as one Pallas kernel (no K grid axis).

    a:    (M, K)  bf16/f32 activations (K taken as one full block)
    b:    (K, Np) bf16 weights, Np % 128 == 0
    bias: (1, Np) f32
    """
    M, K = a.shape
    Kb, Np = b.shape
    assert K == Kb and Np % 128 == 0
    tn = min(Np, 256)

    o_bytes = jnp.dtype(out_dtype).itemsize
    per_row = 2 * (K * a.dtype.itemsize + tn * o_bytes)          # a tile + out tile (x2 bufs)
    fixed = 2 * (K * tn * b.dtype.itemsize + tn * 4)             # weight tile + bias (x2 bufs)
    # v7x: make sure a single-N-block grid still has >=2 blocks for the 2 TCs.
    min_blocks = 2 if (_num_megacore_tcs() >= 2 and Np == tn) else 1
    tm, Mp = _choose_tm(M, per_row, fixed, min_blocks=min_blocks)
    a_p = a if Mp == M else jnp.pad(a, ((0, Mp - M), (0, 0)))

    kernel = functools.partial(_matmul_bias_act_kernel, apply_relu=apply_relu)
    out = pl.pallas_call(
        kernel,
        out_shape=jax.ShapeDtypeStruct((Mp, Np), out_dtype),
        grid_spec=pltpu.PrefetchScalarGridSpec(
            num_scalar_prefetch=0,
            grid=(Mp // tm, Np // tn),
            in_specs=[
                pl.BlockSpec((tm, K), lambda i, j: (i, 0)),   # full-K activation tile
                pl.BlockSpec((K, tn), lambda i, j: (0, j)),   # full-K weight tile
                pl.BlockSpec((1, tn), lambda i, j: (0, j)),   # bias row
            ],
            out_specs=pl.BlockSpec((tm, tn), lambda i, j: (i, j)),
        ),
        compiler_params=pltpu.CompilerParams(
            dimension_semantics=("parallel", "parallel"),
            vmem_limit_bytes=_VMEM_LIMIT,
        ),
    )(a_p, b, bias)

    if Mp != M or Np != out_n:
        out = out[:M, :out_n]
    return out


# ----------------------------------------------------------------------------
# Pallas kernel: fused FC head  q = relu(x @ W1 + b1) @ W2 + b2
# ----------------------------------------------------------------------------
def _fc_head_kernel(x_ref, w1_ref, b1_ref, w2_ref, b2_ref, o_ref):
    x = x_ref[...]
    if x.dtype != jnp.bfloat16:
        x = x.astype(jnp.bfloat16)
    h = jnp.dot(x, w1_ref[...], preferred_element_type=jnp.float32)
    h = jnp.maximum(h + b1_ref[...], 0.0)                       # f32 epilogue
    q = jnp.dot(h.astype(jnp.bfloat16), w2_ref[...],
                preferred_element_type=jnp.float32)
    o_ref[...] = (q + b2_ref[...]).astype(o_ref.dtype)


def fc_head(x, w1, b1, w2, b2):
    """x:(M,K) bf16, w1:(K,H) bf16, b1:(1,H) f32, w2:(H,Np) bf16, b2:(1,Np) f32."""
    M, K = x.shape
    Kb, H = w1.shape
    Hb, Np = w2.shape
    assert K == Kb and H == Hb and Np % 128 == 0 and H % 128 == 0

    per_row = 2 * K * x.dtype.itemsize + H * 4 + 2 * Np * 4     # x tile, f32 h, out tile
    fixed = 2 * (K * H * 2 + H * 4 + H * Np * 2 + Np * 4)       # both weights + biases
    tm, Mp = _choose_tm(M, per_row, fixed, min_blocks=1)
    x_p = x if Mp == M else jnp.pad(x, ((0, Mp - M), (0, 0)))

    out = pl.pallas_call(
        _fc_head_kernel,
        out_shape=jax.ShapeDtypeStruct((Mp, Np), jnp.float32),
        grid_spec=pltpu.PrefetchScalarGridSpec(
            num_scalar_prefetch=0,
            grid=(Mp // tm,),
            in_specs=[
                pl.BlockSpec((tm, K), lambda i: (i, 0)),
                pl.BlockSpec((K, H), lambda i: (0, 0)),
                pl.BlockSpec((1, H), lambda i: (0, 0)),
                pl.BlockSpec((H, Np), lambda i: (0, 0)),
                pl.BlockSpec((1, Np), lambda i: (0, 0)),
            ],
            out_specs=pl.BlockSpec((tm, Np), lambda i: (i, 0)),
        ),
        compiler_params=pltpu.CompilerParams(
            dimension_semantics=("parallel",),
            vmem_limit_bytes=_VMEM_LIMIT,
        ),
    )(x_p, w1, b1, w2, b2)
    return out[:M] if Mp != M else out


# ----------------------------------------------------------------------------
# Conv2d (stride, no padding) = NHWC im2col (glue) + Pallas matmul kernel
# ----------------------------------------------------------------------------
# TODO(synk): fuse the im2col gather into the pallas_call (manual DMA of the
# strided input rows into a VMEM patch buffer) to avoid materializing patches
# in HBM; kept as plain-JAX glue (now bf16, so half the bytes) for robustness.
def _im2col_nhwc(x, kh, kw, stride):
    """x: (B, H, W, C) -> patches (B*OH*OW, KH*KW*C), column order (kh, kw, c)."""
    B, H, W, C = x.shape
    oh = (H - kh) // stride + 1
    ow = (W - kw) // stride + 1
    cols = []
    for i in range(kh):
        for j in range(kw):
            cols.append(
                x[:, i : i + stride * oh : stride, j : j + stride * ow : stride, :]
            )  # (B, oh, ow, C)
    p = jnp.concatenate(cols, axis=-1)  # (B, oh, ow, kh*kw*C) — lane-contiguous
    return p.reshape(B * oh * ow, kh * kw * C), oh, ow


# ----------------------------------------------------------------------------
# Parameters: raw PyTorch-layout init + one-time kernel-ready preparation
# ----------------------------------------------------------------------------
def init_params(key, k_actions, n_frames):
    ks = jax.random.split(key, 10)
    s = 0.05  # deterministic small-scale init (synthetic weights)
    return {
        "conv1_w": jax.random.normal(ks[0], (32, n_frames, 8, 8), jnp.float32) * s,
        "conv1_b": jax.random.normal(ks[1], (32,), jnp.float32) * s,
        "conv2_w": jax.random.normal(ks[2], (64, 32, 4, 4), jnp.float32) * s,
        "conv2_b": jax.random.normal(ks[3], (64,), jnp.float32) * s,
        "conv3_w": jax.random.normal(ks[4], (64, 64, 3, 3), jnp.float32) * s,
        "conv3_b": jax.random.normal(ks[5], (64,), jnp.float32) * s,
        "fc1_w": jax.random.normal(ks[6], (512, 64 * 7 * 7), jnp.float32) * s,
        "fc1_b": jax.random.normal(ks[7], (512,), jnp.float32) * s,
        "fc2_w": jax.random.normal(ks[8], (k_actions, 512), jnp.float32) * s,
        "fc2_b": jax.random.normal(ks[9], (k_actions,), jnp.float32) * s,
    }


def prepare_params(raw, k_actions):
    """One-time weight prep: reshape/permute/pad/cast so forward() does none of it."""

    def prep_conv(w, b, in_c_pad=None):
        oc, c, kh, kw = w.shape
        wt = jnp.transpose(w, (2, 3, 1, 0))  # (kh, kw, c, oc) — matches im2col order
        if in_c_pad is not None and in_c_pad > c:
            wt = jnp.pad(wt, ((0, 0), (0, 0), (0, in_c_pad - c), (0, 0)))
            c = in_c_pad
        wm = wt.reshape(kh * kw * c, oc)
        ocp = _round_up(oc, 128)
        wm = jnp.pad(wm, ((0, 0), (0, ocp - oc))).astype(jnp.bfloat16)
        bp = jnp.pad(b, (0, ocp - oc)).reshape(1, ocp).astype(jnp.float32)
        return wm, bp

    p = {}
    p["c1_w"], p["c1_b"] = prep_conv(raw["conv1_w"], raw["conv1_b"])            # K=256
    p["c2_w"], p["c2_b"] = prep_conv(raw["conv2_w"], raw["conv2_b"])            # K=512
    # conv3 consumes conv2's 128-padded (zero) channels -> K = 3*3*128 = 1152.
    p["c3_w"], p["c3_b"] = prep_conv(raw["conv3_w"], raw["conv3_b"], in_c_pad=128)

    # FC1 rows ordered (h, w, c_pad=128): absorbs PyTorch's C-major flatten AND
    # conv3's 128-channel output padding.  K = 7*7*128 = 6272 (128-aligned).
    fw1 = raw["fc1_w"].reshape(512, 64, 7, 7).transpose(2, 3, 1, 0)  # (h, w, c, out)
    fw1 = jnp.pad(fw1, ((0, 0), (0, 0), (0, 128 - 64), (0, 0)))      # (h, w, 128, out)
    p["fc1_w"] = fw1.reshape(7 * 7 * 128, 512).astype(jnp.bfloat16)
    p["fc1_b"] = raw["fc1_b"].reshape(1, 512).astype(jnp.float32)

    ka_p = _round_up(max(k_actions, 1), 128)
    p["fc2_w"] = jnp.pad(raw["fc2_w"].T, ((0, 0), (0, ka_p - k_actions))).astype(jnp.bfloat16)
    p["fc2_b"] = jnp.pad(raw["fc2_b"], (0, ka_p - k_actions)).reshape(1, ka_p).astype(jnp.float32)
    return p


# ----------------------------------------------------------------------------
# DQNAgent forward
# ----------------------------------------------------------------------------
def dqn_forward(params, state, *, k_actions):
    """state: (B, n_frames, 84, 84) float32 (NCHW) -> Q values (B, k_actions) f32."""
    B = state.shape[0]
    # One NCHW -> NHWC pass + one f32 -> bf16 cast at the input; bf16 everywhere after.
    x = jnp.transpose(state, (0, 2, 3, 1)).astype(jnp.bfloat16)

    # conv1: K=256, slice the 128-padded output back to 32 channels (conv2 K stays 512).
    patches, oh, ow = _im2col_nhwc(x, 8, 8, 4)
    y = matmul_bias_act(patches, params["c1_w"], params["c1_b"],
                        apply_relu=True, out_n=32, out_dtype=jnp.bfloat16)
    x = y.reshape(B, oh, ow, 32)

    # conv2: keep the 128-padded (exactly-zero) channels so conv3's K is 128-aligned.
    patches, oh, ow = _im2col_nhwc(x, 4, 4, 2)
    y = matmul_bias_act(patches, params["c2_w"], params["c2_b"],
                        apply_relu=True, out_n=128, out_dtype=jnp.bfloat16)
    x = y.reshape(B, oh, ow, 128)

    # conv3: keep 128-padded channels; fc1 weight rows absorb the padding.
    patches, oh, ow = _im2col_nhwc(x, 3, 3, 1)
    y = matmul_bias_act(patches, params["c3_w"], params["c3_b"],
                        apply_relu=True, out_n=128, out_dtype=jnp.bfloat16)
    x = y.reshape(B, oh * ow * 128)  # (B, 6272), (h, w, c_pad) order

    # Fused FC head: q = relu(x @ W1 + b1) @ W2 + b2 in a single pallas_call.
    q = fc_head(x, params["fc1_w"], params["fc1_b"], params["fc2_w"], params["fc2_b"])
    return q[:, :k_actions]


if __name__ == "__main__":
    k_actions = 6
    n_frames = 4
    batch = 2
    H = W = 84  # architecture requires 84x84 so the 64*7*7 Linear matches

    key = jax.random.PRNGKey(0)
    pkey, xkey = jax.random.split(key)
    raw_params = init_params(pkey, k_actions, n_frames)
    params = prepare_params(raw_params, k_actions)
    state = jax.random.normal(xkey, (batch, n_frames, H, W), jnp.float32)

    fwd = jax.jit(functools.partial(dqn_forward, k_actions=k_actions))
    q = jax.block_until_ready(fwd(params, state))
    assert q.shape == (batch, k_actions), q.shape
    assert q.dtype == jnp.float32
    print("KERNEL_OK")
</pallas_src>

<mosaic_0001>
module attributes {stable_mosaic.version = 11 : i64} {
  func.func @_matmul_bias_act_kernel(%arg0: i32, %arg1: i32, %arg2: memref<800x256xbf16, #tpu.memory_space<vmem>>, %arg3: memref<256x128xbf16, #tpu.memory_space<vmem>>, %arg4: memref<1x128xf32, #tpu.memory_space<vmem>>, %arg5: memref<800x128xbf16, #tpu.memory_space<vmem>>) attributes {dimension_semantics = [#tpu.dimension_semantics<parallel>, #tpu.dimension_semantics<parallel>], iteration_bounds = array<i64: 1, 1>, scalar_prefetch = 0 : i64, scratch_operands = 0 : i64, tpu.core_type = #tpu.core_type<tc>, window_params = [{transform_indices = @transform_0, window_bounds = array<i64: 800, 256>}, {transform_indices = @transform_1, window_bounds = array<i64: 256, 128>}, {transform_indices = @transform_2, window_bounds = array<i64: 1, 128>}, {transform_indices = @transform_3, window_bounds = array<i64: 800, 128>}]} {
    %c0 = arith.constant 0 : index
    %c0_0 = arith.constant 0 : index
    %0 = vector.load %arg2[%c0, %c0_0] : memref<800x256xbf16, #tpu.memory_space<vmem>>, vector<800x256xbf16>
    %c0_1 = arith.constant 0 : index
    %c0_2 = arith.constant 0 : index
    %1 = vector.load %arg3[%c0_1, %c0_2] : memref<256x128xbf16, #tpu.memory_space<vmem>>, vector<256x128xbf16>
    %cst = arith.constant dense<0.000000e+00> : vector<800x128xf32>
    %2 = tpu.matmul %0, %1, %cst {dimension_numbers = #tpu.dot_dimension_numbers<[1], [0], [0], [1], [0, 0, 1, 1], [], []>} : vector<800x256xbf16>, vector<256x128xbf16>, vector<800x128xf32> -> vector<800x128xf32>
    %c0_3 = arith.constant 0 : index
    %c0_4 = arith.constant 0 : index
    %3 = vector.load %arg4[%c0_3, %c0_4] : memref<1x128xf32, #tpu.memory_space<vmem>>, vector<1x128xf32>
    %4 = vector.broadcast %3 : vector<1x128xf32> to vector<800x128xf32>
    %5 = arith.addf %2, %4 : vector<800x128xf32>
    %cst_5 = arith.constant 0.000000e+00 : f32
    %6 = vector.broadcast %cst_5 : f32 to vector<800x128xf32>
    %7 = arith.maximumf %5, %6 : vector<800x128xf32>
    %8 = arith.truncf %7 : vector<800x128xf32> to vector<800x128xbf16>
    %c0_6 = arith.constant 0 : index
    %c0_7 = arith.constant 0 : index
    %9 = vector.load %arg5[%c0_6, %c0_7] : memref<800x128xbf16, #tpu.memory_space<vmem>>, vector<800x128xbf16>
    tpu.vector_store %arg5[%c0_6, %c0_7], %8 {strides = array<i32>} : memref<800x128xbf16, #tpu.memory_space<vmem>>, vector<800x128xbf16>,
    return
  }
  func.func @transform_0(%arg0: i32, %arg1: i32) -> (i32, i32) {
    %c0_i32 = arith.constant 0 : i32
    %c0_i32_0 = arith.constant 0 : i32
    return %arg0, %c0_i32 : i32, i32
  }
  func.func @transform_1(%arg0: i32, %arg1: i32) -> (i32, i32) {
    %c0_i32 = arith.constant 0 : i32
    %c0_i32_0 = arith.constant 0 : i32
    return %c0_i32, %arg1 : i32, i32
  }
  func.func @transform_2(%arg0: i32, %arg1: i32) -> (i32, i32) {
    %c0_i32 = arith.constant 0 : i32
    %c0_i32_0 = arith.constant 0 : i32
    return %c0_i32, %arg1 : i32, i32
  }
  func.func @transform_3(%arg0: i32, %arg1: i32) -> (i32, i32) {
    %c0_i32 = arith.constant 0 : i32
    return %arg0, %arg1 : i32, i32
  }
}

module attributes {stable_mosaic.version = 11 : i64} {
  func.func @_matmul_bias_act_kernel(%arg0: i32, %arg1: i32, %arg2: memref<162x512xbf16, #tpu.memory_space<vmem>>, %arg3: memref<512x128xbf16, #tpu.memory_space<vmem>>, %arg4: memref<1x128xf32, #tpu.memory_space<vmem>>, %arg5: memref<162x128xbf16, #tpu.memory_space<vmem>>) attributes {dimension_semantics = [#tpu.dimension_semantics<parallel>, #tpu.dimension_semantics<parallel>], iteration_bounds = array<i64: 1, 1>, scalar_prefetch = 0 : i64, scratch_operands = 0 : i64, tpu.core_type = #tpu.core_type<tc>, window_params = [{transform_indices = @transform_0, window_bounds = array<i64: 162, 512>}, {transform_indices = @transform_1, window_bounds = array<i64: 512, 128>}, {transform_indices = @transform_2, window_bounds = array<i64: 1, 128>}, {transform_indices = @transform_3, window_bounds = array<i64: 162, 128>}]} {
    %c0 = arith.constant 0 : index
    %c0_0 = arith.constant 0 : index
    %0 = vector.load %arg2[%c0, %c0_0] : memref<162x512xbf16, #tpu.memory_space<vmem>>, vector<162x512xbf16>
    %c0_1 = arith.constant 0 : index
    %c0_2 = arith.constant 0 : index
    %1 = vector.load %arg3[%c0_1, %c0_2] : memref<512x128xbf16, #tpu.memory_space<vmem>>, vector<512x128xbf16>
    %cst = arith.constant dense<0.000000e+00> : vector<162x128xf32>
    %2 = tpu.matmul %0, %1, %cst {dimension_numbers = #tpu.dot_dimension_numbers<[1], [0], [0], [1], [0, 0, 1, 1], [], []>} : vector<162x512xbf16>, vector<512x128xbf16>, vector<162x128xf32> -> vector<162x128xf32>
    %c0_3 = arith.constant 0 : index
    %c0_4 = arith.constant 0 : index
    %3 = vector.load %arg4[%c0_3, %c0_4] : memref<1x128xf32, #tpu.memory_space<vmem>>, vector<1x128xf32>
    %4 = vector.broadcast %3 : vector<1x128xf32> to vector<162x128xf32>
    %5 = arith.addf %2, %4 : vector<162x128xf32>
    %cst_5 = arith.constant 0.000000e+00 : f32
    %6 = vector.broadcast %cst_5 : f32 to vector<162x128xf32>
    %7 = arith.maximumf %5, %6 : vector<162x128xf32>
    %8 = arith.truncf %7 : vector<162x128xf32> to vector<162x128xbf16>
    %c0_6 = arith.constant 0 : index
    %c0_7 = arith.constant 0 : index
    %9 = vector.load %arg5[%c0_6, %c0_7] : memref<162x128xbf16, #tpu.memory_space<vmem>>, vector<162x128xbf16>
    tpu.vector_store %arg5[%c0_6, %c0_7], %8 {strides = array<i32>} : memref<162x128xbf16, #tpu.memory_space<vmem>>, vector<162x128xbf16>,
    return
  }
  func.func @transform_0(%arg0: i32, %arg1: i32) -> (i32, i32) {
    %c0_i32 = arith.constant 0 : i32
    %c0_i32_0 = arith.constant 0 : i32
    return %arg0, %c0_i32 : i32, i32
  }
  func.func @transform_1(%arg0: i32, %arg1: i32) -> (i32, i32) {
    %c0_i32 = arith.constant 0 : i32
    %c0_i32_0 = arith.constant 0 : i32
    return %c0_i32, %arg1 : i32, i32
  }
  func.func @transform_2(%arg0: i32, %arg1: i32) -> (i32, i32) {
    %c0_i32 = arith.constant 0 : i32
    %c0_i32_0 = arith.constant 0 : i32
    return %c0_i32, %arg1 : i32, i32
  }
  func.func @transform_3(%arg0: i32, %arg1: i32) -> (i32, i32) {
    %c0_i32 = arith.constant 0 : i32
    return %arg0, %arg1 : i32, i32
  }
}

module attributes {stable_mosaic.version = 11 : i64} {
  func.func @_matmul_bias_act_kernel(%arg0: i32, %arg1: i32, %arg2: memref<98x1152xbf16, #tpu.memory_space<vmem>>, %arg3: memref<1152x128xbf16, #tpu.memory_space<vmem>>, %arg4: memref<1x128xf32, #tpu.memory_space<vmem>>, %arg5: memref<98x128xbf16, #tpu.memory_space<vmem>>) attributes {dimension_semantics = [#tpu.dimension_semantics<parallel>, #tpu.dimension_semantics<parallel>], iteration_bounds = array<i64: 1, 1>, scalar_prefetch = 0 : i64, scratch_operands = 0 : i64, tpu.core_type = #tpu.core_type<tc>, window_params = [{transform_indices = @transform_0, window_bounds = array<i64: 98, 1152>}, {transform_indices = @transform_1, window_bounds = array<i64: 1152, 128>}, {transform_indices = @transform_2, window_bounds = array<i64: 1, 128>}, {transform_indices = @transform_3, window_bounds = array<i64: 98, 128>}]} {
    %c0 = arith.constant 0 : index
    %c0_0 = arith.constant 0 : index
    %0 = vector.load %arg2[%c0, %c0_0] : memref<98x1152xbf16, #tpu.memory_space<vmem>>, vector<98x1152xbf16>
    %c0_1 = arith.constant 0 : index
    %c0_2 = arith.constant 0 : index
    %1 = vector.load %arg3[%c0_1, %c0_2] : memref<1152x128xbf16, #tpu.memory_space<vmem>>, vector<1152x128xbf16>
    %cst = arith.constant dense<0.000000e+00> : vector<98x128xf32>
    %2 = tpu.matmul %0, %1, %cst {dimension_numbers = #tpu.dot_dimension_numbers<[1], [0], [0], [1], [0, 0, 1, 1], [], []>} : vector<98x1152xbf16>, vector<1152x128xbf16>, vector<98x128xf32> -> vector<98x128xf32>
    %c0_3 = arith.constant 0 : index
    %c0_4 = arith.constant 0 : index
    %3 = vector.load %arg4[%c0_3, %c0_4] : memref<1x128xf32, #tpu.memory_space<vmem>>, vector<1x128xf32>
    %4 = vector.broadcast %3 : vector<1x128xf32> to vector<98x128xf32>
    %5 = arith.addf %2, %4 : vector<98x128xf32>
    %cst_5 = arith.constant 0.000000e+00 : f32
    %6 = vector.broadcast %cst_5 : f32 to vector<98x128xf32>
    %7 = arith.maximumf %5, %6 : vector<98x128xf32>
    %8 = arith.truncf %7 : vector<98x128xf32> to vector<98x128xbf16>
    %c0_6 = arith.constant 0 : index
    %c0_7 = arith.constant 0 : index
    %9 = vector.load %arg5[%c0_6, %c0_7] : memref<98x128xbf16, #tpu.memory_space<vmem>>, vector<98x128xbf16>
    tpu.vector_store %arg5[%c0_6, %c0_7], %8 {strides = array<i32>} : memref<98x128xbf16, #tpu.memory_space<vmem>>, vector<98x128xbf16>,
    return
  }
  func.func @transform_0(%arg0: i32, %arg1: i32) -> (i32, i32) {
    %c0_i32 = arith.constant 0 : i32
    %c0_i32_0 = arith.constant 0 : i32
    return %arg0, %c0_i32 : i32, i32
  }
  func.func @transform_1(%arg0: i32, %arg1: i32) -> (i32, i32) {
    %c0_i32 = arith.constant 0 : i32
    %c0_i32_0 = arith.constant 0 : i32
    return %c0_i32, %arg1 : i32, i32
  }
  func.func @transform_2(%arg0: i32, %arg1: i32) -> (i32, i32) {
    %c0_i32 = arith.constant 0 : i32
    %c0_i32_0 = arith.constant 0 : i32
    return %c0_i32, %arg1 : i32, i32
  }
  func.func @transform_3(%arg0: i32, %arg1: i32) -> (i32, i32) {
    %c0_i32 = arith.constant 0 : i32
    return %arg0, %arg1 : i32, i32
  }
}

module attributes {stable_mosaic.version = 11 : i64} {
  func.func @_fc_head_kernel(%arg0: i32, %arg1: memref<2x6272xbf16, #tpu.memory_space<vmem>>, %arg2: memref<6272x512xbf16, #tpu.memory_space<vmem>>, %arg3: memref<1x512xf32, #tpu.memory_space<vmem>>, %arg4: memref<512x128xbf16, #tpu.memory_space<vmem>>, %arg5: memref<1x128xf32, #tpu.memory_space<vmem>>, %arg6: memref<2x128xf32, #tpu.memory_space<vmem>>) attributes {dimension_semantics = [#tpu.dimension_semantics<parallel>], iteration_bounds = array<i64: 1>, scalar_prefetch = 0 : i64, scratch_operands = 0 : i64, tpu.core_type = #tpu.core_type<tc>, window_params = [{transform_indices = @transform_0, window_bounds = array<i64: 2, 6272>}, {pipeline_mode = #tpu.pipeline_mode<synchronous>, transform_indices = @transform_1, window_bounds = array<i64: 6272, 512>}, {pipeline_mode = #tpu.pipeline_mode<synchronous>, transform_indices = @transform_2, window_bounds = array<i64: 1, 512>}, {pipeline_mode = #tpu.pipeline_mode<synchronous>, transform_indices = @transform_3, window_bounds = array<i64: 512, 128>}, {pipeline_mode = #tpu.pipeline_mode<synchronous>, transform_indices = @transform_4, window_bounds = array<i64: 1, 128>}, {transform_indices = @transform_5, window_bounds = array<i64: 2, 128>}]} {
    %c0 = arith.constant 0 : index
    %c0_0 = arith.constant 0 : index
    %0 = vector.load %arg1[%c0, %c0_0] : memref<2x6272xbf16, #tpu.memory_space<vmem>>, vector<2x6272xbf16>
    %c0_1 = arith.constant 0 : index
    %c0_2 = arith.constant 0 : index
    %1 = vector.load %arg2[%c0_1, %c0_2] : memref<6272x512xbf16, #tpu.memory_space<vmem>>, vector<6272x512xbf16>
    %cst = arith.constant dense<0.000000e+00> : vector<2x512xf32>
    %2 = tpu.matmul %0, %1, %cst {dimension_numbers = #tpu.dot_dimension_numbers<[1], [0], [0], [1], [0, 0, 1, 1], [], []>} : vector<2x6272xbf16>, vector<6272x512xbf16>, vector<2x512xf32> -> vector<2x512xf32>
    %c0_3 = arith.constant 0 : index
    %c0_4 = arith.constant 0 : index
    %3 = vector.load %arg3[%c0_3, %c0_4] : memref<1x512xf32, #tpu.memory_space<vmem>>, vector<1x512xf32>
    %4 = vector.broadcast %3 : vector<1x512xf32> to vector<2x512xf32>
    %5 = arith.addf %2, %4 : vector<2x512xf32>
    %cst_5 = arith.constant 0.000000e+00 : f32
    %6 = vector.broadcast %cst_5 : f32 to vector<2x512xf32>
    %7 = arith.maximumf %5, %6 : vector<2x512xf32>
    %8 = arith.truncf %7 : vector<2x512xf32> to vector<2x512xbf16>
    %c0_6 = arith.constant 0 : index
    %c0_7 = arith.constant 0 : index
    %9 = vector.load %arg4[%c0_6, %c0_7] : memref<512x128xbf16, #tpu.memory_space<vmem>>, vector<512x128xbf16>
    %cst_8 = arith.constant dense<0.000000e+00> : vector<2x128xf32>
    %10 = tpu.matmul %8, %9, %cst_8 {dimension_numbers = #tpu.dot_dimension_numbers<[1], [0], [0], [1], [0, 0, 1, 1], [], []>} : vector<2x512xbf16>, vector<512x128xbf16>, vector<2x128xf32> -> vector<2x128xf32>
    %c0_9 = arith.constant 0 : index
    %c0_10 = arith.constant 0 : index
    %11 = vector.load %arg5[%c0_9, %c0_10] : memref<1x128xf32, #tpu.memory_space<vmem>>, vector<1x128xf32>
    %12 = vector.broadcast %11 : vector<1x128xf32> to vector<2x128xf32>
    %13 = arith.addf %10, %12 : vector<2x128xf32>
    %c0_11 = arith.constant 0 : index
    %c0_12 = arith.constant 0 : index
    %14 = vector.load %arg6[%c0_11, %c0_12] : memref<2x128xf32, #tpu.memory_space<vmem>>, vector<2x128xf32>
    tpu.vector_store %arg6[%c0_11, %c0_12], %13 {strides = array<i32>} : memref<2x128xf32, #tpu.memory_space<vmem>>, vector<2x128xf32>,
    return
  }
  func.func @transform_0(%arg0: i32) -> (i32, i32) {
    %c0_i32 = arith.constant 0 : i32
    %c0_i32_0 = arith.constant 0 : i32
    return %arg0, %c0_i32 : i32, i32
  }
  func.func @transform_1(%arg0: i32) -> (i32, i32) {
    %c0_i32 = arith.constant 0 : i32
    %c0_i32_0 = arith.constant 0 : i32
    %c0_i32_1 = arith.constant 0 : i32
    return %c0_i32, %c0_i32_0 : i32, i32
  }
  func.func @transform_2(%arg0: i32) -> (i32, i32) {
    %c0_i32 = arith.constant 0 : i32
    %c0_i32_0 = arith.constant 0 : i32
    %c0_i32_1 = arith.constant 0 : i32
    return %c0_i32, %c0_i32_0 : i32, i32
  }
  func.func @transform_3(%arg0: i32) -> (i32, i32) {
    %c0_i32 = arith.constant 0 : i32
    %c0_i32_0 = arith.constant 0 : i32
    %c0_i32_1 = arith.constant 0 : i32
    return %c0_i32, %c0_i32_0 : i32, i32
  }
  func.func @transform_4(%arg0: i32) -> (i32, i32) {
    %c0_i32 = arith.constant 0 : i32
    %c0_i32_0 = arith.constant 0 : i32
    %c0_i32_1 = arith.constant 0 : i32
    return %c0_i32, %c0_i32_0 : i32, i32
  }
  func.func @transform_5(%arg0: i32) -> (i32, i32) {
    %c0_i32 = arith.constant 0 : i32
    %c0_i32_0 = arith.constant 0 : i32
    return %arg0, %c0_i32 : i32, i32
  }
}

</mosaic_0001>

<bundles_post_ra>
// kernel: dqn_forward.4
= control target key start
LH: loop header
LB: loop body
LE: loop exit
PB: predicated region body
PF: predicated region fallthrough
CT: control target
= control target key end

     0   :  { %v2602_v0 = vmov 0   ;;  %s3258_s1 = inlined_call_operand.vmem [shape: bf16[256,128], index: 1, kind: input, shape index: {}]   ;;  %s3259_s0 = inlined_call_operand.vmem [shape: bf16[800,256], index: 0, kind: input, shape index: {}]   ;;  %s3260_s2 = inlined_call_operand.vmem [shape: f32[1,128], index: 2, kind: input, shape index: {}]   ;;  %s3261_s3 = inlined_call_operand.vmem [shape: bf16[800,128], index: 3, kind: output, shape index: {}]  }
   0x1   :  { %750 = vmatprep.subr.bf16.mxu0 %v2602_v0  ;;  %2403 = vmatprep.subr.bf16.mxu1 %v2602_v0  ;;  %v2436_v1 = vld [vmem:[%s3258_s1 + $0x38] sm:$0xff]   ;;  %v2437_v2 = vld [vmem:[%s3258_s1 + $0x30] sm:$0xff]   ;;  %v2438_v3 = vld [vmem:[%s3258_s1 + $0x28] sm:$0xff]  }
   0x2   :  { %751 = vmatpush1.bf16.msra.mxu0 %v2436_v1  ;;  %2419 = vmatpush1.bf16.msra.mxu1 %v2436_v1  ;;  %v2439_v4 = vld [vmem:[%s3258_s1 + $0x20] sm:$0xff]   ;;  %v2440_v5 = vld [vmem:[%s3258_s1 + $0x18] sm:$0xff]   ;;  %v2441_v7 = vld [vmem:[%s3258_s1 + $0x10] sm:$0xff]  }
   0x3   :  { %752 = vmatprep.subr.bf16.mxu0 %v2602_v0  ;;  %2404 = vmatprep.subr.bf16.mxu1 %v2602_v0  ;;  %v2454_v6 = vld [vmem:[%s3259_s0 + $0x4] ss:$8 sps:$4 sm:$0xff]   ;;  %v2457_v8 = vld [vmem:[%s3259_s0 + $0x194] ss:$8 sps:$4 sm:$0xff]   ;;  %v2452_v19 = vld [vmem:[%s3259_s0] ss:$8 sps:$4 sm:$0xff]  }
   0x4   :  { %782 = vmatprep.mubr.bf16.mxu0 %v2454_v6  ;;  %982 = vmatprep.mubr.bf16.mxu1 %v2457_v8  ;;  %v2442_v9 = vld [vmem:[%s3258_s1 + $0x8] sm:$0xff]   ;;  %v2443_v10 = vld [vmem:[%s3258_s1] sm:$0xff]   ;;  %v2444_v11 = vld [vmem:[%s3258_s1 + $0x78] sm:$0xff]  }
   0x5   :  { %v2445_v12 = vld [vmem:[%s3258_s1 + $0x70] sm:$0xff]   ;;  %v2446_v13 = vld [vmem:[%s3258_s1 + $0x68] sm:$0xff]   ;;  %v2447_v14 = vld [vmem:[%s3258_s1 + $0x60] sm:$0xff]  }
   0x6   :  { %753 = vmatpush1.bf16.msra.mxu0 %v2437_v2  ;;  %2420 = vmatpush1.bf16.msra.mxu1 %v2437_v2  ;;  %v2448_v15 = vld [vmem:[%s3258_s1 + $0x58] sm:$0xff]   ;;  %v2449_v16 = vld [vmem:[%s3258_s1 + $0x50] sm:$0xff]   ;;  %v2450_v17 = vld [vmem:[%s3258_s1 + $0x48] sm:$0xff]  }
   0x7   :  { %754 = vmatprep.subr.bf16.mxu0 %v2602_v0  ;;  %2405 = vmatprep.subr.bf16.mxu1 %v2602_v0  ;;  %v2451_v18 = vld [vmem:[%s3258_s1 + $0x40] sm:$0xff]   ;;  %v2455_v20 = vld [vmem:[%s3259_s0 + $0x190] ss:$8 sps:$4 sm:$0xff]   ;;  %v2458_v21 = vld [vmem:[%s3259_s0 + $0x14] ss:$8 sps:$4 sm:$0xff]  }
   0x8   :  { %v2460_v22 = vld [vmem:[%s3259_s0 + $0x1a4] ss:$8 sps:$4 sm:$0xff]   ;;  %v2462_v23 = vld [vmem:[%s3259_s0 + $0x10] ss:$8 sps:$4 sm:$0xff]   ;;  %v2463_v24 = vld [vmem:[%s3259_s0 + $0x1a0] ss:$8 sps:$4 sm:$0xff]  }
   0x9   :  { %v2464_v25 = vld [vmem:[%s3259_s0 + $0x24] ss:$8 sps:$4 sm:$0xff]   ;;  %v2466_v26 = vld [vmem:[%s3259_s0 + $0x1b4] ss:$8 sps:$4 sm:$0xff]   ;;  %v2468_v27 = vld [vmem:[%s3259_s0 + $0x20] ss:$8 sps:$4 sm:$0xff]  }
   0xa   :  { %755 = vmatpush1.bf16.msra.mxu0 %v2438_v3  ;;  %2421 = vmatpush1.bf16.msra.mxu1 %v2438_v3  ;;  %v2469_v28 = vld [vmem:[%s3259_s0 + $0x1b0] ss:$8 sps:$4 sm:$0xff]   ;;  %v2470_v29 = vld [vmem:[%s3259_s0 + $0x34] ss:$8 sps:$4 sm:$0xff]   ;;  %v2472_v30 = vld [vmem:[%s3259_s0 + $0x1c4] ss:$8 sps:$4 sm:$0xff]  }
   0xb   :  { %756 = vmatprep.subr.bf16.mxu0 %v2602_v0  ;;  %2406 = vmatprep.subr.bf16.mxu1 %v2602_v0  ;;  %v2474_v31 = vld [vmem:[%s3259_s0 + $0x30] ss:$8 sps:$4 sm:$0xff]   ;;  %v2475_v32 = vld [vmem:[%s3259_s0 + $0x1c0] ss:$8 sps:$4 sm:$0xff]   ;;  %v2476_v33 = vld [vmem:[%s3259_s0 + $0x44] ss:$8 sps:$4 sm:$0xff]  }
   0xc   :  { %v2478_v34 = vld [vmem:[%s3259_s0 + $0x1d4] ss:$8 sps:$4 sm:$0xff]   ;;  %v2480_v35 = vld [vmem:[%s3259_s0 + $0x40] ss:$8 sps:$4 sm:$0xff]   ;;  %v2481_v36 = vld [vmem:[%s3259_s0 + $0x1d0] ss:$8 sps:$4 sm:$0xff]  }
   0xd   :  { %v2482_v37 = vld [vmem:[%s3259_s0 + $0x54] ss:$8 sps:$4 sm:$0xff]   ;;  %v2484_v38 = vld [vmem:[%s3259_s0 + $0x1e4] ss:$8 sps:$4 sm:$0xff]   ;;  %v2486_v39 = vld [vmem:[%s3259_s0 + $0x50] ss:$8 sps:$4 sm:$0xff]  }
   0xe   :  { %757 = vmatpush1.bf16.msra.mxu0 %v2439_v4  ;;  %2422 = vmatpush1.bf16.msra.mxu1 %v2439_v4  ;;  %v2487_v40 = vld [vmem:[%s3259_s0 + $0x1e0] ss:$8 sps:$4 sm:$0xff]   ;;  %v2488_v41 = vld [vmem:[%s3259_s0 + $0x64] ss:$8 sps:$4 sm:$0xff]   ;;  %v2490_v42 = vld [vmem:[%s3259_s0 + $0x1f4] ss:$8 sps:$4 sm:$0xff]  }
   0xf   :  { %758 = vmatprep.subr.bf16.mxu0 %v2602_v0  ;;  %2407 = vmatprep.subr.bf16.mxu1 %v2602_v0  ;;  %v2492_v43 = vld [vmem:[%s3259_s0 + $0x60] ss:$8 sps:$4 sm:$0xff]   ;;  %v2493_v44 = vld [vmem:[%s3259_s0 + $0x1f0] ss:$8 sps:$4 sm:$0xff]   ;;  %v2494_v45 = vld [vmem:[%s3259_s0 + $0x74] ss:$8 sps:$4 sm:$0xff]  }
  0x10   :  { %v2496_v46 = vld [vmem:[%s3259_s0 + $0x204] ss:$8 sps:$4 sm:$0xff]   ;;  %v2498_v47 = vld [vmem:[%s3259_s0 + $0x70] ss:$8 sps:$4 sm:$0xff]   ;;  %v2499_v48 = vld [vmem:[%s3259_s0 + $0x200] ss:$8 sps:$4 sm:$0xff]  }
  0x11   :  { %v2500_v49 = vld [vmem:[%s3259_s0 + $0x84] ss:$8 sps:$4 sm:$0xff]   ;;  %v2502_v50 = vld [vmem:[%s3259_s0 + $0x214] ss:$8 sps:$4 sm:$0xff]   ;;  %v2504_v51 = vld [vmem:[%s3259_s0 + $0x80] ss:$8 sps:$4 sm:$0xff]  }
  0x12   :  { %759 = vmatpush1.bf16.msra.mxu0 %v2440_v5  ;;  %2423 = vmatpush1.bf16.msra.mxu1 %v2440_v5  ;;  %v2505_v52 = vld [vmem:[%s3259_s0 + $0x210] ss:$8 sps:$4 sm:$0xff]   ;;  %v2506_v53 = vld [vmem:[%s3259_s0 + $0x94] ss:$8 sps:$4 sm:$0xff]   ;;  %v2508_v54 = vld [vmem:[%s3259_s0 + $0x224] ss:$8 sps:$4 sm:$0xff]  }
  0x13   :  { %760 = vmatprep.subr.bf16.mxu0 %v2602_v0  ;;  %2408 = vmatprep.subr.bf16.mxu1 %v2602_v0  ;;  %v2510_v55 = vld [vmem:[%s3259_s0 + $0x90] ss:$8 sps:$4 sm:$0xff]   ;;  %v2511_v56 = vld [vmem:[%s3259_s0 + $0x220] ss:$8 sps:$4 sm:$0xff]   ;;  %v2512_v57 = vld [vmem:[%s3259_s0 + $0xa4] ss:$8 sps:$4 sm:$0xff]  }
  0x14   :  { %v2514_v58 = vld [vmem:[%s3259_s0 + $0x234] ss:$8 sps:$4 sm:$0xff]   ;;  %v2516_v59 = vld [vmem:[%s3259_s0 + $0xa0] ss:$8 sps:$4 sm:$0xff]   ;;  %v2517_v60 = vld [vmem:[%s3259_s0 + $0x230] ss:$8 sps:$4 sm:$0xff]  }
  0x15   :  { %v2518_v61 = vld [vmem:[%s3259_s0 + $0xb4] ss:$8 sps:$4 sm:$0xff]   ;;  %v2520_v62 = vld [vmem:[%s3259_s0 + $0x244] ss:$8 sps:$4 sm:$0xff]   ;;  %v2522_v63 = vld [vmem:[%s3259_s0 + $0xb0] ss:$8 sps:$4 sm:$0xff]  }
  0x16   :  { %761 = vmatpush1.bf16.msra.mxu0 %v2441_v7  ;;  %2424 = vmatpush1.bf16.msra.mxu1 %v2441_v7  ;;  %v2524_v1 = vld [vmem:[%s3259_s0 + $0xc4] ss:$8 sps:$4 sm:$0xff]   ;;  %v2526_v2 = vld [vmem:[%s3259_s0 + $0x254] ss:$8 sps:$4 sm:$0xff]   ;;  %v2528_v3 = vld [vmem:[%s3259_s0 + $0xc0] ss:$8 sps:$4 sm:$0xff]  }
  0x17   :  { %762 = vmatprep.subr.bf16.mxu0 %v2602_v0  ;;  %2409 = vmatprep.subr.bf16.mxu1 %v2602_v0  ;;  %v2529_v4 = vld [vmem:[%s3259_s0 + $0x250] ss:$8 sps:$4 sm:$0xff]   ;;  %v2530_v5 = vld [vmem:[%s3259_s0 + $0xd4] ss:$8 sps:$4 sm:$0xff]   ;;  %v2532_v6 = vld [vmem:[%s3259_s0 + $0x264] ss:$8 sps:$4 sm:$0xff]  }
  0x18   :  { %v2534_v7 = vld [vmem:[%s3259_s0 + $0xd0] ss:$8 sps:$4 sm:$0xff]   ;;  %v2535_v8 = vld [vmem:[%s3259_s0 + $0x260] ss:$8 sps:$4 sm:$0xff]  }
  0x1a   :  { %763 = vmatpush1.bf16.msra.mxu0 %v2442_v9  ;;  %2425 = vmatpush1.bf16.msra.mxu1 %v2442_v9  ;;  %v2536_v9 = vld [vmem:[%s3259_s0 + $0xe4] ss:$8 sps:$4 sm:$0xff]  }
  0x1b   :  { %764 = vmatprep.subr.bf16.mxu0 %v2602_v0  ;;  %2410 = vmatprep.subr.bf16.mxu1 %v2602_v0 }
  0x1e   :  { %765 = vmatpush1.bf16.msra.mxu0 %v2443_v10  ;;  %2426 = vmatpush1.bf16.msra.mxu1 %v2443_v10  ;;  %v2538_v10 = vld [vmem:[%s3259_s0 + $0x274] ss:$8 sps:$4 sm:$0xff]  }
  0x1f   :  { %766 = vmatprep.subr.bf16.mxu0 %v2602_v0  ;;  %2411 = vmatprep.subr.bf16.mxu1 %v2602_v0 }
  0x22   :  { %767 = vmatpush2.bf16.msra.mxu0 %v2444_v11  ;;  %2427 = vmatpush2.bf16.msra.mxu1 %v2444_v11  ;;  %v2540_v11 = vld [vmem:[%s3259_s0 + $0xe0] ss:$8 sps:$4 sm:$0xff]  }
  0x23   :  { %768 = vmatprep.subr.bf16.mxu0 %v2602_v0  ;;  %2412 = vmatprep.subr.bf16.mxu1 %v2602_v0 }
  0x26   :  { %769 = vmatpush2.bf16.msra.mxu0 %v2445_v12  ;;  %2428 = vmatpush2.bf16.msra.mxu1 %v2445_v12  ;;  %v2541_v12 = vld [vmem:[%s3259_s0 + $0x270] ss:$8 sps:$4 sm:$0xff]  }
  0x27   :  { %770 = vmatprep.subr.bf16.mxu0 %v2602_v0  ;;  %2413 = vmatprep.subr.bf16.mxu1 %v2602_v0 }
  0x2a   :  { %771 = vmatpush2.bf16.msra.mxu0 %v2446_v13  ;;  %2429 = vmatpush2.bf16.msra.mxu1 %v2446_v13  ;;  %v2542_v13 = vld [vmem:[%s3259_s0 + $0xf4] ss:$8 sps:$4 sm:$0xff]  }
  0x2b   :  { %772 = vmatprep.subr.bf16.mxu0 %v2602_v0  ;;  %2414 = vmatprep.subr.bf16.mxu1 %v2602_v0 }
  0x2e   :  { %773 = vmatpush2.bf16.msra.mxu0 %v2447_v14  ;;  %2430 = vmatpush2.bf16.msra.mxu1 %v2447_v14  ;;  %v2544_v14 = vld [vmem:[%s3259_s0 + $0x284] ss:$8 sps:$4 sm:$0xff]  }
  0x2f   :  { %774 = vmatprep.subr.bf16.mxu0 %v2602_v0  ;;  %2415 = vmatprep.subr.bf16.mxu1 %v2602_v0 }
  0x32   :  { %775 = vmatpush2.bf16.msra.mxu0 %v2448_v15  ;;  %2431 = vmatpush2.bf16.msra.mxu1 %v2448_v15  ;;  %v2546_v15 = vld [vmem:[%s3259_s0 + $0xf0] ss:$8 sps:$4 sm:$0xff]  }
  0x33   :  { %776 = vmatprep.subr.bf16.mxu0 %v2602_v0  ;;  %2416 = vmatprep.subr.bf16.mxu1 %v2602_v0 }
  0x36   :  { %777 = vmatpush2.bf16.msra.mxu0 %v2449_v16  ;;  %2432 = vmatpush2.bf16.msra.mxu1 %v2449_v16  ;;  %v2547_v16 = vld [vmem:[%s3259_s0 + $0x280] ss:$8 sps:$4 sm:$0xff]  }
  0x37   :  { %778 = vmatprep.subr.bf16.mxu0 %v2602_v0  ;;  %2417 = vmatprep.subr.bf16.mxu1 %v2602_v0 }
  0x3a   :  { %779 = vmatpush2.bf16.msra.mxu0 %v2450_v17  ;;  %2433 = vmatpush2.bf16.msra.mxu1 %v2450_v17  ;;  %v2548_v17 = vld [vmem:[%s3259_s0 + $0x104] ss:$8 sps:$4 sm:$0xff]  }
  0x3b   :  { %780 = vmatprep.subr.bf16.mxu0 %v2602_v0  ;;  %2418 = vmatprep.subr.bf16.mxu1 %v2602_v0  ;;  %v2523_v0 = vld [vmem:[%s3259_s0 + $0x240] ss:$8 sps:$4 sm:$0xff]  }
  0x3e   :  { %781 = vmatpush2.bf16.msra.mxu0 %v2451_v18  ;;  %2434 = vmatpush2.bf16.msra.mxu1 %v2451_v18  ;;  %v2550_v18 = vld [vmem:[%s3259_s0 + $0x294] ss:$8 sps:$4 sm:$0xff]  }
  0x41   :  { %783 = vmatmul.mubr.bf16.vlgmr.msra.gmra.mxu0 %v2452_v19  ;;  %983 = vmatmul.mubr.bf16.vlgmr.msra.gmra.mxu1 %v2455_v20  ;;  %v2552_v19 = vld [vmem:[%s3259_s0 + $0x100] ss:$8 sps:$4 sm:$0xff]   ;;  %v2553_v20 = vld [vmem:[%s3259_s0 + $0x290] ss:$8 sps:$4 sm:$0xff]  }
  0x42   :  { %790 = vmatprep.mubr.bf16.mxu0 %v2458_v21  ;;  %990 = vmatprep.mubr.bf16.mxu1 %v2460_v22  ;;  %v2554_v21 = vld [vmem:[%s3259_s0 + $0x114] ss:$8 sps:$4 sm:$0xff]   ;;  %v2556_v22 = vld [vmem:[%s3259_s0 + $0x2a4] ss:$8 sps:$4 sm:$0xff]  }
  0x49   :  { %791 = vmatmul.mubr.bf16.gmra.mxu0 %v2462_v23  ;;  %991 = vmatmul.mubr.bf16.gmra.mxu1 %v2463_v24  ;;  %v2558_v23 = vld [vmem:[%s3259_s0 + $0x110] ss:$8 sps:$4 sm:$0xff]   ;;  %v2559_v24 = vld [vmem:[%s3259_s0 + $0x2a0] ss:$8 sps:$4 sm:$0xff]  }
  0x4a   :  { %798 = vmatprep.mubr.bf16.mxu0 %v2464_v25  ;;  %998 = vmatprep.mubr.bf16.mxu1 %v2466_v26  ;;  %v2560_v25 = vld [vmem:[%s3259_s0 + $0x124] ss:$8 sps:$4 sm:$0xff]   ;;  %v2562_v26 = vld [vmem:[%s3259_s0 + $0x2b4] ss:$8 sps:$4 sm:$0xff]  }
  0x51   :  { %799 = vmatmul.mubr.bf16.gmra.mxu0 %v2468_v27  ;;  %999 = vmatmul.mubr.bf16.gmra.mxu1 %v2469_v28  ;;  %v2564_v27 = vld [vmem:[%s3259_s0 + $0x120] ss:$8 sps:$4 sm:$0xff]   ;;  %v2565_v28 = vld [vmem:[%s3259_s0 + $0x2b0] ss:$8 sps:$4 sm:$0xff]  }
  0x52   :  { %806 = vmatprep.mubr.bf16.mxu0 %v2470_v29  ;;  %1006 = vmatprep.mubr.bf16.mxu1 %v2472_v30  ;;  %v2566_v29 = vld [vmem:[%s3259_s0 + $0x134] ss:$8 sps:$4 sm:$0xff]   ;;  %v2568_v30 = vld [vmem:[%s3259_s0 + $0x2c4] ss:$8 sps:$4 sm:$0xff]  }
  0x59   :  { %807 = vmatmul.mubr.bf16.gmra.mxu0 %v2474_v31  ;;  %1007 = vmatmul.mubr.bf16.gmra.mxu1 %v2475_v32  ;;  %v2570_v31 = vld [vmem:[%s3259_s0 + $0x130] ss:$8 sps:$4 sm:$0xff]   ;;  %v2571_v32 = vld [vmem:[%s3259_s0 + $0x2c0] ss:$8 sps:$4 sm:$0xff]  }
  0x5a   :  { %814 = vmatprep.mubr.bf16.mxu0 %v2476_v33  ;;  %1014 = vmatprep.mubr.bf16.mxu1 %v2478_v34  ;;  %v2572_v33 = vld [vmem:[%s3259_s0 + $0x144] ss:$8 sps:$4 sm:$0xff]   ;;  %v2574_v34 = vld [vmem:[%s3259_s0 + $0x2d4] ss:$8 sps:$4 sm:$0xff]  }
  0x61   :  { %815 = vmatmul.mubr.bf16.gmra.mxu0 %v2480_v35  ;;  %1015 = vmatmul.mubr.bf16.gmra.mxu1 %v2481_v36  ;;  %v2576_v35 = vld [vmem:[%s3259_s0 + $0x140] ss:$8 sps:$4 sm:$0xff]   ;;  %v2577_v36 = vld [vmem:[%s3259_s0 + $0x2d0] ss:$8 sps:$4 sm:$0xff]  }
  0x62   :  { %822 = vmatprep.mubr.bf16.mxu0 %v2482_v37  ;;  %1022 = vmatprep.mubr.bf16.mxu1 %v2484_v38  ;;  %v2578_v37 = vld [vmem:[%s3259_s0 + $0x154] ss:$8 sps:$4 sm:$0xff]   ;;  %v2580_v38 = vld [vmem:[%s3259_s0 + $0x2e4] ss:$8 sps:$4 sm:$0xff]  }
  0x69   :  { %823 = vmatmul.mubr.bf16.gmra.mxu0 %v2486_v39  ;;  %1023 = vmatmul.mubr.bf16.gmra.mxu1 %v2487_v40  ;;  %v2582_v39 = vld [vmem:[%s3259_s0 + $0x150] ss:$8 sps:$4 sm:$0xff]   ;;  %v2583_v40 = vld [vmem:[%s3259_s0 + $0x2e0] ss:$8 sps:$4 sm:$0xff]  }
  0x6a   :  { %830 = vmatprep.mubr.bf16.mxu0 %v2488_v41  ;;  %1030 = vmatprep.mubr.bf16.mxu1 %v2490_v42  ;;  %v2584_v41 = vld [vmem:[%s3259_s0 + $0x164] ss:$8 sps:$4 sm:$0xff]   ;;  %v2586_v42 = vld [vmem:[%s3259_s0 + $0x2f4] ss:$8 sps:$4 sm:$0xff]  }
  0x71   :  { %831 = vmatmul.mubr.bf16.gmra.mxu0 %v2492_v43  ;;  %1031 = vmatmul.mubr.bf16.gmra.mxu1 %v2493_v44  ;;  %v2588_v43 = vld [vmem:[%s3259_s0 + $0x160] ss:$8 sps:$4 sm:$0xff]   ;;  %v2589_v44 = vld [vmem:[%s3259_s0 + $0x2f0] ss:$8 sps:$4 sm:$0xff]  }
  0x72   :  { %838 = vmatprep.mubr.bf16.mxu0 %v2494_v45  ;;  %1038 = vmatprep.mubr.bf16.mxu1 %v2496_v46  ;;  %v2590_v45 = vld [vmem:[%s3259_s0 + $0x174] ss:$8 sps:$4 sm:$0xff]   ;;  %v2592_v46 = vld [vmem:[%s3259_s0 + $0x304] ss:$8 sps:$4 sm:$0xff]  }
  0x79   :  { %839 = vmatmul.mubr.bf16.gmra.mxu0 %v2498_v47  ;;  %1039 = vmatmul.mubr.bf16.gmra.mxu1 %v2499_v48  ;;  %v2594_v47 = vld [vmem:[%s3259_s0 + $0x170] ss:$8 sps:$4 sm:$0xff]   ;;  %v2595_v48 = vld [vmem:[%s3259_s0 + $0x300] ss:$8 sps:$4 sm:$0xff]  }
  0x7a   :  { %846 = vmatprep.mubr.bf16.mxu0 %v2500_v49  ;;  %1046 = vmatprep.mubr.bf16.mxu1 %v2502_v50  ;;  %v2596_v49 = vld [vmem:[%s3259_s0 + $0x184] ss:$8 sps:$4 sm:$0xff]   ;;  %v2598_v50 = vld [vmem:[%s3259_s0 + $0x314] ss:$8 sps:$4 sm:$0xff]  }
  0x81   :  { %847 = vmatmul.mubr.bf16.gmra.mxu0 %v2504_v51  ;;  %1047 = vmatmul.mubr.bf16.gmra.mxu1 %v2505_v52  ;;  %v2600_v51 = vld [vmem:[%s3259_s0 + $0x180] ss:$8 sps:$4 sm:$0xff]   ;;  %v2601_v52 = vld [vmem:[%s3259_s0 + $0x310] ss:$8 sps:$4 sm:$0xff]  }
  0x82   :  { %854 = vmatprep.mubr.bf16.mxu0 %v2506_v53  ;;  %1054 = vmatprep.mubr.bf16.mxu1 %v2508_v54  ;;  %v3006_v53 = vld [vmem:[%s3260_s2] ss:$0 sm:$0xff] }
  0x89   :  { %855 = vmatmul.mubr.bf16.gmra.mxu0 %v2510_v55  ;;  %1055 = vmatmul.mubr.bf16.gmra.mxu1 %v2511_v56 }
  0x8a   :  { %862 = vmatprep.mubr.bf16.mxu0 %v2512_v57  ;;  %1062 = vmatprep.mubr.bf16.mxu1 %v2514_v58 }
  0x91   :  { %863 = vmatmul.mubr.bf16.gmra.mxu0 %v2516_v59  ;;  %1063 = vmatmul.mubr.bf16.gmra.mxu1 %v2517_v60 }
  0x92   :  { %870 = vmatprep.mubr.bf16.mxu0 %v2518_v61  ;;  %1070 = vmatprep.mubr.bf16.mxu1 %v2520_v62 }
  0x99   :  { %871 = vmatmul.mubr.bf16.gmra.mxu0 %v2522_v63  ;;  %1071 = vmatmul.mubr.bf16.gmra.mxu1 %v2523_v0 }
  0x9a   :  { %878 = vmatprep.mubr.bf16.mxu0 %v2524_v1  ;;  %1078 = vmatprep.mubr.bf16.mxu1 %v2526_v2 }
  0xa1   :  { %879 = vmatmul.mubr.bf16.gmra.mxu0 %v2528_v3  ;;  %1079 = vmatmul.mubr.bf16.gmra.mxu1 %v2529_v4 }
  0xa2   :  { %886 = vmatprep.mubr.bf16.mxu0 %v2530_v5  ;;  %1086 = vmatprep.mubr.bf16.mxu1 %v2532_v6 }
  0xa9   :  { %887 = vmatmul.mubr.bf16.gmra.mxu0 %v2534_v7  ;;  %1087 = vmatmul.mubr.bf16.gmra.mxu1 %v2535_v8 }
  0xaa   :  { %894 = vmatprep.mubr.bf16.mxu0 %v2536_v9  ;;  %1094 = vmatprep.mubr.bf16.mxu1 %v2538_v10 }
  0xb1   :  { %895 = vmatmul.mubr.bf16.gmra.mxu0 %v2540_v11  ;;  %1095 = vmatmul.mubr.bf16.gmra.mxu1 %v2541_v12 }
  0xb2   :  { %902 = vmatprep.mubr.bf16.mxu0 %v2542_v13  ;;  %1102 = vmatprep.mubr.bf16.mxu1 %v2544_v14 }
  0xb9   :  { %903 = vmatmul.mubr.bf16.gmra.mxu0 %v2546_v15  ;;  %1103 = vmatmul.mubr.bf16.gmra.mxu1 %v2547_v16 }
  0xba   :  { %910 = vmatprep.mubr.bf16.mxu0 %v2548_v17  ;;  %1110 = vmatprep.mubr.bf16.mxu1 %v2550_v18 }
  0xc1   :  { %911 = vmatmul.mubr.bf16.gmra.mxu0 %v2552_v19  ;;  %1111 = vmatmul.mubr.bf16.gmra.mxu1 %v2553_v20 }
  0xc2   :  { %918 = vmatprep.mubr.bf16.mxu0 %v2554_v21  ;;  %1118 = vmatprep.mubr.bf16.mxu1 %v2556_v22 }
  0xc9   :  { %919 = vmatmul.mubr.bf16.gmra.mxu0 %v2558_v23  ;;  %1119 = vmatmul.mubr.bf16.gmra.mxu1 %v2559_v24 }
  0xca   :  { %926 = vmatprep.mubr.bf16.mxu0 %v2560_v25  ;;  %1126 = vmatprep.mubr.bf16.mxu1 %v2562_v26 }
  0xd1   :  { %927 = vmatmul.mubr.bf16.gmra.mxu0 %v2564_v27  ;;  %1127 = vmatmul.mubr.bf16.gmra.mxu1 %v2565_v28 }
  0xd2   :  { %934 = vmatprep.mubr.bf16.mxu0 %v2566_v29  ;;  %1134 = vmatprep.mubr.bf16.mxu1 %v2568_v30 }
  0xd9   :  { %935 = vmatmul.mubr.bf16.gmra.mxu0 %v2570_v31  ;;  %1135 = vmatmul.mubr.bf16.gmra.mxu1 %v2571_v32 }
  0xda   :  { %942 = vmatprep.mubr.bf16.mxu0 %v2572_v33  ;;  %1142 = vmatprep.mubr.bf16.mxu1 %v2574_v34 }
  0xe1   :  { %943 = vmatmul.mubr.bf16.gmra.mxu0 %v2576_v35  ;;  %1143 = vmatmul.mubr.bf16.gmra.mxu1 %v2577_v36 }
  0xe2   :  { %950 = vmatprep.mubr.bf16.mxu0 %v2578_v37  ;;  %1150 = vmatprep.mubr.bf16.mxu1 %v2580_v38 }
  0xe9   :  { %951 = vmatmul.mubr.bf16.gmra.mxu0 %v2582_v39  ;;  %1151 = vmatmul.mubr.bf16.gmra.mxu1 %v2583_v40 }
  0xea   :  { %958 = vmatprep.mubr.bf16.mxu0 %v2584_v41  ;;  %1158 = vmatprep.mubr.bf16.mxu1 %v2586_v42 }
  0xf1   :  { %959 = vmatmul.mubr.bf16.gmra.mxu0 %v2588_v43  ;;  %1159 = vmatmul.mubr.bf16.gmra.mxu1 %v2589_v44 }
  0xf2   :  { %966 = vmatprep.mubr.bf16.mxu0 %v2590_v45  ;;  %1166 = vmatprep.mubr.bf16.mxu1 %v2592_v46 }
  0xf9   :  { %967 = vmatmul.mubr.bf16.gmra.mxu0 %v2594_v47  ;;  %1167 = vmatmul.mubr.bf16.gmra.mxu1 %v2595_v48 }
  0xfa   :  { %974 = vmatprep.mubr.bf16.mxu0 %v2596_v49  ;;  %1174 = vmatprep.mubr.bf16.mxu1 %v2598_v50 }
 0x101   :  { %v784_v54 = vpop.f32.mrf.mxu0  ;;  %975 = vmatmul.mubr.bf16.gmra.mxu0 %v2600_v51  ;;  %v984_v55 = vpop.f32.mrf.mxu1  ;;  %1175 = vmatmul.mubr.bf16.gmra.mxu1 %v2601_v52 }
 0x102   :  { %v785_v58 = vadd.f32 %v3006_v53, %v784_v54  ;;  %v985_v59 = vadd.f32 %v3006_v53, %v984_v55 }
 0x103   :  { %v786_v56 = vpop.f32.mrf.mxu0  ;;  %v986_v57 = vpop.f32.mrf.mxu1 }
 0x104   :  { %v1183_v2 = vmax.f32 %v785_v58, 0.0  ;;  %v1233_v3 = vmax.f32 %v985_v59, 0.0 }
 0x105   :  { %v787_v60 = vpop.f32.mrf.mxu0  ;;  %v987_v61 = vpop.f32.mrf.mxu1 }
 0x106   :  { %v788_v62 = vadd.f32 %v3006_v53, %v787_v60  ;;  %v988_v63 = vadd.f32 %v3006_v53, %v987_v61 }
 0x107   :  { %v789_v0 = vpop.f32.mrf.mxu0  ;;  %v989_v1 = vpop.f32.mrf.mxu1 }
 0x108   :  { %v1184_v4 = vmax.f32 %v788_v62, 0.0  ;;  %v1234_v5 = vmax.f32 %v988_v63, 0.0 }
 0x109   :  { %v792_v6 = vpop.f32.mrf.mxu0  ;;  %v992_v7 = vpop.f32.mrf.mxu1 }
 0x10a   :  { %v2107_v8 = vpack.c.bf16 %v1184_v4, %v1183_v2  ;;  %v2232_v9 = vpack.c.bf16 %v1234_v5, %v1233_v3  ;;  %v793_v12 = vadd.f32 %v3006_v53, %v792_v6  ;;  %v993_v13 = vadd.f32 %v3006_v53, %v992_v7 }
 0x10b   :  { %v794_v10 = vpop.f32.mrf.mxu0  ;;  %v994_v11 = vpop.f32.mrf.mxu1 }
 0x10c   :  { %2108 = vst [vmem:[%s3261_s3] sm:$0xff] %v2107_v8   ;;  %2378 = vst [vmem:[%s3261_s3 + $0xc8] sm:$0xff] %v2232_v9   ;;  %v1185_v20 = vmax.f32 %v793_v12, 0.0  ;;  %v1235_v21 = vmax.f32 %v993_v13, 0.0 }
 0x10d   :  { %v795_v14 = vpop.f32.mrf.mxu0  ;;  %v995_v15 = vpop.f32.mrf.mxu1 }
 0x10e   :  { %v796_v16 = vadd.f32 %v3006_v53, %v795_v14  ;;  %v996_v17 = vadd.f32 %v3006_v53, %v995_v15 }
 0x10f   :  { %v797_v18 = vpop.f32.mrf.mxu0  ;;  %v997_v19 = vpop.f32.mrf.mxu1 }
 0x110   :  { %v1186_v22 = vmax.f32 %v796_v16, 0.0  ;;  %v1236_v23 = vmax.f32 %v996_v17, 0.0 }
 0x111   :  { %v800_v24 = vpop.f32.mrf.mxu0  ;;  %v1000_v25 = vpop.f32.mrf.mxu1 }
 0x112   :  { %v2112_v26 = vpack.c.bf16 %v1186_v22, %v1185_v20  ;;  %v2237_v27 = vpack.c.bf16 %v1236_v23, %v1235_v21  ;;  %v801_v30 = vadd.f32 %v3006_v53, %v800_v24  ;;  %v1001_v31 = vadd.f32 %v3006_v53, %v1000_v25 }
 0x113   :  { %v802_v28 = vpop.f32.mrf.mxu0  ;;  %v1002_v29 = vpop.f32.mrf.mxu1 }
 0x114   :  { %2354 = vst [vmem:[%s3261_s3 + $0x8] sm:$0xff] %v2112_v26   ;;  %2379 = vst [vmem:[%s3261_s3 + $0xd0] sm:$0xff] %v2237_v27   ;;  %v1187_v38 = vmax.f32 %v801_v30, 0.0  ;;  %v1237_v39 = vmax.f32 %v1001_v31, 0.0 }
 0x115   :  { %v803_v32 = vpop.f32.mrf.mxu0  ;;  %v1003_v33 = vpop.f32.mrf.mxu1 }
 0x116   :  { %v804_v34 = vadd.f32 %v3006_v53, %v803_v32  ;;  %v1004_v35 = vadd.f32 %v3006_v53, %v1003_v33 }
 0x117   :  { %v805_v36 = vpop.f32.mrf.mxu0  ;;  %v1005_v37 = vpop.f32.mrf.mxu1 }
 0x118   :  { %v1188_v40 = vmax.f32 %v804_v34, 0.0  ;;  %v1238_v41 = vmax.f32 %v1004_v35, 0.0 }
 0x119   :  { %v808_v42 = vpop.f32.mrf.mxu0  ;;  %v1008_v43 = vpop.f32.mrf.mxu1 }
 0x11a   :  { %v2117_v44 = vpack.c.bf16 %v1188_v40, %v1187_v38  ;;  %v2242_v45 = vpack.c.bf16 %v1238_v41, %v1237_v39  ;;  %v809_v48 = vadd.f32 %v3006_v53, %v808_v42  ;;  %v1009_v49 = vadd.f32 %v3006_v53, %v1008_v43 }
 0x11b   :  { %v810_v46 = vpop.f32.mrf.mxu0  ;;  %v1010_v47 = vpop.f32.mrf.mxu1 }
 0x11c   :  { %2355 = vst [vmem:[%s3261_s3 + $0x10] sm:$0xff] %v2117_v44   ;;  %2380 = vst [vmem:[%s3261_s3 + $0xd8] sm:$0xff] %v2242_v45   ;;  %v1189_v57 = vmax.f32 %v809_v48, 0.0  ;;  %v1239_v58 = vmax.f32 %v1009_v49, 0.0 }
 0x11d   :  { %v811_v50 = vpop.f32.mrf.mxu0  ;;  %v1011_v51 = vpop.f32.mrf.mxu1 }
 0x11e   :  { %v812_v52 = vadd.f32 %v3006_v53, %v811_v50  ;;  %v1012_v54 = vadd.f32 %v3006_v53, %v1011_v51 }
 0x11f   :  { %v813_v55 = vpop.f32.mrf.mxu0  ;;  %v1013_v56 = vpop.f32.mrf.mxu1 }
 0x120   :  { %v1190_v59 = vmax.f32 %v812_v52, 0.0  ;;  %v1240_v60 = vmax.f32 %v1012_v54, 0.0 }
 0x121   :  { %v816_v61 = vpop.f32.mrf.mxu0  ;;  %v1016_v62 = vpop.f32.mrf.mxu1 }
 0x122   :  { %v2122_v63 = vpack.c.bf16 %v1190_v59, %v1189_v57  ;;  %v2247_v0 = vpack.c.bf16 %v1240_v60, %v1239_v58  ;;  %v817_v3 = vadd.f32 %v3006_v53, %v816_v61  ;;  %v1017_v4 = vadd.f32 %v3006_v53, %v1016_v62 }
 0x123   :  { %v818_v1 = vpop.f32.mrf.mxu0  ;;  %v1018_v2 = vpop.f32.mrf.mxu1 }
 0x124   :  { %2356 = vst [vmem:[%s3261_s3 + $0x18] sm:$0xff] %v2122_v63   ;;  %2381 = vst [vmem:[%s3261_s3 + $0xe0] sm:$0xff] %v2247_v0   ;;  %v1191_v11 = vmax.f32 %v817_v3, 0.0  ;;  %v1241_v12 = vmax.f32 %v1017_v4, 0.0 }
 0x125   :  { %v819_v5 = vpop.f32.mrf.mxu0  ;;  %v1019_v6 = vpop.f32.mrf.mxu1 }
 0x126   :  { %v820_v7 = vadd.f32 %v3006_v53, %v819_v5  ;;  %v1020_v8 = vadd.f32 %v3006_v53, %v1019_v6 }
 0x127   :  { %v821_v9 = vpop.f32.mrf.mxu0  ;;  %v1021_v10 = vpop.f32.mrf.mxu1 }
 0x128   :  { %v1192_v13 = vmax.f32 %v820_v7, 0.0  ;;  %v1242_v14 = vmax.f32 %v1020_v8, 0.0 }
 0x129   :  { %v824_v15 = vpop.f32.mrf.mxu0  ;;  %v1024_v16 = vpop.f32.mrf.mxu1 }
 0x12a   :  { %v2127_v17 = vpack.c.bf16 %v1192_v13, %v1191_v11  ;;  %v2252_v18 = vpack.c.bf16 %v1242_v14, %v1241_v12  ;;  %v825_v21 = vadd.f32 %v3006_v53, %v824_v15  ;;  %v1025_v22 = vadd.f32 %v3006_v53, %v1024_v16 }
 0x12b   :  { %v826_v19 = vpop.f32.mrf.mxu0  ;;  %v1026_v20 = vpop.f32.mrf.mxu1 }
 0x12c   :  { %2357 = vst [vmem:[%s3261_s3 + $0x20] sm:$0xff] %v2127_v17   ;;  %2382 = vst [vmem:[%s3261_s3 + $0xe8] sm:$0xff] %v2252_v18   ;;  %v1193_v29 = vmax.f32 %v825_v21, 0.0  ;;  %v1243_v30 = vmax.f32 %v1025_v22, 0.0 }
 0x12d   :  { %v827_v23 = vpop.f32.mrf.mxu0  ;;  %v1027_v24 = vpop.f32.mrf.mxu1 }
 0x12e   :  { %v828_v25 = vadd.f32 %v3006_v53, %v827_v23  ;;  %v1028_v26 = vadd.f32 %v3006_v53, %v1027_v24 }
 0x12f   :  { %v829_v27 = vpop.f32.mrf.mxu0  ;;  %v1029_v28 = vpop.f32.mrf.mxu1 }
 0x130   :  { %v1194_v31 = vmax.f32 %v828_v25, 0.0  ;;  %v1244_v32 = vmax.f32 %v1028_v26, 0.0 }
 0x131   :  { %v832_v33 = vpop.f32.mrf.mxu0  ;;  %v1032_v34 = vpop.f32.mrf.mxu1 }
 0x132   :  { %v2132_v35 = vpack.c.bf16 %v1194_v31, %v1193_v29  ;;  %v2257_v36 = vpack.c.bf16 %v1244_v32, %v1243_v30  ;;  %v833_v39 = vadd.f32 %v3006_v53, %v832_v33  ;;  %v1033_v40 = vadd.f32 %v3006_v53, %v1032_v34 }
 0x133   :  { %v834_v37 = vpop.f32.mrf.mxu0  ;;  %v1034_v38 = vpop.f32.mrf.mxu1 }
 0x134   :  { %2358 = vst [vmem:[%s3261_s3 + $0x28] sm:$0xff] %v2132_v35   ;;  %2383 = vst [vmem:[%s3261_s3 + $0xf0] sm:$0xff] %v2257_v36   ;;  %v1195_v47 = vmax.f32 %v833_v39, 0.0  ;;  %v1245_v48 = vmax.f32 %v1033_v40, 0.0 }
 0x135   :  { %v835_v41 = vpop.f32.mrf.mxu0  ;;  %v1035_v42 = vpop.f32.mrf.mxu1 }
 0x136   :  { %v836_v43 = vadd.f32 %v3006_v53, %v835_v41  ;;  %v1036_v44 = vadd.f32 %v3006_v53, %v1035_v42 }
 0x137   :  { %v837_v45 = vpop.f32.mrf.mxu0  ;;  %v1037_v46 = vpop.f32.mrf.mxu1 }
 0x138   :  { %v1196_v49 = vmax.f32 %v836_v43, 0.0  ;;  %v1246_v50 = vmax.f32 %v1036_v44, 0.0 }
 0x139   :  { %v840_v51 = vpop.f32.mrf.mxu0  ;;  %v1040_v52 = vpop.f32.mrf.mxu1 }
 0x13a   :  { %v2137_v54 = vpack.c.bf16 %v1196_v49, %v1195_v47  ;;  %v2262_v55 = vpack.c.bf16 %v1246_v50, %v1245_v48  ;;  %v841_v58 = vadd.f32 %v3006_v53, %v840_v51  ;;  %v1041_v59 = vadd.f32 %v3006_v53, %v1040_v52 }
 0x13b   :  { %v842_v56 = vpop.f32.mrf.mxu0  ;;  %v1042_v57 = vpop.f32.mrf.mxu1 }
 0x13c   :  { %2359 = vst [vmem:[%s3261_s3 + $0x30] sm:$0xff] %v2137_v54   ;;  %2384 = vst [vmem:[%s3261_s3 + $0xf8] sm:$0xff] %v2262_v55   ;;  %v1197_v2 = vmax.f32 %v841_v58, 0.0  ;;  %v1247_v3 = vmax.f32 %v1041_v59, 0.0 }
 0x13d   :  { %v843_v60 = vpop.f32.mrf.mxu0  ;;  %v1043_v61 = vpop.f32.mrf.mxu1 }
 0x13e   :  { %v844_v62 = vadd.f32 %v3006_v53, %v843_v60  ;;  %v1044_v63 = vadd.f32 %v3006_v53, %v1043_v61 }
 0x13f   :  { %v845_v0 = vpop.f32.mrf.mxu0  ;;  %v1045_v1 = vpop.f32.mrf.mxu1 }
 0x140   :  { %v1198_v4 = vmax.f32 %v844_v62, 0.0  ;;  %v1248_v5 = vmax.f32 %v1044_v63, 0.0 }
 0x141   :  { %v848_v6 = vpop.f32.mrf.mxu0  ;;  %v1048_v7 = vpop.f32.mrf.mxu1 }
 0x142   :  { %v2142_v8 = vpack.c.bf16 %v1198_v4, %v1197_v2  ;;  %v2267_v9 = vpack.c.bf16 %v1248_v5, %v1247_v3  ;;  %v849_v12 = vadd.f32 %v3006_v53, %v848_v6  ;;  %v1049_v13 = vadd.f32 %v3006_v53, %v1048_v7 }
 0x143   :  { %v850_v10 = vpop.f32.mrf.mxu0  ;;  %v1050_v11 = vpop.f32.mrf.mxu1 }
 0x144   :  { %2360 = vst [vmem:[%s3261_s3 + $0x38] sm:$0xff] %v2142_v8   ;;  %2385 = vst [vmem:[%s3261_s3 + $0x100] sm:$0xff] %v2267_v9   ;;  %v1199_v20 = vmax.f32 %v849_v12, 0.0  ;;  %v1249_v21 = vmax.f32 %v1049_v13, 0.0 }
 0x145   :  { %v851_v14 = vpop.f32.mrf.mxu0  ;;  %v1051_v15 = vpop.f32.mrf.mxu1 }
 0x146   :  { %v852_v16 = vadd.f32 %v3006_v53, %v851_v14  ;;  %v1052_v17 = vadd.f32 %v3006_v53, %v1051_v15 }
 0x147   :  { %v853_v18 = vpop.f32.mrf.mxu0  ;;  %v1053_v19 = vpop.f32.mrf.mxu1 }
 0x148   :  { %v1200_v22 = vmax.f32 %v852_v16, 0.0  ;;  %v1250_v23 = vmax.f32 %v1052_v17, 0.0 }
 0x149   :  { %v856_v24 = vpop.f32.mrf.mxu0  ;;  %v1056_v25 = vpop.f32.mrf.mxu1 }
 0x14a   :  { %v2147_v26 = vpack.c.bf16 %v1200_v22, %v1199_v20  ;;  %v2272_v27 = vpack.c.bf16 %v1250_v23, %v1249_v21  ;;  %v857_v30 = vadd.f32 %v3006_v53, %v856_v24  ;;  %v1057_v31 = vadd.f32 %v3006_v53, %v1056_v25 }
 0x14b   :  { %v858_v28 = vpop.f32.mrf.mxu0  ;;  %v1058_v29 = vpop.f32.mrf.mxu1 }
 0x14c   :  { %2361 = vst [vmem:[%s3261_s3 + $0x40] sm:$0xff] %v2147_v26   ;;  %2386 = vst [vmem:[%s3261_s3 + $0x108] sm:$0xff] %v2272_v27   ;;  %v1201_v38 = vmax.f32 %v857_v30, 0.0  ;;  %v1251_v39 = vmax.f32 %v1057_v31, 0.0 }
 0x14d   :  { %v859_v32 = vpop.f32.mrf.mxu0  ;;  %v1059_v33 = vpop.f32.mrf.mxu1 }
 0x14e   :  { %v860_v34 = vadd.f32 %v3006_v53, %v859_v32  ;;  %v1060_v35 = vadd.f32 %v3006_v53, %v1059_v33 }
 0x14f   :  { %v861_v36 = vpop.f32.mrf.mxu0  ;;  %v1061_v37 = vpop.f32.mrf.mxu1 }
 0x150   :  { %v1202_v40 = vmax.f32 %v860_v34, 0.0  ;;  %v1252_v41 = vmax.f32 %v1060_v35, 0.0 }
 0x151   :  { %v864_v42 = vpop.f32.mrf.mxu0  ;;  %v1064_v43 = vpop.f32.mrf.mxu1 }
 0x152   :  { %v2152_v44 = vpack.c.bf16 %v1202_v40, %v1201_v38  ;;  %v2277_v45 = vpack.c.bf16 %v1252_v41, %v1251_v39  ;;  %v865_v48 = vadd.f32 %v3006_v53, %v864_v42  ;;  %v1065_v49 = vadd.f32 %v3006_v53, %v1064_v43 }
 0x153   :  { %v866_v46 = vpop.f32.mrf.mxu0  ;;  %v1066_v47 = vpop.f32.mrf.mxu1 }
 0x154   :  { %2362 = vst [vmem:[%s3261_s3 + $0x48] sm:$0xff] %v2152_v44   ;;  %2387 = vst [vmem:[%s3261_s3 + $0x110] sm:$0xff] %v2277_v45   ;;  %v1203_v57 = vmax.f32 %v865_v48, 0.0  ;;  %v1253_v58 = vmax.f32 %v1065_v49, 0.0 }
 0x155   :  { %v867_v50 = vpop.f32.mrf.mxu0  ;;  %v1067_v51 = vpop.f32.mrf.mxu1 }
 0x156   :  { %v868_v52 = vadd.f32 %v3006_v53, %v867_v50  ;;  %v1068_v54 = vadd.f32 %v3006_v53, %v1067_v51 }
 0x157   :  { %v869_v55 = vpop.f32.mrf.mxu0  ;;  %v1069_v56 = vpop.f32.mrf.mxu1 }
 0x158   :  { %v1204_v59 = vmax.f32 %v868_v52, 0.0  ;;  %v1254_v60 = vmax.f32 %v1068_v54, 0.0 }
 0x159   :  { %v872_v61 = vpop.f32.mrf.mxu0  ;;  %v1072_v62 = vpop.f32.mrf.mxu1 }
 0x15a   :  { %v2157_v63 = vpack.c.bf16 %v1204_v59, %v1203_v57  ;;  %v2282_v0 = vpack.c.bf16 %v1254_v60, %v1253_v58  ;;  %v873_v3 = vadd.f32 %v3006_v53, %v872_v61  ;;  %v1073_v4 = vadd.f32 %v3006_v53, %v1072_v62 }
 0x15b   :  { %v874_v1 = vpop.f32.mrf.mxu0  ;;  %v1074_v2 = vpop.f32.mrf.mxu1 }
 0x15c   :  { %2363 = vst [vmem:[%s3261_s3 + $0x50] sm:$0xff] %v2157_v63   ;;  %2388 = vst [vmem:[%s3261_s3 + $0x118] sm:$0xff] %v2282_v0   ;;  %v1205_v11 = vmax.f32 %v873_v3, 0.0  ;;  %v1255_v12 = vmax.f32 %v1073_v4, 0.0 }
 0x15d   :  { %v875_v5 = vpop.f32.mrf.mxu0  ;;  %v1075_v6 = vpop.f32.mrf.mxu1 }
 0x15e   :  { %v876_v7 = vadd.f32 %v3006_v53, %v875_v5  ;;  %v1076_v8 = vadd.f32 %v3006_v53, %v1075_v6 }
 0x15f   :  { %v877_v9 = vpop.f32.mrf.mxu0  ;;  %v1077_v10 = vpop.f32.mrf.mxu1 }
 0x160   :  { %v1206_v13 = vmax.f32 %v876_v7, 0.0  ;;  %v1256_v14 = vmax.f32 %v1076_v8, 0.0 }
 0x161   :  { %v880_v15 = vpop.f32.mrf.mxu0  ;;  %v1080_v16 = vpop.f32.mrf.mxu1 }
 0x162   :  { %v2162_v17 = vpack.c.bf16 %v1206_v13, %v1205_v11  ;;  %v2287_v18 = vpack.c.bf16 %v1256_v14, %v1255_v12  ;;  %v881_v21 = vadd.f32 %v3006_v53, %v880_v15  ;;  %v1081_v22 = vadd.f32 %v3006_v53, %v1080_v16 }
 0x163   :  { %v882_v19 = vpop.f32.mrf.mxu0  ;;  %v1082_v20 = vpop.f32.mrf.mxu1 }
 0x164   :  { %2364 = vst [vmem:[%s3261_s3 + $0x58] sm:$0xff] %v2162_v17   ;;  %2389 = vst [vmem:[%s3261_s3 + $0x120] sm:$0xff] %v2287_v18   ;;  %v1207_v29 = vmax.f32 %v881_v21, 0.0  ;;  %v1257_v30 = vmax.f32 %v1081_v22, 0.0 }
 0x165   :  { %v883_v23 = vpop.f32.mrf.mxu0  ;;  %v1083_v24 = vpop.f32.mrf.mxu1 }
 0x166   :  { %v884_v25 = vadd.f32 %v3006_v53, %v883_v23  ;;  %v1084_v26 = vadd.f32 %v3006_v53, %v1083_v24 }
 0x167   :  { %v885_v27 = vpop.f32.mrf.mxu0  ;;  %v1085_v28 = vpop.f32.mrf.mxu1 }
 0x168   :  { %v1208_v31 = vmax.f32 %v884_v25, 0.0  ;;  %v1258_v32 = vmax.f32 %v1084_v26, 0.0 }
 0x169   :  { %v888_v33 = vpop.f32.mrf.mxu0  ;;  %v1088_v34 = vpop.f32.mrf.mxu1 }
 0x16a   :  { %v2167_v35 = vpack.c.bf16 %v1208_v31, %v1207_v29  ;;  %v2292_v36 = vpack.c.bf16 %v1258_v32, %v1257_v30  ;;  %v889_v39 = vadd.f32 %v3006_v53, %v888_v33  ;;  %v1089_v40 = vadd.f32 %v3006_v53, %v1088_v34 }
 0x16b   :  { %v890_v37 = vpop.f32.mrf.mxu0  ;;  %v1090_v38 = vpop.f32.mrf.mxu1 }
 0x16c   :  { %2365 = vst [vmem:[%s3261_s3 + $0x60] sm:$0xff] %v2167_v35   ;;  %2390 = vst [vmem:[%s3261_s3 + $0x128] sm:$0xff] %v2292_v36   ;;  %v1209_v47 = vmax.f32 %v889_v39, 0.0  ;;  %v1259_v48 = vmax.f32 %v1089_v40, 0.0 }
 0x16d   :  { %v891_v41 = vpop.f32.mrf.mxu0  ;;  %v1091_v42 = vpop.f32.mrf.mxu1 }
 0x16e   :  { %v892_v43 = vadd.f32 %v3006_v53, %v891_v41  ;;  %v1092_v44 = vadd.f32 %v3006_v53, %v1091_v42 }
 0x16f   :  { %v893_v45 = vpop.f32.mrf.mxu0  ;;  %v1093_v46 = vpop.f32.mrf.mxu1 }
 0x170   :  { %v1210_v49 = vmax.f32 %v892_v43, 0.0  ;;  %v1260_v50 = vmax.f32 %v1092_v44, 0.0 }
 0x171   :  { %v896_v51 = vpop.f32.mrf.mxu0  ;;  %v1096_v52 = vpop.f32.mrf.mxu1 }
 0x172   :  { %v2172_v54 = vpack.c.bf16 %v1210_v49, %v1209_v47  ;;  %v2297_v55 = vpack.c.bf16 %v1260_v50, %v1259_v48  ;;  %v897_v58 = vadd.f32 %v3006_v53, %v896_v51  ;;  %v1097_v59 = vadd.f32 %v3006_v53, %v1096_v52 }
 0x173   :  { %v898_v56 = vpop.f32.mrf.mxu0  ;;  %v1098_v57 = vpop.f32.mrf.mxu1 }
 0x174   :  { %2366 = vst [vmem:[%s3261_s3 + $0x68] sm:$0xff] %v2172_v54   ;;  %2391 = vst [vmem:[%s3261_s3 + $0x130] sm:$0xff] %v2297_v55   ;;  %v1211_v2 = vmax.f32 %v897_v58, 0.0  ;;  %v1261_v3 = vmax.f32 %v1097_v59, 0.0 }
 0x175   :  { %v899_v60 = vpop.f32.mrf.mxu0  ;;  %v1099_v61 = vpop.f32.mrf.mxu1 }
 0x176   :  { %v900_v62 = vadd.f32 %v3006_v53, %v899_v60  ;;  %v1100_v63 = vadd.f32 %v3006_v53, %v1099_v61 }
 0x177   :  { %v901_v0 = vpop.f32.mrf.mxu0  ;;  %v1101_v1 = vpop.f32.mrf.mxu1 }
 0x178   :  { %v1212_v4 = vmax.f32 %v900_v62, 0.0  ;;  %v1262_v5 = vmax.f32 %v1100_v63, 0.0 }
 0x179   :  { %v904_v6 = vpop.f32.mrf.mxu0  ;;  %v1104_v7 = vpop.f32.mrf.mxu1 }
 0x17a   :  { %v2177_v8 = vpack.c.bf16 %v1212_v4, %v1211_v2  ;;  %v2302_v9 = vpack.c.bf16 %v1262_v5, %v1261_v3  ;;  %v905_v12 = vadd.f32 %v3006_v53, %v904_v6  ;;  %v1105_v13 = vadd.f32 %v3006_v53, %v1104_v7 }
 0x17b   :  { %v906_v10 = vpop.f32.mrf.mxu0  ;;  %v1106_v11 = vpop.f32.mrf.mxu1 }
 0x17c   :  { %2367 = vst [vmem:[%s3261_s3 + $0x70] sm:$0xff] %v2177_v8   ;;  %2392 = vst [vmem:[%s3261_s3 + $0x138] sm:$0xff] %v2302_v9   ;;  %v1213_v20 = vmax.f32 %v905_v12, 0.0  ;;  %v1263_v21 = vmax.f32 %v1105_v13, 0.0 }
 0x17d   :  { %v907_v14 = vpop.f32.mrf.mxu0  ;;  %v1107_v15 = vpop.f32.mrf.mxu1 }
 0x17e   :  { %v908_v16 = vadd.f32 %v3006_v53, %v907_v14  ;;  %v1108_v17 = vadd.f32 %v3006_v53, %v1107_v15 }
 0x17f   :  { %v909_v18 = vpop.f32.mrf.mxu0  ;;  %v1109_v19 = vpop.f32.mrf.mxu1 }
 0x180   :  { %v1214_v22 = vmax.f32 %v908_v16, 0.0  ;;  %v1264_v23 = vmax.f32 %v1108_v17, 0.0 }
 0x181   :  { %v912_v24 = vpop.f32.mrf.mxu0  ;;  %v1112_v25 = vpop.f32.mrf.mxu1 }
 0x182   :  { %v2182_v26 = vpack.c.bf16 %v1214_v22, %v1213_v20  ;;  %v2307_v27 = vpack.c.bf16 %v1264_v23, %v1263_v21  ;;  %v913_v30 = vadd.f32 %v3006_v53, %v912_v24  ;;  %v1113_v31 = vadd.f32 %v3006_v53, %v1112_v25 }
 0x183   :  { %v914_v28 = vpop.f32.mrf.mxu0  ;;  %v1114_v29 = vpop.f32.mrf.mxu1 }
 0x184   :  { %2368 = vst [vmem:[%s3261_s3 + $0x78] sm:$0xff] %v2182_v26   ;;  %2393 = vst [vmem:[%s3261_s3 + $0x140] sm:$0xff] %v2307_v27   ;;  %v1215_v38 = vmax.f32 %v913_v30, 0.0  ;;  %v1265_v39 = vmax.f32 %v1113_v31, 0.0 }
 0x185   :  { %v915_v32 = vpop.f32.mrf.mxu0  ;;  %v1115_v33 = vpop.f32.mrf.mxu1 }
 0x186   :  { %v916_v34 = vadd.f32 %v3006_v53, %v915_v32  ;;  %v1116_v35 = vadd.f32 %v3006_v53, %v1115_v33 }
 0x187   :  { %v917_v36 = vpop.f32.mrf.mxu0  ;;  %v1117_v37 = vpop.f32.mrf.mxu1 }
 0x188   :  { %v1216_v40 = vmax.f32 %v916_v34, 0.0  ;;  %v1266_v41 = vmax.f32 %v1116_v35, 0.0 }
 0x189   :  { %v920_v42 = vpop.f32.mrf.mxu0  ;;  %v1120_v43 = vpop.f32.mrf.mxu1 }
 0x18a   :  { %v2187_v44 = vpack.c.bf16 %v1216_v40, %v1215_v38  ;;  %v2312_v45 = vpack.c.bf16 %v1266_v41, %v1265_v39  ;;  %v921_v48 = vadd.f32 %v3006_v53, %v920_v42  ;;  %v1121_v49 = vadd.f32 %v3006_v53, %v1120_v43 }
 0x18b   :  { %v922_v46 = vpop.f32.mrf.mxu0  ;;  %v1122_v47 = vpop.f32.mrf.mxu1 }
 0x18c   :  { %2369 = vst [vmem:[%s3261_s3 + $0x80] sm:$0xff] %v2187_v44   ;;  %2394 = vst [vmem:[%s3261_s3 + $0x148] sm:$0xff] %v2312_v45   ;;  %v1217_v57 = vmax.f32 %v921_v48, 0.0  ;;  %v1267_v58 = vmax.f32 %v1121_v49, 0.0 }
 0x18d   :  { %v923_v50 = vpop.f32.mrf.mxu0  ;;  %v1123_v51 = vpop.f32.mrf.mxu1 }
 0x18e   :  { %v924_v52 = vadd.f32 %v3006_v53, %v923_v50  ;;  %v1124_v54 = vadd.f32 %v3006_v53, %v1123_v51 }
 0x18f   :  { %v925_v55 = vpop.f32.mrf.mxu0  ;;  %v1125_v56 = vpop.f32.mrf.mxu1 }
 0x190   :  { %v1218_v59 = vmax.f32 %v924_v52, 0.0  ;;  %v1268_v60 = vmax.f32 %v1124_v54, 0.0 }
 0x191   :  { %v928_v61 = vpop.f32.mrf.mxu0  ;;  %v1128_v62 = vpop.f32.mrf.mxu1 }
 0x192   :  { %v2192_v63 = vpack.c.bf16 %v1218_v59, %v1217_v57  ;;  %v2317_v0 = vpack.c.bf16 %v1268_v60, %v1267_v58  ;;  %v929_v3 = vadd.f32 %v3006_v53, %v928_v61  ;;  %v1129_v4 = vadd.f32 %v3006_v53, %v1128_v62 }
 0x193   :  { %v930_v1 = vpop.f32.mrf.mxu0  ;;  %v1130_v2 = vpop.f32.mrf.mxu1 }
 0x194   :  { %2370 = vst [vmem:[%s3261_s3 + $0x88] sm:$0xff] %v2192_v63   ;;  %2395 = vst [vmem:[%s3261_s3 + $0x150] sm:$0xff] %v2317_v0   ;;  %v1219_v11 = vmax.f32 %v929_v3, 0.0  ;;  %v1269_v12 = vmax.f32 %v1129_v4, 0.0 }
 0x195   :  { %v931_v5 = vpop.f32.mrf.mxu0  ;;  %v1131_v6 = vpop.f32.mrf.mxu1 }
 0x196   :  { %v932_v7 = vadd.f32 %v3006_v53, %v931_v5  ;;  %v1132_v8 = vadd.f32 %v3006_v53, %v1131_v6 }
 0x197   :  { %v933_v9 = vpop.f32.mrf.mxu0  ;;  %v1133_v10 = vpop.f32.mrf.mxu1 }
 0x198   :  { %v1220_v13 = vmax.f32 %v932_v7, 0.0  ;;  %v1270_v14 = vmax.f32 %v1132_v8, 0.0 }
 0x199   :  { %v936_v15 = vpop.f32.mrf.mxu0  ;;  %v1136_v16 = vpop.f32.mrf.mxu1 }
 0x19a   :  { %v2197_v17 = vpack.c.bf16 %v1220_v13, %v1219_v11  ;;  %v2322_v18 = vpack.c.bf16 %v1270_v14, %v1269_v12  ;;  %v937_v21 = vadd.f32 %v3006_v53, %v936_v15  ;;  %v1137_v22 = vadd.f32 %v3006_v53, %v1136_v16 }
 0x19b   :  { %v938_v19 = vpop.f32.mrf.mxu0  ;;  %v1138_v20 = vpop.f32.mrf.mxu1 }
 0x19c   :  { %2371 = vst [vmem:[%s3261_s3 + $0x90] sm:$0xff] %v2197_v17   ;;  %2396 = vst [vmem:[%s3261_s3 + $0x158] sm:$0xff] %v2322_v18   ;;  %v1221_v29 = vmax.f32 %v937_v21, 0.0  ;;  %v1271_v30 = vmax.f32 %v1137_v22, 0.0 }
 0x19d   :  { %v939_v23 = vpop.f32.mrf.mxu0  ;;  %v1139_v24 = vpop.f32.mrf.mxu1 }
 0x19e   :  { %v940_v25 = vadd.f32 %v3006_v53, %v939_v23  ;;  %v1140_v26 = vadd.f32 %v3006_v53, %v1139_v24 }
 0x19f   :  { %v941_v27 = vpop.f32.mrf.mxu0  ;;  %v1141_v28 = vpop.f32.mrf.mxu1 }
 0x1a0   :  { %v1222_v31 = vmax.f32 %v940_v25, 0.0  ;;  %v1272_v32 = vmax.f32 %v1140_v26, 0.0 }
 0x1a1   :  { %v944_v33 = vpop.f32.mrf.mxu0  ;;  %v1144_v34 = vpop.f32.mrf.mxu1 }
 0x1a2   :  { %v2202_v35 = vpack.c.bf16 %v1222_v31, %v1221_v29  ;;  %v2327_v36 = vpack.c.bf16 %v1272_v32, %v1271_v30  ;;  %v945_v39 = vadd.f32 %v3006_v53, %v944_v33  ;;  %v1145_v40 = vadd.f32 %v3006_v53, %v1144_v34 }
 0x1a3   :  { %v946_v37 = vpop.f32.mrf.mxu0  ;;  %v1146_v38 = vpop.f32.mrf.mxu1 }
 0x1a4   :  { %2372 = vst [vmem:[%s3261_s3 + $0x98] sm:$0xff] %v2202_v35   ;;  %2397 = vst [vmem:[%s3261_s3 + $0x160] sm:$0xff] %v2327_v36   ;;  %v1223_v47 = vmax.f32 %v945_v39, 0.0  ;;  %v1273_v48 = vmax.f32 %v1145_v40, 0.0 }
 0x1a5   :  { %v947_v41 = vpop.f32.mrf.mxu0  ;;  %v1147_v42 = vpop.f32.mrf.mxu1 }
 0x1a6   :  { %v948_v43 = vadd.f32 %v3006_v53, %v947_v41  ;;  %v1148_v44 = vadd.f32 %v3006_v53, %v1147_v42 }
 0x1a7   :  { %v949_v45 = vpop.f32.mrf.mxu0  ;;  %v1149_v46 = vpop.f32.mrf.mxu1 }
 0x1a8   :  { %v1224_v49 = vmax.f32 %v948_v43, 0.0  ;;  %v1274_v50 = vmax.f32 %v1148_v44, 0.0 }
 0x1a9   :  { %v952_v51 = vpop.f32.mrf.mxu0  ;;  %v1152_v52 = vpop.f32.mrf.mxu1 }
 0x1aa   :  { %v2207_v54 = vpack.c.bf16 %v1224_v49, %v1223_v47  ;;  %v2332_v55 = vpack.c.bf16 %v1274_v50, %v1273_v48  ;;  %v953_v58 = vadd.f32 %v3006_v53, %v952_v51  ;;  %v1153_v59 = vadd.f32 %v3006_v53, %v1152_v52 }
 0x1ab   :  { %v954_v56 = vpop.f32.mrf.mxu0  ;;  %v1154_v57 = vpop.f32.mrf.mxu1 }
 0x1ac   :  { %2373 = vst [vmem:[%s3261_s3 + $0xa0] sm:$0xff] %v2207_v54   ;;  %2398 = vst [vmem:[%s3261_s3 + $0x168] sm:$0xff] %v2332_v55   ;;  %v1225_v2 = vmax.f32 %v953_v58, 0.0  ;;  %v1275_v3 = vmax.f32 %v1153_v59, 0.0 }
 0x1ad   :  { %v955_v60 = vpop.f32.mrf.mxu0  ;;  %v1155_v61 = vpop.f32.mrf.mxu1 }
 0x1ae   :  { %v956_v62 = vadd.f32 %v3006_v53, %v955_v60  ;;  %v1156_v63 = vadd.f32 %v3006_v53, %v1155_v61 }
 0x1af   :  { %v957_v0 = vpop.f32.mrf.mxu0  ;;  %v1157_v1 = vpop.f32.mrf.mxu1 }
 0x1b0   :  { %v1226_v4 = vmax.f32 %v956_v62, 0.0  ;;  %v1276_v5 = vmax.f32 %v1156_v63, 0.0 }
 0x1b1   :  { %v960_v6 = vpop.f32.mrf.mxu0  ;;  %v1160_v7 = vpop.f32.mrf.mxu1 }
 0x1b2   :  { %v2212_v8 = vpack.c.bf16 %v1226_v4, %v1225_v2  ;;  %v2337_v9 = vpack.c.bf16 %v1276_v5, %v1275_v3  ;;  %v961_v12 = vadd.f32 %v3006_v53, %v960_v6  ;;  %v1161_v13 = vadd.f32 %v3006_v53, %v1160_v7 }
 0x1b3   :  { %v962_v10 = vpop.f32.mrf.mxu0  ;;  %v1162_v11 = vpop.f32.mrf.mxu1 }
 0x1b4   :  { %2374 = vst [vmem:[%s3261_s3 + $0xa8] sm:$0xff] %v2212_v8   ;;  %2399 = vst [vmem:[%s3261_s3 + $0x170] sm:$0xff] %v2337_v9   ;;  %v1227_v20 = vmax.f32 %v961_v12, 0.0  ;;  %v1277_v21 = vmax.f32 %v1161_v13, 0.0 }
 0x1b5   :  { %v963_v14 = vpop.f32.mrf.mxu0  ;;  %v1163_v15 = vpop.f32.mrf.mxu1 }
 0x1b6   :  { %v964_v16 = vadd.f32 %v3006_v53, %v963_v14  ;;  %v1164_v17 = vadd.f32 %v3006_v53, %v1163_v15 }
 0x1b7   :  { %v965_v18 = vpop.f32.mrf.mxu0  ;;  %v1165_v19 = vpop.f32.mrf.mxu1 }
 0x1b8   :  { %v1228_v22 = vmax.f32 %v964_v16, 0.0  ;;  %v1278_v23 = vmax.f32 %v1164_v17, 0.0 }
 0x1b9   :  { %v968_v24 = vpop.f32.mrf.mxu0  ;;  %v1168_v25 = vpop.f32.mrf.mxu1 }
 0x1ba   :  { %v2217_v26 = vpack.c.bf16 %v1228_v22, %v1227_v20  ;;  %v2342_v27 = vpack.c.bf16 %v1278_v23, %v1277_v21  ;;  %v969_v30 = vadd.f32 %v3006_v53, %v968_v24  ;;  %v1169_v31 = vadd.f32 %v3006_v53, %v1168_v25 }
 0x1bb   :  { %v970_v28 = vpop.f32.mrf.mxu0  ;;  %v1170_v29 = vpop.f32.mrf.mxu1 }
 0x1bc   :  { %2375 = vst [vmem:[%s3261_s3 + $0xb0] sm:$0xff] %v2217_v26   ;;  %2400 = vst [vmem:[%s3261_s3 + $0x178] sm:$0xff] %v2342_v27   ;;  %v1229_v38 = vmax.f32 %v969_v30, 0.0  ;;  %v1279_v39 = vmax.f32 %v1169_v31, 0.0 }
 0x1bd   :  { %v971_v32 = vpop.f32.mrf.mxu0  ;;  %v1171_v33 = vpop.f32.mrf.mxu1 }
 0x1be   :  { %v972_v34 = vadd.f32 %v3006_v53, %v971_v32  ;;  %v1172_v35 = vadd.f32 %v3006_v53, %v1171_v33 }
 0x1bf   :  { %v973_v36 = vpop.f32.mrf.mxu0  ;;  %v1173_v37 = vpop.f32.mrf.mxu1 }
 0x1c0   :  { %v1230_v40 = vmax.f32 %v972_v34, 0.0  ;;  %v1280_v41 = vmax.f32 %v1172_v35, 0.0 }
 0x1c1   :  { %v976_v42 = vpop.f32.mrf.mxu0  ;;  %v1176_v43 = vpop.f32.mrf.mxu1 }
 0x1c2   :  { %v2222_v44 = vpack.c.bf16 %v1230_v40, %v1229_v38  ;;  %v2347_v45 = vpack.c.bf16 %v1280_v41, %v1279_v39  ;;  %v977_v48 = vadd.f32 %v3006_v53, %v976_v42  ;;  %v1177_v49 = vadd.f32 %v3006_v53, %v1176_v43 }
 0x1c3   :  { %v978_v46 = vpop.f32.mrf.mxu0  ;;  %v1178_v47 = vpop.f32.mrf.mxu1 }
 0x1c4   :  { %2376 = vst [vmem:[%s3261_s3 + $0xb8] sm:$0xff] %v2222_v44   ;;  %2401 = vst [vmem:[%s3261_s3 + $0x180] sm:$0xff] %v2347_v45   ;;  %v1231_v57 = vmax.f32 %v977_v48, 0.0  ;;  %v1281_v58 = vmax.f32 %v1177_v49, 0.0 }
 0x1c5   :  { %v979_v50 = vpop.f32.mrf.mxu0  ;;  %v1179_v51 = vpop.f32.mrf.mxu1 }
 0x1c6   :  { %v980_v52 = vadd.f32 %v3006_v53, %v979_v50  ;;  %v1180_v54 = vadd.f32 %v3006_v53, %v1179_v51 }
 0x1c7   :  { %v981_v55 = vpop.f32.mrf.mxu0  ;;  %v1181_v56 = vpop.f32.mrf.mxu1 }
 0x1c8   :  { %v1232_v59 = vmax.f32 %v980_v52, 0.0  ;;  %v1282_v60 = vmax.f32 %v1180_v54, 0.0 }
 0x1ca   :  { %v2227_v61 = vpack.c.bf16 %v1232_v59, %v1231_v57  ;;  %v2352_v62 = vpack.c.bf16 %v1282_v60, %v1281_v58 }
 0x1cc   :  { %2377 = vst [vmem:[%s3261_s3 + $0xc0] sm:$0xff] %v2227_v61   ;;  %2402 = vst [vmem:[%s3261_s3 + $0x188] sm:$0xff] %v2352_v62  }

// kernel: dqn_forward.5
= control target key start
LH: loop header
LB: loop body
LE: loop exit
PB: predicated region body
PF: predicated region fallthrough
CT: control target
= control target key end

     0   :  { %s1644_s1 = inlined_call_operand.vmem [shape: bf16[512,128], index: 1, kind: input, shape index: {}]   ;;  %s1645_s0 = inlined_call_operand.vmem [shape: bf16[162,512], index: 0, kind: input, shape index: {}]   ;;  %s1646_s2 = inlined_call_operand.vmem [shape: f32[1,128], index: 2, kind: input, shape index: {}]   ;;  %s1647_s3 = inlined_call_operand.vmem [shape: bf16[162,128], index: 3, kind: output, shape index: {}]  }
   0x1   :  { %v1247_v0 = vld [vmem:[%s1644_s1 + $0x78] sm:$0xff]   ;;  %v1251_v4 = vld [vmem:[%s1644_s1 + $0x70] sm:$0xff]   ;;  %v1255_v8 = vld [vmem:[%s1644_s1 + $0x68] sm:$0xff]  }
   0x2   :  { %v1248_v1 = vld [vmem:[%s1644_s1 + $0xf8] sm:$0xff]   ;;  %1083 = vmatprep.subr.bf16.mxu0 %v1247_v0  ;;  %v1252_v5 = vld [vmem:[%s1644_s1 + $0xf0] sm:$0xff]   ;;  %v1256_v9 = vld [vmem:[%s1644_s1 + $0xe8] sm:$0xff]  }
   0x3   :  { %v1249_v2 = vld [vmem:[%s1644_s1 + $0x38] sm:$0xff]   ;;  %1165 = vmatprep.subr.bf16.mxu1 %v1248_v1  ;;  %v1253_v6 = vld [vmem:[%s1644_s1 + $0x30] sm:$0xff]   ;;  %v1257_v10 = vld [vmem:[%s1644_s1 + $0x28] sm:$0xff]  }
   0x4   :  { %v1250_v3 = vld [vmem:[%s1644_s1 + $0xb8] sm:$0xff]   ;;  %1084 = vmatpush3.bf16.msra.mxu0 %v1249_v2  ;;  %v1254_v7 = vld [vmem:[%s1644_s1 + $0xb0] sm:$0xff]   ;;  %v1258_v11 = vld [vmem:[%s1644_s1 + $0xa8] sm:$0xff]  }
   0x5   :  { %1166 = vmatpush3.bf16.msra.mxu1 %v1250_v3  ;;  %1085 = vmatprep.subr.bf16.mxu0 %v1251_v4  ;;  %v1259_v12 = vld [vmem:[%s1644_s1 + $0x60] sm:$0xff]   ;;  %v1263_v16 = vld [vmem:[%s1644_s1 + $0x58] sm:$0xff]   ;;  %v1267_v20 = vld [vmem:[%s1644_s1 + $0x50] sm:$0xff]  }
   0x6   :  { %1167 = vmatprep.subr.bf16.mxu1 %v1252_v5  ;;  %v1260_v13 = vld [vmem:[%s1644_s1 + $0xe0] sm:$0xff]   ;;  %v1264_v17 = vld [vmem:[%s1644_s1 + $0xd8] sm:$0xff]   ;;  %v1268_v21 = vld [vmem:[%s1644_s1 + $0xd0] sm:$0xff]  }
   0x7   :  { %v1261_v14 = vld [vmem:[%s1644_s1 + $0x20] sm:$0xff]   ;;  %v1265_v18 = vld [vmem:[%s1644_s1 + $0x18] sm:$0xff]   ;;  %v1269_v22 = vld [vmem:[%s1644_s1 + $0x10] sm:$0xff]  }
   0x8   :  { %1086 = vmatpush3.bf16.msra.mxu0 %v1253_v6  ;;  %v1262_v15 = vld [vmem:[%s1644_s1 + $0xa0] sm:$0xff]   ;;  %v1266_v19 = vld [vmem:[%s1644_s1 + $0x98] sm:$0xff]   ;;  %v1270_v23 = vld [vmem:[%s1644_s1 + $0x90] sm:$0xff]  }
   0x9   :  { %1168 = vmatpush3.bf16.msra.mxu1 %v1254_v7  ;;  %1087 = vmatprep.subr.bf16.mxu0 %v1255_v8  ;;  %v1271_v24 = vld [vmem:[%s1644_s1 + $0x48] sm:$0xff]   ;;  %v1275_v28 = vld [vmem:[%s1644_s1 + $0x40] sm:$0xff]  }
   0xa   :  { %1169 = vmatprep.subr.bf16.mxu1 %v1256_v9  ;;  %v1272_v25 = vld [vmem:[%s1644_s1 + $0xc8] sm:$0xff]   ;;  %v1276_v29 = vld [vmem:[%s1644_s1 + $0xc0] sm:$0xff]  }
   0xb   :  { %v1273_v26 = vld [vmem:[%s1644_s1 + $0x8] sm:$0xff]   ;;  %v1277_v30 = vld [vmem:[%s1644_s1] sm:$0xff]  }
   0xc   :  { %1088 = vmatpush3.bf16.msra.mxu0 %v1257_v10  ;;  %v1274_v27 = vld [vmem:[%s1644_s1 + $0x88] sm:$0xff]   ;;  %v1278_v31 = vld [vmem:[%s1644_s1 + $0x80] sm:$0xff]  }
   0xd   :  { %1170 = vmatpush3.bf16.msra.mxu1 %v1258_v11  ;;  %1089 = vmatprep.subr.bf16.mxu0 %v1259_v12  ;;  %v1279_v32 = vld [vmem:[%s1645_s0] ss:$16 sps:$4 sm:$0xff]   ;;  %v1281_v33 = vld [vmem:[%s1645_s0 + $0x4] ss:$16 sps:$4 sm:$0xff]   ;;  %v1282_v34 = vld [vmem:[%s1645_s0 + $0x8] ss:$16 sps:$4 sm:$0xff]  }
   0xe   :  { %1171 = vmatprep.subr.bf16.mxu1 %v1260_v13  ;;  %v1284_v35 = vld [vmem:[%s1645_s0 + $0xc] ss:$16 sps:$4 sm:$0xff]   ;;  %566 = vmatprep.mubr.bf16.mxu0 %v1281_v33  ;;  %v1285_v36 = vld [vmem:[%s1645_s0 + $0x24] ss:$16 sps:$4 sm:$0xff]   ;;  %v1289_v38 = vld [vmem:[%s1645_s0 + $0x20] ss:$16 sps:$4 sm:$0xff]  }
   0xf   :  { %686 = vmatprep.mubr.bf16.mxu1 %v1284_v35  ;;  %v1287_v37 = vld [vmem:[%s1645_s0 + $0x2c] ss:$16 sps:$4 sm:$0xff]   ;;  %v1290_v39 = vld [vmem:[%s1645_s0 + $0x28] ss:$16 sps:$4 sm:$0xff]   ;;  %v1291_v40 = vld [vmem:[%s1645_s0 + $0x44] ss:$16 sps:$4 sm:$0xff]  }
  0x10   :  { %1090 = vmatpush3.bf16.msra.mxu0 %v1261_v14  ;;  %v1293_v41 = vld [vmem:[%s1645_s0 + $0x4c] ss:$16 sps:$4 sm:$0xff]   ;;  %v1295_v42 = vld [vmem:[%s1645_s0 + $0x40] ss:$16 sps:$4 sm:$0xff]   ;;  %v1296_v43 = vld [vmem:[%s1645_s0 + $0x48] ss:$16 sps:$4 sm:$0xff]  }
  0x11   :  { %1172 = vmatpush3.bf16.msra.mxu1 %v1262_v15  ;;  %1091 = vmatprep.subr.bf16.mxu0 %v1263_v16  ;;  %v1297_v44 = vld [vmem:[%s1645_s0 + $0x64] ss:$16 sps:$4 sm:$0xff]   ;;  %v1299_v45 = vld [vmem:[%s1645_s0 + $0x6c] ss:$16 sps:$4 sm:$0xff]   ;;  %v1301_v46 = vld [vmem:[%s1645_s0 + $0x60] ss:$16 sps:$4 sm:$0xff]  }
  0x12   :  { %1173 = vmatprep.subr.bf16.mxu1 %v1264_v17  ;;  %v1302_v47 = vld [vmem:[%s1645_s0 + $0x68] ss:$16 sps:$4 sm:$0xff]   ;;  %v1303_v48 = vld [vmem:[%s1645_s0 + $0x84] ss:$16 sps:$4 sm:$0xff]   ;;  %v1305_v49 = vld [vmem:[%s1645_s0 + $0x8c] ss:$16 sps:$4 sm:$0xff]  }
  0x13   :  { %v1307_v50 = vld [vmem:[%s1645_s0 + $0x80] ss:$16 sps:$4 sm:$0xff]   ;;  %v1308_v51 = vld [vmem:[%s1645_s0 + $0x88] ss:$16 sps:$4 sm:$0xff]   ;;  %v1309_v52 = vld [vmem:[%s1645_s0 + $0xa4] ss:$16 sps:$4 sm:$0xff]  }
  0x14   :  { %1092 = vmatpush3.bf16.msra.mxu0 %v1265_v18  ;;  %v1311_v53 = vld [vmem:[%s1645_s0 + $0xac] ss:$16 sps:$4 sm:$0xff]   ;;  %v1313_v54 = vld [vmem:[%s1645_s0 + $0xa0] ss:$16 sps:$4 sm:$0xff]   ;;  %v1314_v55 = vld [vmem:[%s1645_s0 + $0xa8] ss:$16 sps:$4 sm:$0xff]  }
  0x15   :  { %1174 = vmatpush3.bf16.msra.mxu1 %v1266_v19  ;;  %1093 = vmatprep.subr.bf16.mxu0 %v1267_v20  ;;  %v1315_v56 = vld [vmem:[%s1645_s0 + $0xc4] ss:$16 sps:$4 sm:$0xff]   ;;  %v1317_v57 = vld [vmem:[%s1645_s0 + $0xcc] ss:$16 sps:$4 sm:$0xff]   ;;  %v1319_v58 = vld [vmem:[%s1645_s0 + $0xc0] ss:$16 sps:$4 sm:$0xff]  }
  0x16   :  { %1175 = vmatprep.subr.bf16.mxu1 %v1268_v21  ;;  %v1320_v59 = vld [vmem:[%s1645_s0 + $0xc8] ss:$16 sps:$4 sm:$0xff]   ;;  %v1321_v60 = vld [vmem:[%s1645_s0 + $0xe4] ss:$16 sps:$4 sm:$0xff]   ;;  %v1323_v61 = vld [vmem:[%s1645_s0 + $0xec] ss:$16 sps:$4 sm:$0xff]  }
  0x17   :  { %v1325_v62 = vld [vmem:[%s1645_s0 + $0xe0] ss:$16 sps:$4 sm:$0xff]   ;;  %v1326_v63 = vld [vmem:[%s1645_s0 + $0xe8] ss:$16 sps:$4 sm:$0xff]   ;;  %v1327_v0 = vld [vmem:[%s1645_s0 + $0x104] ss:$16 sps:$4 sm:$0xff]  }
  0x18   :  { %1094 = vmatpush3.bf16.msra.mxu0 %v1269_v22  ;;  %v1329_v1 = vld [vmem:[%s1645_s0 + $0x10c] ss:$16 sps:$4 sm:$0xff]   ;;  %v1331_v2 = vld [vmem:[%s1645_s0 + $0x100] ss:$16 sps:$4 sm:$0xff]   ;;  %v1332_v3 = vld [vmem:[%s1645_s0 + $0x108] ss:$16 sps:$4 sm:$0xff]  }
  0x19   :  { %1176 = vmatpush3.bf16.msra.mxu1 %v1270_v23  ;;  %1095 = vmatprep.subr.bf16.mxu0 %v1271_v24  ;;  %v1333_v4 = vld [vmem:[%s1645_s0 + $0x124] ss:$16 sps:$4 sm:$0xff]   ;;  %v1335_v5 = vld [vmem:[%s1645_s0 + $0x12c] ss:$16 sps:$4 sm:$0xff]   ;;  %v1337_v8 = vld [vmem:[%s1645_s0 + $0x120] ss:$16 sps:$4 sm:$0xff]  }
  0x1a   :  { %1177 = vmatprep.subr.bf16.mxu1 %v1272_v25  ;;  %v55_v6 = vld [vmem:[%s1645_s0 + $0x140] sm:$0x11]  ;;  %v56_v7 = vld [vmem:[%s1645_s0 + $0x148] sm:$0x11] }
  0x1b   :  { %v1338_v9 = vld [vmem:[%s1645_s0 + $0x128] ss:$16 sps:$4 sm:$0xff]   ;;  %v947_v10 = vcombine.high %v55_v6, %v55_v6  ;;  %v949_v11 = vcombine.high %v56_v7, %v56_v7  ;;  %v946_v12 = vcombine.low %v55_v6, %v55_v6  ;;  %v948_v13 = vcombine.low %v56_v7, %v56_v7  ;;  %v1588_v16 = vld [vmem:[%s1646_s2] ss:$0 sm:$0xff] }
  0x1c   :  { %1096 = vmatpush3.bf16.msra.mxu0 %v1273_v26 }
  0x1d   :  { %1178 = vmatpush3.bf16.msra.mxu1 %v1274_v27  ;;  %1097 = vmatprep.subr.bf16.mxu0 %v1275_v28 }
  0x1e   :  { %1179 = vmatprep.subr.bf16.mxu1 %v1276_v29 }
  0x20   :  { %1098 = vmatpush3.bf16.msra.mxu0 %v1277_v30 }
  0x21   :  { %1180 = vmatpush3.bf16.msra.mxu1 %v1278_v31 }
  0x23   :  { %567 = vmatmul.mubr.bf16.vlgmr.msra.gmra.mxu0 %v1279_v32 }
  0x24   :  { %687 = vmatmul.mubr.bf16.vlgmr.msra.gmra.mxu1 %v1282_v34  ;;  %574 = vmatprep.mubr.bf16.mxu0 %v1285_v36 }
  0x25   :  { %694 = vmatprep.mubr.bf16.mxu1 %v1287_v37 }
  0x2b   :  { %575 = vmatmul.mubr.bf16.gmra.mxu0 %v1289_v38 }
  0x2c   :  { %695 = vmatmul.mubr.bf16.gmra.mxu1 %v1290_v39  ;;  %582 = vmatprep.mubr.bf16.mxu0 %v1291_v40 }
  0x2d   :  { %702 = vmatprep.mubr.bf16.mxu1 %v1293_v41 }
  0x33   :  { %583 = vmatmul.mubr.bf16.gmra.mxu0 %v1295_v42 }
  0x34   :  { %703 = vmatmul.mubr.bf16.gmra.mxu1 %v1296_v43  ;;  %590 = vmatprep.mubr.bf16.mxu0 %v1297_v44 }
  0x35   :  { %710 = vmatprep.mubr.bf16.mxu1 %v1299_v45 }
  0x3b   :  { %591 = vmatmul.mubr.bf16.gmra.mxu0 %v1301_v46 }
  0x3c   :  { %711 = vmatmul.mubr.bf16.gmra.mxu1 %v1302_v47  ;;  %598 = vmatprep.mubr.bf16.mxu0 %v1303_v48 }
  0x3d   :  { %718 = vmatprep.mubr.bf16.mxu1 %v1305_v49 }
  0x43   :  { %599 = vmatmul.mubr.bf16.gmra.mxu0 %v1307_v50 }
  0x44   :  { %719 = vmatmul.mubr.bf16.gmra.mxu1 %v1308_v51  ;;  %606 = vmatprep.mubr.bf16.mxu0 %v1309_v52 }
  0x45   :  { %726 = vmatprep.mubr.bf16.mxu1 %v1311_v53 }
  0x4b   :  { %607 = vmatmul.mubr.bf16.gmra.mxu0 %v1313_v54 }
  0x4c   :  { %727 = vmatmul.mubr.bf16.gmra.mxu1 %v1314_v55  ;;  %614 = vmatprep.mubr.bf16.mxu0 %v1315_v56 }
  0x4d   :  { %734 = vmatprep.mubr.bf16.mxu1 %v1317_v57 }
  0x53   :  { %615 = vmatmul.mubr.bf16.gmra.mxu0 %v1319_v58 }
  0x54   :  { %735 = vmatmul.mubr.bf16.gmra.mxu1 %v1320_v59  ;;  %622 = vmatprep.mubr.bf16.mxu0 %v1321_v60 }
  0x55   :  { %742 = vmatprep.mubr.bf16.mxu1 %v1323_v61 }
  0x5b   :  { %623 = vmatmul.mubr.bf16.gmra.mxu0 %v1325_v62 }
  0x5c   :  { %743 = vmatmul.mubr.bf16.gmra.mxu1 %v1326_v63  ;;  %630 = vmatprep.mubr.bf16.mxu0 %v1327_v0 }
  0x5d   :  { %750 = vmatprep.mubr.bf16.mxu1 %v1329_v1 }
  0x63   :  { %631 = vmatmul.mubr.bf16.gmra.mxu0 %v1331_v2 }
  0x64   :  { %751 = vmatmul.mubr.bf16.gmra.mxu1 %v1332_v3  ;;  %638 = vmatprep.mubr.bf16.mxu0 %v1333_v4 }
  0x65   :  { %758 = vmatprep.mubr.bf16.mxu1 %v1335_v5 }
  0x6b   :  { %639 = vmatmul.mubr.bf16.gmra.mxu0 %v1337_v8 }
  0x6c   :  { %759 = vmatmul.mubr.bf16.gmra.mxu1 %v1338_v9  ;;  %646 = vmatprep.mubr.bf16.mxu0 %v947_v10 }
  0x6d   :  { %766 = vmatprep.mubr.bf16.mxu1 %v949_v11 }
  0x73   :  { %647 = vmatmul.mubr.bf16.gmra.mxu0 %v946_v12 }
  0x74   :  { %767 = vmatmul.mubr.bf16.gmra.mxu1 %v948_v13 }
  0xe3   :  { %v1099_v14 = vpop.f32.mrf.mxu0 }
  0xe4   :  { %v1181_v15 = vpop.f32.mrf.mxu1 }
  0xe5   :  { %v1100_v17 = vpop.f32.mrf.mxu0 }
  0xe6   :  { %v1101_v18 = vadd.f32 %v1100_v17, %v1099_v14  ;;  %v1182_v19 = vpop.f32.mrf.mxu1 }
  0xe7   :  { %v1102_v20 = vpop.f32.mrf.mxu0  ;;  %v1183_v24 = vadd.f32 %v1182_v19, %v1181_v15 }
  0xe8   :  { %v569_v21 = vadd.f32 %v1101_v18, %v1588_v16  ;;  %v1184_v22 = vpop.f32.mrf.mxu1 }
  0xe9   :  { %v1103_v23 = vpop.f32.mrf.mxu0 }
  0xea   :  { %v1104_v25 = vadd.f32 %v1103_v23, %v1102_v20  ;;  %v1185_v26 = vpop.f32.mrf.mxu1  ;;  %v689_v28 = vadd.f32 %v1183_v24, %v569_v21 }
  0xeb   :  { %v1105_v27 = vpop.f32.mrf.mxu0  ;;  %v1186_v30 = vadd.f32 %v1185_v26, %v1184_v22 }
  0xec   :  { %v572_v29 = vadd.f32 %v1104_v25, %v1588_v16  ;;  %v1187_v31 = vpop.f32.mrf.mxu1  ;;  %v774_v37 = vmax.f32 %v689_v28, 0.0 }
  0xed   :  { %v1106_v32 = vpop.f32.mrf.mxu0 }
  0xee   :  { %v692_v33 = vadd.f32 %v1186_v30, %v572_v29  ;;  %v1107_v34 = vadd.f32 %v1106_v32, %v1105_v27  ;;  %v1188_v35 = vpop.f32.mrf.mxu1 }
  0xef   :  { %v1108_v36 = vpop.f32.mrf.mxu0  ;;  %v1189_v43 = vadd.f32 %v1188_v35, %v1187_v31 }
  0xf0   :  { %v775_v38 = vmax.f32 %v692_v33, 0.0  ;;  %v577_v39 = vadd.f32 %v1107_v34, %v1588_v16  ;;  %v1190_v40 = vpop.f32.mrf.mxu1 }
  0xf1   :  { %v1109_v41 = vpop.f32.mrf.mxu0 }
  0xf2   :  { %v1027_v42 = vpack.c.bf16 %v775_v38, %v774_v37  ;;  %v1110_v44 = vadd.f32 %v1109_v41, %v1108_v36  ;;  %v1191_v45 = vpop.f32.mrf.mxu1  ;;  %v697_v47 = vadd.f32 %v1189_v43, %v577_v39 }
  0xf3   :  { %v1111_v46 = vpop.f32.mrf.mxu0  ;;  %v1192_v49 = vadd.f32 %v1191_v45, %v1190_v40 }
  0xf4   :  { %1028 = vst [vmem:[%s1647_s3] sm:$0xff] %v1027_v42   ;;  %v580_v48 = vadd.f32 %v1110_v44, %v1588_v16  ;;  %v1193_v50 = vpop.f32.mrf.mxu1  ;;  %v776_v56 = vmax.f32 %v697_v47, 0.0 }
  0xf5   :  { %v1112_v51 = vpop.f32.mrf.mxu0 }
  0xf6   :  { %v700_v52 = vadd.f32 %v1192_v49, %v580_v48  ;;  %v1113_v53 = vadd.f32 %v1112_v51, %v1111_v46  ;;  %v1194_v54 = vpop.f32.mrf.mxu1 }
  0xf7   :  { %v1114_v55 = vpop.f32.mrf.mxu0  ;;  %v1195_v62 = vadd.f32 %v1194_v54, %v1193_v50 }
  0xf8   :  { %v777_v57 = vmax.f32 %v700_v52, 0.0  ;;  %v585_v58 = vadd.f32 %v1113_v53, %v1588_v16  ;;  %v1196_v59 = vpop.f32.mrf.mxu1 }
  0xf9   :  { %v1115_v60 = vpop.f32.mrf.mxu0 }
  0xfa   :  { %v1032_v61 = vpack.c.bf16 %v777_v57, %v776_v56  ;;  %v1116_v63 = vadd.f32 %v1115_v60, %v1114_v55  ;;  %v1197_v0 = vpop.f32.mrf.mxu1  ;;  %v705_v2 = vadd.f32 %v1195_v62, %v585_v58 }
  0xfb   :  { %v1117_v1 = vpop.f32.mrf.mxu0  ;;  %v1198_v4 = vadd.f32 %v1197_v0, %v1196_v59 }
  0xfc   :  { %1074 = vst [vmem:[%s1647_s3 + $0x8] sm:$0xff] %v1032_v61   ;;  %v588_v3 = vadd.f32 %v1116_v63, %v1588_v16  ;;  %v1199_v5 = vpop.f32.mrf.mxu1  ;;  %v778_v11 = vmax.f32 %v705_v2, 0.0 }
  0xfd   :  { %v1118_v6 = vpop.f32.mrf.mxu0 }
  0xfe   :  { %v708_v7 = vadd.f32 %v1198_v4, %v588_v3  ;;  %v1119_v8 = vadd.f32 %v1118_v6, %v1117_v1  ;;  %v1200_v9 = vpop.f32.mrf.mxu1 }
  0xff   :  { %v1120_v10 = vpop.f32.mrf.mxu0  ;;  %v1201_v18 = vadd.f32 %v1200_v9, %v1199_v5 }
 0x100   :  { %v779_v12 = vmax.f32 %v708_v7, 0.0  ;;  %v593_v13 = vadd.f32 %v1119_v8, %v1588_v16  ;;  %v1202_v14 = vpop.f32.mrf.mxu1 }
 0x101   :  { %v1121_v15 = vpop.f32.mrf.mxu0 }
 0x102   :  { %v1037_v17 = vpack.c.bf16 %v779_v12, %v778_v11  ;;  %v1122_v19 = vadd.f32 %v1121_v15, %v1120_v10  ;;  %v1203_v20 = vpop.f32.mrf.mxu1  ;;  %v713_v22 = vadd.f32 %v1201_v18, %v593_v13 }
 0x103   :  { %v1123_v21 = vpop.f32.mrf.mxu0  ;;  %v1204_v24 = vadd.f32 %v1203_v20, %v1202_v14 }
 0x104   :  { %1075 = vst [vmem:[%s1647_s3 + $0x10] sm:$0xff] %v1037_v17   ;;  %v596_v23 = vadd.f32 %v1122_v19, %v1588_v16  ;;  %v1205_v25 = vpop.f32.mrf.mxu1  ;;  %v780_v31 = vmax.f32 %v713_v22, 0.0 }
 0x105   :  { %v1124_v26 = vpop.f32.mrf.mxu0 }
 0x106   :  { %v716_v27 = vadd.f32 %v1204_v24, %v596_v23  ;;  %v1125_v28 = vadd.f32 %v1124_v26, %v1123_v21  ;;  %v1206_v29 = vpop.f32.mrf.mxu1 }
 0x107   :  { %v1126_v30 = vpop.f32.mrf.mxu0  ;;  %v1207_v37 = vadd.f32 %v1206_v29, %v1205_v25 }
 0x108   :  { %v781_v32 = vmax.f32 %v716_v27, 0.0  ;;  %v601_v33 = vadd.f32 %v1125_v28, %v1588_v16  ;;  %v1208_v34 = vpop.f32.mrf.mxu1 }
 0x109   :  { %v1127_v35 = vpop.f32.mrf.mxu0 }
 0x10a   :  { %v1042_v36 = vpack.c.bf16 %v781_v32, %v780_v31  ;;  %v1128_v38 = vadd.f32 %v1127_v35, %v1126_v30  ;;  %v1209_v39 = vpop.f32.mrf.mxu1  ;;  %v721_v41 = vadd.f32 %v1207_v37, %v601_v33 }
 0x10b   :  { %v1129_v40 = vpop.f32.mrf.mxu0  ;;  %v1210_v43 = vadd.f32 %v1209_v39, %v1208_v34 }
 0x10c   :  { %1076 = vst [vmem:[%s1647_s3 + $0x18] sm:$0xff] %v1042_v36   ;;  %v604_v42 = vadd.f32 %v1128_v38, %v1588_v16  ;;  %v1211_v44 = vpop.f32.mrf.mxu1  ;;  %v782_v50 = vmax.f32 %v721_v41, 0.0 }
 0x10d   :  { %v1130_v45 = vpop.f32.mrf.mxu0 }
 0x10e   :  { %v724_v46 = vadd.f32 %v1210_v43, %v604_v42  ;;  %v1131_v47 = vadd.f32 %v1130_v45, %v1129_v40  ;;  %v1212_v48 = vpop.f32.mrf.mxu1 }
 0x10f   :  { %v1132_v49 = vpop.f32.mrf.mxu0  ;;  %v1213_v56 = vadd.f32 %v1212_v48, %v1211_v44 }
 0x110   :  { %v783_v51 = vmax.f32 %v724_v46, 0.0  ;;  %v609_v52 = vadd.f32 %v1131_v47, %v1588_v16  ;;  %v1214_v53 = vpop.f32.mrf.mxu1 }
 0x111   :  { %v1133_v54 = vpop.f32.mrf.mxu0 }
 0x112   :  { %v1047_v55 = vpack.c.bf16 %v783_v51, %v782_v50  ;;  %v1134_v57 = vadd.f32 %v1133_v54, %v1132_v49  ;;  %v1215_v58 = vpop.f32.mrf.mxu1  ;;  %v729_v60 = vadd.f32 %v1213_v56, %v609_v52 }
 0x113   :  { %v1135_v59 = vpop.f32.mrf.mxu0  ;;  %v1216_v62 = vadd.f32 %v1215_v58, %v1214_v53 }
 0x114   :  { %1077 = vst [vmem:[%s1647_s3 + $0x20] sm:$0xff] %v1047_v55   ;;  %v612_v61 = vadd.f32 %v1134_v57, %v1588_v16  ;;  %v1217_v63 = vpop.f32.mrf.mxu1  ;;  %v784_v5 = vmax.f32 %v729_v60, 0.0 }
 0x115   :  { %v1136_v0 = vpop.f32.mrf.mxu0 }
 0x116   :  { %v732_v1 = vadd.f32 %v1216_v62, %v612_v61  ;;  %v1137_v2 = vadd.f32 %v1136_v0, %v1135_v59  ;;  %v1218_v3 = vpop.f32.mrf.mxu1 }
 0x117   :  { %v1138_v4 = vpop.f32.mrf.mxu0  ;;  %v1219_v11 = vadd.f32 %v1218_v3, %v1217_v63 }
 0x118   :  { %v785_v6 = vmax.f32 %v732_v1, 0.0  ;;  %v617_v7 = vadd.f32 %v1137_v2, %v1588_v16  ;;  %v1220_v8 = vpop.f32.mrf.mxu1 }
 0x119   :  { %v1139_v9 = vpop.f32.mrf.mxu0 }
 0x11a   :  { %v1052_v10 = vpack.c.bf16 %v785_v6, %v784_v5  ;;  %v1140_v12 = vadd.f32 %v1139_v9, %v1138_v4  ;;  %v1221_v13 = vpop.f32.mrf.mxu1  ;;  %v737_v15 = vadd.f32 %v1219_v11, %v617_v7 }
 0x11b   :  { %v1141_v14 = vpop.f32.mrf.mxu0  ;;  %v1222_v18 = vadd.f32 %v1221_v13, %v1220_v8 }
 0x11c   :  { %1078 = vst [vmem:[%s1647_s3 + $0x28] sm:$0xff] %v1052_v10   ;;  %v620_v17 = vadd.f32 %v1140_v12, %v1588_v16  ;;  %v1223_v19 = vpop.f32.mrf.mxu1  ;;  %v786_v25 = vmax.f32 %v737_v15, 0.0 }
 0x11d   :  { %v1142_v20 = vpop.f32.mrf.mxu0 }
 0x11e   :  { %v740_v21 = vadd.f32 %v1222_v18, %v620_v17  ;;  %v1143_v22 = vadd.f32 %v1142_v20, %v1141_v14  ;;  %v1224_v23 = vpop.f32.mrf.mxu1 }
 0x11f   :  { %v1144_v24 = vpop.f32.mrf.mxu0  ;;  %v1225_v31 = vadd.f32 %v1224_v23, %v1223_v19 }
 0x120   :  { %v787_v26 = vmax.f32 %v740_v21, 0.0  ;;  %v625_v27 = vadd.f32 %v1143_v22, %v1588_v16  ;;  %v1226_v28 = vpop.f32.mrf.mxu1 }
 0x121   :  { %v1145_v29 = vpop.f32.mrf.mxu0 }
 0x122   :  { %v1057_v30 = vpack.c.bf16 %v787_v26, %v786_v25  ;;  %v1146_v32 = vadd.f32 %v1145_v29, %v1144_v24  ;;  %v1227_v33 = vpop.f32.mrf.mxu1  ;;  %v745_v35 = vadd.f32 %v1225_v31, %v625_v27 }
 0x123   :  { %v1147_v34 = vpop.f32.mrf.mxu0  ;;  %v1228_v37 = vadd.f32 %v1227_v33, %v1226_v28 }
 0x124   :  { %1079 = vst [vmem:[%s1647_s3 + $0x30] sm:$0xff] %v1057_v30   ;;  %v628_v36 = vadd.f32 %v1146_v32, %v1588_v16  ;;  %v1229_v38 = vpop.f32.mrf.mxu1  ;;  %v788_v44 = vmax.f32 %v745_v35, 0.0 }
 0x125   :  { %v1148_v39 = vpop.f32.mrf.mxu0 }
 0x126   :  { %v748_v40 = vadd.f32 %v1228_v37, %v628_v36  ;;  %v1149_v41 = vadd.f32 %v1148_v39, %v1147_v34  ;;  %v1230_v42 = vpop.f32.mrf.mxu1 }
 0x127   :  { %v1150_v43 = vpop.f32.mrf.mxu0  ;;  %v1231_v50 = vadd.f32 %v1230_v42, %v1229_v38 }
 0x128   :  { %v789_v45 = vmax.f32 %v748_v40, 0.0  ;;  %v633_v46 = vadd.f32 %v1149_v41, %v1588_v16  ;;  %v1232_v47 = vpop.f32.mrf.mxu1 }
 0x129   :  { %v1151_v48 = vpop.f32.mrf.mxu0 }
 0x12a   :  { %v1062_v49 = vpack.c.bf16 %v789_v45, %v788_v44  ;;  %v1152_v51 = vadd.f32 %v1151_v48, %v1150_v43  ;;  %v1233_v52 = vpop.f32.mrf.mxu1  ;;  %v753_v54 = vadd.f32 %v1231_v50, %v633_v46 }
 0x12b   :  { %v1153_v53 = vpop.f32.mrf.mxu0  ;;  %v1234_v56 = vadd.f32 %v1233_v52, %v1232_v47 }
 0x12c   :  { %1080 = vst [vmem:[%s1647_s3 + $0x38] sm:$0xff] %v1062_v49   ;;  %v636_v55 = vadd.f32 %v1152_v51, %v1588_v16  ;;  %v1235_v57 = vpop.f32.mrf.mxu1  ;;  %v790_v63 = vmax.f32 %v753_v54, 0.0 }
 0x12d   :  { %v1154_v58 = vpop.f32.mrf.mxu0 }
 0x12e   :  { %v756_v59 = vadd.f32 %v1234_v56, %v636_v55  ;;  %v1155_v60 = vadd.f32 %v1154_v58, %v1153_v53  ;;  %v1236_v61 = vpop.f32.mrf.mxu1 }
 0x12f   :  { %v1156_v62 = vpop.f32.mrf.mxu0  ;;  %v1237_v5 = vadd.f32 %v1236_v61, %v1235_v57 }
 0x130   :  { %v791_v0 = vmax.f32 %v756_v59, 0.0  ;;  %v641_v1 = vadd.f32 %v1155_v60, %v1588_v16  ;;  %v1238_v2 = vpop.f32.mrf.mxu1 }
 0x131   :  { %v1157_v3 = vpop.f32.mrf.mxu0 }
 0x132   :  { %v1067_v4 = vpack.c.bf16 %v791_v0, %v790_v63  ;;  %v1158_v6 = vadd.f32 %v1157_v3, %v1156_v62  ;;  %v1239_v7 = vpop.f32.mrf.mxu1  ;;  %v761_v9 = vadd.f32 %v1237_v5, %v641_v1 }
 0x133   :  { %v1159_v8 = vpop.f32.mrf.mxu0  ;;  %v1240_v11 = vadd.f32 %v1239_v7, %v1238_v2 }
 0x134   :  { %1081 = vst [vmem:[%s1647_s3 + $0x40] sm:$0xff] %v1067_v4   ;;  %v644_v10 = vadd.f32 %v1158_v6, %v1588_v16  ;;  %v1241_v12 = vpop.f32.mrf.mxu1  ;;  %v792_v19 = vmax.f32 %v761_v9, 0.0 }
 0x135   :  { %v1160_v13 = vpop.f32.mrf.mxu0 }
 0x136   :  { %v764_v14 = vadd.f32 %v1240_v11, %v644_v10  ;;  %v1161_v15 = vadd.f32 %v1160_v13, %v1159_v8  ;;  %v1242_v17 = vpop.f32.mrf.mxu1 }
 0x137   :  { %v1162_v18 = vpop.f32.mrf.mxu0  ;;  %v1243_v22 = vadd.f32 %v1242_v17, %v1241_v12 }
 0x138   :  { %v793_v20 = vmax.f32 %v764_v14, 0.0  ;;  %v649_v21 = vadd.f32 %v1161_v15, %v1588_v16  ;;  %v1244_v23 = vpop.f32.mrf.mxu1 }
 0x139   :  { %v1163_v24 = vpop.f32.mrf.mxu0 }
 0x13a   :  { %v1072_v25 = vpack.c.bf16 %v793_v20, %v792_v19  ;;  %v769_v26 = vadd.f32 %v1243_v22, %v649_v21  ;;  %v1245_v27 = vpop.f32.mrf.mxu1 }
 0x13c   :  { %1082 = vst [vmem:[%s1647_s3 + $0x48] sm:$0xff] %v1072_v25   ;;  %v794_v28 = vmax.f32 %v769_v26, 0.0 }
 0x13e   :  { %v1023_v29 = vpack.c.bf16 %v794_v28, %v794_v28 }
 0x140   :  { %900 = vst [vmem:[%s1647_s3 + $0x50] sm:$0x1] %v1023_v29 }

// kernel: dqn_forward.6
= control target key start
LH: loop header
LB: loop body
LE: loop exit
PB: predicated region body
PF: predicated region fallthrough
CT: control target
= control target key end

     0   :  { %vm2160_vm0 = vmmov 0   ;;  %s2806_s1 = inlined_call_operand.vmem [shape: bf16[1152,128], index: 1, kind: input, shape index: {}]   ;;  %s2807_s0 = inlined_call_operand.vmem [shape: bf16[98,1152], index: 0, kind: input, shape index: {}]   ;;  %s2808_s2 = inlined_call_operand.vmem [shape: f32[1,128], index: 2, kind: input, shape index: {}]   ;;  %s2809_s3 = inlined_call_operand.vmem [shape: bf16[98,128], index: 3, kind: output, shape index: {}]  }
   0x1   :  { %v2000_v0 = vld [vmem:[%s2806_s1 + $0x78] sm:$0xff]   ;;  %v2002_v2 = vld [vmem:[%s2806_s1 + $0x70] sm:$0xff]   ;;  %v2004_v4 = vld [vmem:[%s2806_s1 + $0x68] sm:$0xff]  }
   0x2   :  { %v2001_v1 = vld [vmem:[%s2806_s1 + $0x38] sm:$0xff]   ;;  %1982 = vmatprep.subr.bf16.mxu1 %v2000_v0  ;;  %1691 = vmatprep.subr.bf16.mxu0 %v2000_v0  ;;  %v2003_v3 = vld [vmem:[%s2806_s1 + $0x30] sm:$0xff]   ;;  %v2005_v5 = vld [vmem:[%s2806_s1 + $0x28] sm:$0xff]  }
   0x3   :  { %1990 = vmatpush3.bf16.msra.mxu1 %v2001_v1  ;;  %1692 = vmatpush3.bf16.msra.mxu0 %v2001_v1  ;;  %v2006_v6 = vld [vmem:[%s2806_s1 + $0x60] sm:$0xff]   ;;  %v2008_v8 = vld [vmem:[%s2806_s1 + $0x58] sm:$0xff]   ;;  %v2010_v10 = vld [vmem:[%s2806_s1 + $0x50] sm:$0xff]  }
   0x4   :  { %1983 = vmatprep.subr.bf16.mxu1 %v2002_v2  ;;  %1693 = vmatprep.subr.bf16.mxu0 %v2002_v2  ;;  %v2007_v7 = vld [vmem:[%s2806_s1 + $0x20] sm:$0xff]   ;;  %v2009_v9 = vld [vmem:[%s2806_s1 + $0x18] sm:$0xff]   ;;  %v2011_v13 = vld [vmem:[%s2806_s1 + $0x10] sm:$0xff]  }
   0x5   :  { %v2018_v11 = vld [vmem:[%s2807_s0 + $0x124] ss:$36 sps:$4 sm:$0xff]   ;;  %v2022_v20 = vld [vmem:[%s2806_s1 + $0xf8] sm:$0xff]   ;;  %v2026_v24 = vld [vmem:[%s2806_s1 + $0xf0] sm:$0xff]  }
   0x6   :  { %v2021_v12 = vld [vmem:[%s2807_s0 + $0x4] ss:$36 sps:$4 sm:$0xff]   ;;  %1035 = vmatprep.mubr.bf16.mxu1 %v2018_v11  ;;  %v2024_v21 = vld [vmem:[%s2806_s1 + $0x178] sm:$0xff]   ;;  %v2028_v25 = vld [vmem:[%s2806_s1 + $0x170] sm:$0xff]  }
   0x7   :  { %1991 = vmatpush3.bf16.msra.mxu1 %v2003_v3  ;;  %1694 = vmatpush3.bf16.msra.mxu0 %v2003_v3  ;;  %v2012_v14 = vld [vmem:[%s2806_s1 + $0x48] sm:$0xff]   ;;  %v2014_v16 = vld [vmem:[%s2806_s1 + $0x40] sm:$0xff]   ;;  %v2023_v22 = vld [vmem:[%s2806_s1 + $0xb8] sm:$0xff]  }
   0x8   :  { %1984 = vmatprep.subr.bf16.mxu1 %v2004_v4  ;;  %1695 = vmatprep.subr.bf16.mxu0 %v2004_v4  ;;  %v2013_v15 = vld [vmem:[%s2806_s1 + $0x8] sm:$0xff]   ;;  %v2015_v17 = vld [vmem:[%s2806_s1] sm:$0xff]   ;;  %v2025_v23 = vld [vmem:[%s2806_s1 + $0x138] sm:$0xff]  }
   0x9   :  { %1003 = vmatprep.mubr.bf16.mxu0 %v2021_v12  ;;  %v2016_v18 = vld [vmem:[%s2807_s0 + $0x120] ss:$36 sps:$4 sm:$0xff]   ;;  %v2030_v26 = vld [vmem:[%s2807_s0 + $0x4c] ss:$36 sps:$4 sm:$0xff]   ;;  %v2044_v39 = vld [vmem:[%s2807_s0 + $0x94] ss:$36 sps:$4 sm:$0xff]  }
   0xa   :  { %v2019_v19 = vld [vmem:[%s2807_s0] ss:$36 sps:$4 sm:$0xff]   ;;  %v2027_v27 = vld [vmem:[%s2806_s1 + $0xb0] sm:$0xff]   ;;  %v2032_v30 = vld [vmem:[%s2806_s1 + $0xe8] sm:$0xff]  }
   0xb   :  { %1992 = vmatpush3.bf16.msra.mxu1 %v2005_v5  ;;  %1696 = vmatpush3.bf16.msra.mxu0 %v2005_v5  ;;  %v2036_v28 = vld [vmem:[%s2807_s0 + $0x16c] ss:$36 sps:$4 sm:$0xff]   ;;  %v2040_v36 = vld [vmem:[%s2806_s1 + $0xe0] sm:$0xff]   ;;  %v2046_v43 = vld [vmem:[%s2806_s1 + $0xd8] sm:$0xff]  }
   0xc   :  { %1985 = vmatprep.subr.bf16.mxu1 %v2006_v6  ;;  %1697 = vmatprep.subr.bf16.mxu0 %v2006_v6  ;;  %v2029_v29 = vld [vmem:[%s2806_s1 + $0x130] sm:$0xff]   ;;  %v2033_v31 = vld [vmem:[%s2807_s0 + $0x48] ss:$36 sps:$4 sm:$0xff]   ;;  %v2042_v37 = vld [vmem:[%s2806_s1 + $0x160] sm:$0xff]  }
   0xd   :  { %v2035_v32 = vld [vmem:[%s2806_s1 + $0x168] sm:$0xff]   ;;  %v2041_v38 = vld [vmem:[%s2806_s1 + $0xa0] sm:$0xff]   ;;  %v75_v40 = vld [vmem:[%s2807_s0 + $0x1b0] sm:$0x11] }
   0xe   :  { %v2034_v33 = vld [vmem:[%s2806_s1 + $0xa8] sm:$0xff]   ;;  %v2043_v41 = vld [vmem:[%s2806_s1 + $0x120] sm:$0xff]   ;;  %v1550_v42 = vcombine.high %v75_v40, %v75_v40  ;;  %v2047_v44 = vld [vmem:[%s2807_s0 + $0x90] ss:$36 sps:$4 sm:$0xff]   ;;  %v1549_v48 = vcombine.low %v75_v40, %v75_v40 }
   0xf   :  { %1993 = vmatpush3.bf16.msra.mxu1 %v2007_v7  ;;  %1698 = vmatpush3.bf16.msra.mxu0 %v2007_v7  ;;  %v2039_v34 = vld [vmem:[%s2807_s0 + $0x168] ss:$36 sps:$4 sm:$0xff]   ;;  %v2049_v45 = vld [vmem:[%s2806_s1 + $0x158] sm:$0xff]   ;;  %v2053_v49 = vld [vmem:[%s2806_s1 + $0xd0] sm:$0xff]   ;;  %v2159_v7 = vmov 0.0  }
  0x10   :  { %1986 = vmatprep.subr.bf16.mxu1 %v2008_v8  ;;  %1699 = vmatprep.subr.bf16.mxu0 %v2008_v8  ;;  %v2038_v35 = vld [vmem:[%s2806_s1 + $0x128] sm:$0xff]   ;;  %v2048_v46 = vld [vmem:[%s2806_s1 + $0x98] sm:$0xff]   ;;  %v2055_v50 = vld [vmem:[%s2806_s1 + $0x150] sm:$0xff]  }
  0x11   :  { %v2051_v47 = vld [vmem:[%s2806_s1 + $0x118] sm:$0xff]   ;;  %v2054_v51 = vld [vmem:[%s2806_s1 + $0x90] sm:$0xff]   ;;  %v2059_v54 = vld [vmem:[%s2806_s1 + $0xc8] sm:$0xff]  }
  0x12   :  { %v2057_v52 = vld [vmem:[%s2807_s0 + $0xdc] ss:$36 sps:$4 sm:$0xff]   ;;  %v2056_v53 = vld [vmem:[%s2806_s1 + $0x110] sm:$0xff]   ;;  %v2062_v56 = vld [vmem:[%s2806_s1 + $0x148] sm:$0xff]  }
  0x13   :  { %1994 = vmatpush3.bf16.msra.mxu1 %v2009_v9  ;;  %1700 = vmatpush3.bf16.msra.mxu0 %v2009_v9  ;;  %v2060_v55 = vld [vmem:[%s2807_s0 + $0xd8] ss:$36 sps:$4 sm:$0xff]   ;;  %v2061_v57 = vld [vmem:[%s2806_s1 + $0x88] sm:$0xff]   ;;  %v2064_v59 = vld [vmem:[%s2806_s1 + $0xc0] sm:$0xff]  }
  0x14   :  { %1987 = vmatprep.subr.bf16.mxu1 %v2010_v10  ;;  %1701 = vmatprep.subr.bf16.mxu0 %v2010_v10  ;;  %v2063_v58 = vld [vmem:[%s2806_s1 + $0x108] sm:$0xff]   ;;  %v2066_v60 = vld [vmem:[%s2806_s1 + $0x140] sm:$0xff]   ;;  %v2073_v63 = vld [vmem:[%s2807_s0 + $0x14] ss:$36 sps:$4 sm:$0xff]  }
  0x15   :  { %v2070_v61 = vld [vmem:[%s2807_s0 + $0xc] ss:$36 sps:$4 sm:$0xff]   ;;  %v2065_v62 = vld [vmem:[%s2806_s1 + $0x80] sm:$0xff]   ;;  %v2074_v3 = vld [vmem:[%s2806_s1 + $0x1f8] sm:$0xff]  }
  0x16   :  { %v2067_v0 = vld [vmem:[%s2806_s1 + $0x100] sm:$0xff]   ;;  %v2068_v1 = vld [vmem:[%s2807_s0 + $0x8] ss:$36 sps:$4 sm:$0xff]   ;;  %v2071_v2 = vld [vmem:[%s2807_s0 + $0x10] ss:$36 sps:$4 sm:$0xff]  }
  0x17   :  { %1995 = vmatpush3.bf16.msra.mxu1 %v2011_v13  ;;  %1702 = vmatpush3.bf16.msra.mxu0 %v2011_v13  ;;  %v2075_v4 = vld [vmem:[%s2806_s1 + $0x1b8] sm:$0xff]   ;;  %v2078_v6 = vld [vmem:[%s2806_s1 + $0x1f0] sm:$0xff]   ;;  %v2085_v11 = vld [vmem:[%s2806_s1 + $0x1e8] sm:$0xff]  }
  0x18   :  { %1988 = vmatprep.subr.bf16.mxu1 %v2012_v14  ;;  %1703 = vmatprep.subr.bf16.mxu0 %v2012_v14  ;;  %v2076_v5 = vld [vmem:[%s2807_s0 + $0x54] ss:$36 sps:$4 sm:$0xff]   ;;  %v2081_v9 = vld [vmem:[%s2807_s0 + $0x5c] ss:$36 sps:$4 sm:$0xff]  }
  0x19   :  { %v2079_v8 = vld [vmem:[%s2806_s1 + $0x238] sm:$0xff]   ;;  %v2083_v10 = vld [vmem:[%s2806_s1 + $0x1b0] sm:$0xff]  }
  0x1a   :  { %v2086_v12 = vld [vmem:[%s2806_s1 + $0x230] sm:$0xff]   ;;  %v2084_v14 = vld [vmem:[%s2807_s0 + $0x58] ss:$36 sps:$4 sm:$0xff]  }
  0x1b   :  { %1996 = vmatpush3.bf16.msra.mxu1 %v2013_v15  ;;  %1704 = vmatpush3.bf16.msra.mxu0 %v2013_v15  ;;  %v2080_v13 = vld [vmem:[%s2807_s0 + $0x50] ss:$36 sps:$4 sm:$0xff]   ;;  %v2087_v15 = vld [vmem:[%s2807_s0 + $0x9c] ss:$36 sps:$4 sm:$0xff]  }
  0x1c   :  { %1989 = vmatprep.subr.bf16.mxu1 %v2014_v16  ;;  %1705 = vmatprep.subr.bf16.mxu0 %v2014_v16  ;;  %v2089_v16 = vld [vmem:[%s2806_s1 + $0x1a8] sm:$0xff]   ;;  %v2115_v40 = vld [vmem:[%s2807_s0 + $0x174] ss:$36 sps:$4 sm:$0xff]  }
  0x1f   :  { %1997 = vmatpush3.bf16.msra.mxu1 %v2015_v17  ;;  %1706 = vmatpush3.bf16.msra.mxu0 %v2015_v17  ;;  %v2091_v17 = vld [vmem:[%s2807_s0 + $0xa4] ss:$36 sps:$4 sm:$0xff]  }
  0x20   :  { %1749 = vmatprep.subr.bf16.mxu1 %v2022_v20  ;;  %1807 = vmatprep.subr.bf16.mxu0 %v2024_v21  ;;  %v2096_v20 = vld [vmem:[%s2806_s1 + $0x1a0] sm:$0xff]   ;;  %v2090_v21 = vld [vmem:[%s2807_s0 + $0x98] ss:$36 sps:$4 sm:$0xff]  }
  0x22   :  { %1036 = vmatmul.mubr.bf16.vlgmr.msra.gmra.mxu1 %v2016_v18  ;;  %1004 = vmatmul.mubr.bf16.vlgmr.msra.gmra.mxu0 %v2019_v19  ;;  %v2094_v18 = vld [vmem:[%s2806_s1 + $0x1e0] sm:$0xff]   ;;  %v2095_v19 = vld [vmem:[%s2806_s1 + $0x228] sm:$0xff]  }
  0x23   :  { %1750 = vmatpush3.bf16.msra.mxu1 %v2023_v22  ;;  %1808 = vmatpush3.bf16.msra.mxu0 %v2025_v23  ;;  %v2093_v22 = vld [vmem:[%s2807_s0 + $0xa0] ss:$36 sps:$4 sm:$0xff]  }
  0x24   :  { %1751 = vmatprep.subr.bf16.mxu1 %v2026_v24  ;;  %1809 = vmatprep.subr.bf16.mxu0 %v2028_v25  ;;  %v2097_v23 = vld [vmem:[%s2807_s0 + $0xe4] ss:$36 sps:$4 sm:$0xff]   ;;  %v2100_v24 = vld [vmem:[%s2807_s0 + $0xec] ss:$36 sps:$4 sm:$0xff]   ;;  %v2103_v25 = vld [vmem:[%s2806_s1 + $0x1d8] sm:$0xff]  }
  0x25   :  { %1011 = vmatprep.mubr.bf16.mxu0 %v2030_v26  ;;  %1043 = vmatprep.mubr.bf16.mxu1 %v2036_v28  ;;  %v2104_v26 = vld [vmem:[%s2806_s1 + $0x220] sm:$0xff]  }
  0x26   :  { %v2099_v28 = vld [vmem:[%s2807_s0 + $0xe0] ss:$36 sps:$4 sm:$0xff]  }
  0x27   :  { %1752 = vmatpush3.bf16.msra.mxu1 %v2027_v27  ;;  %1810 = vmatpush3.bf16.msra.mxu0 %v2029_v29  ;;  %v2105_v27 = vld [vmem:[%s2806_s1 + $0x198] sm:$0xff]   ;;  %v2102_v29 = vld [vmem:[%s2807_s0 + $0xe8] ss:$36 sps:$4 sm:$0xff]  }
  0x28   :  { %1753 = vmatprep.subr.bf16.mxu1 %v2032_v30  ;;  %1811 = vmatprep.subr.bf16.mxu0 %v2035_v32  ;;  %v2112_v30 = vld [vmem:[%s2806_s1 + $0x1d0] sm:$0xff]  }
  0x29   :  { %v2114_v32 = vld [vmem:[%s2806_s1 + $0x190] sm:$0xff]  }
  0x2a   :  { %1012 = vmatmul.mubr.bf16.gmra.mxu0 %v2033_v31  ;;  %1044 = vmatmul.mubr.bf16.gmra.mxu1 %v2039_v34  ;;  %v2113_v31 = vld [vmem:[%s2806_s1 + $0x218] sm:$0xff]  }
  0x2b   :  { %1754 = vmatpush3.bf16.msra.mxu1 %v2034_v33  ;;  %1812 = vmatpush3.bf16.msra.mxu0 %v2038_v35  ;;  %v2106_v33 = vld [vmem:[%s2807_s0 + $0x12c] ss:$36 sps:$4 sm:$0xff]   ;;  %v2109_v34 = vld [vmem:[%s2807_s0 + $0x134] ss:$36 sps:$4 sm:$0xff]  }
  0x2c   :  { %1755 = vmatprep.subr.bf16.mxu1 %v2040_v36  ;;  %1813 = vmatprep.subr.bf16.mxu0 %v2042_v37  ;;  %v2121_v35 = vld [vmem:[%s2806_s1 + $0x1c8] sm:$0xff]   ;;  %v2122_v36 = vld [vmem:[%s2806_s1 + $0x210] sm:$0xff]  }
  0x2d   :  { %1019 = vmatprep.mubr.bf16.mxu0 %v2044_v39  ;;  %1051 = vmatprep.mubr.bf16.mxu1 %v1550_v42  ;;  %v2108_v37 = vld [vmem:[%s2807_s0 + $0x128] ss:$36 sps:$4 sm:$0xff]  }
  0x2e   :  { %v2123_v39 = vld [vmem:[%s2806_s1 + $0x188] sm:$0xff]  }
  0x2f   :  { %1756 = vmatpush3.bf16.msra.mxu1 %v2041_v38  ;;  %1814 = vmatpush3.bf16.msra.mxu0 %v2043_v41  ;;  %v2111_v38 = vld [vmem:[%s2807_s0 + $0x130] ss:$36 sps:$4 sm:$0xff]   ;;  %v2128_v41 = vld [vmem:[%s2806_s1 + $0x1c0] sm:$0xff]   ;;  %v2129_v42 = vld [vmem:[%s2806_s1 + $0x208] sm:$0xff]  }
  0x30   :  { %1757 = vmatprep.subr.bf16.mxu1 %v2046_v43  ;;  %1815 = vmatprep.subr.bf16.mxu0 %v2049_v45  ;;  %v2118_v43 = vld [vmem:[%s2807_s0 + $0x17c] ss:$36 sps:$4 sm:$0xff]  }
  0x31   :  { %v2131_v45 = vld [vmem:[%s2806_s1 + $0x200] sm:$0xff]  }
  0x32   :  { %1020 = vmatmul.mubr.bf16.gmra.mxu0 %v2047_v44  ;;  %1052 = vmatmul.mubr.bf16.gmra.mxu1 %v1549_v48  ;;  %v2130_v44 = vld [vmem:[%s2806_s1 + $0x180] sm:$0xff]   ;;  %v2117_v48 = vld [vmem:[%s2807_s0 + $0x170] ss:$36 sps:$4 sm:$0xff]  }
  0x33   :  { %1758 = vmatpush3.bf16.msra.mxu1 %v2048_v46  ;;  %1816 = vmatpush3.bf16.msra.mxu0 %v2051_v47  ;;  %v76_v46 = vld [vmem:[%s2807_s0 + $0x1b8] sm:$0x11]  ;;  %v77_v47 = vld [vmem:[%s2807_s0 + $0x1c0] sm:$0x11] }
  0x34   :  { %1759 = vmatprep.subr.bf16.mxu1 %v2053_v49  ;;  %1817 = vmatprep.subr.bf16.mxu0 %v2055_v50  ;;  %v2120_v49 = vld [vmem:[%s2807_s0 + $0x178] ss:$36 sps:$4 sm:$0xff]   ;;  %v1552_v50 = vcombine.high %v76_v46, %v76_v46 }
  0x35   :  { %1027 = vmatprep.mubr.bf16.mxu0 %v2057_v52  ;;  %1091 = vmatprep.mubr.bf16.mxu1 %v2070_v61  ;;  %v1551_v52 = vcombine.low %v76_v46, %v76_v46  ;;  %v2142_v61 = vld [vmem:[%s2807_s0 + $0xa8] ss:$36 sps:$4 sm:$0xff]  }
  0x37   :  { %1760 = vmatpush3.bf16.msra.mxu1 %v2054_v51  ;;  %1818 = vmatpush3.bf16.msra.mxu0 %v2056_v53  ;;  %v1554_v51 = vcombine.high %v77_v47, %v77_v47  ;;  %v1553_v53 = vcombine.low %v77_v47, %v77_v47 }
  0x38   :  { %1761 = vmatprep.subr.bf16.mxu1 %v2059_v54  ;;  %1819 = vmatprep.subr.bf16.mxu0 %v2062_v56  ;;  %v2134_v54 = vld [vmem:[%s2807_s0 + $0x1c] ss:$36 sps:$4 sm:$0xff]  }
  0x39   :  { %v2135_v56 = vld [vmem:[%s2807_s0 + $0x20] ss:$36 sps:$4 sm:$0xff]  }
  0x3a   :  { %1028 = vmatmul.mubr.bf16.gmra.mxu0 %v2060_v55  ;;  %v2132_v55 = vld [vmem:[%s2807_s0 + $0x18] ss:$36 sps:$4 sm:$0xff]  }
  0x3b   :  { %1762 = vmatpush3.bf16.msra.mxu1 %v2061_v57  ;;  %1820 = vmatpush3.bf16.msra.mxu0 %v2063_v58  ;;  %v2136_v57 = vld [vmem:[%s2807_s0 + $0x64] ss:$36 sps:$4 sm:$0xff]  }
  0x3c   :  { %1763 = vmatprep.subr.bf16.mxu1 %v2064_v59  ;;  %1821 = vmatprep.subr.bf16.mxu0 %v2066_v60  ;;  %v2138_v58 = vld [vmem:[%s2807_s0 + $0x60] ss:$36 sps:$4 sm:$0xff]   ;;  %v2139_v59 = vld [vmem:[%s2807_s0 + $0x68] ss:$36 sps:$4 sm:$0xff]  }
  0x3d   :  { %1179 = vmatprep.mubr.bf16.mxu0 %v2073_v63  ;;  %v2140_v60 = vld [vmem:[%s2807_s0 + $0xac] ss:$36 sps:$4 sm:$0xff]   ;;  %v2144_v63 = vld [vmem:[%s2807_s0 + $0xf4] ss:$36 sps:$4 sm:$0xff]  }
  0x3f   :  { %1764 = vmatpush3.bf16.msra.mxu1 %v2065_v62  ;;  %1822 = vmatpush3.bf16.msra.mxu0 %v2067_v0  ;;  %v2143_v62 = vld [vmem:[%s2807_s0 + $0xb0] ss:$36 sps:$4 sm:$0xff]  }
  0x40   :  { %1865 = vmatprep.subr.bf16.mxu1 %v2074_v3  ;;  %1938 = vmatprep.subr.bf16.mxu0 %v2159_v7  ;;  %v2146_v0 = vld [vmem:[%s2807_s0 + $0xf0] ss:$36 sps:$4 sm:$0xff]   ;;  %v2150_v3 = vld [vmem:[%s2807_s0 + $0x138] ss:$36 sps:$4 sm:$0xff]  }
  0x42   :  { %1092 = vmatmul.mubr.bf16.vlgmr.msra.gmra.mxu1 %v2068_v1  ;;  %1180 = vmatmul.mubr.bf16.vlgmr.msra.gmra.mxu0 %v2071_v2  ;;  %v2147_v1 = vld [vmem:[%s2807_s0 + $0xf8] ss:$36 sps:$4 sm:$0xff]  }
  0x43   :  { %1866 = vmatpush3.bf16.msra.mxu1 %v2075_v4  ;;  %1099 = vmatprep.mubr.bf16.mxu1 %v2076_v5  ;;  %v2148_v2 = vld [vmem:[%s2807_s0 + $0x13c] ss:$36 sps:$4 sm:$0xff]   ;;  %v2152_v5 = vld [vmem:[%s2807_s0 + $0x184] ss:$36 sps:$4 sm:$0xff]  }
  0x44   :  { %1867 = vmatprep.subr.bf16.mxu1 %v2078_v6  ;;  %1939 = vmatpush3.bf16.msra.mxu0 %v2079_v8  ;;  %v2151_v4 = vld [vmem:[%s2807_s0 + $0x140] ss:$36 sps:$4 sm:$0xff]   ;;  %v78_v6 = vld [vmem:[%s2807_s0 + $0x1c8] sm:$0x11] }
  0x45   :  { %1187 = vmatprep.mubr.bf16.mxu0 %v2081_v9  ;;  %1940 = vmatprep.subr.bf16.mxu0 %v2159_v7  ;;  %v2154_v8 = vld [vmem:[%s2807_s0 + $0x180] ss:$36 sps:$4 sm:$0xff]   ;;  %v2155_v9 = vld [vmem:[%s2807_s0 + $0x188] ss:$36 sps:$4 sm:$0xff]  }
  0x47   :  { %1868 = vmatpush3.bf16.msra.mxu1 %v2083_v10  ;;  %v1556_v10 = vcombine.high %v78_v6, %v78_v6 }
  0x48   :  { %1869 = vmatprep.subr.bf16.mxu1 %v2085_v11  ;;  %1941 = vmatpush3.bf16.msra.mxu0 %v2086_v12  ;;  %v1555_v11 = vcombine.low %v78_v6, %v78_v6  ;;  %v2158_v12 = vld [vmem:[%s2807_s0 + $0x1d0] ss:$0 sps:$4 sm:$0x11]  }
  0x49   :  { %1942 = vmatprep.subr.bf16.mxu0 %v2159_v7 }
  0x4a   :  { %1100 = vmatmul.mubr.bf16.gmra.mxu1 %v2080_v13  ;;  %1188 = vmatmul.mubr.bf16.gmra.mxu0 %v2084_v14 }
  0x4b   :  { %1107 = vmatprep.mubr.bf16.mxu1 %v2087_v15  ;;  %1870 = vmatpush3.bf16.msra.mxu1 %v2089_v16 }
  0x4c   :  { %1195 = vmatprep.mubr.bf16.mxu0 %v2091_v17  ;;  %1871 = vmatprep.subr.bf16.mxu1 %v2094_v18 }
  0x4d   :  { %1943 = vmatpush3.bf16.msra.mxu0 %v2095_v19 }
  0x4e   :  { %1944 = vmatprep.subr.bf16.mxu0 %v2159_v7 }
  0x4f   :  { %1872 = vmatpush3.bf16.msra.mxu1 %v2096_v20 }
  0x50   :  { %1873 = vmatprep.subr.bf16.mxu1 %v2103_v25 }
  0x51   :  { %1945 = vmatpush3.bf16.msra.mxu0 %v2104_v26 }
  0x52   :  { %1108 = vmatmul.mubr.bf16.gmra.mxu1 %v2090_v21  ;;  %1196 = vmatmul.mubr.bf16.gmra.mxu0 %v2093_v22 }
  0x53   :  { %1115 = vmatprep.mubr.bf16.mxu1 %v2097_v23  ;;  %1203 = vmatprep.mubr.bf16.mxu0 %v2100_v24 }
  0x54   :  { %1874 = vmatpush3.bf16.msra.mxu1 %v2105_v27  ;;  %1946 = vmatprep.subr.bf16.mxu0 %v2159_v7 }
  0x55   :  { %1875 = vmatprep.subr.bf16.mxu1 %v2112_v30  ;;  %1947 = vmatpush3.bf16.msra.mxu0 %v2113_v31 }
  0x56   :  { %1948 = vmatprep.subr.bf16.mxu0 %v2159_v7 }
  0x58   :  { %1876 = vmatpush3.bf16.msra.mxu1 %v2114_v32 }
  0x59   :  { %1877 = vmatprep.subr.bf16.mxu1 %v2121_v35  ;;  %1949 = vmatpush3.bf16.msra.mxu0 %v2122_v36 }
  0x5a   :  { %1116 = vmatmul.mubr.bf16.gmra.mxu1 %v2099_v28  ;;  %1204 = vmatmul.mubr.bf16.gmra.mxu0 %v2102_v29 }
  0x5b   :  { %1123 = vmatprep.mubr.bf16.mxu1 %v2106_v33  ;;  %1211 = vmatprep.mubr.bf16.mxu0 %v2109_v34 }
  0x5c   :  { %1878 = vmatpush3.bf16.msra.mxu1 %v2123_v39  ;;  %1950 = vmatprep.subr.bf16.mxu0 %v2159_v7 }
  0x5d   :  { %1879 = vmatprep.subr.bf16.mxu1 %v2128_v41  ;;  %1951 = vmatpush3.bf16.msra.mxu0 %v2129_v42 }
  0x5e   :  { %1952 = vmatprep.subr.bf16.mxu0 %v2159_v7 }
  0x60   :  { %1880 = vmatpush3.bf16.msra.mxu1 %v2130_v44 }
  0x61   :  { %1953 = vmatpush3.bf16.msra.mxu0 %v2131_v45 }
  0x62   :  { %1124 = vmatmul.mubr.bf16.gmra.mxu1 %v2108_v37  ;;  %1212 = vmatmul.mubr.bf16.gmra.mxu0 %v2111_v38 }
  0x63   :  { %1131 = vmatprep.mubr.bf16.mxu1 %v2115_v40  ;;  %1219 = vmatprep.mubr.bf16.mxu0 %v2118_v43 }
  0x6a   :  { %1132 = vmatmul.mubr.bf16.gmra.mxu1 %v2117_v48  ;;  %1220 = vmatmul.mubr.bf16.gmra.mxu0 %v2120_v49 }
  0x6b   :  { %1139 = vmatprep.mubr.bf16.mxu1 %v1552_v50  ;;  %1227 = vmatprep.mubr.bf16.mxu0 %v1554_v51 }
  0x72   :  { %1140 = vmatmul.mubr.bf16.gmra.mxu1 %v1551_v52  ;;  %1228 = vmatmul.mubr.bf16.gmra.mxu0 %v1553_v53 }
  0x73   :  { %1267 = vmatprep.mubr.bf16.mxu1 %v2134_v54  ;;  %1954 = vmatprep.mubr.msk.bf16.mxu0 %vm2160_vm0, %v2159_v7 }
  0x7a   :  { %1268 = vmatmul.mubr.bf16.vlgmr.msra.gmra.mxu1 %v2132_v55  ;;  %1955 = vmatmul.mubr.bf16.vlgmr.msra.gmra.mxu0 %v2135_v56 }
  0x7b   :  { %1275 = vmatprep.mubr.bf16.mxu1 %v2136_v57  ;;  %1958 = vmatprep.mubr.msk.bf16.mxu0 %vm2160_vm0, %v2159_v7 }
  0x82   :  { %1276 = vmatmul.mubr.bf16.gmra.mxu1 %v2138_v58  ;;  %1959 = vmatmul.mubr.bf16.gmra.mxu0 %v2139_v59 }
  0x83   :  { %1283 = vmatprep.mubr.bf16.mxu1 %v2140_v60  ;;  %1962 = vmatprep.mubr.msk.bf16.mxu0 %vm2160_vm0, %v2159_v7 }
  0x8a   :  { %1284 = vmatmul.mubr.bf16.gmra.mxu1 %v2142_v61  ;;  %1963 = vmatmul.mubr.bf16.gmra.mxu0 %v2143_v62 }
  0x8b   :  { %1291 = vmatprep.mubr.bf16.mxu1 %v2144_v63  ;;  %1966 = vmatprep.mubr.msk.bf16.mxu0 %vm2160_vm0, %v2159_v7 }
  0x92   :  { %1292 = vmatmul.mubr.bf16.gmra.mxu1 %v2146_v0  ;;  %1967 = vmatmul.mubr.bf16.gmra.mxu0 %v2147_v1 }
  0x93   :  { %1299 = vmatprep.mubr.bf16.mxu1 %v2148_v2  ;;  %1970 = vmatprep.mubr.msk.bf16.mxu0 %vm2160_vm0, %v2159_v7 }
  0x9a   :  { %1300 = vmatmul.mubr.bf16.gmra.mxu1 %v2150_v3  ;;  %1971 = vmatmul.mubr.bf16.gmra.mxu0 %v2151_v4 }
  0x9b   :  { %1307 = vmatprep.mubr.bf16.mxu1 %v2152_v5  ;;  %1974 = vmatprep.mubr.msk.bf16.mxu0 %vm2160_vm0, %v2159_v7 }
  0xa2   :  { %1308 = vmatmul.mubr.bf16.gmra.mxu1 %v2154_v8  ;;  %1975 = vmatmul.mubr.bf16.gmra.mxu0 %v2155_v9 }
  0xa3   :  { %1315 = vmatprep.mubr.bf16.mxu1 %v1556_v10  ;;  %1978 = vmatprep.mubr.msk.bf16.mxu0 %vm2160_vm0, %v2159_v7 }
  0xaa   :  { %1316 = vmatmul.mubr.bf16.gmra.mxu1 %v1555_v11  ;;  %1979 = vmatmul.mubr.bf16.gmra.mxu0 %v2158_v12 }
  0xe2   :  { %v1731_v13 = vpop.f32.mrf.mxu1  ;;  %v1707_v14 = vpop.f32.mrf.mxu0 }
  0xe4   :  { %v1732_v15 = vpop.f32.mrf.mxu1  ;;  %v1708_v16 = vpop.f32.mrf.mxu0 }
  0xe5   :  { %v2596_v17 = vadd.f32 %v1732_v15, %v1731_v13  ;;  %v2598_v18 = vadd.f32 %v1708_v16, %v1707_v14 }
  0xe6   :  { %v1734_v19 = vpop.f32.mrf.mxu1  ;;  %v1710_v20 = vpop.f32.mrf.mxu0 }
  0xe8   :  { %v1735_v21 = vpop.f32.mrf.mxu1  ;;  %v1711_v22 = vpop.f32.mrf.mxu0 }
  0xe9   :  { %v2600_v7 = vadd.f32 %v1735_v21, %v1734_v19  ;;  %v2602_v23 = vadd.f32 %v1711_v22, %v1710_v20 }
  0xea   :  { %v1713_v24 = vpop.f32.mrf.mxu0  ;;  %v1737_v25 = vpop.f32.mrf.mxu1 }
  0xeb   :  { %2810 = vst [vmem:[#allocation2_spill] sm:$0xff] %v2600_v7 }
  0xec   :  { %v1714_v26 = vpop.f32.mrf.mxu0  ;;  %v1738_v27 = vpop.f32.mrf.mxu1 }
  0xed   :  { %v2604_v28 = vadd.f32 %v1714_v26, %v1713_v24  ;;  %v2606_v29 = vadd.f32 %v1738_v27, %v1737_v25 }
  0xee   :  { %v1716_v30 = vpop.f32.mrf.mxu0  ;;  %v1740_v31 = vpop.f32.mrf.mxu1 }
  0xef   :  { %2811 = vst [vmem:[#allocation3_spill] sm:$0xff] %v2606_v29 }
  0xf0   :  { %v1717_v32 = vpop.f32.mrf.mxu0  ;;  %v1741_v33 = vpop.f32.mrf.mxu1 }
  0xf1   :  { %v2608_v34 = vadd.f32 %v1717_v32, %v1716_v30  ;;  %v2610_v35 = vadd.f32 %v1741_v33, %v1740_v31 }
  0xf2   :  { %v1719_v36 = vpop.f32.mrf.mxu0  ;;  %v1743_v37 = vpop.f32.mrf.mxu1 }
  0xf3   :  { %2812 = vst [vmem:[#allocation4_spill] sm:$0xff] %v2610_v35 }
  0xf4   :  { %v1720_v38 = vpop.f32.mrf.mxu0  ;;  %v1744_v39 = vpop.f32.mrf.mxu1 }
  0xf5   :  { %v2612_v40 = vadd.f32 %v1720_v38, %v1719_v36  ;;  %v2614_v41 = vadd.f32 %v1744_v39, %v1743_v37 }
  0xf6   :  { %v1722_v42 = vpop.f32.mrf.mxu0  ;;  %v1746_v43 = vpop.f32.mrf.mxu1 }
  0xf7   :  { %2813 = vst [vmem:[#allocation5_spill] sm:$0xff] %v2614_v41 }
  0xf8   :  { %v1723_v44 = vpop.f32.mrf.mxu0  ;;  %v1747_v45 = vpop.f32.mrf.mxu1 }
  0xf9   :  { %v2616_v46 = vadd.f32 %v1723_v44, %v1722_v42 }
  0xfa   :  { %v1725_v47 = vpop.f32.mrf.mxu0 }
  0xfc   :  { %v1726_v48 = vpop.f32.mrf.mxu0 }
  0xfd   :  { %v2618_v49 = vadd.f32 %v1726_v48, %v1725_v47 }
  0xfe   :  { %v1728_v50 = vpop.f32.mrf.mxu0 }
 0x100   :  { %v1729_v51 = vpop.f32.mrf.mxu0 }
 0x101   :  { %v2620_v52 = vadd.f32 %v1729_v51, %v1728_v50 }
 0x102   :  { %v1765_v53 = vpop.f32.mrf.mxu1  ;;  %v1823_v54 = vpop.f32.mrf.mxu0 }
 0x104   :  { %v1766_v55 = vpop.f32.mrf.mxu1  ;;  %v1824_v56 = vpop.f32.mrf.mxu0 }
 0x105   :  { %v1767_v35 = vadd.f32 %v1766_v55, %v1765_v53  ;;  %v1825_v29 = vadd.f32 %v1824_v56, %v1823_v54 }
 0x106   :  { %v1768_v57 = vpop.f32.mrf.mxu1  ;;  %v2622_v58 = vpop.f32.mrf.mxu0 }
 0x108   :  { %v1769_v59 = vpop.f32.mrf.mxu1  ;;  %v2624_v60 = vpop.f32.mrf.mxu0 }
 0x10a   :  { %v1771_v61 = vpop.f32.mrf.mxu1  ;;  %v2626_v62 = vpop.f32.mrf.mxu0 }
 0x10c   :  { %v1772_v63 = vpop.f32.mrf.mxu1  ;;  %v2628_v0 = vpop.f32.mrf.mxu0 }
 0x10e   :  { %v2630_v1 = vpop.f32.mrf.mxu1  ;;  %v2632_v2 = vpop.f32.mrf.mxu0 }
 0x110   :  { %v2634_v3 = vpop.f32.mrf.mxu1  ;;  %v2636_v4 = vpop.f32.mrf.mxu0 }
 0x111   :  { %v1776_v56 = vadd.f32 %v2634_v3, %v2630_v1 }
 0x112   :  { %v2638_v5 = vpop.f32.mrf.mxu1  ;;  %v2640_v6 = vpop.f32.mrf.mxu0 }
 0x114   :  { %v2642_v8 = vpop.f32.mrf.mxu1  ;;  %v2644_v9 = vpop.f32.mrf.mxu0 }
 0x115   :  { %v1779_v1 = vadd.f32 %v2642_v8, %v2638_v5 }
 0x116   :  { %v2646_v10 = vpop.f32.mrf.mxu1  ;;  %v2648_v11 = vpop.f32.mrf.mxu0 }
 0x118   :  { %v2650_v12 = vpop.f32.mrf.mxu1  ;;  %v2652_v13 = vpop.f32.mrf.mxu0 }
 0x11a   :  { %v2654_v14 = vpop.f32.mrf.mxu1  ;;  %v2656_v15 = vpop.f32.mrf.mxu0 }
 0x11c   :  { %v2658_v16 = vpop.f32.mrf.mxu1  ;;  %v2660_v19 = vpop.f32.mrf.mxu0 }
 0x11e   :  { %v2662_v20 = vpop.f32.mrf.mxu1  ;;  %v2664_v21 = vpop.f32.mrf.mxu0 }
 0x120   :  { %v2666_v22 = vpop.f32.mrf.mxu1  ;;  %v2668_v24 = vpop.f32.mrf.mxu0 }
 0x122   :  { %v2670_v25 = vpop.f32.mrf.mxu1  ;;  %v2672_v26 = vpop.f32.mrf.mxu0 }
 0x124   :  { %v2674_v27 = vpop.f32.mrf.mxu1  ;;  %v2676_v30 = vpop.f32.mrf.mxu0 }
 0x126   :  { %v2678_v31 = vpop.f32.mrf.mxu1  ;;  %v2680_v32 = vpop.f32.mrf.mxu0 }
 0x127   :  { %2814 = vst [vmem:[#allocation6_spill] sm:$0xff] %v2680_v32 }
 0x128   :  { %v2682_v33 = vpop.f32.mrf.mxu1  ;;  %v2684_v36 = vpop.f32.mrf.mxu0 }
 0x129   :  { %2815 = vst [vmem:[#allocation7_spill] sm:$0xff] %v2684_v36 }
 0x12a   :  { %v2686_v37 = vpop.f32.mrf.mxu1  ;;  %v2688_v38 = vpop.f32.mrf.mxu0 }
 0x12b   :  { %2816 = vst [vmem:[#allocation8_spill] sm:$0xff] %v2686_v37  ;;  %2817 = vst [vmem:[#allocation9_spill] sm:$0xff] %v2688_v38  ;;  %v1773_v37 = vadd.f32 %v1772_v63, %v1771_v61 }
 0x12c   :  { %v2690_v39 = vpop.f32.mrf.mxu1  ;;  %v2692_v42 = vpop.f32.mrf.mxu0 }
 0x12d   :  { %2818 = vst [vmem:[#allocation10_spill] sm:$0xff] %v2690_v39  ;;  %2819 = vst [vmem:[#allocation11_spill] sm:$0xff] %v2692_v42  ;;  %v2713_v42 = vld [vmem:[%s2808_s2] ss:$0 sm:$0xff] }
 0x12e   :  { %v2694_v43 = vpop.f32.mrf.mxu1  ;;  %v2696_v44 = vpop.f32.mrf.mxu0  ;;  %v1009_v53 = vadd.f32 %v2602_v23, %v2713_v42  ;;  %v1017_v63 = vadd.f32 %v2608_v34, %v2713_v42  ;;  %v1022_v34 = vadd.f32 %v2612_v40, %v2713_v42 }
 0x12f   :  { %2820 = vst [vmem:[#allocation12_spill] sm:$0xff] %v2694_v43  ;;  %2821 = vst [vmem:[#allocation13_spill] sm:$0xff] %v2696_v44 }
 0x130   :  { %v2698_v45 = vpop.f32.mrf.mxu1  ;;  %v2700_v47 = vpop.f32.mrf.mxu0  ;;  %v1110_v5 = vadd.f32 %v1779_v1, %v1022_v34  ;;  %v1038_v34 = vadd.f32 %v2596_v17, %v2713_v42 }
 0x131   :  { %2822 = vst [vmem:[#allocation14_spill] sm:$0xff] %v2698_v45  ;;  %2823 = vst [vmem:[#allocation15_spill] sm:$0xff] %v2700_v47  ;;  %v1006_v45 = vadd.f32 %v2598_v18, %v2713_v42  ;;  %v1014_v18 = vadd.f32 %v2604_v28, %v2713_v42 }
 0x132   :  { %v2702_v48 = vpop.f32.mrf.mxu1  ;;  %v2704_v50 = vpop.f32.mrf.mxu0 }
 0x133   :  { %2824 = vst [vmem:[#allocation16_spill] sm:$0xff] %v2702_v48  ;;  %2825 = vst [vmem:[#allocation17_spill] sm:$0xff] %v2704_v50  ;;  %v1094_v48 = vadd.f32 %v1767_v35, %v1006_v45  ;;  %v1770_v50 = vadd.f32 %v1769_v59, %v1768_v57  ;;  %v1828_v35 = vadd.f32 %v2624_v60, %v2622_v58 }
 0x134   :  { %v2706_v51 = vpop.f32.mrf.mxu1  ;;  %v2708_v41 = vpop.f32.mrf.mxu0  ;;  %v1105_v58 = vadd.f32 %v1776_v56, %v1017_v63 }
 0x135   :  { %2826 = vst [vmem:[#allocation18_spill] sm:$0xff] %v2706_v51  ;;  %2827 = vst [vmem:[#allocation19_spill] sm:$0xff] %v2708_v41  ;;  %v1182_v32 = vadd.f32 %v1825_v29, %v1094_v48  ;;  %v1097_v39 = vadd.f32 %v1770_v50, %v1009_v53  ;;  %v1831_v29 = vadd.f32 %v2628_v0, %v2626_v62 }
 0x136   :  { %v1804_v38 = vpop.f32.mrf.mxu1  ;;  %v1862_v44 = vpop.f32.mrf.mxu0  ;;  %v1834_v62 = vadd.f32 %v2636_v4, %v2632_v2  ;;  %v1025_v4 = vadd.f32 %v2616_v46, %v2713_v42  ;;  %v1840_v46 = vadd.f32 %v2652_v13, %v2648_v11  ;;  %v1033_v13 = vadd.f32 %v2620_v52, %v2713_v42 }
 0x137   :  { %v1185_v59 = vadd.f32 %v1828_v35, %v1097_v39  ;;  %v1846_v52 = vadd.f32 %v2668_v24, %v2664_v21  ;;  %v2828_v24 = vld [vmem:[#allocation2_spill] sm:$0xff] }
 0x138   :  { %v1805_v47 = vpop.f32.mrf.mxu1  ;;  %v1863_v43 = vpop.f32.mrf.mxu0  ;;  %v1193_v53 = vadd.f32 %v1834_v62, %v1105_v58 }
 0x13a   :  { %v1881_v36 = vpop.f32.mrf.mxu1  ;;  %v1357_v51 = vpop.f32.mrf.mxu0 }
 0x13c   :  { %v1882_v55 = vpop.f32.mrf.mxu1  ;;  %v1956_v41 = vpop.f32.mrf.mxu0 }
 0x13d   :  { %v1883_v38 = vadd.f32 %v1882_v55, %v1881_v36  ;;  %v1102_v41 = vadd.f32 %v1773_v37, %v1014_v18  ;;  %v1782_v55 = vadd.f32 %v2650_v12, %v2646_v10 }
 0x13e   :  { %v1884_v44 = vpop.f32.mrf.mxu1  ;;  %v1360_v7 = vpop.f32.mrf.mxu0 }
 0x13f   :  { %v1270_v54 = vadd.f32 %v1883_v38, %v1182_v32  ;;  %v1190_v47 = vadd.f32 %v1831_v29, %v1102_v41  ;;  %v1113_v10 = vadd.f32 %v1782_v55, %v1025_v4  ;;  %v1030_v29 = vadd.f32 %v2618_v49, %v2713_v42 }
 0x140   :  { %v1885_v57 = vpop.f32.mrf.mxu1  ;;  %v1957_v23 = vpop.f32.mrf.mxu0  ;;  %v1794_v55 = vadd.f32 %v2682_v33, %v2678_v31 }
 0x141   :  { %v1886_v61 = vadd.f32 %v1885_v57, %v1884_v44  ;;  %v1358_v43 = vadd.f32 %v1357_v51, %v1270_v54 }
 0x142   :  { %v1887_v36 = vpop.f32.mrf.mxu1  ;;  %v1365_v28 = vpop.f32.mrf.mxu0 }
 0x143   :  { %v1273_v45 = vadd.f32 %v1886_v61, %v1185_v59  ;;  %v1411_v48 = vmax.f32 %v1358_v43, 0.0  ;;  %v1788_v43 = vadd.f32 %v2666_v22, %v2662_v20 }
 0x144   :  { %v1888_v60 = vpop.f32.mrf.mxu1  ;;  %v1960_v32 = vpop.f32.mrf.mxu0 }
 0x145   :  { %v1361_v3 = vadd.f32 %v1360_v7, %v1273_v45  ;;  %v1889_v37 = vadd.f32 %v1888_v60, %v1887_v36  ;;  %v1837_v7 = vadd.f32 %v2644_v9, %v2640_v6  ;;  %v1785_v6 = vadd.f32 %v2658_v16, %v2654_v14 }
 0x146   :  { %v1890_v0 = vpop.f32.mrf.mxu1  ;;  %v1368_v39 = vpop.f32.mrf.mxu0  ;;  %v1843_v16 = vadd.f32 %v2660_v19, %v2656_v15  ;;  %v1121_v20 = vadd.f32 %v1788_v43, %v1033_v13  ;;  %v1791_v15 = vadd.f32 %v2674_v27, %v2670_v25  ;;  %v1849_v27 = vadd.f32 %v2676_v30, %v2672_v26 }
 0x147   :  { %v1412_v50 = vmax.f32 %v1361_v3, 0.0  ;;  %v1278_v51 = vadd.f32 %v1889_v37, %v1190_v47  ;;  %v1198_v57 = vadd.f32 %v1837_v7, %v1110_v5  ;;  %v1118_v14 = vadd.f32 %v1785_v6, %v1030_v29 }
 0x148   :  { %v1891_v38 = vpop.f32.mrf.mxu1  ;;  %v1961_v44 = vpop.f32.mrf.mxu0  ;;  %v1126_v25 = vadd.f32 %v1791_v15, %v1038_v34  ;;  %v1041_v7 = vadd.f32 %v2828_v24, %v2713_v42 }
 0x149   :  { %v1659_v8 = vpack.c.bf16 %v1412_v50, %v1411_v48  ;;  %v1892_v2 = vadd.f32 %v1891_v38, %v1890_v0  ;;  %v1366_v35 = vadd.f32 %v1365_v28, %v1278_v51  ;;  %v1201_v28 = vadd.f32 %v1840_v46, %v1113_v10 }
 0x14a   :  { %v1893_v18 = vpop.f32.mrf.mxu1  ;;  %v1373_v40 = vpop.f32.mrf.mxu0  ;;  %v1206_v37 = vadd.f32 %v1843_v16, %v1118_v14  ;;  %v1129_v31 = vadd.f32 %v1794_v55, %v1041_v7  ;;  %v2836_v14 = vld [vmem:[#allocation9_spill] sm:$0xff]  ;;  %v2837_v16 = vld [vmem:[#allocation11_spill] sm:$0xff] }
 0x14b   :  { %1660 = vst [vmem:[%s2809_s3] sm:$0xff] %v1659_v8   ;;  %v1281_v54 = vadd.f32 %v1892_v2, %v1193_v53  ;;  %v1413_v61 = vmax.f32 %v1366_v35, 0.0  ;;  %v1209_v53 = vadd.f32 %v1846_v52, %v1121_v20  ;;  %v2829_v35 = vld [vmem:[#allocation8_spill] sm:$0xff]  ;;  %v2840_v52 = vld [vmem:[#allocation18_spill] sm:$0xff] }
 0x14c   :  { %v1894_v12 = vpop.f32.mrf.mxu1  ;;  %v1964_v56 = vpop.f32.mrf.mxu0 }
 0x14d   :  { %v1369_v9 = vadd.f32 %v1368_v39, %v1281_v54  ;;  %v1895_v23 = vadd.f32 %v1894_v12, %v1893_v18  ;;  %v2830_v54 = vld [vmem:[#allocation10_spill] sm:$0xff]  ;;  %v2832_v56 = vld [vmem:[#allocation7_spill] sm:$0xff] }
 0x14e   :  { %v1896_v59 = vpop.f32.mrf.mxu1  ;;  %v1376_v41 = vpop.f32.mrf.mxu0  ;;  %v1797_v26 = vadd.f32 %v2830_v54, %v2829_v35  ;;  %v2831_v12 = vld [vmem:[#allocation6_spill] sm:$0xff] }
 0x14f   :  { %v1414_v63 = vmax.f32 %v1369_v9, 0.0  ;;  %v1286_v36 = vadd.f32 %v1895_v23, %v1198_v57  ;;  %v1852_v57 = vadd.f32 %v2832_v56, %v2831_v12  ;;  %v2833_v23 = vld [vmem:[#allocation3_spill] sm:$0xff] }
 0x150   :  { %v1897_v45 = vpop.f32.mrf.mxu1  ;;  %v1965_v58 = vpop.f32.mrf.mxu0  ;;  %v1046_v46 = vadd.f32 %v2833_v23, %v2713_v42 }
 0x151   :  { %v1664_v60 = vpack.c.bf16 %v1414_v63, %v1413_v61  ;;  %v1898_v11 = vadd.f32 %v1897_v45, %v1896_v59  ;;  %v1374_v47 = vadd.f32 %v1373_v40, %v1286_v36  ;;  %v1214_v40 = vadd.f32 %v1849_v27, %v1126_v25  ;;  %v2834_v63 = vld [vmem:[#allocation12_spill] sm:$0xff]  ;;  %v2835_v36 = vld [vmem:[#allocation14_spill] sm:$0xff] }
 0x152   :  { %v1899_v32 = vpop.f32.mrf.mxu1  ;;  %v1381_v49 = vpop.f32.mrf.mxu0  ;;  %v1217_v61 = vadd.f32 %v1852_v57, %v1129_v31  ;;  %v1134_v58 = vadd.f32 %v1797_v26, %v1046_v46 }
 0x153   :  { %1686 = vst [vmem:[%s2809_s3 + $0x8] sm:$0xff] %v1664_v60   ;;  %v1289_v1 = vadd.f32 %v1898_v11, %v1201_v28  ;;  %v1415_v48 = vmax.f32 %v1374_v47, 0.0  ;;  %v1800_v28 = vadd.f32 %v2835_v36, %v2834_v63  ;;  %v1855_v60 = vadd.f32 %v2837_v16, %v2836_v14 }
 0x154   :  { %v1900_v22 = vpop.f32.mrf.mxu1  ;;  %v1968_v3 = vpop.f32.mrf.mxu0 }
 0x155   :  { %v1377_v19 = vadd.f32 %v1376_v41, %v1289_v1  ;;  %v1901_v62 = vadd.f32 %v1900_v22, %v1899_v32  ;;  %v2838_v32 = vld [vmem:[#allocation4_spill] sm:$0xff] }
 0x156   :  { %v1902_v0 = vpop.f32.mrf.mxu1  ;;  %v1384_v39 = vpop.f32.mrf.mxu0 }
 0x157   :  { %v1416_v50 = vmax.f32 %v1377_v19, 0.0  ;;  %v1294_v51 = vadd.f32 %v1901_v62, %v1206_v37  ;;  %v1222_v19 = vadd.f32 %v1855_v60, %v1134_v58  ;;  %v2839_v62 = vld [vmem:[#allocation16_spill] sm:$0xff] }
 0x158   :  { %v1903_v38 = vpop.f32.mrf.mxu1  ;;  %v1969_v44 = vpop.f32.mrf.mxu0 }
 0x159   :  { %v1669_v5 = vpack.c.bf16 %v1416_v50, %v1415_v48  ;;  %v1904_v21 = vadd.f32 %v1903_v38, %v1902_v0  ;;  %v1382_v2 = vadd.f32 %v1381_v49, %v1294_v51  ;;  %v1049_v49 = vadd.f32 %v2838_v32, %v2713_v42  ;;  %v2841_v48 = vld [vmem:[#allocation13_spill] sm:$0xff]  ;;  %v2842_v50 = vld [vmem:[#allocation15_spill] sm:$0xff] }
 0x15a   :  { %v1905_v8 = vpop.f32.mrf.mxu1  ;;  %v1389_v17 = vpop.f32.mrf.mxu0  ;;  %v1803_v0 = vadd.f32 %v2840_v52, %v2839_v62  ;;  %v1858_v51 = vadd.f32 %v2842_v50, %v2841_v48  ;;  %v2843_v38 = vld [vmem:[#allocation5_spill] sm:$0xff] }
 0x15b   :  { %1687 = vst [vmem:[%s2809_s3 + $0x10] sm:$0xff] %v1669_v5   ;;  %v1297_v4 = vadd.f32 %v1904_v21, %v1209_v53  ;;  %v1417_v59 = vmax.f32 %v1382_v2, 0.0  ;;  %v1137_v3 = vadd.f32 %v1800_v28, %v1049_v49  ;;  %v1054_v44 = vadd.f32 %v2843_v38, %v2713_v42  ;;  %v2845_v2 = vld [vmem:[#allocation19_spill] sm:$0xff] }
 0x15c   :  { %v1906_v33 = vpop.f32.mrf.mxu1  ;;  %v1972_v18 = vpop.f32.mrf.mxu0 }
 0x15d   :  { %v1385_v30 = vadd.f32 %v1384_v39, %v1297_v4  ;;  %v1907_v10 = vadd.f32 %v1906_v33, %v1905_v8  ;;  %v1225_v21 = vadd.f32 %v1858_v51, %v1137_v3  ;;  %v1142_v8 = vadd.f32 %v1803_v0, %v1054_v44 }
 0x15e   :  { %v1908_v6 = vpop.f32.mrf.mxu1  ;;  %v1392_v9 = vpop.f32.mrf.mxu0 }
 0x15f   :  { %v1418_v41 = vmax.f32 %v1385_v30, 0.0  ;;  %v1302_v29 = vadd.f32 %v1907_v10, %v1214_v40 }
 0x160   :  { %v1909_v43 = vpop.f32.mrf.mxu1  ;;  %v1973_v45 = vpop.f32.mrf.mxu0 }
 0x161   :  { %v1674_v11 = vpack.c.bf16 %v1418_v41, %v1417_v59  ;;  %v1910_v13 = vadd.f32 %v1909_v43, %v1908_v6  ;;  %v1390_v20 = vadd.f32 %v1389_v17, %v1302_v29  ;;  %v2844_v17 = vld [vmem:[#allocation17_spill] sm:$0xff] }
 0x162   :  { %v1911_v47 = vpop.f32.mrf.mxu1  ;;  %v1397_v1 = vpop.f32.mrf.mxu0  ;;  %v1861_v4 = vadd.f32 %v2845_v2, %v2844_v17 }
 0x163   :  { %1688 = vst [vmem:[%s2809_s3 + $0x18] sm:$0xff] %v1674_v11   ;;  %v1305_v22 = vadd.f32 %v1910_v13, %v1217_v61  ;;  %v1419_v25 = vmax.f32 %v1390_v20, 0.0 }
 0x164   :  { %v1912_v37 = vpop.f32.mrf.mxu1  ;;  %v1976_v15 = vpop.f32.mrf.mxu0  ;;  %v1230_v30 = vadd.f32 %v1861_v4, %v1142_v8 }
 0x165   :  { %v1393_v39 = vadd.f32 %v1392_v9, %v1305_v22  ;;  %v1913_v34 = vadd.f32 %v1912_v37, %v1911_v47 }
 0x166   :  { %v1914_v53 = vpop.f32.mrf.mxu1  ;;  %v1400_v55 = vpop.f32.mrf.mxu0 }
 0x167   :  { %v1420_v27 = vmax.f32 %v1393_v39, 0.0  ;;  %v1310_v5 = vadd.f32 %v1913_v34, %v1222_v19 }
 0x168   :  { %v1915_v24 = vpop.f32.mrf.mxu1  ;;  %v1977_v7 = vpop.f32.mrf.mxu0 }
 0x169   :  { %v1679_v31 = vpack.c.bf16 %v1420_v27, %v1419_v25  ;;  %v1916_v33 = vadd.f32 %v1915_v24, %v1914_v53  ;;  %v1398_v35 = vadd.f32 %v1397_v1, %v1310_v5 }
 0x16a   :  { %v1917_v18 = vpop.f32.mrf.mxu1  ;;  %v1405_v40 = vpop.f32.mrf.mxu0 }
 0x16b   :  { %1689 = vst [vmem:[%s2809_s3 + $0x20] sm:$0xff] %v1679_v31   ;;  %v1313_v42 = vadd.f32 %v1916_v33, %v1225_v21  ;;  %v1421_v6 = vmax.f32 %v1398_v35, 0.0 }
 0x16c   :  { %v1918_v54 = vpop.f32.mrf.mxu1  ;;  %v1980_v26 = vpop.f32.mrf.mxu0 }
 0x16d   :  { %v1401_v10 = vadd.f32 %v1400_v55, %v1313_v42  ;;  %v1919_v12 = vadd.f32 %v1918_v54, %v1917_v18 }
 0x16e   :  { %v1920_v56 = vpop.f32.mrf.mxu1  ;;  %v1408_v57 = vpop.f32.mrf.mxu0 }
 0x16f   :  { %v1422_v9 = vmax.f32 %v1401_v10, 0.0  ;;  %v1318_v23 = vadd.f32 %v1919_v12, %v1230_v30 }
 0x170   :  { %v1921_v46 = vpop.f32.mrf.mxu1  ;;  %v1981_v59 = vpop.f32.mrf.mxu0 }
 0x171   :  { %v1684_v41 = vpack.c.bf16 %v1422_v9, %v1421_v6  ;;  %v1406_v29 = vadd.f32 %v1405_v40, %v1318_v23 }
 0x173   :  { %1690 = vst [vmem:[%s2809_s3 + $0x28] sm:$0xff] %v1684_v41   ;;  %v1423_v61 = vmax.f32 %v1406_v29, 0.0 }
 0x175   :  { %v1655_v63 = vpack.c.bf16 %v1423_v61, %v1423_v61 }
 0x177   :  { %1489 = vst [vmem:[%s2809_s3 + $0x30] sm:$0x1] %v1655_v63 }

// kernel: dqn_forward.7
= control target key start
LH: loop header
LB: loop body
LE: loop exit
PB: predicated region body
PF: predicated region fallthrough
CT: control target
= control target key end

     0   :  { %v1599_v36 = vlaneseq  ;;  %v16301_v37 = vmov 1966171168   ;;  %s21719_s0 = inlined_call_operand.vmem [shape: bf16[2,6272], index: 0, kind: input, shape index: {}]   ;;  %s21720_s1 = inlined_call_operand.vmem [shape: bf16[6272,512], index: 1, kind: input, shape index: {}]   ;;  %s21721_s2 = inlined_call_operand.vmem [shape: f32[1,512], index: 2, kind: input, shape index: {}]   ;;  %s21722_s3 = inlined_call_operand.vmem [shape: bf16[512,128], index: 3, kind: input, shape index: {}]   ;;  %s21723_s4 = inlined_call_operand.vmem [shape: f32[1,128], index: 4, kind: input, shape index: {}]   ;;  %s21724_s5 = inlined_call_operand.hbm [shape: f32[2,128], index: 5, kind: output, shape index: {}]  }
   0x1   :  { %v13888_v0 = vld [vmem:[%s21720_s1 + $0xe4] ss:$16 sps:$4 sm:$0xff]   ;;  %v13892_v2 = vld [vmem:[%s21720_s1 + $0xe0] ss:$16 sps:$4 sm:$0xff]   ;;  %v1628_v38 = vunpack.c.l.s4 %v16301_v37 }
   0x2   :  { %v13890_v1 = vld [vmem:[%s21720_s1 + $0x2e4] ss:$16 sps:$4 sm:$0xff]   ;;  %9823 = vmatprep.subr.bf16.mxu0 %v13888_v0  ;;  %v13893_v3 = vld [vmem:[%s21720_s1 + $0x2e0] ss:$16 sps:$4 sm:$0xff]   ;;  %v16451_v42 = vshrl.u32 %v1599_v36, 7 }
   0x3   :  { %9864 = vmatprep.subr.bf16.mxu1 %v13890_v1  ;;  %v13894_v4 = vld [vmem:[%s21720_s1 + $0xc4] ss:$16 sps:$4 sm:$0xff]   ;;  %9824 = vmatpush1.bf16.msra.mxu0 %v13892_v2  ;;  %v13898_v6 = vld [vmem:[%s21720_s1 + $0xc0] ss:$16 sps:$4 sm:$0xff]   ;;  %v1629_v43 = vunpack.c.0.s8 %v1628_v38 }
   0x4   :  { %9865 = vmatpush1.bf16.msra.mxu1 %v13893_v3  ;;  %v13896_v5 = vld [vmem:[%s21720_s1 + $0x2c4] ss:$16 sps:$4 sm:$0xff]   ;;  %9825 = vmatprep.subr.bf16.mxu0 %v13894_v4  ;;  %v13899_v7 = vld [vmem:[%s21720_s1 + $0x2c0] ss:$16 sps:$4 sm:$0xff]  }
   0x5   :  { %9866 = vmatprep.subr.bf16.mxu1 %v13896_v5  ;;  %v13900_v8 = vld [vmem:[%s21720_s1 + $0xa4] ss:$16 sps:$4 sm:$0xff]   ;;  %v13904_v10 = vld [vmem:[%s21720_s1 + $0xa0] ss:$16 sps:$4 sm:$0xff]   ;;  %v16469_v49 = vsub.s32 %v1629_v43, %v16451_v42 }
   0x6   :  { %v13902_v9 = vld [vmem:[%s21720_s1 + $0x2a4] ss:$16 sps:$4 sm:$0xff]   ;;  %v13905_v11 = vld [vmem:[%s21720_s1 + $0x2a0] ss:$16 sps:$4 sm:$0xff]  }
   0x7   :  { %9826 = vmatpush1.bf16.msra.mxu0 %v13898_v6  ;;  %v13906_v12 = vld [vmem:[%s21720_s1 + $0x84] ss:$16 sps:$4 sm:$0xff]   ;;  %v13910_v14 = vld [vmem:[%s21720_s1 + $0x80] ss:$16 sps:$4 sm:$0xff]  }
   0x8   :  { %9867 = vmatpush1.bf16.msra.mxu1 %v13899_v7  ;;  %9827 = vmatprep.subr.bf16.mxu0 %v13900_v8  ;;  %v13908_v13 = vld [vmem:[%s21720_s1 + $0x284] ss:$16 sps:$4 sm:$0xff]   ;;  %v13911_v15 = vld [vmem:[%s21720_s1 + $0x280] ss:$16 sps:$4 sm:$0xff]  }
   0x9   :  { %9868 = vmatprep.subr.bf16.mxu1 %v13902_v9  ;;  %v13912_v16 = vld [vmem:[%s21720_s1 + $0x64] ss:$16 sps:$4 sm:$0xff]   ;;  %v13916_v18 = vld [vmem:[%s21720_s1 + $0x60] ss:$16 sps:$4 sm:$0xff]  }
   0xa   :  { %v13914_v17 = vld [vmem:[%s21720_s1 + $0x264] ss:$16 sps:$4 sm:$0xff]   ;;  %v13917_v19 = vld [vmem:[%s21720_s1 + $0x260] ss:$16 sps:$4 sm:$0xff]  }
   0xb   :  { %9828 = vmatpush1.bf16.msra.mxu0 %v13904_v10  ;;  %v13918_v20 = vld [vmem:[%s21720_s1 + $0x44] ss:$16 sps:$4 sm:$0xff]   ;;  %v13922_v22 = vld [vmem:[%s21720_s1 + $0x40] ss:$16 sps:$4 sm:$0xff]  }
   0xc   :  { %9869 = vmatpush1.bf16.msra.mxu1 %v13905_v11  ;;  %9829 = vmatprep.subr.bf16.mxu0 %v13906_v12  ;;  %v13920_v21 = vld [vmem:[%s21720_s1 + $0x244] ss:$16 sps:$4 sm:$0xff]   ;;  %v13923_v23 = vld [vmem:[%s21720_s1 + $0x240] ss:$16 sps:$4 sm:$0xff]  }
   0xd   :  { %9870 = vmatprep.subr.bf16.mxu1 %v13908_v13  ;;  %v13924_v24 = vld [vmem:[%s21720_s1 + $0x24] ss:$16 sps:$4 sm:$0xff]   ;;  %v13928_v26 = vld [vmem:[%s21720_s1 + $0x20] ss:$16 sps:$4 sm:$0xff]  }
   0xe   :  { %v13926_v25 = vld [vmem:[%s21720_s1 + $0x224] ss:$16 sps:$4 sm:$0xff]   ;;  %v13929_v27 = vld [vmem:[%s21720_s1 + $0x220] ss:$16 sps:$4 sm:$0xff]  }
   0xf   :  { %9830 = vmatpush1.bf16.msra.mxu0 %v13910_v14  ;;  %v13930_v28 = vld [vmem:[%s21720_s1 + $0x4] ss:$16 sps:$4 sm:$0xff]   ;;  %v13934_v30 = vld [vmem:[%s21720_s1] ss:$16 sps:$4 sm:$0xff]  }
  0x10   :  { %9871 = vmatpush1.bf16.msra.mxu1 %v13911_v15  ;;  %9831 = vmatprep.subr.bf16.mxu0 %v13912_v16  ;;  %v13932_v29 = vld [vmem:[%s21720_s1 + $0x204] ss:$16 sps:$4 sm:$0xff]   ;;  %v13935_v31 = vld [vmem:[%s21720_s1 + $0x200] ss:$16 sps:$4 sm:$0xff]  }
  0x11   :  { %9872 = vmatprep.subr.bf16.mxu1 %v13914_v17  ;;  %v13936_v32 = vld [vmem:[%s21720_s1 + $0x1e4] ss:$16 sps:$4 sm:$0xff]   ;;  %v13940_v34 = vld [vmem:[%s21720_s1 + $0x1e0] ss:$16 sps:$4 sm:$0xff]  }
  0x12   :  { %v13938_v33 = vld [vmem:[%s21720_s1 + $0x3e4] ss:$16 sps:$4 sm:$0xff]   ;;  %v13941_v35 = vld [vmem:[%s21720_s1 + $0x3e0] ss:$16 sps:$4 sm:$0xff]  }
  0x13   :  { %9832 = vmatpush1.bf16.msra.mxu0 %v13916_v18  ;;  %v13942_v39 = vld [vmem:[%s21720_s1 + $0x1c4] ss:$16 sps:$4 sm:$0xff]   ;;  %v13946_v41 = vld [vmem:[%s21720_s1 + $0x1c0] ss:$16 sps:$4 sm:$0xff]  }
  0x14   :  { %9873 = vmatpush1.bf16.msra.mxu1 %v13917_v19  ;;  %9833 = vmatprep.subr.bf16.mxu0 %v13918_v20  ;;  %v13944_v40 = vld [vmem:[%s21720_s1 + $0x3c4] ss:$16 sps:$4 sm:$0xff]   ;;  %v13947_v44 = vld [vmem:[%s21720_s1 + $0x3c0] ss:$16 sps:$4 sm:$0xff]  }
  0x15   :  { %9874 = vmatprep.subr.bf16.mxu1 %v13920_v21  ;;  %v13948_v45 = vld [vmem:[%s21720_s1 + $0x1a4] ss:$16 sps:$4 sm:$0xff]   ;;  %v13952_v47 = vld [vmem:[%s21720_s1 + $0x1a0] ss:$16 sps:$4 sm:$0xff]  }
  0x16   :  { %v13950_v46 = vld [vmem:[%s21720_s1 + $0x3a4] ss:$16 sps:$4 sm:$0xff]   ;;  %v13953_v48 = vld [vmem:[%s21720_s1 + $0x3a0] ss:$16 sps:$4 sm:$0xff]  }
  0x17   :  { %9834 = vmatpush1.bf16.msra.mxu0 %v13922_v22  ;;  %v13954_v50 = vld [vmem:[%s21720_s1 + $0x184] ss:$16 sps:$4 sm:$0xff]   ;;  %v13958_v53 = vld [vmem:[%s21720_s1 + $0x180] ss:$16 sps:$4 sm:$0xff]  }
  0x18   :  { %9875 = vmatpush1.bf16.msra.mxu1 %v13923_v23  ;;  %9835 = vmatprep.subr.bf16.mxu0 %v13924_v24  ;;  %v13956_v51 = vld [vmem:[%s21720_s1 + $0x384] ss:$16 sps:$4 sm:$0xff]   ;;  %v13959_v55 = vld [vmem:[%s21720_s1 + $0x380] ss:$16 sps:$4 sm:$0xff]  }
  0x19   :  { %9876 = vmatprep.subr.bf16.mxu1 %v13926_v25  ;;  %v22_v52 = vld [vmem:[%s21719_s0] sm:$0xff] }
  0x1a   :  { %v1633_v54 = vrot.slane %v22_v52, %v16469_v49  ;;  %v13960_v56 = vld [vmem:[%s21720_s1 + $0x164] ss:$16 sps:$4 sm:$0xff]   ;;  %v13964_v59 = vld [vmem:[%s21720_s1 + $0x160] ss:$16 sps:$4 sm:$0xff]   ;;  %v1626_v1 = vcombine.high %v22_v52, %v22_v52 }
  0x1b   :  { %9836 = vmatpush1.bf16.msra.mxu0 %v13928_v26  ;;  %v13962_v57 = vld [vmem:[%s21720_s1 + $0x364] ss:$16 sps:$4 sm:$0xff]   ;;  %v13965_v61 = vld [vmem:[%s21720_s1 + $0x360] ss:$16 sps:$4 sm:$0xff]  }
  0x1c   :  { %9877 = vmatpush1.bf16.msra.mxu1 %v13929_v27  ;;  %9837 = vmatprep.subr.bf16.mxu0 %v13930_v28  ;;  %v1641_v58 = vcombine.high %v1633_v54, %v1633_v54  ;;  %v13966_v62 = vld [vmem:[%s21720_s1 + $0x144] ss:$16 sps:$4 sm:$0xff]   ;;  %v13970_v2 = vld [vmem:[%s21720_s1 + $0x140] ss:$16 sps:$4 sm:$0xff]   ;;  %v16527_v6 = vrot.slane %v1626_v1, %v16469_v49  ;;  %v16547_v13 = vrot.slane %v1633_v54, %v16469_v49 }
  0x1d   :  { %9878 = vmatprep.subr.bf16.mxu1 %v13932_v29  ;;  %v13968_v63 = vld [vmem:[%s21720_s1 + $0x344] ss:$16 sps:$4 sm:$0xff]   ;;  %v13971_v3 = vld [vmem:[%s21720_s1 + $0x340] ss:$16 sps:$4 sm:$0xff]  }
  0x1e   :  { %v16497_v60 = vrot.slane %v1641_v58, %v16469_v49  ;;  %v13972_v4 = vld [vmem:[%s21720_s1 + $0x124] ss:$16 sps:$4 sm:$0xff]   ;;  %v13976_v7 = vld [vmem:[%s21720_s1 + $0x120] ss:$16 sps:$4 sm:$0xff]   ;;  %v1642_v11 = vcombine.high %v16527_v6, %v16527_v6  ;;  %v16563_v18 = vcombine.high %v16547_v13, %v16547_v13 }
  0x1f   :  { %9838 = vmatpush1.bf16.msra.mxu0 %v13934_v30  ;;  %v13974_v5 = vld [vmem:[%s21720_s1 + $0x324] ss:$16 sps:$4 sm:$0xff]   ;;  %v13977_v8 = vld [vmem:[%s21720_s1 + $0x320] ss:$16 sps:$4 sm:$0xff]  }
  0x20   :  { %9879 = vmatpush1.bf16.msra.mxu1 %v13935_v31  ;;  %9839 = vmatprep.subr.bf16.mxu0 %v13936_v32  ;;  %v16510_v0 = vcombine.high %v16497_v60, %v16497_v60  ;;  %v13978_v9 = vld [vmem:[%s21720_s1 + $0x104] ss:$16 sps:$4 sm:$0xff]   ;;  %v13982_v12 = vld [vmem:[%s21720_s1 + $0x100] ss:$16 sps:$4 sm:$0xff]   ;;  %v16559_v17 = vrot.slane %v1642_v11, %v16469_v49 }
  0x21   :  { %9880 = vmatprep.subr.bf16.mxu1 %v13938_v33  ;;  %9855 = vmatprep.mubr.bf16.mxu0 %v16497_v60  ;;  %v13980_v10 = vld [vmem:[%s21720_s1 + $0x304] ss:$16 sps:$4 sm:$0xff]   ;;  %v13983_v14 = vld [vmem:[%s21720_s1 + $0x300] ss:$16 sps:$4 sm:$0xff]  }
  0x22   :  { %9896 = vmatprep.mubr.bf16.mxu1 %v16510_v0  ;;  %v13986_v15 = vld [vmem:[%s21720_s1 + $0x4e4] ss:$16 sps:$4 sm:$0xff]   ;;  %v13984_v19 = vld [vmem:[%s21720_s1 + $0x4e0] ss:$16 sps:$4 sm:$0xff]   ;;  %v16579_v23 = vcombine.high %v16559_v17, %v16559_v17 }
  0x23   :  { %9840 = vmatpush2.bf16.msra.mxu0 %v13940_v34  ;;  %v13989_v16 = vld [vmem:[%s21720_s1 + $0x6e4] ss:$16 sps:$4 sm:$0xff]   ;;  %v13987_v20 = vld [vmem:[%s21720_s1 + $0x6e0] ss:$16 sps:$4 sm:$0xff]  }
  0x24   :  { %9881 = vmatpush2.bf16.msra.mxu1 %v13941_v35  ;;  %9841 = vmatprep.subr.bf16.mxu0 %v13942_v39  ;;  %v13992_v21 = vld [vmem:[%s21720_s1 + $0x4c4] ss:$16 sps:$4 sm:$0xff]   ;;  %v13990_v24 = vld [vmem:[%s21720_s1 + $0x4c0] ss:$16 sps:$4 sm:$0xff]  }
  0x25   :  { %9882 = vmatprep.subr.bf16.mxu1 %v13944_v40  ;;  %v13995_v22 = vld [vmem:[%s21720_s1 + $0x6c4] ss:$16 sps:$4 sm:$0xff]   ;;  %v13993_v25 = vld [vmem:[%s21720_s1 + $0x6c0] ss:$16 sps:$4 sm:$0xff]  }
  0x26   :  { %v13998_v26 = vld [vmem:[%s21720_s1 + $0x4a4] ss:$16 sps:$4 sm:$0xff]   ;;  %v13996_v28 = vld [vmem:[%s21720_s1 + $0x4a0] ss:$16 sps:$4 sm:$0xff]  }
  0x27   :  { %9842 = vmatpush2.bf16.msra.mxu0 %v13946_v41  ;;  %v14001_v27 = vld [vmem:[%s21720_s1 + $0x6a4] ss:$16 sps:$4 sm:$0xff]   ;;  %v13999_v29 = vld [vmem:[%s21720_s1 + $0x6a0] ss:$16 sps:$4 sm:$0xff]  }
  0x28   :  { %9883 = vmatpush2.bf16.msra.mxu1 %v13947_v44  ;;  %9843 = vmatprep.subr.bf16.mxu0 %v13948_v45  ;;  %v14004_v30 = vld [vmem:[%s21720_s1 + $0x484] ss:$16 sps:$4 sm:$0xff]   ;;  %v14002_v32 = vld [vmem:[%s21720_s1 + $0x480] ss:$16 sps:$4 sm:$0xff]  }
  0x29   :  { %9884 = vmatprep.subr.bf16.mxu1 %v13950_v46  ;;  %v14007_v31 = vld [vmem:[%s21720_s1 + $0x684] ss:$16 sps:$4 sm:$0xff]   ;;  %v14005_v33 = vld [vmem:[%s21720_s1 + $0x680] ss:$16 sps:$4 sm:$0xff]  }
  0x2a   :  { %v14010_v34 = vld [vmem:[%s21720_s1 + $0x464] ss:$16 sps:$4 sm:$0xff]   ;;  %v14008_v36 = vld [vmem:[%s21720_s1 + $0x460] ss:$16 sps:$4 sm:$0xff]  }
  0x2b   :  { %9844 = vmatpush2.bf16.msra.mxu0 %v13952_v47  ;;  %v14013_v35 = vld [vmem:[%s21720_s1 + $0x664] ss:$16 sps:$4 sm:$0xff]   ;;  %v14011_v37 = vld [vmem:[%s21720_s1 + $0x660] ss:$16 sps:$4 sm:$0xff]  }
  0x2c   :  { %9885 = vmatpush2.bf16.msra.mxu1 %v13953_v48  ;;  %9845 = vmatprep.subr.bf16.mxu0 %v13954_v50  ;;  %v14016_v38 = vld [vmem:[%s21720_s1 + $0x444] ss:$16 sps:$4 sm:$0xff]   ;;  %v14014_v40 = vld [vmem:[%s21720_s1 + $0x440] ss:$16 sps:$4 sm:$0xff]  }
  0x2d   :  { %9886 = vmatprep.subr.bf16.mxu1 %v13956_v51  ;;  %v14019_v39 = vld [vmem:[%s21720_s1 + $0x644] ss:$16 sps:$4 sm:$0xff]   ;;  %v14017_v41 = vld [vmem:[%s21720_s1 + $0x640] ss:$16 sps:$4 sm:$0xff]  }
  0x2e   :  { %v14022_v43 = vld [vmem:[%s21720_s1 + $0x424] ss:$16 sps:$4 sm:$0xff]   ;;  %v14020_v45 = vld [vmem:[%s21720_s1 + $0x420] ss:$16 sps:$4 sm:$0xff]  }
  0x2f   :  { %9846 = vmatpush2.bf16.msra.mxu0 %v13958_v53  ;;  %v14025_v44 = vld [vmem:[%s21720_s1 + $0x624] ss:$16 sps:$4 sm:$0xff]   ;;  %v14023_v46 = vld [vmem:[%s21720_s1 + $0x620] ss:$16 sps:$4 sm:$0xff]  }
  0x30   :  { %9887 = vmatpush2.bf16.msra.mxu1 %v13959_v55  ;;  %9847 = vmatprep.subr.bf16.mxu0 %v13960_v56  ;;  %v14028_v47 = vld [vmem:[%s21720_s1 + $0x404] ss:$16 sps:$4 sm:$0xff]   ;;  %v14026_v50 = vld [vmem:[%s21720_s1 + $0x400] ss:$16 sps:$4 sm:$0xff]  }
  0x31   :  { %9888 = vmatprep.subr.bf16.mxu1 %v13962_v57  ;;  %v14031_v48 = vld [vmem:[%s21720_s1 + $0x604] ss:$16 sps:$4 sm:$0xff]   ;;  %v14029_v51 = vld [vmem:[%s21720_s1 + $0x600] ss:$16 sps:$4 sm:$0xff]  }
  0x32   :  { %v14034_v52 = vld [vmem:[%s21720_s1 + $0x5e4] ss:$16 sps:$4 sm:$0xff]   ;;  %v14032_v54 = vld [vmem:[%s21720_s1 + $0x5e0] ss:$16 sps:$4 sm:$0xff]  }
  0x33   :  { %9848 = vmatpush2.bf16.msra.mxu0 %v13964_v59  ;;  %v14037_v53 = vld [vmem:[%s21720_s1 + $0x7e4] ss:$16 sps:$4 sm:$0xff]   ;;  %v14035_v55 = vld [vmem:[%s21720_s1 + $0x7e0] ss:$16 sps:$4 sm:$0xff]  }
  0x34   :  { %9889 = vmatpush2.bf16.msra.mxu1 %v13965_v61  ;;  %9849 = vmatprep.subr.bf16.mxu0 %v13966_v62  ;;  %v14040_v56 = vld [vmem:[%s21720_s1 + $0x5c4] ss:$16 sps:$4 sm:$0xff]   ;;  %v14038_v58 = vld [vmem:[%s21720_s1 + $0x5c0] ss:$16 sps:$4 sm:$0xff]  }
  0x35   :  { %9890 = vmatprep.subr.bf16.mxu1 %v13968_v63  ;;  %v14043_v57 = vld [vmem:[%s21720_s1 + $0x7c4] ss:$16 sps:$4 sm:$0xff]   ;;  %v14041_v59 = vld [vmem:[%s21720_s1 + $0x7c0] ss:$16 sps:$4 sm:$0xff]  }
  0x36   :  { %v14046_v61 = vld [vmem:[%s21720_s1 + $0x5a4] ss:$16 sps:$4 sm:$0xff]   ;;  %v14044_v63 = vld [vmem:[%s21720_s1 + $0x5a0] ss:$16 sps:$4 sm:$0xff]  }
  0x37   :  { %9850 = vmatpush2.bf16.msra.mxu0 %v13970_v2  ;;  %v14049_v62 = vld [vmem:[%s21720_s1 + $0x7a4] ss:$16 sps:$4 sm:$0xff]   ;;  %v14047_v1 = vld [vmem:[%s21720_s1 + $0x7a0] ss:$16 sps:$4 sm:$0xff]  }
  0x38   :  { %9891 = vmatpush2.bf16.msra.mxu1 %v13971_v3  ;;  %9851 = vmatprep.subr.bf16.mxu0 %v13972_v4  ;;  %v14052_v2 = vld [vmem:[%s21720_s1 + $0x584] ss:$16 sps:$4 sm:$0xff]   ;;  %v14050_v4 = vld [vmem:[%s21720_s1 + $0x580] ss:$16 sps:$4 sm:$0xff]  }
  0x39   :  { %9892 = vmatprep.subr.bf16.mxu1 %v13974_v5  ;;  %v14055_v3 = vld [vmem:[%s21720_s1 + $0x784] ss:$16 sps:$4 sm:$0xff]   ;;  %v14053_v5 = vld [vmem:[%s21720_s1 + $0x780] ss:$16 sps:$4 sm:$0xff]  }
  0x3a   :  { %v14064_v11 = vld [vmem:[%s21720_s1 + $0x544] ss:$16 sps:$4 sm:$0xff]  }
  0x3b   :  { %9852 = vmatpush2.bf16.msra.mxu0 %v13976_v7  ;;  %v14058_v7 = vld [vmem:[%s21720_s1 + $0x564] ss:$16 sps:$4 sm:$0xff]  }
  0x3c   :  { %9893 = vmatpush2.bf16.msra.mxu1 %v13977_v8  ;;  %9853 = vmatprep.subr.bf16.mxu0 %v13978_v9  ;;  %v14061_v8 = vld [vmem:[%s21720_s1 + $0x764] ss:$16 sps:$4 sm:$0xff]   ;;  %v14056_v9 = vld [vmem:[%s21720_s1 + $0x560] ss:$16 sps:$4 sm:$0xff]  }
  0x3d   :  { %9894 = vmatprep.subr.bf16.mxu1 %v13980_v10  ;;  %v14059_v10 = vld [vmem:[%s21720_s1 + $0x760] ss:$16 sps:$4 sm:$0xff]  }
  0x3f   :  { %9854 = vmatpush2.bf16.msra.mxu0 %v13982_v12  ;;  %v14067_v12 = vld [vmem:[%s21720_s1 + $0x744] ss:$16 sps:$4 sm:$0xff]  }
  0x40   :  { %9895 = vmatpush2.bf16.msra.mxu1 %v13983_v14  ;;  %9905 = vmatprep.subr.bf16.mxu0 %v13986_v15  ;;  %v14062_v14 = vld [vmem:[%s21720_s1 + $0x540] ss:$16 sps:$4 sm:$0xff]  }
  0x41   :  { %9946 = vmatprep.subr.bf16.mxu1 %v13989_v16  ;;  %v14065_v15 = vld [vmem:[%s21720_s1 + $0x740] ss:$16 sps:$4 sm:$0xff]   ;;  %v14070_v16 = vld [vmem:[%s21720_s1 + $0x524] ss:$16 sps:$4 sm:$0xff]  }
  0x42   :  { %9856 = vmatmul.mubr.bf16.vlgmr.msra.gmra.mxu0 %v16547_v13 }
  0x43   :  { %9897 = vmatmul.mubr.bf16.vlgmr.msra.gmra.mxu1 %v16563_v18  ;;  %9906 = vmatpush1.bf16.msra.mxu0 %v13984_v19  ;;  %v14073_v19 = vld [vmem:[%s21720_s1 + $0x724] ss:$16 sps:$4 sm:$0xff]  }
  0x44   :  { %9947 = vmatpush1.bf16.msra.mxu1 %v13987_v20  ;;  %9907 = vmatprep.subr.bf16.mxu0 %v13992_v21  ;;  %v14068_v20 = vld [vmem:[%s21720_s1 + $0x520] ss:$16 sps:$4 sm:$0xff]  }
  0x45   :  { %9948 = vmatprep.subr.bf16.mxu1 %v13995_v22  ;;  %9937 = vmatprep.mubr.bf16.mxu0 %v16559_v17  ;;  %v14071_v21 = vld [vmem:[%s21720_s1 + $0x720] ss:$16 sps:$4 sm:$0xff]   ;;  %v14076_v22 = vld [vmem:[%s21720_s1 + $0x504] ss:$16 sps:$4 sm:$0xff]  }
  0x46   :  { %9978 = vmatprep.mubr.bf16.mxu1 %v16579_v23 }
  0x47   :  { %9908 = vmatpush1.bf16.msra.mxu0 %v13990_v24  ;;  %v14079_v24 = vld [vmem:[%s21720_s1 + $0x704] ss:$16 sps:$4 sm:$0xff]  }
  0x48   :  { %9949 = vmatpush1.bf16.msra.mxu1 %v13993_v25  ;;  %9909 = vmatprep.subr.bf16.mxu0 %v13998_v26  ;;  %v14074_v25 = vld [vmem:[%s21720_s1 + $0x500] ss:$16 sps:$4 sm:$0xff]   ;;  %v16758_v26 = vrot.slane %v16527_v6, %v16469_v49 }
  0x49   :  { %9950 = vmatprep.subr.bf16.mxu1 %v14001_v27  ;;  %v14077_v27 = vld [vmem:[%s21720_s1 + $0x700] ss:$16 sps:$4 sm:$0xff]  }
  0x4a   :  { %v16771_v6 = vcombine.high %v16758_v26, %v16758_v26 }
  0x4b   :  { %9910 = vmatpush1.bf16.msra.mxu0 %v13996_v28  ;;  %v14083_v28 = vld [vmem:[%s21720_s1 + $0x8e4] ss:$16 sps:$4 sm:$0xff]  }
  0x4c   :  { %9951 = vmatpush1.bf16.msra.mxu1 %v13999_v29  ;;  %9911 = vmatprep.subr.bf16.mxu0 %v14004_v30  ;;  %v14086_v29 = vld [vmem:[%s21720_s1 + $0xae4] ss:$16 sps:$4 sm:$0xff]   ;;  %v14081_v30 = vld [vmem:[%s21720_s1 + $0x8e0] ss:$16 sps:$4 sm:$0xff]  }
  0x4d   :  { %9952 = vmatprep.subr.bf16.mxu1 %v14007_v31  ;;  %v14084_v31 = vld [vmem:[%s21720_s1 + $0xae0] ss:$16 sps:$4 sm:$0xff]  }
  0x4f   :  { %9912 = vmatpush1.bf16.msra.mxu0 %v14002_v32  ;;  %v16782_v32 = vld [vmem:[%s21719_s0 + $0x8] sm:$0xff] }
  0x50   :  { %9953 = vmatpush1.bf16.msra.mxu1 %v14005_v33  ;;  %9913 = vmatprep.subr.bf16.mxu0 %v14010_v34  ;;  %v14089_v33 = vld [vmem:[%s21720_s1 + $0x8c4] ss:$16 sps:$4 sm:$0xff]  }
  0x51   :  { %9954 = vmatprep.subr.bf16.mxu1 %v14013_v35  ;;  %v14092_v34 = vld [vmem:[%s21720_s1 + $0xac4] ss:$16 sps:$4 sm:$0xff]   ;;  %v16792_v35 = vrot.slane %v16782_v32, %v16469_v49 }
  0x53   :  { %9914 = vmatpush1.bf16.msra.mxu0 %v14008_v36  ;;  %v1690_v36 = vcombine.high %v16792_v35, %v16792_v35 }
  0x54   :  { %9955 = vmatpush1.bf16.msra.mxu1 %v14011_v37  ;;  %9915 = vmatprep.subr.bf16.mxu0 %v14016_v38  ;;  %v14087_v37 = vld [vmem:[%s21720_s1 + $0x8c0] ss:$16 sps:$4 sm:$0xff]  }
  0x55   :  { %9956 = vmatprep.subr.bf16.mxu1 %v14019_v39  ;;  %v14090_v38 = vld [vmem:[%s21720_s1 + $0xac0] ss:$16 sps:$4 sm:$0xff]   ;;  %v14095_v39 = vld [vmem:[%s21720_s1 + $0x8a4] ss:$16 sps:$4 sm:$0xff]  }
  0x57   :  { %9916 = vmatpush1.bf16.msra.mxu0 %v14014_v40  ;;  %v14098_v40 = vld [vmem:[%s21720_s1 + $0xaa4] ss:$16 sps:$4 sm:$0xff]  }
  0x58   :  { %9957 = vmatpush1.bf16.msra.mxu1 %v14017_v41  ;;  %9917 = vmatprep.subr.bf16.mxu0 %v14022_v43  ;;  %v16811_v41 = vrot.slane %v1690_v36, %v16469_v49  ;;  %v14159_v36 = vld [vmem:[%s21720_s1 + $0x940] ss:$16 sps:$4 sm:$0xff]  }
  0x59   :  { %9958 = vmatprep.subr.bf16.mxu1 %v14025_v44  ;;  %v14093_v44 = vld [vmem:[%s21720_s1 + $0x8a0] ss:$16 sps:$4 sm:$0xff]  }
  0x5a   :  { %v16816_v43 = vcombine.high %v16811_v41, %v16811_v41 }
  0x5b   :  { %9918 = vmatpush1.bf16.msra.mxu0 %v14020_v45  ;;  %v14096_v45 = vld [vmem:[%s21720_s1 + $0xaa0] ss:$16 sps:$4 sm:$0xff]  }
  0x5c   :  { %9959 = vmatpush1.bf16.msra.mxu1 %v14023_v46  ;;  %9919 = vmatprep.subr.bf16.mxu0 %v14028_v47  ;;  %v14101_v46 = vld [vmem:[%s21720_s1 + $0x884] ss:$16 sps:$4 sm:$0xff]  }
  0x5d   :  { %9960 = vmatprep.subr.bf16.mxu1 %v14031_v48  ;;  %v14104_v47 = vld [vmem:[%s21720_s1 + $0xa84] ss:$16 sps:$4 sm:$0xff]   ;;  %v14099_v48 = vld [vmem:[%s21720_s1 + $0x880] ss:$16 sps:$4 sm:$0xff]  }
  0x5f   :  { %9920 = vmatpush1.bf16.msra.mxu0 %v14026_v50  ;;  %v14102_v50 = vld [vmem:[%s21720_s1 + $0xa80] ss:$16 sps:$4 sm:$0xff]  }
  0x60   :  { %9961 = vmatpush1.bf16.msra.mxu1 %v14029_v51  ;;  %9921 = vmatprep.subr.bf16.mxu0 %v14034_v52  ;;  %v14107_v51 = vld [vmem:[%s21720_s1 + $0x864] ss:$16 sps:$4 sm:$0xff]  }
  0x61   :  { %9962 = vmatprep.subr.bf16.mxu1 %v14037_v53  ;;  %v14110_v52 = vld [vmem:[%s21720_s1 + $0xa64] ss:$16 sps:$4 sm:$0xff]   ;;  %v14105_v53 = vld [vmem:[%s21720_s1 + $0x860] ss:$16 sps:$4 sm:$0xff]  }
  0x63   :  { %9922 = vmatpush2.bf16.msra.mxu0 %v14032_v54  ;;  %v14108_v54 = vld [vmem:[%s21720_s1 + $0xa60] ss:$16 sps:$4 sm:$0xff]  }
  0x64   :  { %9963 = vmatpush2.bf16.msra.mxu1 %v14035_v55  ;;  %9923 = vmatprep.subr.bf16.mxu0 %v14040_v56  ;;  %v14113_v55 = vld [vmem:[%s21720_s1 + $0x844] ss:$16 sps:$4 sm:$0xff]  }
  0x65   :  { %9964 = vmatprep.subr.bf16.mxu1 %v14043_v57  ;;  %v14116_v56 = vld [vmem:[%s21720_s1 + $0xa44] ss:$16 sps:$4 sm:$0xff]   ;;  %v14111_v57 = vld [vmem:[%s21720_s1 + $0x840] ss:$16 sps:$4 sm:$0xff]  }
  0x67   :  { %9924 = vmatpush2.bf16.msra.mxu0 %v14038_v58  ;;  %v14114_v58 = vld [vmem:[%s21720_s1 + $0xa40] ss:$16 sps:$4 sm:$0xff]  }
  0x68   :  { %9965 = vmatpush2.bf16.msra.mxu1 %v14041_v59  ;;  %9925 = vmatprep.subr.bf16.mxu0 %v14046_v61  ;;  %v14119_v59 = vld [vmem:[%s21720_s1 + $0x824] ss:$16 sps:$4 sm:$0xff]  }
  0x69   :  { %9966 = vmatprep.subr.bf16.mxu1 %v14049_v62  ;;  %v14122_v61 = vld [vmem:[%s21720_s1 + $0xa24] ss:$16 sps:$4 sm:$0xff]   ;;  %v14117_v62 = vld [vmem:[%s21720_s1 + $0x820] ss:$16 sps:$4 sm:$0xff]  }
  0x6b   :  { %9926 = vmatpush2.bf16.msra.mxu0 %v14044_v63  ;;  %v14120_v63 = vld [vmem:[%s21720_s1 + $0xa20] ss:$16 sps:$4 sm:$0xff]  }
  0x6c   :  { %9967 = vmatpush2.bf16.msra.mxu1 %v14047_v1  ;;  %9927 = vmatprep.subr.bf16.mxu0 %v14052_v2  ;;  %v14125_v1 = vld [vmem:[%s21720_s1 + $0x804] ss:$16 sps:$4 sm:$0xff]  }
  0x6d   :  { %9968 = vmatprep.subr.bf16.mxu1 %v14055_v3  ;;  %v14128_v2 = vld [vmem:[%s21720_s1 + $0xa04] ss:$16 sps:$4 sm:$0xff]   ;;  %v14123_v3 = vld [vmem:[%s21720_s1 + $0x800] ss:$16 sps:$4 sm:$0xff]  }
  0x6f   :  { %9928 = vmatpush2.bf16.msra.mxu0 %v14050_v4  ;;  %v14126_v4 = vld [vmem:[%s21720_s1 + $0xa00] ss:$16 sps:$4 sm:$0xff]  }
  0x70   :  { %9969 = vmatpush2.bf16.msra.mxu1 %v14053_v5  ;;  %9929 = vmatprep.subr.bf16.mxu0 %v14058_v7  ;;  %v14131_v5 = vld [vmem:[%s21720_s1 + $0x9e4] ss:$16 sps:$4 sm:$0xff]  }
  0x71   :  { %9970 = vmatprep.subr.bf16.mxu1 %v14061_v8  ;;  %v14134_v7 = vld [vmem:[%s21720_s1 + $0xbe4] ss:$16 sps:$4 sm:$0xff]   ;;  %v14129_v8 = vld [vmem:[%s21720_s1 + $0x9e0] ss:$16 sps:$4 sm:$0xff]  }
  0x73   :  { %9930 = vmatpush2.bf16.msra.mxu0 %v14056_v9  ;;  %v14132_v9 = vld [vmem:[%s21720_s1 + $0xbe0] ss:$16 sps:$4 sm:$0xff]  }
  0x74   :  { %9971 = vmatpush2.bf16.msra.mxu1 %v14059_v10  ;;  %9931 = vmatprep.subr.bf16.mxu0 %v14064_v11  ;;  %v14137_v10 = vld [vmem:[%s21720_s1 + $0x9c4] ss:$16 sps:$4 sm:$0xff]  }
  0x75   :  { %9972 = vmatprep.subr.bf16.mxu1 %v14067_v12  ;;  %v14140_v11 = vld [vmem:[%s21720_s1 + $0xbc4] ss:$16 sps:$4 sm:$0xff]   ;;  %v14135_v12 = vld [vmem:[%s21720_s1 + $0x9c0] ss:$16 sps:$4 sm:$0xff]  }
  0x77   :  { %9932 = vmatpush2.bf16.msra.mxu0 %v14062_v14  ;;  %v14138_v14 = vld [vmem:[%s21720_s1 + $0xbc0] ss:$16 sps:$4 sm:$0xff]  }
  0x78   :  { %9973 = vmatpush2.bf16.msra.mxu1 %v14065_v15  ;;  %9933 = vmatprep.subr.bf16.mxu0 %v14070_v16  ;;  %v14143_v15 = vld [vmem:[%s21720_s1 + $0x9a4] ss:$16 sps:$4 sm:$0xff]  }
  0x79   :  { %9974 = vmatprep.subr.bf16.mxu1 %v14073_v19  ;;  %v14146_v16 = vld [vmem:[%s21720_s1 + $0xba4] ss:$16 sps:$4 sm:$0xff]   ;;  %v14141_v19 = vld [vmem:[%s21720_s1 + $0x9a0] ss:$16 sps:$4 sm:$0xff]  }
  0x7b   :  { %9934 = vmatpush2.bf16.msra.mxu0 %v14068_v20  ;;  %v14144_v20 = vld [vmem:[%s21720_s1 + $0xba0] ss:$16 sps:$4 sm:$0xff]  }
  0x7c   :  { %9975 = vmatpush2.bf16.msra.mxu1 %v14071_v21  ;;  %9935 = vmatprep.subr.bf16.mxu0 %v14076_v22  ;;  %v14149_v21 = vld [vmem:[%s21720_s1 + $0x984] ss:$16 sps:$4 sm:$0xff]  }
  0x7d   :  { %9976 = vmatprep.subr.bf16.mxu1 %v14079_v24  ;;  %v14152_v22 = vld [vmem:[%s21720_s1 + $0xb84] ss:$16 sps:$4 sm:$0xff]   ;;  %v14147_v24 = vld [vmem:[%s21720_s1 + $0x980] ss:$16 sps:$4 sm:$0xff]  }
  0x7f   :  { %9936 = vmatpush2.bf16.msra.mxu0 %v14074_v25  ;;  %v14150_v25 = vld [vmem:[%s21720_s1 + $0xb80] ss:$16 sps:$4 sm:$0xff]  }
  0x80   :  { %9977 = vmatpush2.bf16.msra.mxu1 %v14077_v27  ;;  %9987 = vmatprep.subr.bf16.mxu0 %v14083_v28  ;;  %v14155_v27 = vld [vmem:[%s21720_s1 + $0x964] ss:$16 sps:$4 sm:$0xff]  }
  0x81   :  { %10028 = vmatprep.subr.bf16.mxu1 %v14086_v29  ;;  %v14158_v28 = vld [vmem:[%s21720_s1 + $0xb64] ss:$16 sps:$4 sm:$0xff]   ;;  %v14153_v29 = vld [vmem:[%s21720_s1 + $0x960] ss:$16 sps:$4 sm:$0xff]  }
  0x82   :  { %9938 = vmatmul.mubr.bf16.vlgmr.msra.gmra.mxu0 %v16758_v26 }
  0x83   :  { %9979 = vmatmul.mubr.bf16.vlgmr.msra.gmra.mxu1 %v16771_v6  ;;  %9988 = vmatpush1.bf16.msra.mxu0 %v14081_v30  ;;  %v14156_v30 = vld [vmem:[%s21720_s1 + $0xb60] ss:$16 sps:$4 sm:$0xff]  }
  0x84   :  { %10029 = vmatpush1.bf16.msra.mxu1 %v14084_v31  ;;  %9989 = vmatprep.subr.bf16.mxu0 %v14089_v33  ;;  %v14161_v31 = vld [vmem:[%s21720_s1 + $0x944] ss:$16 sps:$4 sm:$0xff]  }
  0x85   :  { %10030 = vmatprep.subr.bf16.mxu1 %v14092_v34  ;;  %10019 = vmatprep.mubr.bf16.mxu0 %v16811_v41  ;;  %v14164_v33 = vld [vmem:[%s21720_s1 + $0xb44] ss:$16 sps:$4 sm:$0xff]   ;;  %v1675_v34 = vcombine.high %v16782_v32, %v16782_v32 }
  0x86   :  { %10060 = vmatprep.mubr.bf16.mxu1 %v16816_v43  ;;  %v14170_v32 = vld [vmem:[%s21720_s1 + $0xb24] ss:$16 sps:$4 sm:$0xff]  }
  0x87   :  { %9990 = vmatpush1.bf16.msra.mxu0 %v14087_v37  ;;  %v14162_v37 = vld [vmem:[%s21720_s1 + $0xb40] ss:$16 sps:$4 sm:$0xff]  }
  0x88   :  { %10031 = vmatpush1.bf16.msra.mxu1 %v14090_v38  ;;  %9991 = vmatprep.subr.bf16.mxu0 %v14095_v39  ;;  %v14167_v38 = vld [vmem:[%s21720_s1 + $0x924] ss:$16 sps:$4 sm:$0xff]   ;;  %v16966_v39 = vrot.slane %v1675_v34, %v16469_v49  ;;  %v14228_v34 = vld [vmem:[%s21720_s1 + $0xfe0] ss:$16 sps:$4 sm:$0xff]  }
  0x89   :  { %10032 = vmatprep.subr.bf16.mxu1 %v14098_v40  ;;  %v14165_v40 = vld [vmem:[%s21720_s1 + $0x920] ss:$16 sps:$4 sm:$0xff]  }
  0x8b   :  { %9992 = vmatpush1.bf16.msra.mxu0 %v14093_v44  ;;  %v14168_v44 = vld [vmem:[%s21720_s1 + $0xb20] ss:$16 sps:$4 sm:$0xff]  }
  0x8c   :  { %10033 = vmatpush1.bf16.msra.mxu1 %v14096_v45  ;;  %9993 = vmatprep.subr.bf16.mxu0 %v14101_v46  ;;  %v14173_v45 = vld [vmem:[%s21720_s1 + $0x904] ss:$16 sps:$4 sm:$0xff]  }
  0x8d   :  { %10034 = vmatprep.subr.bf16.mxu1 %v14104_v47  ;;  %v14176_v46 = vld [vmem:[%s21720_s1 + $0xb04] ss:$16 sps:$4 sm:$0xff]   ;;  %v1691_v47 = vcombine.high %v16966_v39, %v16966_v39 }
  0x8f   :  { %9994 = vmatpush1.bf16.msra.mxu0 %v14099_v48  ;;  %v14171_v48 = vld [vmem:[%s21720_s1 + $0x900] ss:$16 sps:$4 sm:$0xff]  }
  0x90   :  { %10035 = vmatpush1.bf16.msra.mxu1 %v14102_v50  ;;  %9995 = vmatprep.subr.bf16.mxu0 %v14107_v51  ;;  %v16987_v50 = vrot.slane %v16792_v35, %v16469_v49  ;;  %v14174_v51 = vld [vmem:[%s21720_s1 + $0xb00] ss:$16 sps:$4 sm:$0xff]  }
  0x91   :  { %10036 = vmatprep.subr.bf16.mxu1 %v14110_v52  ;;  %v14179_v52 = vld [vmem:[%s21720_s1 + $0xce4] ss:$16 sps:$4 sm:$0xff]  }
  0x92   :  { %v17003_v35 = vcombine.high %v16987_v50, %v16987_v50 }
  0x93   :  { %9996 = vmatpush1.bf16.msra.mxu0 %v14105_v53  ;;  %v14182_v53 = vld [vmem:[%s21720_s1 + $0xee4] ss:$16 sps:$4 sm:$0xff]  }
  0x94   :  { %10037 = vmatpush1.bf16.msra.mxu1 %v14108_v54  ;;  %9997 = vmatprep.subr.bf16.mxu0 %v14113_v55  ;;  %v16999_v54 = vrot.slane %v1691_v47, %v16469_v49  ;;  %v14177_v55 = vld [vmem:[%s21720_s1 + $0xce0] ss:$16 sps:$4 sm:$0xff]   ;;  %v14245_v47 = vld [vmem:[%s21720_s1 + $0xd84] ss:$16 sps:$4 sm:$0xff]  }
  0x95   :  { %10038 = vmatprep.subr.bf16.mxu1 %v14116_v56  ;;  %v14180_v56 = vld [vmem:[%s21720_s1 + $0xee0] ss:$16 sps:$4 sm:$0xff]  }
  0x97   :  { %9998 = vmatpush1.bf16.msra.mxu0 %v14111_v57  ;;  %v14185_v57 = vld [vmem:[%s21720_s1 + $0xcc4] ss:$16 sps:$4 sm:$0xff]  }
  0x98   :  { %10039 = vmatpush1.bf16.msra.mxu1 %v14114_v58  ;;  %9999 = vmatprep.subr.bf16.mxu0 %v14119_v59  ;;  %v14188_v58 = vld [vmem:[%s21720_s1 + $0xec4] ss:$16 sps:$4 sm:$0xff]   ;;  %v17019_v59 = vcombine.high %v16999_v54, %v16999_v54 }
  0x99   :  { %10040 = vmatprep.subr.bf16.mxu1 %v14122_v61  ;;  %v14183_v61 = vld [vmem:[%s21720_s1 + $0xcc0] ss:$16 sps:$4 sm:$0xff]  }
  0x9b   :  { %10000 = vmatpush1.bf16.msra.mxu0 %v14117_v62  ;;  %v14186_v62 = vld [vmem:[%s21720_s1 + $0xec0] ss:$16 sps:$4 sm:$0xff]  }
  0x9c   :  { %10041 = vmatpush1.bf16.msra.mxu1 %v14120_v63  ;;  %10001 = vmatprep.subr.bf16.mxu0 %v14125_v1  ;;  %v14191_v63 = vld [vmem:[%s21720_s1 + $0xca4] ss:$16 sps:$4 sm:$0xff]  }
  0x9d   :  { %10042 = vmatprep.subr.bf16.mxu1 %v14128_v2  ;;  %v14194_v1 = vld [vmem:[%s21720_s1 + $0xea4] ss:$16 sps:$4 sm:$0xff]   ;;  %v14189_v2 = vld [vmem:[%s21720_s1 + $0xca0] ss:$16 sps:$4 sm:$0xff]  }
  0x9f   :  { %10002 = vmatpush1.bf16.msra.mxu0 %v14123_v3  ;;  %v14192_v3 = vld [vmem:[%s21720_s1 + $0xea0] ss:$16 sps:$4 sm:$0xff]  }
  0xa0   :  { %10043 = vmatpush1.bf16.msra.mxu1 %v14126_v4  ;;  %10003 = vmatprep.subr.bf16.mxu0 %v14131_v5  ;;  %v14197_v4 = vld [vmem:[%s21720_s1 + $0xc84] ss:$16 sps:$4 sm:$0xff]  }
  0xa1   :  { %10044 = vmatprep.subr.bf16.mxu1 %v14134_v7  ;;  %v14200_v5 = vld [vmem:[%s21720_s1 + $0xe84] ss:$16 sps:$4 sm:$0xff]   ;;  %v14195_v7 = vld [vmem:[%s21720_s1 + $0xc80] ss:$16 sps:$4 sm:$0xff]  }
  0xa3   :  { %10004 = vmatpush2.bf16.msra.mxu0 %v14129_v8  ;;  %v14198_v8 = vld [vmem:[%s21720_s1 + $0xe80] ss:$16 sps:$4 sm:$0xff]  }
  0xa4   :  { %10045 = vmatpush2.bf16.msra.mxu1 %v14132_v9  ;;  %10005 = vmatprep.subr.bf16.mxu0 %v14137_v10  ;;  %v14203_v9 = vld [vmem:[%s21720_s1 + $0xc64] ss:$16 sps:$4 sm:$0xff]  }
  0xa5   :  { %10046 = vmatprep.subr.bf16.mxu1 %v14140_v11  ;;  %v14206_v10 = vld [vmem:[%s21720_s1 + $0xe64] ss:$16 sps:$4 sm:$0xff]   ;;  %v14201_v11 = vld [vmem:[%s21720_s1 + $0xc60] ss:$16 sps:$4 sm:$0xff]  }
  0xa7   :  { %10006 = vmatpush2.bf16.msra.mxu0 %v14135_v12  ;;  %v14204_v12 = vld [vmem:[%s21720_s1 + $0xe60] ss:$16 sps:$4 sm:$0xff]  }
  0xa8   :  { %10047 = vmatpush2.bf16.msra.mxu1 %v14138_v14  ;;  %10007 = vmatprep.subr.bf16.mxu0 %v14143_v15  ;;  %v14209_v14 = vld [vmem:[%s21720_s1 + $0xc44] ss:$16 sps:$4 sm:$0xff]  }
  0xa9   :  { %10048 = vmatprep.subr.bf16.mxu1 %v14146_v16  ;;  %v14212_v15 = vld [vmem:[%s21720_s1 + $0xe44] ss:$16 sps:$4 sm:$0xff]   ;;  %v14207_v16 = vld [vmem:[%s21720_s1 + $0xc40] ss:$16 sps:$4 sm:$0xff]  }
  0xab   :  { %10008 = vmatpush2.bf16.msra.mxu0 %v14141_v19  ;;  %v14210_v19 = vld [vmem:[%s21720_s1 + $0xe40] ss:$16 sps:$4 sm:$0xff]  }
  0xac   :  { %10049 = vmatpush2.bf16.msra.mxu1 %v14144_v20  ;;  %10009 = vmatprep.subr.bf16.mxu0 %v14149_v21  ;;  %v14215_v20 = vld [vmem:[%s21720_s1 + $0xc24] ss:$16 sps:$4 sm:$0xff]  }
  0xad   :  { %10050 = vmatprep.subr.bf16.mxu1 %v14152_v22  ;;  %v14218_v21 = vld [vmem:[%s21720_s1 + $0xe24] ss:$16 sps:$4 sm:$0xff]   ;;  %v14213_v22 = vld [vmem:[%s21720_s1 + $0xc20] ss:$16 sps:$4 sm:$0xff]  }
  0xaf   :  { %10010 = vmatpush2.bf16.msra.mxu0 %v14147_v24  ;;  %v14216_v24 = vld [vmem:[%s21720_s1 + $0xe20] ss:$16 sps:$4 sm:$0xff]  }
  0xb0   :  { %10051 = vmatpush2.bf16.msra.mxu1 %v14150_v25  ;;  %10011 = vmatprep.subr.bf16.mxu0 %v14155_v27  ;;  %v14221_v25 = vld [vmem:[%s21720_s1 + $0xc04] ss:$16 sps:$4 sm:$0xff]  }
  0xb1   :  { %10052 = vmatprep.subr.bf16.mxu1 %v14158_v28  ;;  %v14224_v27 = vld [vmem:[%s21720_s1 + $0xe04] ss:$16 sps:$4 sm:$0xff]   ;;  %v14219_v28 = vld [vmem:[%s21720_s1 + $0xc00] ss:$16 sps:$4 sm:$0xff]  }
  0xb3   :  { %10012 = vmatpush2.bf16.msra.mxu0 %v14153_v29  ;;  %v14222_v29 = vld [vmem:[%s21720_s1 + $0xe00] ss:$16 sps:$4 sm:$0xff]  }
  0xb4   :  { %10053 = vmatpush2.bf16.msra.mxu1 %v14156_v30  ;;  %10013 = vmatprep.subr.bf16.mxu0 %v14161_v31  ;;  %v14227_v30 = vld [vmem:[%s21720_s1 + $0xde4] ss:$16 sps:$4 sm:$0xff]  }
  0xb5   :  { %10054 = vmatprep.subr.bf16.mxu1 %v14164_v33  ;;  %v14230_v31 = vld [vmem:[%s21720_s1 + $0xfe4] ss:$16 sps:$4 sm:$0xff]   ;;  %v14225_v33 = vld [vmem:[%s21720_s1 + $0xde0] ss:$16 sps:$4 sm:$0xff]  }
  0xb7   :  { %10014 = vmatpush2.bf16.msra.mxu0 %v14159_v36  ;;  %v14233_v36 = vld [vmem:[%s21720_s1 + $0xdc4] ss:$16 sps:$4 sm:$0xff]  }
  0xb8   :  { %10055 = vmatpush2.bf16.msra.mxu1 %v14162_v37  ;;  %10015 = vmatprep.subr.bf16.mxu0 %v14167_v38  ;;  %v14236_v37 = vld [vmem:[%s21720_s1 + $0xfc4] ss:$16 sps:$4 sm:$0xff]   ;;  %v14231_v38 = vld [vmem:[%s21720_s1 + $0xdc0] ss:$16 sps:$4 sm:$0xff]  }
  0xb9   :  { %10056 = vmatprep.subr.bf16.mxu1 %v14170_v32  ;;  %v14234_v32 = vld [vmem:[%s21720_s1 + $0xfc0] ss:$16 sps:$4 sm:$0xff]  }
  0xbb   :  { %10016 = vmatpush2.bf16.msra.mxu0 %v14165_v40  ;;  %v14239_v40 = vld [vmem:[%s21720_s1 + $0xda4] ss:$16 sps:$4 sm:$0xff]  }
  0xbc   :  { %10057 = vmatpush2.bf16.msra.mxu1 %v14168_v44  ;;  %10017 = vmatprep.subr.bf16.mxu0 %v14173_v45  ;;  %v14242_v44 = vld [vmem:[%s21720_s1 + $0xfa4] ss:$16 sps:$4 sm:$0xff]   ;;  %v14237_v45 = vld [vmem:[%s21720_s1 + $0xda0] ss:$16 sps:$4 sm:$0xff]  }
  0xbd   :  { %10058 = vmatprep.subr.bf16.mxu1 %v14176_v46  ;;  %v14240_v46 = vld [vmem:[%s21720_s1 + $0xfa0] ss:$16 sps:$4 sm:$0xff]  }
  0xbf   :  { %10018 = vmatpush2.bf16.msra.mxu0 %v14171_v48  ;;  %v14248_v48 = vld [vmem:[%s21720_s1 + $0xf84] ss:$16 sps:$4 sm:$0xff]  }
  0xc0   :  { %10059 = vmatpush2.bf16.msra.mxu1 %v14174_v51  ;;  %10069 = vmatprep.subr.bf16.mxu0 %v14179_v52  ;;  %v14243_v51 = vld [vmem:[%s21720_s1 + $0xd80] ss:$16 sps:$4 sm:$0xff]  }
  0xc1   :  { %10110 = vmatprep.subr.bf16.mxu1 %v14182_v53  ;;  %v14246_v52 = vld [vmem:[%s21720_s1 + $0xf80] ss:$16 sps:$4 sm:$0xff]   ;;  %v14251_v53 = vld [vmem:[%s21720_s1 + $0xd64] ss:$16 sps:$4 sm:$0xff]  }
  0xc2   :  { %10020 = vmatmul.mubr.bf16.vlgmr.msra.gmra.mxu0 %v16987_v50 }
  0xc3   :  { %10061 = vmatmul.mubr.bf16.vlgmr.msra.gmra.mxu1 %v17003_v35  ;;  %10070 = vmatpush1.bf16.msra.mxu0 %v14177_v55  ;;  %v14254_v55 = vld [vmem:[%s21720_s1 + $0xf64] ss:$16 sps:$4 sm:$0xff]  }
  0xc4   :  { %10111 = vmatpush1.bf16.msra.mxu1 %v14180_v56  ;;  %10071 = vmatprep.subr.bf16.mxu0 %v14185_v57  ;;  %v14249_v56 = vld [vmem:[%s21720_s1 + $0xd60] ss:$16 sps:$4 sm:$0xff]  }
  0xc5   :  { %10112 = vmatprep.subr.bf16.mxu1 %v14188_v58  ;;  %10101 = vmatprep.mubr.bf16.mxu0 %v16999_v54  ;;  %v14252_v57 = vld [vmem:[%s21720_s1 + $0xf60] ss:$16 sps:$4 sm:$0xff]   ;;  %v14257_v58 = vld [vmem:[%s21720_s1 + $0xd44] ss:$16 sps:$4 sm:$0xff]  }
  0xc6   :  { %10142 = vmatprep.mubr.bf16.mxu1 %v17019_v59 }
  0xc7   :  { %10072 = vmatpush1.bf16.msra.mxu0 %v14183_v61  ;;  %v14260_v61 = vld [vmem:[%s21720_s1 + $0xf44] ss:$16 sps:$4 sm:$0xff]  }
  0xc8   :  { %10113 = vmatpush1.bf16.msra.mxu1 %v14186_v62  ;;  %10073 = vmatprep.subr.bf16.mxu0 %v14191_v63  ;;  %v14255_v62 = vld [vmem:[%s21720_s1 + $0xd40] ss:$16 sps:$4 sm:$0xff]  }
  0xc9   :  { %10114 = vmatprep.subr.bf16.mxu1 %v14194_v1  ;;  %v14258_v63 = vld [vmem:[%s21720_s1 + $0xf40] ss:$16 sps:$4 sm:$0xff]  }
  0xca   :  { %v17178_v1 = vld [vmem:[%s21719_s0 + $0x10] sm:$0xff] }
  0xcb   :  { %10074 = vmatpush1.bf16.msra.mxu0 %v14189_v2  ;;  %v14263_v2 = vld [vmem:[%s21720_s1 + $0xd24] ss:$16 sps:$4 sm:$0xff]  }
  0xcc   :  { %10115 = vmatpush1.bf16.msra.mxu1 %v14192_v3  ;;  %10075 = vmatprep.subr.bf16.mxu0 %v14197_v4  ;;  %v14266_v3 = vld [vmem:[%s21720_s1 + $0xf24] ss:$16 sps:$4 sm:$0xff]   ;;  %v17188_v4 = vrot.slane %v17178_v1, %v16469_v49 }
  0xcd   :  { %10116 = vmatprep.subr.bf16.mxu1 %v14200_v5  ;;  %v14261_v5 = vld [vmem:[%s21720_s1 + $0xd20] ss:$16 sps:$4 sm:$0xff]  }
  0xcf   :  { %10076 = vmatpush1.bf16.msra.mxu0 %v14195_v7  ;;  %v14264_v7 = vld [vmem:[%s21720_s1 + $0xf20] ss:$16 sps:$4 sm:$0xff]  }
  0xd0   :  { %10117 = vmatpush1.bf16.msra.mxu1 %v14198_v8  ;;  %10077 = vmatprep.subr.bf16.mxu0 %v14203_v9  ;;  %v14269_v8 = vld [vmem:[%s21720_s1 + $0xd04] ss:$16 sps:$4 sm:$0xff]  }
  0xd1   :  { %10118 = vmatprep.subr.bf16.mxu1 %v14206_v10  ;;  %v14272_v9 = vld [vmem:[%s21720_s1 + $0xf04] ss:$16 sps:$4 sm:$0xff]   ;;  %v14267_v10 = vld [vmem:[%s21720_s1 + $0xd00] ss:$16 sps:$4 sm:$0xff]  }
  0xd3   :  { %10078 = vmatpush1.bf16.msra.mxu0 %v14201_v11  ;;  %v1739_v11 = vcombine.high %v17188_v4, %v17188_v4 }
  0xd4   :  { %10119 = vmatpush1.bf16.msra.mxu1 %v14204_v12  ;;  %10079 = vmatprep.subr.bf16.mxu0 %v14209_v14  ;;  %v14270_v12 = vld [vmem:[%s21720_s1 + $0xf00] ss:$16 sps:$4 sm:$0xff]  }
  0xd5   :  { %10120 = vmatprep.subr.bf16.mxu1 %v14212_v15  ;;  %v1597_v14 = vld [vmem:[%s21721_s2] sm:$0xf]  ;;  %v17215_v15 = vrot.slane %v16966_v39, %v16469_v49 }
  0xd7   :  { %10080 = vmatpush1.bf16.msra.mxu0 %v14207_v16  ;;  %v1601_v16 = vsub.s32 0, %v16451_v42  ;;  %v17230_v39 = vcombine.high %v17215_v15, %v17215_v15 }
  0xd8   :  { %10121 = vmatpush1.bf16.msra.mxu1 %v14210_v19  ;;  %10081 = vmatprep.subr.bf16.mxu0 %v14215_v20  ;;  %v14276_v19 = vld [vmem:[%s21720_s1 + $0x10e4] ss:$16 sps:$4 sm:$0xff]  }
  0xd9   :  { %10122 = vmatprep.subr.bf16.mxu1 %v14218_v21  ;;  %v14279_v20 = vld [vmem:[%s21720_s1 + $0x12e4] ss:$16 sps:$4 sm:$0xff]   ;;  %v1605_v21 = vsub.s32 1, %v16451_v42 }
  0xdb   :  { %10082 = vmatpush1.bf16.msra.mxu0 %v14213_v22  ;;  %v17226_v22 = vrot.slane %v1739_v11, %v16469_v49  ;;  %v14307_v11 = vld [vmem:[%s21720_s1 + $0x1240] ss:$16 sps:$4 sm:$0xff]  }
  0xdc   :  { %10123 = vmatpush1.bf16.msra.mxu1 %v14216_v24  ;;  %10083 = vmatprep.subr.bf16.mxu0 %v14221_v25  ;;  %v14274_v24 = vld [vmem:[%s21720_s1 + $0x10e0] ss:$16 sps:$4 sm:$0xff]  }
  0xdd   :  { %10124 = vmatprep.subr.bf16.mxu1 %v14224_v27  ;;  %v14277_v25 = vld [vmem:[%s21720_s1 + $0x12e0] ss:$16 sps:$4 sm:$0xff]   ;;  %v1602_v27 = vrot.slane %v1597_v14, %v1601_v16 }
  0xde   :  { %v14310_v16 = vld [vmem:[%s21720_s1 + $0x1020] ss:$16 sps:$4 sm:$0xff]  }
  0xdf   :  { %10084 = vmatpush1.bf16.msra.mxu0 %v14219_v28  ;;  %v14282_v28 = vld [vmem:[%s21720_s1 + $0x10c4] ss:$16 sps:$4 sm:$0xff]  }
  0xe0   :  { %10125 = vmatpush1.bf16.msra.mxu1 %v14222_v29  ;;  %10085 = vmatprep.subr.bf16.mxu0 %v14227_v30  ;;  %v14285_v29 = vld [vmem:[%s21720_s1 + $0x12c4] ss:$16 sps:$4 sm:$0xff]   ;;  %v1606_v30 = vrot.slane %v1597_v14, %v1605_v21 }
  0xe1   :  { %10126 = vmatprep.subr.bf16.mxu1 %v14230_v31  ;;  %v17246_v31 = vcombine.high %v17226_v22, %v17226_v22  ;;  %v14315_v14 = vld [vmem:[%s21720_s1 + $0x1224] ss:$16 sps:$4 sm:$0xff]  }
  0xe2   :  { %v14321_v21 = vld [vmem:[%s21720_s1 + $0x1204] ss:$16 sps:$4 sm:$0xff]  }
  0xe3   :  { %10086 = vmatpush2.bf16.msra.mxu0 %v14225_v33 }
  0xe4   :  { %10127 = vmatpush2.bf16.msra.mxu1 %v14228_v34  ;;  %10087 = vmatprep.subr.bf16.mxu0 %v14233_v36  ;;  %v14280_v36 = vld [vmem:[%s21720_s1 + $0x10c0] ss:$16 sps:$4 sm:$0xff]  }
  0xe5   :  { %10128 = vmatprep.subr.bf16.mxu1 %v14236_v37  ;;  %v14283_v37 = vld [vmem:[%s21720_s1 + $0x12c0] ss:$16 sps:$4 sm:$0xff]  }
  0xe7   :  { %10088 = vmatpush2.bf16.msra.mxu0 %v14231_v38 }
  0xe8   :  { %10129 = vmatpush2.bf16.msra.mxu1 %v14234_v32  ;;  %10089 = vmatprep.subr.bf16.mxu0 %v14239_v40 }
  0xe9   :  { %10130 = vmatprep.subr.bf16.mxu1 %v14242_v44  ;;  %v14288_v44 = vld [vmem:[%s21720_s1 + $0x10a4] ss:$16 sps:$4 sm:$0xff]  }
  0xeb   :  { %10090 = vmatpush2.bf16.msra.mxu0 %v14237_v45  ;;  %v14291_v45 = vld [vmem:[%s21720_s1 + $0x12a4] ss:$16 sps:$4 sm:$0xff]  }
  0xec   :  { %10131 = vmatpush2.bf16.msra.mxu1 %v14240_v46  ;;  %10091 = vmatprep.subr.bf16.mxu0 %v14245_v47 }
  0xed   :  { %10132 = vmatprep.subr.bf16.mxu1 %v14248_v48  ;;  %v14286_v48 = vld [vmem:[%s21720_s1 + $0x10a0] ss:$16 sps:$4 sm:$0xff]  }
  0xef   :  { %10092 = vmatpush2.bf16.msra.mxu0 %v14243_v51  ;;  %v14289_v51 = vld [vmem:[%s21720_s1 + $0x12a0] ss:$16 sps:$4 sm:$0xff]  }
  0xf0   :  { %10133 = vmatpush2.bf16.msra.mxu1 %v14246_v52  ;;  %10093 = vmatprep.subr.bf16.mxu0 %v14251_v53 }
  0xf1   :  { %10134 = vmatprep.subr.bf16.mxu1 %v14254_v55 }
  0xf3   :  { %10094 = vmatpush2.bf16.msra.mxu0 %v14249_v56 }
  0xf4   :  { %10135 = vmatpush2.bf16.msra.mxu1 %v14252_v57  ;;  %10095 = vmatprep.subr.bf16.mxu0 %v14257_v58  ;;  %v14294_v58 = vld [vmem:[%s21720_s1 + $0x1084] ss:$16 sps:$4 sm:$0xff]  }
  0xf5   :  { %10136 = vmatprep.subr.bf16.mxu1 %v14260_v61  ;;  %v14297_v61 = vld [vmem:[%s21720_s1 + $0x1284] ss:$16 sps:$4 sm:$0xff]  }
  0xf7   :  { %10096 = vmatpush2.bf16.msra.mxu0 %v14255_v62  ;;  %v14292_v62 = vld [vmem:[%s21720_s1 + $0x1080] ss:$16 sps:$4 sm:$0xff]  }
  0xf8   :  { %10137 = vmatpush2.bf16.msra.mxu1 %v14258_v63  ;;  %10097 = vmatprep.subr.bf16.mxu0 %v14263_v2  ;;  %v14295_v63 = vld [vmem:[%s21720_s1 + $0x1280] ss:$16 sps:$4 sm:$0xff]   ;;  %v14300_v2 = vld [vmem:[%s21720_s1 + $0x1064] ss:$16 sps:$4 sm:$0xff]  }
  0xf9   :  { %10138 = vmatprep.subr.bf16.mxu1 %v14266_v3  ;;  %v14303_v3 = vld [vmem:[%s21720_s1 + $0x1264] ss:$16 sps:$4 sm:$0xff]  }
  0xfb   :  { %10098 = vmatpush2.bf16.msra.mxu0 %v14261_v5  ;;  %v14298_v5 = vld [vmem:[%s21720_s1 + $0x1060] ss:$16 sps:$4 sm:$0xff]  }
  0xfc   :  { %10139 = vmatpush2.bf16.msra.mxu1 %v14264_v7  ;;  %10099 = vmatprep.subr.bf16.mxu0 %v14269_v8  ;;  %v14301_v7 = vld [vmem:[%s21720_s1 + $0x1260] ss:$16 sps:$4 sm:$0xff]   ;;  %v14306_v8 = vld [vmem:[%s21720_s1 + $0x1044] ss:$16 sps:$4 sm:$0xff]  }
  0xfd   :  { %10140 = vmatprep.subr.bf16.mxu1 %v14272_v9  ;;  %v14309_v9 = vld [vmem:[%s21720_s1 + $0x1244] ss:$16 sps:$4 sm:$0xff]  }
  0xff   :  { %10100 = vmatpush2.bf16.msra.mxu0 %v14267_v10  ;;  %v14304_v10 = vld [vmem:[%s21720_s1 + $0x1040] ss:$16 sps:$4 sm:$0xff]  }
 0x100   :  { %10141 = vmatpush2.bf16.msra.mxu1 %v14270_v12  ;;  %10151 = vmatprep.subr.bf16.mxu0 %v14276_v19  ;;  %v14312_v12 = vld [vmem:[%s21720_s1 + $0x1024] ss:$16 sps:$4 sm:$0xff]   ;;  %v14313_v19 = vld [vmem:[%s21720_s1 + $0x1220] ss:$16 sps:$4 sm:$0xff]  }
 0x101   :  { %10192 = vmatprep.subr.bf16.mxu1 %v14279_v20  ;;  %v14318_v20 = vld [vmem:[%s21720_s1 + $0x1004] ss:$16 sps:$4 sm:$0xff]  }
 0x102   :  { %v9857_v33 = vpop.f32.mrf.mxu0  ;;  %10102 = vmatmul.mubr.bf16.vlgmr.msra.gmra.mxu0 %v17215_v15 }
 0x103   :  { %v9898_v34 = vpop.f32.mrf.mxu1  ;;  %10143 = vmatmul.mubr.bf16.vlgmr.msra.gmra.mxu1 %v17230_v39  ;;  %v9858_v38 = vadd.f32 %v9857_v33, %v1602_v27  ;;  %10152 = vmatpush1.bf16.msra.mxu0 %v14274_v24  ;;  %v14316_v24 = vld [vmem:[%s21720_s1 + $0x1000] ss:$16 sps:$4 sm:$0xff]   ;;  %v14324_v27 = vld [vmem:[%s21720_s1 + $0x11e4] ss:$16 sps:$4 sm:$0xff]  }
 0x104   :  { %10193 = vmatpush1.bf16.msra.mxu1 %v14277_v25  ;;  %v9859_v32 = vpop.f32.mrf.mxu0  ;;  %10153 = vmatprep.subr.bf16.mxu0 %v14282_v28  ;;  %v14319_v25 = vld [vmem:[%s21720_s1 + $0x1200] ss:$16 sps:$4 sm:$0xff]   ;;  %v14327_v28 = vld [vmem:[%s21720_s1 + $0x13e4] ss:$16 sps:$4 sm:$0xff]  }
 0x105   :  { %v9900_v40 = vpop.f32.mrf.mxu1  ;;  %10194 = vmatprep.subr.bf16.mxu1 %v14285_v29  ;;  %v17262_v46 = vadd.f32 %v9898_v34, %v9858_v38  ;;  %v9860_v47 = vadd.f32 %v9859_v32, %v1606_v30  ;;  %10183 = vmatprep.mubr.bf16.mxu0 %v17226_v22  ;;  %v14322_v29 = vld [vmem:[%s21720_s1 + $0x11e0] ss:$16 sps:$4 sm:$0xff]   ;;  %v14330_v33 = vld [vmem:[%s21720_s1 + $0x11c4] ss:$16 sps:$4 sm:$0xff]  }
 0x106   :  { %10224 = vmatprep.mubr.bf16.mxu1 %v17246_v31  ;;  %v9861_v52 = vpop.f32.mrf.mxu0  ;;  %v14325_v30 = vld [vmem:[%s21720_s1 + $0x13e0] ss:$16 sps:$4 sm:$0xff]   ;;  %v14333_v34 = vld [vmem:[%s21720_s1 + $0x13c4] ss:$16 sps:$4 sm:$0xff]  }
 0x107   :  { %v9902_v53 = vpop.f32.mrf.mxu1  ;;  %v17272_v55 = vadd.f32 %v9900_v40, %v9860_v47  ;;  %10154 = vmatpush1.bf16.msra.mxu0 %v14280_v36  ;;  %v14328_v36 = vld [vmem:[%s21720_s1 + $0x11c0] ss:$16 sps:$4 sm:$0xff]   ;;  %v14336_v38 = vld [vmem:[%s21720_s1 + $0x11a4] ss:$16 sps:$4 sm:$0xff]  }
 0x108   :  { %10195 = vmatpush1.bf16.msra.mxu1 %v14283_v37  ;;  %v9862_v56 = vpop.f32.mrf.mxu0  ;;  %10155 = vmatprep.subr.bf16.mxu0 %v14288_v44  ;;  %v14331_v37 = vld [vmem:[%s21720_s1 + $0x13c0] ss:$16 sps:$4 sm:$0xff]   ;;  %v14339_v32 = vld [vmem:[%s21720_s1 + $0x13a4] ss:$16 sps:$4 sm:$0xff]  }
 0x109   :  { %v9903_v57 = vpop.f32.mrf.mxu1  ;;  %10196 = vmatprep.subr.bf16.mxu1 %v14291_v45  ;;  %v14334_v40 = vld [vmem:[%s21720_s1 + $0x11a0] ss:$16 sps:$4 sm:$0xff]   ;;  %v14342_v45 = vld [vmem:[%s21720_s1 + $0x1184] ss:$16 sps:$4 sm:$0xff]  }
 0x10a   :  { %v14337_v44 = vld [vmem:[%s21720_s1 + $0x13a0] ss:$16 sps:$4 sm:$0xff]   ;;  %v14345_v47 = vld [vmem:[%s21720_s1 + $0x1384] ss:$16 sps:$4 sm:$0xff]  }
 0x10b   :  { %10156 = vmatpush1.bf16.msra.mxu0 %v14286_v48  ;;  %v14340_v48 = vld [vmem:[%s21720_s1 + $0x1180] ss:$16 sps:$4 sm:$0xff]   ;;  %v14348_v52 = vld [vmem:[%s21720_s1 + $0x1164] ss:$16 sps:$4 sm:$0xff]  }
 0x10c   :  { %10197 = vmatpush1.bf16.msra.mxu1 %v14289_v51  ;;  %10157 = vmatprep.subr.bf16.mxu0 %v14294_v58  ;;  %v14343_v51 = vld [vmem:[%s21720_s1 + $0x1380] ss:$16 sps:$4 sm:$0xff]   ;;  %v14351_v53 = vld [vmem:[%s21720_s1 + $0x1364] ss:$16 sps:$4 sm:$0xff]  }
 0x10d   :  { %10198 = vmatprep.subr.bf16.mxu1 %v14297_v61  ;;  %v14346_v56 = vld [vmem:[%s21720_s1 + $0x1160] ss:$16 sps:$4 sm:$0xff]   ;;  %v14354_v58 = vld [vmem:[%s21720_s1 + $0x1144] ss:$16 sps:$4 sm:$0xff]  }
 0x10e   :  { %v14349_v57 = vld [vmem:[%s21720_s1 + $0x1360] ss:$16 sps:$4 sm:$0xff]   ;;  %v14357_v61 = vld [vmem:[%s21720_s1 + $0x1344] ss:$16 sps:$4 sm:$0xff]  }
 0x10f   :  { %10158 = vmatpush1.bf16.msra.mxu0 %v14292_v62  ;;  %v1724_v62 = vcombine.high %v17178_v1, %v17178_v1  ;;  %v14363_v1 = vld [vmem:[%s21720_s1 + $0x1324] ss:$16 sps:$4 sm:$0xff]  }
 0x110   :  { %10199 = vmatpush1.bf16.msra.mxu1 %v14295_v63  ;;  %10159 = vmatprep.subr.bf16.mxu0 %v14300_v2  ;;  %v14352_v63 = vld [vmem:[%s21720_s1 + $0x1140] ss:$16 sps:$4 sm:$0xff]  }
 0x111   :  { %10200 = vmatprep.subr.bf16.mxu1 %v14303_v3  ;;  %v14355_v2 = vld [vmem:[%s21720_s1 + $0x1340] ss:$16 sps:$4 sm:$0xff]   ;;  %v14360_v3 = vld [vmem:[%s21720_s1 + $0x1124] ss:$16 sps:$4 sm:$0xff]  }
 0x113   :  { %10160 = vmatpush1.bf16.msra.mxu0 %v14298_v5  ;;  %v17415_v5 = vrot.slane %v1724_v62, %v16469_v49  ;;  %v14391_v62 = vld [vmem:[%s21720_s1 + $0x1680] ss:$16 sps:$4 sm:$0xff]  }
 0x114   :  { %10201 = vmatpush1.bf16.msra.mxu1 %v14301_v7  ;;  %10161 = vmatprep.subr.bf16.mxu0 %v14306_v8  ;;  %v14358_v7 = vld [vmem:[%s21720_s1 + $0x1120] ss:$16 sps:$4 sm:$0xff]  }
 0x115   :  { %10202 = vmatprep.subr.bf16.mxu1 %v14309_v9  ;;  %v14361_v8 = vld [vmem:[%s21720_s1 + $0x1320] ss:$16 sps:$4 sm:$0xff]   ;;  %v14366_v9 = vld [vmem:[%s21720_s1 + $0x1104] ss:$16 sps:$4 sm:$0xff]  }
 0x117   :  { %10162 = vmatpush1.bf16.msra.mxu0 %v14304_v10  ;;  %v14369_v10 = vld [vmem:[%s21720_s1 + $0x1304] ss:$16 sps:$4 sm:$0xff]  }
 0x118   :  { %10203 = vmatpush1.bf16.msra.mxu1 %v14307_v11  ;;  %10163 = vmatprep.subr.bf16.mxu0 %v14312_v12  ;;  %v1740_v11 = vcombine.high %v17415_v5, %v17415_v5  ;;  %v17433_v12 = vrot.slane %v17188_v4, %v16469_v49  ;;  %v14375_v4 = vld [vmem:[%s21720_s1 + $0x16e4] ss:$16 sps:$4 sm:$0xff]  }
 0x119   :  { %10204 = vmatprep.subr.bf16.mxu1 %v14315_v14  ;;  %v14364_v14 = vld [vmem:[%s21720_s1 + $0x1100] ss:$16 sps:$4 sm:$0xff]  }
 0x11b   :  { %10164 = vmatpush1.bf16.msra.mxu0 %v14310_v16  ;;  %v14367_v16 = vld [vmem:[%s21720_s1 + $0x1300] ss:$16 sps:$4 sm:$0xff]  }
 0x11c   :  { %10205 = vmatpush1.bf16.msra.mxu1 %v14313_v19  ;;  %10165 = vmatprep.subr.bf16.mxu0 %v14318_v20  ;;  %v14372_v19 = vld [vmem:[%s21720_s1 + $0x14e4] ss:$16 sps:$4 sm:$0xff]   ;;  %v14370_v20 = vld [vmem:[%s21720_s1 + $0x14e0] ss:$16 sps:$4 sm:$0xff]  }
 0x11d   :  { %10206 = vmatprep.subr.bf16.mxu1 %v14321_v21  ;;  %v14373_v21 = vld [vmem:[%s21720_s1 + $0x16e0] ss:$16 sps:$4 sm:$0xff]  }
 0x11f   :  { %10166 = vmatpush1.bf16.msra.mxu0 %v14316_v24  ;;  %v17454_v24 = vrot.slane %v1740_v11, %v16469_v49  ;;  %v14408_v11 = vld [vmem:[%s21720_s1 + $0x1424] ss:$16 sps:$4 sm:$0xff]  }
 0x120   :  { %10207 = vmatpush1.bf16.msra.mxu1 %v14319_v25  ;;  %10167 = vmatprep.subr.bf16.mxu0 %v14324_v27  ;;  %v17458_v25 = vcombine.high %v17433_v12, %v17433_v12  ;;  %v14378_v27 = vld [vmem:[%s21720_s1 + $0x14c4] ss:$16 sps:$4 sm:$0xff]  }
 0x121   :  { %10208 = vmatprep.subr.bf16.mxu1 %v14327_v28  ;;  %v14381_v28 = vld [vmem:[%s21720_s1 + $0x16c4] ss:$16 sps:$4 sm:$0xff]  }
 0x123   :  { %10168 = vmatpush2.bf16.msra.mxu0 %v14322_v29  ;;  %v14376_v29 = vld [vmem:[%s21720_s1 + $0x14c0] ss:$16 sps:$4 sm:$0xff]  }
 0x124   :  { %10209 = vmatpush2.bf16.msra.mxu1 %v14325_v30  ;;  %10169 = vmatprep.subr.bf16.mxu0 %v14330_v33  ;;  %v14379_v30 = vld [vmem:[%s21720_s1 + $0x16c0] ss:$16 sps:$4 sm:$0xff]   ;;  %v17474_v33 = vcombine.high %v17454_v24, %v17454_v24 }
 0x125   :  { %10210 = vmatprep.subr.bf16.mxu1 %v14333_v34 }
 0x127   :  { %10170 = vmatpush2.bf16.msra.mxu0 %v14328_v36 }
 0x128   :  { %10211 = vmatpush2.bf16.msra.mxu1 %v14331_v37  ;;  %10171 = vmatprep.subr.bf16.mxu0 %v14336_v38 }
 0x129   :  { %10212 = vmatprep.subr.bf16.mxu1 %v14339_v32 }
 0x12b   :  { %10172 = vmatpush2.bf16.msra.mxu0 %v14334_v40  ;;  %v14384_v40 = vld [vmem:[%s21720_s1 + $0x14a4] ss:$16 sps:$4 sm:$0xff]  }
 0x12c   :  { %10213 = vmatpush2.bf16.msra.mxu1 %v14337_v44  ;;  %10173 = vmatprep.subr.bf16.mxu0 %v14342_v45  ;;  %v14387_v44 = vld [vmem:[%s21720_s1 + $0x16a4] ss:$16 sps:$4 sm:$0xff]  }
 0x12d   :  { %10214 = vmatprep.subr.bf16.mxu1 %v14345_v47 }
 0x12f   :  { %10174 = vmatpush2.bf16.msra.mxu0 %v14340_v48  ;;  %v14385_v48 = vld [vmem:[%s21720_s1 + $0x16a0] ss:$16 sps:$4 sm:$0xff]  }
 0x130   :  { %10215 = vmatpush2.bf16.msra.mxu1 %v14343_v51  ;;  %10175 = vmatprep.subr.bf16.mxu0 %v14348_v52 }
 0x131   :  { %10216 = vmatprep.subr.bf16.mxu1 %v14351_v53 }
 0x133   :  { %10176 = vmatpush2.bf16.msra.mxu0 %v14346_v56 }
 0x134   :  { %10217 = vmatpush2.bf16.msra.mxu1 %v14349_v57  ;;  %10177 = vmatprep.subr.bf16.mxu0 %v14354_v58  ;;  %v14390_v57 = vld [vmem:[%s21720_s1 + $0x1484] ss:$16 sps:$4 sm:$0xff]  }
 0x135   :  { %10218 = vmatprep.subr.bf16.mxu1 %v14357_v61  ;;  %v14393_v58 = vld [vmem:[%s21720_s1 + $0x1684] ss:$16 sps:$4 sm:$0xff]   ;;  %v14388_v61 = vld [vmem:[%s21720_s1 + $0x1480] ss:$16 sps:$4 sm:$0xff]  }
 0x137   :  { %10178 = vmatpush2.bf16.msra.mxu0 %v14352_v63  ;;  %v14396_v63 = vld [vmem:[%s21720_s1 + $0x1464] ss:$16 sps:$4 sm:$0xff]  }
 0x138   :  { %10219 = vmatpush2.bf16.msra.mxu1 %v14355_v2  ;;  %10179 = vmatprep.subr.bf16.mxu0 %v14360_v3  ;;  %v14399_v2 = vld [vmem:[%s21720_s1 + $0x1664] ss:$16 sps:$4 sm:$0xff]   ;;  %v14394_v3 = vld [vmem:[%s21720_s1 + $0x1460] ss:$16 sps:$4 sm:$0xff]  }
 0x139   :  { %10220 = vmatprep.subr.bf16.mxu1 %v14363_v1  ;;  %v14397_v1 = vld [vmem:[%s21720_s1 + $0x1660] ss:$16 sps:$4 sm:$0xff]  }
 0x13b   :  { %10180 = vmatpush2.bf16.msra.mxu0 %v14358_v7  ;;  %v14402_v7 = vld [vmem:[%s21720_s1 + $0x1444] ss:$16 sps:$4 sm:$0xff]  }
 0x13c   :  { %10221 = vmatpush2.bf16.msra.mxu1 %v14361_v8  ;;  %10181 = vmatprep.subr.bf16.mxu0 %v14366_v9  ;;  %v14405_v8 = vld [vmem:[%s21720_s1 + $0x1644] ss:$16 sps:$4 sm:$0xff]   ;;  %v14400_v9 = vld [vmem:[%s21720_s1 + $0x1440] ss:$16 sps:$4 sm:$0xff]  }
 0x13d   :  { %10222 = vmatprep.subr.bf16.mxu1 %v14369_v10  ;;  %v14403_v10 = vld [vmem:[%s21720_s1 + $0x1640] ss:$16 sps:$4 sm:$0xff]  }
 0x13f   :  { %10182 = vmatpush2.bf16.msra.mxu0 %v14364_v14  ;;  %v14411_v14 = vld [vmem:[%s21720_s1 + $0x1624] ss:$16 sps:$4 sm:$0xff]  }
 0x140   :  { %10223 = vmatpush2.bf16.msra.mxu1 %v14367_v16  ;;  %10233 = vmatprep.subr.bf16.mxu0 %v14372_v19  ;;  %v14406_v16 = vld [vmem:[%s21720_s1 + $0x1420] ss:$16 sps:$4 sm:$0xff]  }
 0x141   :  { %10274 = vmatprep.subr.bf16.mxu1 %v14375_v4  ;;  %v14409_v19 = vld [vmem:[%s21720_s1 + $0x1620] ss:$16 sps:$4 sm:$0xff]   ;;  %v14414_v4 = vld [vmem:[%s21720_s1 + $0x1404] ss:$16 sps:$4 sm:$0xff]  }
 0x142   :  { %v9939_v34 = vpop.f32.mrf.mxu0  ;;  %10184 = vmatmul.mubr.bf16.vlgmr.msra.gmra.mxu0 %v17433_v12 }
 0x143   :  { %v9980_v36 = vpop.f32.mrf.mxu1  ;;  %10225 = vmatmul.mubr.bf16.vlgmr.msra.gmra.mxu1 %v17458_v25  ;;  %v9940_v37 = vadd.f32 %v9939_v34, %v17262_v46  ;;  %10234 = vmatpush1.bf16.msra.mxu0 %v14370_v20  ;;  %v14382_v46 = vld [vmem:[%s21720_s1 + $0x14a0] ss:$16 sps:$4 sm:$0xff]   ;;  %v14417_v20 = vld [vmem:[%s21720_s1 + $0x1604] ss:$16 sps:$4 sm:$0xff]  }
 0x144   :  { %10275 = vmatpush1.bf16.msra.mxu1 %v14373_v21  ;;  %v9941_v38 = vpop.f32.mrf.mxu0  ;;  %10235 = vmatprep.subr.bf16.mxu0 %v14378_v27  ;;  %v14412_v21 = vld [vmem:[%s21720_s1 + $0x1400] ss:$16 sps:$4 sm:$0xff]  }
 0x145   :  { %v9982_v32 = vpop.f32.mrf.mxu1  ;;  %10276 = vmatprep.subr.bf16.mxu1 %v14381_v28  ;;  %v17485_v45 = vadd.f32 %v9980_v36, %v9940_v37  ;;  %v9942_v47 = vadd.f32 %v9941_v38, %v17272_v55  ;;  %10265 = vmatprep.mubr.bf16.mxu0 %v17454_v24  ;;  %v14415_v27 = vld [vmem:[%s21720_s1 + $0x1600] ss:$16 sps:$4 sm:$0xff]   ;;  %v14420_v28 = vld [vmem:[%s21720_s1 + $0x15e4] ss:$16 sps:$4 sm:$0xff]  }
 0x146   :  { %10306 = vmatprep.mubr.bf16.mxu1 %v17474_v33  ;;  %v9943_v51 = vpop.f32.mrf.mxu0  ;;  %v14421_v34 = vld [vmem:[%s21720_s1 + $0x17e0] ss:$16 sps:$4 sm:$0xff]   ;;  %v14426_v36 = vld [vmem:[%s21720_s1 + $0x15c4] ss:$16 sps:$4 sm:$0xff]  }
 0x147   :  { %v9984_v52 = vpop.f32.mrf.mxu1  ;;  %v17496_v53 = vadd.f32 %v9982_v32, %v9942_v47  ;;  %10236 = vmatpush1.bf16.msra.mxu0 %v14376_v29  ;;  %v14423_v29 = vld [vmem:[%s21720_s1 + $0x17e4] ss:$16 sps:$4 sm:$0xff]   ;;  %v14424_v38 = vld [vmem:[%s21720_s1 + $0x15c0] ss:$16 sps:$4 sm:$0xff]  }
 0x148   :  { %10277 = vmatpush1.bf16.msra.mxu1 %v14379_v30  ;;  %v9944_v56 = vpop.f32.mrf.mxu0  ;;  %10237 = vmatprep.subr.bf16.mxu0 %v14384_v40  ;;  %v14418_v30 = vld [vmem:[%s21720_s1 + $0x15e0] ss:$16 sps:$4 sm:$0xff]   ;;  %v14429_v37 = vld [vmem:[%s21720_s1 + $0x17c4] ss:$16 sps:$4 sm:$0xff]  }
 0x149   :  { %v9985_v55 = vpop.f32.mrf.mxu1  ;;  %10278 = vmatprep.subr.bf16.mxu1 %v14387_v44  ;;  %v14427_v32 = vld [vmem:[%s21720_s1 + $0x17c0] ss:$16 sps:$4 sm:$0xff]   ;;  %v14432_v40 = vld [vmem:[%s21720_s1 + $0x15a4] ss:$16 sps:$4 sm:$0xff]  }
 0x14a   :  { %v14435_v44 = vld [vmem:[%s21720_s1 + $0x17a4] ss:$16 sps:$4 sm:$0xff]   ;;  %v14430_v47 = vld [vmem:[%s21720_s1 + $0x15a0] ss:$16 sps:$4 sm:$0xff]  }
 0x14b   :  { %10238 = vmatpush1.bf16.msra.mxu0 %v14382_v46  ;;  %v14433_v46 = vld [vmem:[%s21720_s1 + $0x17a0] ss:$16 sps:$4 sm:$0xff]   ;;  %v14441_v51 = vld [vmem:[%s21720_s1 + $0x1784] ss:$16 sps:$4 sm:$0xff]  }
 0x14c   :  { %10279 = vmatpush1.bf16.msra.mxu1 %v14385_v48  ;;  %10239 = vmatprep.subr.bf16.mxu0 %v14390_v57  ;;  %v14438_v48 = vld [vmem:[%s21720_s1 + $0x1584] ss:$16 sps:$4 sm:$0xff]   ;;  %v14436_v52 = vld [vmem:[%s21720_s1 + $0x1580] ss:$16 sps:$4 sm:$0xff]  }
 0x14d   :  { %10280 = vmatprep.subr.bf16.mxu1 %v14393_v58  ;;  %v14439_v56 = vld [vmem:[%s21720_s1 + $0x1780] ss:$16 sps:$4 sm:$0xff]   ;;  %v14444_v55 = vld [vmem:[%s21720_s1 + $0x1564] ss:$16 sps:$4 sm:$0xff]  }
 0x14e   :  { %v14447_v57 = vld [vmem:[%s21720_s1 + $0x1764] ss:$16 sps:$4 sm:$0xff]   ;;  %v14442_v58 = vld [vmem:[%s21720_s1 + $0x1560] ss:$16 sps:$4 sm:$0xff]  }
 0x14f   :  { %10240 = vmatpush1.bf16.msra.mxu0 %v14388_v61  ;;  %v14445_v61 = vld [vmem:[%s21720_s1 + $0x1760] ss:$16 sps:$4 sm:$0xff]  }
 0x150   :  { %10281 = vmatpush1.bf16.msra.mxu1 %v14391_v62  ;;  %10241 = vmatprep.subr.bf16.mxu0 %v14396_v63  ;;  %v14450_v62 = vld [vmem:[%s21720_s1 + $0x1544] ss:$16 sps:$4 sm:$0xff]  }
 0x151   :  { %10282 = vmatprep.subr.bf16.mxu1 %v14399_v2  ;;  %v14453_v63 = vld [vmem:[%s21720_s1 + $0x1744] ss:$16 sps:$4 sm:$0xff]   ;;  %v17627_v2 = vld [vmem:[%s21719_s0 + $0x18] sm:$0xff] }
 0x153   :  { %10242 = vmatpush1.bf16.msra.mxu0 %v14394_v3  ;;  %v14448_v3 = vld [vmem:[%s21720_s1 + $0x1540] ss:$16 sps:$4 sm:$0xff]  }
 0x154   :  { %10283 = vmatpush1.bf16.msra.mxu1 %v14397_v1  ;;  %10243 = vmatprep.subr.bf16.mxu0 %v14402_v7  ;;  %v14451_v1 = vld [vmem:[%s21720_s1 + $0x1740] ss:$16 sps:$4 sm:$0xff]   ;;  %v14456_v7 = vld [vmem:[%s21720_s1 + $0x1524] ss:$16 sps:$4 sm:$0xff]  }
 0x155   :  { %10284 = vmatprep.subr.bf16.mxu1 %v14405_v8  ;;  %v14459_v8 = vld [vmem:[%s21720_s1 + $0x1724] ss:$16 sps:$4 sm:$0xff]  }
 0x157   :  { %10244 = vmatpush1.bf16.msra.mxu0 %v14400_v9  ;;  %v17643_v9 = vrot.slane %v17627_v2, %v16469_v49 }
 0x158   :  { %10285 = vmatpush1.bf16.msra.mxu1 %v14403_v10  ;;  %10245 = vmatprep.subr.bf16.mxu0 %v14408_v11  ;;  %v14454_v10 = vld [vmem:[%s21720_s1 + $0x1520] ss:$16 sps:$4 sm:$0xff]  }
 0x159   :  { %10286 = vmatprep.subr.bf16.mxu1 %v14411_v14  ;;  %v14457_v11 = vld [vmem:[%s21720_s1 + $0x1720] ss:$16 sps:$4 sm:$0xff]   ;;  %v14462_v14 = vld [vmem:[%s21720_s1 + $0x1504] ss:$16 sps:$4 sm:$0xff]  }
 0x15b   :  { %10246 = vmatpush1.bf16.msra.mxu0 %v14406_v16  ;;  %v14465_v16 = vld [vmem:[%s21720_s1 + $0x1704] ss:$16 sps:$4 sm:$0xff]  }
 0x15c   :  { %10287 = vmatpush1.bf16.msra.mxu1 %v14409_v19  ;;  %10247 = vmatprep.subr.bf16.mxu0 %v14414_v4  ;;  %v1788_v19 = vcombine.high %v17643_v9, %v17643_v9  ;;  %v17661_v4 = vrot.slane %v17415_v5, %v16469_v49  ;;  %v14472_v5 = vld [vmem:[%s21720_s1 + $0x1ae4] ss:$16 sps:$4 sm:$0xff]  }
 0x15d   :  { %10288 = vmatprep.subr.bf16.mxu1 %v14417_v20  ;;  %v14460_v20 = vld [vmem:[%s21720_s1 + $0x1500] ss:$16 sps:$4 sm:$0xff]  }
 0x15f   :  { %10248 = vmatpush1.bf16.msra.mxu0 %v14412_v21  ;;  %v14463_v21 = vld [vmem:[%s21720_s1 + $0x1700] ss:$16 sps:$4 sm:$0xff]  }
 0x160   :  { %10289 = vmatpush1.bf16.msra.mxu1 %v14415_v27  ;;  %10249 = vmatprep.subr.bf16.mxu0 %v14420_v28  ;;  %v14469_v27 = vld [vmem:[%s21720_s1 + $0x18e4] ss:$16 sps:$4 sm:$0xff]   ;;  %v14467_v28 = vld [vmem:[%s21720_s1 + $0x18e0] ss:$16 sps:$4 sm:$0xff]  }
 0x161   :  { %10290 = vmatprep.subr.bf16.mxu1 %v14423_v29  ;;  %v14470_v29 = vld [vmem:[%s21720_s1 + $0x1ae0] ss:$16 sps:$4 sm:$0xff]  }
 0x163   :  { %10250 = vmatpush2.bf16.msra.mxu0 %v14418_v30  ;;  %v17682_v30 = vrot.slane %v1788_v19, %v16469_v49  ;;  %v14494_v19 = vld [vmem:[%s21720_s1 + $0x1a60] ss:$16 sps:$4 sm:$0xff]  }
 0x164   :  { %10291 = vmatpush2.bf16.msra.mxu1 %v14421_v34  ;;  %10251 = vmatprep.subr.bf16.mxu0 %v14426_v36  ;;  %v17686_v34 = vcombine.high %v17661_v4, %v17661_v4  ;;  %v14475_v36 = vld [vmem:[%s21720_s1 + $0x18c4] ss:$16 sps:$4 sm:$0xff]  }
 0x165   :  { %10292 = vmatprep.subr.bf16.mxu1 %v14429_v37  ;;  %v14478_v37 = vld [vmem:[%s21720_s1 + $0x1ac4] ss:$16 sps:$4 sm:$0xff]  }
 0x167   :  { %10252 = vmatpush2.bf16.msra.mxu0 %v14424_v38  ;;  %v14473_v38 = vld [vmem:[%s21720_s1 + $0x18c0] ss:$16 sps:$4 sm:$0xff]  }
 0x168   :  { %10293 = vmatpush2.bf16.msra.mxu1 %v14427_v32  ;;  %10253 = vmatprep.subr.bf16.mxu0 %v14432_v40  ;;  %v14476_v32 = vld [vmem:[%s21720_s1 + $0x1ac0] ss:$16 sps:$4 sm:$0xff]   ;;  %v17702_v40 = vcombine.high %v17682_v30, %v17682_v30 }
 0x169   :  { %10294 = vmatprep.subr.bf16.mxu1 %v14435_v44 }
 0x16b   :  { %10254 = vmatpush2.bf16.msra.mxu0 %v14430_v47 }
 0x16c   :  { %10295 = vmatpush2.bf16.msra.mxu1 %v14433_v46  ;;  %10255 = vmatprep.subr.bf16.mxu0 %v14438_v48 }
 0x16d   :  { %10296 = vmatprep.subr.bf16.mxu1 %v14441_v51 }
 0x16f   :  { %10256 = vmatpush2.bf16.msra.mxu0 %v14436_v52  ;;  %v14481_v52 = vld [vmem:[%s21720_s1 + $0x18a4] ss:$16 sps:$4 sm:$0xff]  }
 0x170   :  { %10297 = vmatpush2.bf16.msra.mxu1 %v14439_v56  ;;  %10257 = vmatprep.subr.bf16.mxu0 %v14444_v55  ;;  %v14484_v56 = vld [vmem:[%s21720_s1 + $0x1aa4] ss:$16 sps:$4 sm:$0xff]  }
 0x171   :  { %10298 = vmatprep.subr.bf16.mxu1 %v14447_v57 }
 0x173   :  { %10258 = vmatpush2.bf16.msra.mxu0 %v14442_v58  ;;  %v14482_v58 = vld [vmem:[%s21720_s1 + $0x1aa0] ss:$16 sps:$4 sm:$0xff]  }
 0x174   :  { %10299 = vmatpush2.bf16.msra.mxu1 %v14445_v61  ;;  %10259 = vmatprep.subr.bf16.mxu0 %v14450_v62 }
 0x175   :  { %10300 = vmatprep.subr.bf16.mxu1 %v14453_v63 }
 0x177   :  { %10260 = vmatpush2.bf16.msra.mxu0 %v14448_v3 }
 0x178   :  { %10301 = vmatpush2.bf16.msra.mxu1 %v14451_v1  ;;  %10261 = vmatprep.subr.bf16.mxu0 %v14456_v7  ;;  %v14487_v1 = vld [vmem:[%s21720_s1 + $0x1884] ss:$16 sps:$4 sm:$0xff]  }
 0x179   :  { %10302 = vmatprep.subr.bf16.mxu1 %v14459_v8  ;;  %v14490_v7 = vld [vmem:[%s21720_s1 + $0x1a84] ss:$16 sps:$4 sm:$0xff]   ;;  %v14485_v8 = vld [vmem:[%s21720_s1 + $0x1880] ss:$16 sps:$4 sm:$0xff]  }
 0x17b   :  { %10262 = vmatpush2.bf16.msra.mxu0 %v14454_v10  ;;  %v14488_v10 = vld [vmem:[%s21720_s1 + $0x1a80] ss:$16 sps:$4 sm:$0xff]  }
 0x17c   :  { %10303 = vmatpush2.bf16.msra.mxu1 %v14457_v11  ;;  %10263 = vmatprep.subr.bf16.mxu0 %v14462_v14  ;;  %v14493_v11 = vld [vmem:[%s21720_s1 + $0x1864] ss:$16 sps:$4 sm:$0xff]  }
 0x17d   :  { %10304 = vmatprep.subr.bf16.mxu1 %v14465_v16  ;;  %v14496_v14 = vld [vmem:[%s21720_s1 + $0x1a64] ss:$16 sps:$4 sm:$0xff]   ;;  %v14491_v16 = vld [vmem:[%s21720_s1 + $0x1860] ss:$16 sps:$4 sm:$0xff]  }
 0x17f   :  { %10264 = vmatpush2.bf16.msra.mxu0 %v14460_v20  ;;  %v14499_v20 = vld [vmem:[%s21720_s1 + $0x1844] ss:$16 sps:$4 sm:$0xff]  }
 0x180   :  { %10305 = vmatpush2.bf16.msra.mxu1 %v14463_v21  ;;  %10315 = vmatprep.subr.bf16.mxu0 %v14469_v27  ;;  %v14502_v21 = vld [vmem:[%s21720_s1 + $0x1a44] ss:$16 sps:$4 sm:$0xff]   ;;  %v14497_v27 = vld [vmem:[%s21720_s1 + $0x1840] ss:$16 sps:$4 sm:$0xff]  }
 0x181   :  { %10356 = vmatprep.subr.bf16.mxu1 %v14472_v5  ;;  %v14500_v5 = vld [vmem:[%s21720_s1 + $0x1a40] ss:$16 sps:$4 sm:$0xff]  }
 0x182   :  { %v10021_v44 = vpop.f32.mrf.mxu0  ;;  %10266 = vmatmul.mubr.bf16.vlgmr.msra.gmra.mxu0 %v17661_v4 }
 0x183   :  { %v10062_v47 = vpop.f32.mrf.mxu1  ;;  %10307 = vmatmul.mubr.bf16.vlgmr.msra.gmra.mxu1 %v17686_v34  ;;  %v10022_v46 = vadd.f32 %v10021_v44, %v17485_v45  ;;  %10316 = vmatpush1.bf16.msra.mxu0 %v14467_v28  ;;  %v14479_v45 = vld [vmem:[%s21720_s1 + $0x18a0] ss:$16 sps:$4 sm:$0xff]   ;;  %v14505_v28 = vld [vmem:[%s21720_s1 + $0x1824] ss:$16 sps:$4 sm:$0xff]  }
 0x184   :  { %10357 = vmatpush1.bf16.msra.mxu1 %v14470_v29  ;;  %v10023_v48 = vpop.f32.mrf.mxu0  ;;  %10317 = vmatprep.subr.bf16.mxu0 %v14475_v36  ;;  %v14508_v29 = vld [vmem:[%s21720_s1 + $0x1a24] ss:$16 sps:$4 sm:$0xff]   ;;  %v14503_v36 = vld [vmem:[%s21720_s1 + $0x1820] ss:$16 sps:$4 sm:$0xff]  }
 0x185   :  { %v10064_v51 = vpop.f32.mrf.mxu1  ;;  %10358 = vmatprep.subr.bf16.mxu1 %v14478_v37  ;;  %v17713_v55 = vadd.f32 %v10062_v47, %v10022_v46  ;;  %v10024_v57 = vadd.f32 %v10023_v48, %v17496_v53  ;;  %10347 = vmatprep.mubr.bf16.mxu0 %v17682_v30  ;;  %v14506_v37 = vld [vmem:[%s21720_s1 + $0x1a20] ss:$16 sps:$4 sm:$0xff]   ;;  %v14517_v46 = vld [vmem:[%s21720_s1 + $0x19e4] ss:$16 sps:$4 sm:$0xff]  }
 0x186   :  { %10388 = vmatprep.mubr.bf16.mxu1 %v17702_v40  ;;  %v10025_v61 = vpop.f32.mrf.mxu0  ;;  %v14509_v44 = vld [vmem:[%s21720_s1 + $0x1800] ss:$16 sps:$4 sm:$0xff]   ;;  %v14520_v48 = vld [vmem:[%s21720_s1 + $0x1be4] ss:$16 sps:$4 sm:$0xff]  }
 0x187   :  { %v10066_v62 = vpop.f32.mrf.mxu1  ;;  %v17724_v63 = vadd.f32 %v10064_v51, %v10024_v57  ;;  %10318 = vmatpush1.bf16.msra.mxu0 %v14473_v38  ;;  %v14511_v38 = vld [vmem:[%s21720_s1 + $0x1804] ss:$16 sps:$4 sm:$0xff]   ;;  %v14512_v47 = vld [vmem:[%s21720_s1 + $0x1a00] ss:$16 sps:$4 sm:$0xff]  }
 0x188   :  { %10359 = vmatpush1.bf16.msra.mxu1 %v14476_v32  ;;  %v10026_v3 = vpop.f32.mrf.mxu0  ;;  %10319 = vmatprep.subr.bf16.mxu0 %v14481_v52  ;;  %v14514_v32 = vld [vmem:[%s21720_s1 + $0x1a04] ss:$16 sps:$4 sm:$0xff]   ;;  %v14515_v51 = vld [vmem:[%s21720_s1 + $0x19e0] ss:$16 sps:$4 sm:$0xff]  }
 0x189   :  { %v10067_v53 = vpop.f32.mrf.mxu1  ;;  %10360 = vmatprep.subr.bf16.mxu1 %v14484_v56  ;;  %v14518_v52 = vld [vmem:[%s21720_s1 + $0x1be0] ss:$16 sps:$4 sm:$0xff]   ;;  %v14523_v56 = vld [vmem:[%s21720_s1 + $0x19c4] ss:$16 sps:$4 sm:$0xff]  }
 0x18a   :  { %v14526_v57 = vld [vmem:[%s21720_s1 + $0x1bc4] ss:$16 sps:$4 sm:$0xff]   ;;  %v14527_v3 = vld [vmem:[%s21720_s1 + $0x19a0] ss:$16 sps:$4 sm:$0xff]  }
 0x18b   :  { %10320 = vmatpush1.bf16.msra.mxu0 %v14479_v45  ;;  %v14521_v45 = vld [vmem:[%s21720_s1 + $0x19c0] ss:$16 sps:$4 sm:$0xff]   ;;  %v14529_v61 = vld [vmem:[%s21720_s1 + $0x19a4] ss:$16 sps:$4 sm:$0xff]  }
 0x18c   :  { %10361 = vmatpush1.bf16.msra.mxu1 %v14482_v58  ;;  %10321 = vmatprep.subr.bf16.mxu0 %v14487_v1  ;;  %v14524_v58 = vld [vmem:[%s21720_s1 + $0x1bc0] ss:$16 sps:$4 sm:$0xff]   ;;  %v14532_v62 = vld [vmem:[%s21720_s1 + $0x1ba4] ss:$16 sps:$4 sm:$0xff]  }
 0x18d   :  { %10362 = vmatprep.subr.bf16.mxu1 %v14490_v7  ;;  %v14530_v53 = vld [vmem:[%s21720_s1 + $0x1ba0] ss:$16 sps:$4 sm:$0xff]   ;;  %v14535_v1 = vld [vmem:[%s21720_s1 + $0x1984] ss:$16 sps:$4 sm:$0xff]  }
 0x18e   :  { %v14538_v7 = vld [vmem:[%s21720_s1 + $0x1b84] ss:$16 sps:$4 sm:$0xff]  }
 0x18f   :  { %10322 = vmatpush1.bf16.msra.mxu0 %v14485_v8  ;;  %v14533_v8 = vld [vmem:[%s21720_s1 + $0x1980] ss:$16 sps:$4 sm:$0xff]  }
 0x190   :  { %10363 = vmatpush1.bf16.msra.mxu1 %v14488_v10  ;;  %10323 = vmatprep.subr.bf16.mxu0 %v14493_v11  ;;  %v14536_v10 = vld [vmem:[%s21720_s1 + $0x1b80] ss:$16 sps:$4 sm:$0xff]   ;;  %v14541_v11 = vld [vmem:[%s21720_s1 + $0x1964] ss:$16 sps:$4 sm:$0xff]  }
 0x191   :  { %10364 = vmatprep.subr.bf16.mxu1 %v14496_v14  ;;  %v14544_v14 = vld [vmem:[%s21720_s1 + $0x1b64] ss:$16 sps:$4 sm:$0xff]  }
 0x193   :  { %10324 = vmatpush1.bf16.msra.mxu0 %v14491_v16  ;;  %v14539_v16 = vld [vmem:[%s21720_s1 + $0x1960] ss:$16 sps:$4 sm:$0xff]  }
 0x194   :  { %10365 = vmatpush1.bf16.msra.mxu1 %v14494_v19  ;;  %10325 = vmatprep.subr.bf16.mxu0 %v14499_v20  ;;  %v14542_v19 = vld [vmem:[%s21720_s1 + $0x1b60] ss:$16 sps:$4 sm:$0xff]   ;;  %v14547_v20 = vld [vmem:[%s21720_s1 + $0x1944] ss:$16 sps:$4 sm:$0xff]  }
 0x195   :  { %10366 = vmatprep.subr.bf16.mxu1 %v14502_v21  ;;  %v14550_v21 = vld [vmem:[%s21720_s1 + $0x1b44] ss:$16 sps:$4 sm:$0xff]  }
 0x197   :  { %10326 = vmatpush1.bf16.msra.mxu0 %v14497_v27  ;;  %v1773_v27 = vcombine.high %v17627_v2, %v17627_v2  ;;  %v14556_v2 = vld [vmem:[%s21720_s1 + $0x1b24] ss:$16 sps:$4 sm:$0xff]  }
 0x198   :  { %10367 = vmatpush1.bf16.msra.mxu1 %v14500_v5  ;;  %10327 = vmatprep.subr.bf16.mxu0 %v14505_v28  ;;  %v14545_v5 = vld [vmem:[%s21720_s1 + $0x1940] ss:$16 sps:$4 sm:$0xff]  }
 0x199   :  { %10368 = vmatprep.subr.bf16.mxu1 %v14508_v29  ;;  %v14548_v28 = vld [vmem:[%s21720_s1 + $0x1b40] ss:$16 sps:$4 sm:$0xff]   ;;  %v14553_v29 = vld [vmem:[%s21720_s1 + $0x1924] ss:$16 sps:$4 sm:$0xff]  }
 0x19b   :  { %10328 = vmatpush1.bf16.msra.mxu0 %v14503_v36  ;;  %v17867_v36 = vrot.slane %v1773_v27, %v16469_v49  ;;  %v14578_v27 = vld [vmem:[%s21720_s1 + $0x1ea0] ss:$16 sps:$4 sm:$0xff]  }
 0x19c   :  { %10369 = vmatpush1.bf16.msra.mxu1 %v14506_v37  ;;  %10329 = vmatprep.subr.bf16.mxu0 %v14511_v38  ;;  %v14551_v37 = vld [vmem:[%s21720_s1 + $0x1920] ss:$16 sps:$4 sm:$0xff]  }
 0x19d   :  { %10370 = vmatprep.subr.bf16.mxu1 %v14514_v32  ;;  %v14554_v38 = vld [vmem:[%s21720_s1 + $0x1b20] ss:$16 sps:$4 sm:$0xff]   ;;  %v14559_v32 = vld [vmem:[%s21720_s1 + $0x1904] ss:$16 sps:$4 sm:$0xff]  }
 0x19f   :  { %10330 = vmatpush1.bf16.msra.mxu0 %v14509_v44  ;;  %v14562_v44 = vld [vmem:[%s21720_s1 + $0x1b04] ss:$16 sps:$4 sm:$0xff]  }
 0x1a0   :  { %10371 = vmatpush1.bf16.msra.mxu1 %v14512_v47  ;;  %10331 = vmatprep.subr.bf16.mxu0 %v14517_v46  ;;  %v1789_v47 = vcombine.high %v17867_v36, %v17867_v36  ;;  %v17885_v46 = vrot.slane %v17643_v9, %v16469_v49  ;;  %v14568_v9 = vld [vmem:[%s21720_s1 + $0x1ee4] ss:$16 sps:$4 sm:$0xff]  }
 0x1a1   :  { %10372 = vmatprep.subr.bf16.mxu1 %v14520_v48  ;;  %v14557_v48 = vld [vmem:[%s21720_s1 + $0x1900] ss:$16 sps:$4 sm:$0xff]  }
 0x1a3   :  { %10332 = vmatpush2.bf16.msra.mxu0 %v14515_v51  ;;  %v14560_v51 = vld [vmem:[%s21720_s1 + $0x1b00] ss:$16 sps:$4 sm:$0xff]  }
 0x1a4   :  { %10373 = vmatpush2.bf16.msra.mxu1 %v14518_v52  ;;  %10333 = vmatprep.subr.bf16.mxu0 %v14523_v56  ;;  %v14565_v52 = vld [vmem:[%s21720_s1 + $0x1ce4] ss:$16 sps:$4 sm:$0xff]   ;;  %v14563_v56 = vld [vmem:[%s21720_s1 + $0x1ce0] ss:$16 sps:$4 sm:$0xff]  }
 0x1a5   :  { %10374 = vmatprep.subr.bf16.mxu1 %v14526_v57  ;;  %v14566_v57 = vld [vmem:[%s21720_s1 + $0x1ee0] ss:$16 sps:$4 sm:$0xff]  }
 0x1a7   :  { %10334 = vmatpush2.bf16.msra.mxu0 %v14521_v45  ;;  %v17906_v45 = vrot.slane %v1789_v47, %v16469_v49  ;;  %v14589_v47 = vld [vmem:[%s21720_s1 + $0x1c64] ss:$16 sps:$4 sm:$0xff]  }
 0x1a8   :  { %10375 = vmatpush2.bf16.msra.mxu1 %v14524_v58  ;;  %10335 = vmatprep.subr.bf16.mxu0 %v14529_v61  ;;  %v17910_v58 = vcombine.high %v17885_v46, %v17885_v46  ;;  %v14571_v61 = vld [vmem:[%s21720_s1 + $0x1cc4] ss:$16 sps:$4 sm:$0xff]  }
 0x1a9   :  { %10376 = vmatprep.subr.bf16.mxu1 %v14532_v62  ;;  %v14574_v62 = vld [vmem:[%s21720_s1 + $0x1ec4] ss:$16 sps:$4 sm:$0xff]  }
 0x1ab   :  { %10336 = vmatpush2.bf16.msra.mxu0 %v14527_v3  ;;  %v14569_v3 = vld [vmem:[%s21720_s1 + $0x1cc0] ss:$16 sps:$4 sm:$0xff]  }
 0x1ac   :  { %10377 = vmatpush2.bf16.msra.mxu1 %v14530_v53  ;;  %10337 = vmatprep.subr.bf16.mxu0 %v14535_v1  ;;  %v14572_v53 = vld [vmem:[%s21720_s1 + $0x1ec0] ss:$16 sps:$4 sm:$0xff]   ;;  %v17926_v1 = vcombine.high %v17906_v45, %v17906_v45 }
 0x1ad   :  { %10378 = vmatprep.subr.bf16.mxu1 %v14538_v7 }
 0x1af   :  { %10338 = vmatpush2.bf16.msra.mxu0 %v14533_v8 }
 0x1b0   :  { %10379 = vmatpush2.bf16.msra.mxu1 %v14536_v10  ;;  %10339 = vmatprep.subr.bf16.mxu0 %v14541_v11 }
 0x1b1   :  { %10380 = vmatprep.subr.bf16.mxu1 %v14544_v14 }
 0x1b3   :  { %10340 = vmatpush2.bf16.msra.mxu0 %v14539_v16  ;;  %v14577_v16 = vld [vmem:[%s21720_s1 + $0x1ca4] ss:$16 sps:$4 sm:$0xff]  }
 0x1b4   :  { %10381 = vmatpush2.bf16.msra.mxu1 %v14542_v19  ;;  %10341 = vmatprep.subr.bf16.mxu0 %v14547_v20  ;;  %v14580_v19 = vld [vmem:[%s21720_s1 + $0x1ea4] ss:$16 sps:$4 sm:$0xff]  }
 0x1b5   :  { %10382 = vmatprep.subr.bf16.mxu1 %v14550_v21 }
 0x1b7   :  { %10342 = vmatpush2.bf16.msra.mxu0 %v14545_v5 }
 0x1b8   :  { %10383 = vmatpush2.bf16.msra.mxu1 %v14548_v28  ;;  %10343 = vmatprep.subr.bf16.mxu0 %v14553_v29 }
 0x1b9   :  { %10384 = vmatprep.subr.bf16.mxu1 %v14556_v2 }
 0x1bb   :  { %10344 = vmatpush2.bf16.msra.mxu0 %v14551_v37  ;;  %v14583_v37 = vld [vmem:[%s21720_s1 + $0x1c84] ss:$16 sps:$4 sm:$0xff]  }
 0x1bc   :  { %10385 = vmatpush2.bf16.msra.mxu1 %v14554_v38  ;;  %10345 = vmatprep.subr.bf16.mxu0 %v14559_v32  ;;  %v14586_v38 = vld [vmem:[%s21720_s1 + $0x1e84] ss:$16 sps:$4 sm:$0xff]   ;;  %v14581_v32 = vld [vmem:[%s21720_s1 + $0x1c80] ss:$16 sps:$4 sm:$0xff]  }
 0x1bd   :  { %10386 = vmatprep.subr.bf16.mxu1 %v14562_v44  ;;  %v14584_v44 = vld [vmem:[%s21720_s1 + $0x1e80] ss:$16 sps:$4 sm:$0xff]  }
 0x1bf   :  { %10346 = vmatpush2.bf16.msra.mxu0 %v14557_v48  ;;  %v14592_v48 = vld [vmem:[%s21720_s1 + $0x1e64] ss:$16 sps:$4 sm:$0xff]  }
 0x1c0   :  { %10387 = vmatpush2.bf16.msra.mxu1 %v14560_v51  ;;  %10397 = vmatprep.subr.bf16.mxu0 %v14565_v52  ;;  %v14587_v51 = vld [vmem:[%s21720_s1 + $0x1c60] ss:$16 sps:$4 sm:$0xff]  }
 0x1c1   :  { %10438 = vmatprep.subr.bf16.mxu1 %v14568_v9  ;;  %v14590_v52 = vld [vmem:[%s21720_s1 + $0x1e60] ss:$16 sps:$4 sm:$0xff]   ;;  %v14595_v9 = vld [vmem:[%s21720_s1 + $0x1c44] ss:$16 sps:$4 sm:$0xff]  }
 0x1c2   :  { %v10103_v7 = vpop.f32.mrf.mxu0  ;;  %10348 = vmatmul.mubr.bf16.vlgmr.msra.gmra.mxu0 %v17885_v46 }
 0x1c3   :  { %v10144_v8 = vpop.f32.mrf.mxu1  ;;  %10389 = vmatmul.mubr.bf16.vlgmr.msra.gmra.mxu1 %v17910_v58  ;;  %v10104_v10 = vadd.f32 %v10103_v7, %v17713_v55  ;;  %10398 = vmatpush1.bf16.msra.mxu0 %v14563_v56  ;;  %v14575_v55 = vld [vmem:[%s21720_s1 + $0x1ca0] ss:$16 sps:$4 sm:$0xff]   ;;  %v14598_v56 = vld [vmem:[%s21720_s1 + $0x1e44] ss:$16 sps:$4 sm:$0xff]  }
 0x1c4   :  { %10439 = vmatpush1.bf16.msra.mxu1 %v14566_v57  ;;  %v10105_v11 = vpop.f32.mrf.mxu0  ;;  %10399 = vmatprep.subr.bf16.mxu0 %v14571_v61  ;;  %v14593_v57 = vld [vmem:[%s21720_s1 + $0x1c40] ss:$16 sps:$4 sm:$0xff]  }
 0x1c5   :  { %v10146_v14 = vpop.f32.mrf.mxu1  ;;  %10440 = vmatprep.subr.bf16.mxu1 %v14574_v62  ;;  %v17937_v20 = vadd.f32 %v10144_v8, %v10104_v10  ;;  %v10106_v21 = vadd.f32 %v10105_v11, %v17724_v63  ;;  %10429 = vmatprep.mubr.bf16.mxu0 %v17906_v45  ;;  %v14596_v61 = vld [vmem:[%s21720_s1 + $0x1e40] ss:$16 sps:$4 sm:$0xff]   ;;  %v14601_v62 = vld [vmem:[%s21720_s1 + $0x1c24] ss:$16 sps:$4 sm:$0xff]  }
 0x1c6   :  { %10470 = vmatprep.mubr.bf16.mxu1 %v17926_v1  ;;  %v10107_v5 = vpop.f32.mrf.mxu0  ;;  %v14602_v7 = vld [vmem:[%s21720_s1 + $0x1e20] ss:$16 sps:$4 sm:$0xff]   ;;  %v14607_v8 = vld [vmem:[%s21720_s1 + $0x1c04] ss:$16 sps:$4 sm:$0xff]  }
 0x1c7   :  { %v10148_v28 = vpop.f32.mrf.mxu1  ;;  %v17948_v29 = vadd.f32 %v10146_v14, %v10106_v21  ;;  %10400 = vmatpush1.bf16.msra.mxu0 %v14569_v3  ;;  %v14604_v3 = vld [vmem:[%s21720_s1 + $0x1e24] ss:$16 sps:$4 sm:$0xff]   ;;  %v14605_v11 = vld [vmem:[%s21720_s1 + $0x1c00] ss:$16 sps:$4 sm:$0xff]  }
 0x1c8   :  { %10441 = vmatpush1.bf16.msra.mxu1 %v14572_v53  ;;  %v10108_v2 = vpop.f32.mrf.mxu0  ;;  %10401 = vmatprep.subr.bf16.mxu0 %v14577_v16  ;;  %v14599_v53 = vld [vmem:[%s21720_s1 + $0x1c20] ss:$16 sps:$4 sm:$0xff]   ;;  %v14610_v10 = vld [vmem:[%s21720_s1 + $0x1e04] ss:$16 sps:$4 sm:$0xff]  }
 0x1c9   :  { %v10149_v63 = vpop.f32.mrf.mxu1  ;;  %10442 = vmatprep.subr.bf16.mxu1 %v14580_v19  ;;  %v14608_v14 = vld [vmem:[%s21720_s1 + $0x1e00] ss:$16 sps:$4 sm:$0xff]   ;;  %v14613_v16 = vld [vmem:[%s21720_s1 + $0x1de4] ss:$16 sps:$4 sm:$0xff]  }
 0x1ca   :  { %v14616_v19 = vld [vmem:[%s21720_s1 + $0x1fe4] ss:$16 sps:$4 sm:$0xff]   ;;  %v14611_v21 = vld [vmem:[%s21720_s1 + $0x1de0] ss:$16 sps:$4 sm:$0xff]  }
 0x1cb   :  { %10402 = vmatpush1.bf16.msra.mxu0 %v14575_v55  ;;  %v14614_v55 = vld [vmem:[%s21720_s1 + $0x1fe0] ss:$16 sps:$4 sm:$0xff]   ;;  %v14622_v5 = vld [vmem:[%s21720_s1 + $0x1fc4] ss:$16 sps:$4 sm:$0xff]  }
 0x1cc   :  { %10443 = vmatpush1.bf16.msra.mxu1 %v14578_v27  ;;  %10403 = vmatprep.subr.bf16.mxu0 %v14583_v37  ;;  %v14619_v27 = vld [vmem:[%s21720_s1 + $0x1dc4] ss:$16 sps:$4 sm:$0xff]   ;;  %v14617_v28 = vld [vmem:[%s21720_s1 + $0x1dc0] ss:$16 sps:$4 sm:$0xff]  }
 0x1cd   :  { %10444 = vmatprep.subr.bf16.mxu1 %v14586_v38  ;;  %v14620_v2 = vld [vmem:[%s21720_s1 + $0x1fc0] ss:$16 sps:$4 sm:$0xff]   ;;  %v14625_v63 = vld [vmem:[%s21720_s1 + $0x1da4] ss:$16 sps:$4 sm:$0xff]  }
 0x1ce   :  { %v14628_v37 = vld [vmem:[%s21720_s1 + $0x1fa4] ss:$16 sps:$4 sm:$0xff]   ;;  %v14623_v38 = vld [vmem:[%s21720_s1 + $0x1da0] ss:$16 sps:$4 sm:$0xff]  }
 0x1cf   :  { %10404 = vmatpush1.bf16.msra.mxu0 %v14581_v32  ;;  %v14626_v32 = vld [vmem:[%s21720_s1 + $0x1fa0] ss:$16 sps:$4 sm:$0xff]  }
 0x1d0   :  { %10445 = vmatpush1.bf16.msra.mxu1 %v14584_v44  ;;  %10405 = vmatprep.subr.bf16.mxu0 %v14589_v47  ;;  %v14631_v44 = vld [vmem:[%s21720_s1 + $0x1d84] ss:$16 sps:$4 sm:$0xff]  }
 0x1d1   :  { %10446 = vmatprep.subr.bf16.mxu1 %v14592_v48  ;;  %v14634_v47 = vld [vmem:[%s21720_s1 + $0x1f84] ss:$16 sps:$4 sm:$0xff]   ;;  %v14629_v48 = vld [vmem:[%s21720_s1 + $0x1d80] ss:$16 sps:$4 sm:$0xff]  }
 0x1d3   :  { %10406 = vmatpush1.bf16.msra.mxu0 %v14587_v51  ;;  %v14632_v51 = vld [vmem:[%s21720_s1 + $0x1f80] ss:$16 sps:$4 sm:$0xff]  }
 0x1d4   :  { %10447 = vmatpush1.bf16.msra.mxu1 %v14590_v52  ;;  %10407 = vmatprep.subr.bf16.mxu0 %v14595_v9  ;;  %v14637_v52 = vld [vmem:[%s21720_s1 + $0x1d64] ss:$16 sps:$4 sm:$0xff]  }
 0x1d5   :  { %10448 = vmatprep.subr.bf16.mxu1 %v14598_v56  ;;  %v14640_v9 = vld [vmem:[%s21720_s1 + $0x1f64] ss:$16 sps:$4 sm:$0xff]   ;;  %v14635_v56 = vld [vmem:[%s21720_s1 + $0x1d60] ss:$16 sps:$4 sm:$0xff]  }
 0x1d7   :  { %10408 = vmatpush1.bf16.msra.mxu0 %v14593_v57  ;;  %v14638_v57 = vld [vmem:[%s21720_s1 + $0x1f60] ss:$16 sps:$4 sm:$0xff]  }
 0x1d8   :  { %10449 = vmatpush1.bf16.msra.mxu1 %v14596_v61  ;;  %10409 = vmatprep.subr.bf16.mxu0 %v14601_v62  ;;  %v14643_v61 = vld [vmem:[%s21720_s1 + $0x1d44] ss:$16 sps:$4 sm:$0xff]  }
 0x1d9   :  { %10450 = vmatprep.subr.bf16.mxu1 %v14604_v3  ;;  %v14646_v62 = vld [vmem:[%s21720_s1 + $0x1f44] ss:$16 sps:$4 sm:$0xff]  }
 0x1da   :  { %v18079_v3 = vld [vmem:[%s21719_s0 + $0x20] sm:$0xff] }
 0x1db   :  { %10410 = vmatpush1.bf16.msra.mxu0 %v14599_v53  ;;  %v14641_v53 = vld [vmem:[%s21720_s1 + $0x1d40] ss:$16 sps:$4 sm:$0xff]  }
 0x1dc   :  { %10451 = vmatpush1.bf16.msra.mxu1 %v14602_v7  ;;  %10411 = vmatprep.subr.bf16.mxu0 %v14607_v8  ;;  %v14644_v7 = vld [vmem:[%s21720_s1 + $0x1f40] ss:$16 sps:$4 sm:$0xff]   ;;  %v14649_v8 = vld [vmem:[%s21720_s1 + $0x1d24] ss:$16 sps:$4 sm:$0xff]  }
 0x1dd   :  { %10452 = vmatprep.subr.bf16.mxu1 %v14610_v10  ;;  %v14652_v10 = vld [vmem:[%s21720_s1 + $0x1f24] ss:$16 sps:$4 sm:$0xff]  }
 0x1df   :  { %10412 = vmatpush1.bf16.msra.mxu0 %v14605_v11  ;;  %v18095_v11 = vrot.slane %v18079_v3, %v16469_v49 }
 0x1e0   :  { %10453 = vmatpush1.bf16.msra.mxu1 %v14608_v14  ;;  %10413 = vmatprep.subr.bf16.mxu0 %v14613_v16  ;;  %v14647_v14 = vld [vmem:[%s21720_s1 + $0x1d20] ss:$16 sps:$4 sm:$0xff]  }
 0x1e1   :  { %10454 = vmatprep.subr.bf16.mxu1 %v14616_v19  ;;  %v14650_v16 = vld [vmem:[%s21720_s1 + $0x1f20] ss:$16 sps:$4 sm:$0xff]   ;;  %v14655_v19 = vld [vmem:[%s21720_s1 + $0x1d04] ss:$16 sps:$4 sm:$0xff]  }
 0x1e3   :  { %10414 = vmatpush2.bf16.msra.mxu0 %v14611_v21  ;;  %v14658_v21 = vld [vmem:[%s21720_s1 + $0x1f04] ss:$16 sps:$4 sm:$0xff]  }
 0x1e4   :  { %10455 = vmatpush2.bf16.msra.mxu1 %v14614_v55  ;;  %10415 = vmatprep.subr.bf16.mxu0 %v14619_v27  ;;  %v1837_v55 = vcombine.high %v18095_v11, %v18095_v11  ;;  %v18113_v27 = vrot.slane %v17867_v36, %v16469_v49  ;;  %v14665_v36 = vld [vmem:[%s21720_s1 + $0x22e4] ss:$16 sps:$4 sm:$0xff]  }
 0x1e5   :  { %10456 = vmatprep.subr.bf16.mxu1 %v14622_v5  ;;  %v14653_v5 = vld [vmem:[%s21720_s1 + $0x1d00] ss:$16 sps:$4 sm:$0xff]  }
 0x1e7   :  { %10416 = vmatpush2.bf16.msra.mxu0 %v14617_v28  ;;  %v14656_v28 = vld [vmem:[%s21720_s1 + $0x1f00] ss:$16 sps:$4 sm:$0xff]  }
 0x1e8   :  { %10457 = vmatpush2.bf16.msra.mxu1 %v14620_v2  ;;  %10417 = vmatprep.subr.bf16.mxu0 %v14625_v63  ;;  %v14662_v2 = vld [vmem:[%s21720_s1 + $0x20e4] ss:$16 sps:$4 sm:$0xff]   ;;  %v14660_v63 = vld [vmem:[%s21720_s1 + $0x20e0] ss:$16 sps:$4 sm:$0xff]  }
 0x1e9   :  { %10458 = vmatprep.subr.bf16.mxu1 %v14628_v37  ;;  %v14663_v37 = vld [vmem:[%s21720_s1 + $0x22e0] ss:$16 sps:$4 sm:$0xff]  }
 0x1eb   :  { %10418 = vmatpush2.bf16.msra.mxu0 %v14623_v38  ;;  %v18134_v38 = vrot.slane %v1837_v55, %v16469_v49 }
 0x1ec   :  { %10459 = vmatpush2.bf16.msra.mxu1 %v14626_v32  ;;  %10419 = vmatprep.subr.bf16.mxu0 %v14631_v44  ;;  %v18138_v32 = vcombine.high %v18113_v27, %v18113_v27  ;;  %v14668_v44 = vld [vmem:[%s21720_s1 + $0x20c4] ss:$16 sps:$4 sm:$0xff]  }
 0x1ed   :  { %10460 = vmatprep.subr.bf16.mxu1 %v14634_v47  ;;  %v14671_v47 = vld [vmem:[%s21720_s1 + $0x22c4] ss:$16 sps:$4 sm:$0xff]  }
 0x1ef   :  { %10420 = vmatpush2.bf16.msra.mxu0 %v14629_v48  ;;  %v14666_v48 = vld [vmem:[%s21720_s1 + $0x20c0] ss:$16 sps:$4 sm:$0xff]  }
 0x1f0   :  { %10461 = vmatpush2.bf16.msra.mxu1 %v14632_v51  ;;  %10421 = vmatprep.subr.bf16.mxu0 %v14637_v52  ;;  %v14669_v51 = vld [vmem:[%s21720_s1 + $0x22c0] ss:$16 sps:$4 sm:$0xff]   ;;  %v18154_v52 = vcombine.high %v18134_v38, %v18134_v38 }
 0x1f1   :  { %10462 = vmatprep.subr.bf16.mxu1 %v14640_v9 }
 0x1f3   :  { %10422 = vmatpush2.bf16.msra.mxu0 %v14635_v56 }
 0x1f4   :  { %10463 = vmatpush2.bf16.msra.mxu1 %v14638_v57  ;;  %10423 = vmatprep.subr.bf16.mxu0 %v14643_v61 }
 0x1f5   :  { %10464 = vmatprep.subr.bf16.mxu1 %v14646_v62 }
 0x1f7   :  { %10424 = vmatpush2.bf16.msra.mxu0 %v14641_v53  ;;  %v14674_v53 = vld [vmem:[%s21720_s1 + $0x20a4] ss:$16 sps:$4 sm:$0xff]  }
 0x1f8   :  { %10465 = vmatpush2.bf16.msra.mxu1 %v14644_v7  ;;  %10425 = vmatprep.subr.bf16.mxu0 %v14649_v8  ;;  %v14677_v7 = vld [vmem:[%s21720_s1 + $0x22a4] ss:$16 sps:$4 sm:$0xff]  }
 0x1f9   :  { %10466 = vmatprep.subr.bf16.mxu1 %v14652_v10 }
 0x1fb   :  { %10426 = vmatpush2.bf16.msra.mxu0 %v14647_v14  ;;  %v14675_v14 = vld [vmem:[%s21720_s1 + $0x22a0] ss:$16 sps:$4 sm:$0xff]  }
 0x1fc   :  { %10467 = vmatpush2.bf16.msra.mxu1 %v14650_v16  ;;  %10427 = vmatprep.subr.bf16.mxu0 %v14655_v19 }
 0x1fd   :  { %10468 = vmatprep.subr.bf16.mxu1 %v14658_v21 }
 0x1ff   :  { %10428 = vmatpush2.bf16.msra.mxu0 %v14653_v5  ;;  %v14680_v5 = vld [vmem:[%s21720_s1 + $0x2084] ss:$16 sps:$4 sm:$0xff]  }
 0x200   :  { %10469 = vmatpush2.bf16.msra.mxu1 %v14656_v28  ;;  %10479 = vmatprep.subr.bf16.mxu0 %v14662_v2  ;;  %v14683_v28 = vld [vmem:[%s21720_s1 + $0x2284] ss:$16 sps:$4 sm:$0xff]   ;;  %v14678_v2 = vld [vmem:[%s21720_s1 + $0x2080] ss:$16 sps:$4 sm:$0xff]  }
 0x201   :  { %10520 = vmatprep.subr.bf16.mxu1 %v14665_v36  ;;  %v14681_v36 = vld [vmem:[%s21720_s1 + $0x2280] ss:$16 sps:$4 sm:$0xff]  }
 0x202   :  { %v10185_v9 = vpop.f32.mrf.mxu0  ;;  %10430 = vmatmul.mubr.bf16.vlgmr.msra.gmra.mxu0 %v18113_v27 }
 0x203   :  { %v10226_v56 = vpop.f32.mrf.mxu1  ;;  %10471 = vmatmul.mubr.bf16.vlgmr.msra.gmra.mxu1 %v18138_v32  ;;  %v10186_v57 = vadd.f32 %v10185_v9, %v17937_v20  ;;  %10480 = vmatpush1.bf16.msra.mxu0 %v14660_v63  ;;  %v14672_v20 = vld [vmem:[%s21720_s1 + $0x20a0] ss:$16 sps:$4 sm:$0xff]   ;;  %v14686_v63 = vld [vmem:[%s21720_s1 + $0x2064] ss:$16 sps:$4 sm:$0xff]  }
 0x204   :  { %10521 = vmatpush1.bf16.msra.mxu1 %v14663_v37  ;;  %v10187_v61 = vpop.f32.mrf.mxu0  ;;  %10481 = vmatprep.subr.bf16.mxu0 %v14668_v44  ;;  %v14689_v37 = vld [vmem:[%s21720_s1 + $0x2264] ss:$16 sps:$4 sm:$0xff]   ;;  %v14684_v44 = vld [vmem:[%s21720_s1 + $0x2060] ss:$16 sps:$4 sm:$0xff]  }
 0x205   :  { %v10228_v62 = vpop.f32.mrf.mxu1  ;;  %10522 = vmatprep.subr.bf16.mxu1 %v14671_v47  ;;  %v18165_v8 = vadd.f32 %v10226_v56, %v10186_v57  ;;  %v10188_v10 = vadd.f32 %v10187_v61, %v17948_v29  ;;  %10511 = vmatprep.mubr.bf16.mxu0 %v18134_v38  ;;  %v14687_v47 = vld [vmem:[%s21720_s1 + $0x2260] ss:$16 sps:$4 sm:$0xff]   ;;  %v14698_v57 = vld [vmem:[%s21720_s1 + $0x2024] ss:$16 sps:$4 sm:$0xff]  }
 0x206   :  { %10552 = vmatprep.mubr.bf16.mxu1 %v18154_v52  ;;  %v10189_v16 = vpop.f32.mrf.mxu0  ;;  %v14690_v9 = vld [vmem:[%s21720_s1 + $0x2040] ss:$16 sps:$4 sm:$0xff]   ;;  %v14701_v61 = vld [vmem:[%s21720_s1 + $0x2224] ss:$16 sps:$4 sm:$0xff]  }
 0x207   :  { %v10230_v19 = vpop.f32.mrf.mxu1  ;;  %v18176_v21 = vadd.f32 %v10228_v62, %v10188_v10  ;;  %10482 = vmatpush1.bf16.msra.mxu0 %v14666_v48  ;;  %v14692_v48 = vld [vmem:[%s21720_s1 + $0x2044] ss:$16 sps:$4 sm:$0xff]   ;;  %v14693_v56 = vld [vmem:[%s21720_s1 + $0x2240] ss:$16 sps:$4 sm:$0xff]  }
 0x208   :  { %10523 = vmatpush1.bf16.msra.mxu1 %v14669_v51  ;;  %v10190_v55 = vpop.f32.mrf.mxu0  ;;  %10483 = vmatprep.subr.bf16.mxu0 %v14674_v53  ;;  %v14695_v51 = vld [vmem:[%s21720_s1 + $0x2244] ss:$16 sps:$4 sm:$0xff]   ;;  %v14696_v62 = vld [vmem:[%s21720_s1 + $0x2020] ss:$16 sps:$4 sm:$0xff]  }
 0x209   :  { %v10231_v29 = vpop.f32.mrf.mxu1  ;;  %10524 = vmatprep.subr.bf16.mxu1 %v14677_v7  ;;  %v14699_v53 = vld [vmem:[%s21720_s1 + $0x2220] ss:$16 sps:$4 sm:$0xff]   ;;  %v14704_v7 = vld [vmem:[%s21720_s1 + $0x2004] ss:$16 sps:$4 sm:$0xff]  }
 0x20a   :  { %v14707_v10 = vld [vmem:[%s21720_s1 + $0x2204] ss:$16 sps:$4 sm:$0xff]   ;;  %v14708_v55 = vld [vmem:[%s21720_s1 + $0x21e0] ss:$16 sps:$4 sm:$0xff]  }
 0x20b   :  { %10484 = vmatpush1.bf16.msra.mxu0 %v14672_v20  ;;  %v14702_v20 = vld [vmem:[%s21720_s1 + $0x2000] ss:$16 sps:$4 sm:$0xff]   ;;  %v14710_v16 = vld [vmem:[%s21720_s1 + $0x21e4] ss:$16 sps:$4 sm:$0xff]  }
 0x20c   :  { %10525 = vmatpush1.bf16.msra.mxu1 %v14675_v14  ;;  %10485 = vmatprep.subr.bf16.mxu0 %v14680_v5  ;;  %v14705_v14 = vld [vmem:[%s21720_s1 + $0x2200] ss:$16 sps:$4 sm:$0xff]   ;;  %v14713_v19 = vld [vmem:[%s21720_s1 + $0x23e4] ss:$16 sps:$4 sm:$0xff]  }
 0x20d   :  { %10526 = vmatprep.subr.bf16.mxu1 %v14683_v28  ;;  %v14711_v29 = vld [vmem:[%s21720_s1 + $0x23e0] ss:$16 sps:$4 sm:$0xff]   ;;  %v14716_v5 = vld [vmem:[%s21720_s1 + $0x21c4] ss:$16 sps:$4 sm:$0xff]  }
 0x20e   :  { %v14719_v28 = vld [vmem:[%s21720_s1 + $0x23c4] ss:$16 sps:$4 sm:$0xff]  }
 0x20f   :  { %10486 = vmatpush1.bf16.msra.mxu0 %v14678_v2  ;;  %v14714_v2 = vld [vmem:[%s21720_s1 + $0x21c0] ss:$16 sps:$4 sm:$0xff]  }
 0x210   :  { %10527 = vmatpush1.bf16.msra.mxu1 %v14681_v36  ;;  %10487 = vmatprep.subr.bf16.mxu0 %v14686_v63  ;;  %v14717_v36 = vld [vmem:[%s21720_s1 + $0x23c0] ss:$16 sps:$4 sm:$0xff]   ;;  %v14722_v63 = vld [vmem:[%s21720_s1 + $0x21a4] ss:$16 sps:$4 sm:$0xff]  }
 0x211   :  { %10528 = vmatprep.subr.bf16.mxu1 %v14689_v37  ;;  %v14725_v37 = vld [vmem:[%s21720_s1 + $0x23a4] ss:$16 sps:$4 sm:$0xff]  }
 0x213   :  { %10488 = vmatpush1.bf16.msra.mxu0 %v14684_v44  ;;  %v14720_v44 = vld [vmem:[%s21720_s1 + $0x21a0] ss:$16 sps:$4 sm:$0xff]  }
 0x214   :  { %10529 = vmatpush1.bf16.msra.mxu1 %v14687_v47  ;;  %10489 = vmatprep.subr.bf16.mxu0 %v14692_v48  ;;  %v14723_v47 = vld [vmem:[%s21720_s1 + $0x23a0] ss:$16 sps:$4 sm:$0xff]   ;;  %v14728_v48 = vld [vmem:[%s21720_s1 + $0x2184] ss:$16 sps:$4 sm:$0xff]  }
 0x215   :  { %10530 = vmatprep.subr.bf16.mxu1 %v14695_v51  ;;  %v14731_v51 = vld [vmem:[%s21720_s1 + $0x2384] ss:$16 sps:$4 sm:$0xff]  }
 0x217   :  { %10490 = vmatpush1.bf16.msra.mxu0 %v14690_v9  ;;  %v14726_v9 = vld [vmem:[%s21720_s1 + $0x2180] ss:$16 sps:$4 sm:$0xff]  }
 0x218   :  { %10531 = vmatpush1.bf16.msra.mxu1 %v14693_v56  ;;  %10491 = vmatprep.subr.bf16.mxu0 %v14698_v57  ;;  %v14729_v56 = vld [vmem:[%s21720_s1 + $0x2380] ss:$16 sps:$4 sm:$0xff]   ;;  %v14734_v57 = vld [vmem:[%s21720_s1 + $0x2164] ss:$16 sps:$4 sm:$0xff]  }
 0x219   :  { %10532 = vmatprep.subr.bf16.mxu1 %v14701_v61  ;;  %v14737_v61 = vld [vmem:[%s21720_s1 + $0x2364] ss:$16 sps:$4 sm:$0xff]  }
 0x21b   :  { %10492 = vmatpush1.bf16.msra.mxu0 %v14696_v62  ;;  %v14732_v62 = vld [vmem:[%s21720_s1 + $0x2160] ss:$16 sps:$4 sm:$0xff]  }
 0x21c   :  { %10533 = vmatpush1.bf16.msra.mxu1 %v14699_v53  ;;  %10493 = vmatprep.subr.bf16.mxu0 %v14704_v7  ;;  %v14735_v53 = vld [vmem:[%s21720_s1 + $0x2360] ss:$16 sps:$4 sm:$0xff]   ;;  %v14740_v7 = vld [vmem:[%s21720_s1 + $0x2144] ss:$16 sps:$4 sm:$0xff]  }
 0x21d   :  { %10534 = vmatprep.subr.bf16.mxu1 %v14707_v10  ;;  %v14743_v10 = vld [vmem:[%s21720_s1 + $0x2344] ss:$16 sps:$4 sm:$0xff]  }
 0x21f   :  { %10494 = vmatpush1.bf16.msra.mxu0 %v14702_v20  ;;  %v1822_v20 = vcombine.high %v18079_v3, %v18079_v3  ;;  %v14749_v3 = vld [vmem:[%s21720_s1 + $0x2324] ss:$16 sps:$4 sm:$0xff]  }
 0x220   :  { %10535 = vmatpush1.bf16.msra.mxu1 %v14705_v14  ;;  %10495 = vmatprep.subr.bf16.mxu0 %v14710_v16  ;;  %v14738_v14 = vld [vmem:[%s21720_s1 + $0x2140] ss:$16 sps:$4 sm:$0xff]  }
 0x221   :  { %10536 = vmatprep.subr.bf16.mxu1 %v14713_v19  ;;  %v14741_v16 = vld [vmem:[%s21720_s1 + $0x2340] ss:$16 sps:$4 sm:$0xff]   ;;  %v14746_v19 = vld [vmem:[%s21720_s1 + $0x2124] ss:$16 sps:$4 sm:$0xff]  }
 0x223   :  { %10496 = vmatpush2.bf16.msra.mxu0 %v14708_v55  ;;  %v18319_v55 = vrot.slane %v1822_v20, %v16469_v49 }
 0x224   :  { %10537 = vmatpush2.bf16.msra.mxu1 %v14711_v29  ;;  %10497 = vmatprep.subr.bf16.mxu0 %v14716_v5  ;;  %v14744_v29 = vld [vmem:[%s21720_s1 + $0x2120] ss:$16 sps:$4 sm:$0xff]  }
 0x225   :  { %10538 = vmatprep.subr.bf16.mxu1 %v14719_v28  ;;  %v14747_v5 = vld [vmem:[%s21720_s1 + $0x2320] ss:$16 sps:$4 sm:$0xff]   ;;  %v14752_v28 = vld [vmem:[%s21720_s1 + $0x2104] ss:$16 sps:$4 sm:$0xff]  }
 0x227   :  { %10498 = vmatpush2.bf16.msra.mxu0 %v14714_v2  ;;  %v14755_v2 = vld [vmem:[%s21720_s1 + $0x2304] ss:$16 sps:$4 sm:$0xff]  }
 0x228   :  { %10539 = vmatpush2.bf16.msra.mxu1 %v14717_v36  ;;  %10499 = vmatprep.subr.bf16.mxu0 %v14722_v63  ;;  %v1838_v36 = vcombine.high %v18319_v55, %v18319_v55  ;;  %v18337_v63 = vrot.slane %v18095_v11, %v16469_v49  ;;  %v14761_v11 = vld [vmem:[%s21720_s1 + $0x26e4] ss:$16 sps:$4 sm:$0xff]  }
 0x229   :  { %10540 = vmatprep.subr.bf16.mxu1 %v14725_v37  ;;  %v14750_v37 = vld [vmem:[%s21720_s1 + $0x2100] ss:$16 sps:$4 sm:$0xff]  }
 0x22b   :  { %10500 = vmatpush2.bf16.msra.mxu0 %v14720_v44  ;;  %v14753_v44 = vld [vmem:[%s21720_s1 + $0x2300] ss:$16 sps:$4 sm:$0xff]  }
 0x22c   :  { %10541 = vmatpush2.bf16.msra.mxu1 %v14723_v47  ;;  %10501 = vmatprep.subr.bf16.mxu0 %v14728_v48  ;;  %v14758_v47 = vld [vmem:[%s21720_s1 + $0x24e4] ss:$16 sps:$4 sm:$0xff]   ;;  %v14756_v48 = vld [vmem:[%s21720_s1 + $0x24e0] ss:$16 sps:$4 sm:$0xff]  }
 0x22d   :  { %10542 = vmatprep.subr.bf16.mxu1 %v14731_v51  ;;  %v14759_v51 = vld [vmem:[%s21720_s1 + $0x26e0] ss:$16 sps:$4 sm:$0xff]  }
 0x22f   :  { %10502 = vmatpush2.bf16.msra.mxu0 %v14726_v9  ;;  %v18358_v9 = vrot.slane %v1838_v36, %v16469_v49 }
 0x230   :  { %10543 = vmatpush2.bf16.msra.mxu1 %v14729_v56  ;;  %10503 = vmatprep.subr.bf16.mxu0 %v14734_v57  ;;  %v18362_v56 = vcombine.high %v18337_v63, %v18337_v63  ;;  %v14764_v57 = vld [vmem:[%s21720_s1 + $0x24c4] ss:$16 sps:$4 sm:$0xff]  }
 0x231   :  { %10544 = vmatprep.subr.bf16.mxu1 %v14737_v61  ;;  %v14767_v61 = vld [vmem:[%s21720_s1 + $0x26c4] ss:$16 sps:$4 sm:$0xff]  }
 0x233   :  { %10504 = vmatpush2.bf16.msra.mxu0 %v14732_v62  ;;  %v14762_v62 = vld [vmem:[%s21720_s1 + $0x24c0] ss:$16 sps:$4 sm:$0xff]  }
 0x234   :  { %10545 = vmatpush2.bf16.msra.mxu1 %v14735_v53  ;;  %10505 = vmatprep.subr.bf16.mxu0 %v14740_v7  ;;  %v14765_v53 = vld [vmem:[%s21720_s1 + $0x26c0] ss:$16 sps:$4 sm:$0xff]   ;;  %v18378_v7 = vcombine.high %v18358_v9, %v18358_v9 }
 0x235   :  { %10546 = vmatprep.subr.bf16.mxu1 %v14743_v10 }
 0x237   :  { %10506 = vmatpush2.bf16.msra.mxu0 %v14738_v14 }
 0x238   :  { %10547 = vmatpush2.bf16.msra.mxu1 %v14741_v16  ;;  %10507 = vmatprep.subr.bf16.mxu0 %v14746_v19 }
 0x239   :  { %10548 = vmatprep.subr.bf16.mxu1 %v14749_v3  ;;  %v14770_v3 = vld [vmem:[%s21720_s1 + $0x24a4] ss:$16 sps:$4 sm:$0xff]  }
 0x23b   :  { %10508 = vmatpush2.bf16.msra.mxu0 %v14744_v29  ;;  %v14773_v29 = vld [vmem:[%s21720_s1 + $0x26a4] ss:$16 sps:$4 sm:$0xff]  }
 0x23c   :  { %10549 = vmatpush2.bf16.msra.mxu1 %v14747_v5  ;;  %10509 = vmatprep.subr.bf16.mxu0 %v14752_v28 }
 0x23d   :  { %10550 = vmatprep.subr.bf16.mxu1 %v14755_v2  ;;  %v14771_v2 = vld [vmem:[%s21720_s1 + $0x26a0] ss:$16 sps:$4 sm:$0xff]  }
 0x23f   :  { %10510 = vmatpush2.bf16.msra.mxu0 %v14750_v37 }
 0x240   :  { %10551 = vmatpush2.bf16.msra.mxu1 %v14753_v44  ;;  %10561 = vmatprep.subr.bf16.mxu0 %v14758_v47 }
 0x241   :  { %10602 = vmatprep.subr.bf16.mxu1 %v14761_v11  ;;  %v14776_v11 = vld [vmem:[%s21720_s1 + $0x2484] ss:$16 sps:$4 sm:$0xff]  }
 0x242   :  { %v10267_v10 = vpop.f32.mrf.mxu0  ;;  %10512 = vmatmul.mubr.bf16.vlgmr.msra.gmra.mxu0 %v18337_v63 }
 0x243   :  { %v10308_v20 = vpop.f32.mrf.mxu1  ;;  %10553 = vmatmul.mubr.bf16.vlgmr.msra.gmra.mxu1 %v18362_v56  ;;  %v10268_v14 = vadd.f32 %v10267_v10, %v18165_v8  ;;  %10562 = vmatpush1.bf16.msra.mxu0 %v14756_v48  ;;  %v14768_v8 = vld [vmem:[%s21720_s1 + $0x24a0] ss:$16 sps:$4 sm:$0xff]   ;;  %v14779_v48 = vld [vmem:[%s21720_s1 + $0x2684] ss:$16 sps:$4 sm:$0xff]  }
 0x244   :  { %10603 = vmatpush1.bf16.msra.mxu1 %v14759_v51  ;;  %v10269_v16 = vpop.f32.mrf.mxu0  ;;  %10563 = vmatprep.subr.bf16.mxu0 %v14764_v57  ;;  %v14774_v51 = vld [vmem:[%s21720_s1 + $0x2480] ss:$16 sps:$4 sm:$0xff]  }
 0x245   :  { %v10310_v19 = vpop.f32.mrf.mxu1  ;;  %10604 = vmatprep.subr.bf16.mxu1 %v14767_v61  ;;  %v18389_v5 = vadd.f32 %v10308_v20, %v10268_v14  ;;  %v10270_v28 = vadd.f32 %v10269_v16, %v18176_v21  ;;  %10593 = vmatprep.mubr.bf16.mxu0 %v18358_v9  ;;  %v14777_v57 = vld [vmem:[%s21720_s1 + $0x2680] ss:$16 sps:$4 sm:$0xff]   ;;  %v14782_v61 = vld [vmem:[%s21720_s1 + $0x2464] ss:$16 sps:$4 sm:$0xff]  }
 0x246   :  { %10634 = vmatprep.mubr.bf16.mxu1 %v18378_v7  ;;  %v10271_v36 = vpop.f32.mrf.mxu0  ;;  %v14783_v10 = vld [vmem:[%s21720_s1 + $0x2660] ss:$16 sps:$4 sm:$0xff]   ;;  %v14788_v20 = vld [vmem:[%s21720_s1 + $0x2444] ss:$16 sps:$4 sm:$0xff]  }
 0x247   :  { %v10312_v37 = vpop.f32.mrf.mxu1  ;;  %v18400_v44 = vadd.f32 %v10310_v19, %v10270_v28  ;;  %10564 = vmatpush1.bf16.msra.mxu0 %v14762_v62  ;;  %v14785_v62 = vld [vmem:[%s21720_s1 + $0x2664] ss:$16 sps:$4 sm:$0xff]   ;;  %v14786_v16 = vld [vmem:[%s21720_s1 + $0x2440] ss:$16 sps:$4 sm:$0xff]  }
 0x248   :  { %10605 = vmatpush1.bf16.msra.mxu1 %v14765_v53  ;;  %v10272_v47 = vpop.f32.mrf.mxu0  ;;  %10565 = vmatprep.subr.bf16.mxu0 %v14770_v3  ;;  %v14780_v53 = vld [vmem:[%s21720_s1 + $0x2460] ss:$16 sps:$4 sm:$0xff]   ;;  %v14791_v14 = vld [vmem:[%s21720_s1 + $0x2644] ss:$16 sps:$4 sm:$0xff]  }
 0x249   :  { %v10313_v21 = vpop.f32.mrf.mxu1  ;;  %10606 = vmatprep.subr.bf16.mxu1 %v14773_v29  ;;  %v14789_v19 = vld [vmem:[%s21720_s1 + $0x2640] ss:$16 sps:$4 sm:$0xff]   ;;  %v14794_v3 = vld [vmem:[%s21720_s1 + $0x2424] ss:$16 sps:$4 sm:$0xff]  }
 0x24a   :  { %v14797_v29 = vld [vmem:[%s21720_s1 + $0x2624] ss:$16 sps:$4 sm:$0xff]   ;;  %v14792_v28 = vld [vmem:[%s21720_s1 + $0x2420] ss:$16 sps:$4 sm:$0xff]  }
 0x24b   :  { %10566 = vmatpush1.bf16.msra.mxu0 %v14768_v8  ;;  %v14795_v8 = vld [vmem:[%s21720_s1 + $0x2620] ss:$16 sps:$4 sm:$0xff]   ;;  %v14803_v36 = vld [vmem:[%s21720_s1 + $0x2604] ss:$16 sps:$4 sm:$0xff]  }
 0x24c   :  { %10607 = vmatpush1.bf16.msra.mxu1 %v14771_v2  ;;  %10567 = vmatprep.subr.bf16.mxu0 %v14776_v11  ;;  %v14800_v2 = vld [vmem:[%s21720_s1 + $0x2404] ss:$16 sps:$4 sm:$0xff]   ;;  %v14798_v37 = vld [vmem:[%s21720_s1 + $0x2400] ss:$16 sps:$4 sm:$0xff]  }
 0x24d   :  { %10608 = vmatprep.subr.bf16.mxu1 %v14779_v48  ;;  %v14801_v47 = vld [vmem:[%s21720_s1 + $0x2600] ss:$16 sps:$4 sm:$0xff]   ;;  %v14806_v21 = vld [vmem:[%s21720_s1 + $0x25e4] ss:$16 sps:$4 sm:$0xff]  }
 0x24e   :  { %v14809_v11 = vld [vmem:[%s21720_s1 + $0x27e4] ss:$16 sps:$4 sm:$0xff]   ;;  %v14804_v48 = vld [vmem:[%s21720_s1 + $0x25e0] ss:$16 sps:$4 sm:$0xff]  }
 0x24f   :  { %10568 = vmatpush1.bf16.msra.mxu0 %v14774_v51  ;;  %v14807_v51 = vld [vmem:[%s21720_s1 + $0x27e0] ss:$16 sps:$4 sm:$0xff]  }
 0x250   :  { %10609 = vmatpush1.bf16.msra.mxu1 %v14777_v57  ;;  %10569 = vmatprep.subr.bf16.mxu0 %v14782_v61  ;;  %v14812_v57 = vld [vmem:[%s21720_s1 + $0x25c4] ss:$16 sps:$4 sm:$0xff]  }
 0x251   :  { %10610 = vmatprep.subr.bf16.mxu1 %v14785_v62  ;;  %v14815_v61 = vld [vmem:[%s21720_s1 + $0x27c4] ss:$16 sps:$4 sm:$0xff]   ;;  %v14810_v62 = vld [vmem:[%s21720_s1 + $0x25c0] ss:$16 sps:$4 sm:$0xff]  }
 0x253   :  { %10570 = vmatpush1.bf16.msra.mxu0 %v14780_v53  ;;  %v14813_v53 = vld [vmem:[%s21720_s1 + $0x27c0] ss:$16 sps:$4 sm:$0xff]  }
 0x254   :  { %10611 = vmatpush1.bf16.msra.mxu1 %v14783_v10  ;;  %10571 = vmatprep.subr.bf16.mxu0 %v14788_v20  ;;  %v14818_v10 = vld [vmem:[%s21720_s1 + $0x25a4] ss:$16 sps:$4 sm:$0xff]  }
 0x255   :  { %10612 = vmatprep.subr.bf16.mxu1 %v14791_v14  ;;  %v14821_v20 = vld [vmem:[%s21720_s1 + $0x27a4] ss:$16 sps:$4 sm:$0xff]   ;;  %v14816_v14 = vld [vmem:[%s21720_s1 + $0x25a0] ss:$16 sps:$4 sm:$0xff]  }
 0x257   :  { %10572 = vmatpush1.bf16.msra.mxu0 %v14786_v16  ;;  %v14819_v16 = vld [vmem:[%s21720_s1 + $0x27a0] ss:$16 sps:$4 sm:$0xff]  }
 0x258   :  { %10613 = vmatpush1.bf16.msra.mxu1 %v14789_v19  ;;  %10573 = vmatprep.subr.bf16.mxu0 %v14794_v3  ;;  %v14824_v19 = vld [vmem:[%s21720_s1 + $0x2584] ss:$16 sps:$4 sm:$0xff]  }
 0x259   :  { %10614 = vmatprep.subr.bf16.mxu1 %v14797_v29  ;;  %v14827_v3 = vld [vmem:[%s21720_s1 + $0x2784] ss:$16 sps:$4 sm:$0xff]   ;;  %v14822_v29 = vld [vmem:[%s21720_s1 + $0x2580] ss:$16 sps:$4 sm:$0xff]  }
 0x25b   :  { %10574 = vmatpush1.bf16.msra.mxu0 %v14792_v28  ;;  %v14825_v28 = vld [vmem:[%s21720_s1 + $0x2780] ss:$16 sps:$4 sm:$0xff]  }
 0x25c   :  { %10615 = vmatpush1.bf16.msra.mxu1 %v14795_v8  ;;  %10575 = vmatprep.subr.bf16.mxu0 %v14800_v2  ;;  %v14830_v8 = vld [vmem:[%s21720_s1 + $0x2564] ss:$16 sps:$4 sm:$0xff]  }
 0x25d   :  { %10616 = vmatprep.subr.bf16.mxu1 %v14803_v36  ;;  %v14833_v2 = vld [vmem:[%s21720_s1 + $0x2764] ss:$16 sps:$4 sm:$0xff]   ;;  %v14828_v36 = vld [vmem:[%s21720_s1 + $0x2560] ss:$16 sps:$4 sm:$0xff]  }
 0x25f   :  { %10576 = vmatpush1.bf16.msra.mxu0 %v14798_v37  ;;  %v14831_v37 = vld [vmem:[%s21720_s1 + $0x2760] ss:$16 sps:$4 sm:$0xff]  }
 0x260   :  { %10617 = vmatpush1.bf16.msra.mxu1 %v14801_v47  ;;  %10577 = vmatprep.subr.bf16.mxu0 %v14806_v21  ;;  %v14836_v47 = vld [vmem:[%s21720_s1 + $0x2544] ss:$16 sps:$4 sm:$0xff]  }
 0x261   :  { %10618 = vmatprep.subr.bf16.mxu1 %v14809_v11  ;;  %v14839_v21 = vld [vmem:[%s21720_s1 + $0x2744] ss:$16 sps:$4 sm:$0xff]   ;;  %v18531_v11 = vld [vmem:[%s21719_s0 + $0x28] sm:$0xff] }
 0x263   :  { %10578 = vmatpush2.bf16.msra.mxu0 %v14804_v48  ;;  %v14834_v48 = vld [vmem:[%s21720_s1 + $0x2540] ss:$16 sps:$4 sm:$0xff]  }
 0x264   :  { %10619 = vmatpush2.bf16.msra.mxu1 %v14807_v51  ;;  %10579 = vmatprep.subr.bf16.mxu0 %v14812_v57  ;;  %v14837_v51 = vld [vmem:[%s21720_s1 + $0x2740] ss:$16 sps:$4 sm:$0xff]   ;;  %v14842_v57 = vld [vmem:[%s21720_s1 + $0x2524] ss:$16 sps:$4 sm:$0xff]  }
 0x265   :  { %10620 = vmatprep.subr.bf16.mxu1 %v14815_v61  ;;  %v14845_v61 = vld [vmem:[%s21720_s1 + $0x2724] ss:$16 sps:$4 sm:$0xff]  }
 0x267   :  { %10580 = vmatpush2.bf16.msra.mxu0 %v14810_v62  ;;  %v18547_v62 = vrot.slane %v18531_v11, %v16469_v49 }
 0x268   :  { %10621 = vmatpush2.bf16.msra.mxu1 %v14813_v53  ;;  %10581 = vmatprep.subr.bf16.mxu0 %v14818_v10  ;;  %v14840_v53 = vld [vmem:[%s21720_s1 + $0x2520] ss:$16 sps:$4 sm:$0xff]  }
 0x269   :  { %10622 = vmatprep.subr.bf16.mxu1 %v14821_v20  ;;  %v14843_v10 = vld [vmem:[%s21720_s1 + $0x2720] ss:$16 sps:$4 sm:$0xff]   ;;  %v14848_v20 = vld [vmem:[%s21720_s1 + $0x2504] ss:$16 sps:$4 sm:$0xff]  }
 0x26b   :  { %10582 = vmatpush2.bf16.msra.mxu0 %v14816_v14  ;;  %v14851_v14 = vld [vmem:[%s21720_s1 + $0x2704] ss:$16 sps:$4 sm:$0xff]  }
 0x26c   :  { %10623 = vmatpush2.bf16.msra.mxu1 %v14819_v16  ;;  %10583 = vmatprep.subr.bf16.mxu0 %v14824_v19  ;;  %v1886_v16 = vcombine.high %v18547_v62, %v18547_v62  ;;  %v18565_v19 = vrot.slane %v18319_v55, %v16469_v49  ;;  %v14858_v55 = vld [vmem:[%s21720_s1 + $0x2ae4] ss:$16 sps:$4 sm:$0xff]  }
 0x26d   :  { %10624 = vmatprep.subr.bf16.mxu1 %v14827_v3  ;;  %v14846_v3 = vld [vmem:[%s21720_s1 + $0x2500] ss:$16 sps:$4 sm:$0xff]  }
 0x26f   :  { %10584 = vmatpush2.bf16.msra.mxu0 %v14822_v29  ;;  %v14849_v29 = vld [vmem:[%s21720_s1 + $0x2700] ss:$16 sps:$4 sm:$0xff]  }
 0x270   :  { %10625 = vmatpush2.bf16.msra.mxu1 %v14825_v28  ;;  %10585 = vmatprep.subr.bf16.mxu0 %v14830_v8  ;;  %v14855_v28 = vld [vmem:[%s21720_s1 + $0x28e4] ss:$16 sps:$4 sm:$0xff]   ;;  %v14853_v8 = vld [vmem:[%s21720_s1 + $0x28e0] ss:$16 sps:$4 sm:$0xff]  }
 0x271   :  { %10626 = vmatprep.subr.bf16.mxu1 %v14833_v2  ;;  %v14856_v2 = vld [vmem:[%s21720_s1 + $0x2ae0] ss:$16 sps:$4 sm:$0xff]  }
 0x273   :  { %10586 = vmatpush2.bf16.msra.mxu0 %v14828_v36  ;;  %v18586_v36 = vrot.slane %v1886_v16, %v16469_v49  ;;  %v14867_v16 = vld [vmem:[%s21720_s1 + $0x28a4] ss:$16 sps:$4 sm:$0xff]  }
 0x274   :  { %10627 = vmatpush2.bf16.msra.mxu1 %v14831_v37  ;;  %10587 = vmatprep.subr.bf16.mxu0 %v14836_v47  ;;  %v18590_v37 = vcombine.high %v18565_v19, %v18565_v19  ;;  %v14861_v47 = vld [vmem:[%s21720_s1 + $0x28c4] ss:$16 sps:$4 sm:$0xff]  }
 0x275   :  { %10628 = vmatprep.subr.bf16.mxu1 %v14839_v21  ;;  %v14864_v21 = vld [vmem:[%s21720_s1 + $0x2ac4] ss:$16 sps:$4 sm:$0xff]  }
 0x277   :  { %10588 = vmatpush2.bf16.msra.mxu0 %v14834_v48  ;;  %v14859_v48 = vld [vmem:[%s21720_s1 + $0x28c0] ss:$16 sps:$4 sm:$0xff]  }
 0x278   :  { %10629 = vmatpush2.bf16.msra.mxu1 %v14837_v51  ;;  %10589 = vmatprep.subr.bf16.mxu0 %v14842_v57  ;;  %v14862_v51 = vld [vmem:[%s21720_s1 + $0x2ac0] ss:$16 sps:$4 sm:$0xff]   ;;  %v18606_v57 = vcombine.high %v18586_v36, %v18586_v36 }
 0x279   :  { %10630 = vmatprep.subr.bf16.mxu1 %v14845_v61 }
 0x27a   :  { %21728 = vst [vmem:[#allocation5_spill] sm:$0xff] %v18606_v57 }
 0x27b   :  { %10590 = vmatpush2.bf16.msra.mxu0 %v14840_v53 }
 0x27c   :  { %10631 = vmatpush2.bf16.msra.mxu1 %v14843_v10  ;;  %10591 = vmatprep.subr.bf16.mxu0 %v14848_v20 }
 0x27d   :  { %10632 = vmatprep.subr.bf16.mxu1 %v14851_v14 }
 0x27f   :  { %10592 = vmatpush2.bf16.msra.mxu0 %v14846_v3  ;;  %v14870_v3 = vld [vmem:[%s21720_s1 + $0x2aa4] ss:$16 sps:$4 sm:$0xff]  }
 0x280   :  { %10633 = vmatpush2.bf16.msra.mxu1 %v14849_v29  ;;  %10643 = vmatprep.subr.bf16.mxu0 %v14855_v28 }
 0x281   :  { %10684 = vmatprep.subr.bf16.mxu1 %v14858_v55  ;;  %v14868_v55 = vld [vmem:[%s21720_s1 + $0x2aa0] ss:$16 sps:$4 sm:$0xff]  }
 0x282   :  { %v10349_v61 = vpop.f32.mrf.mxu0  ;;  %10594 = vmatmul.mubr.bf16.vlgmr.msra.gmra.mxu0 %v18565_v19 }
 0x283   :  { %v10390_v53 = vpop.f32.mrf.mxu1  ;;  %10635 = vmatmul.mubr.bf16.vlgmr.msra.gmra.mxu1 %v18590_v37  ;;  %v10350_v10 = vadd.f32 %v10349_v61, %v18389_v5  ;;  %10644 = vmatpush1.bf16.msra.mxu0 %v14853_v8  ;;  %v14865_v5 = vld [vmem:[%s21720_s1 + $0x28a0] ss:$16 sps:$4 sm:$0xff]   ;;  %v14873_v61 = vld [vmem:[%s21720_s1 + $0x2884] ss:$16 sps:$4 sm:$0xff]  }
 0x284   :  { %10685 = vmatpush1.bf16.msra.mxu1 %v14856_v2  ;;  %v10351_v20 = vpop.f32.mrf.mxu0  ;;  %10645 = vmatprep.subr.bf16.mxu0 %v14861_v47 }
 0x285   :  { %v10392_v14 = vpop.f32.mrf.mxu1  ;;  %10686 = vmatprep.subr.bf16.mxu1 %v14864_v21  ;;  %v18617_v29 = vadd.f32 %v10390_v53, %v10350_v10  ;;  %v10352_v28 = vadd.f32 %v10351_v20, %v18400_v44  ;;  %10675 = vmatprep.mubr.bf16.mxu0 %v18586_v36  ;;  %v14876_v53 = vld [vmem:[%s21720_s1 + $0x2a84] ss:$16 sps:$4 sm:$0xff]   ;;  %v14871_v10 = vld [vmem:[%s21720_s1 + $0x2880] ss:$16 sps:$4 sm:$0xff]  }
 0x286   :  { %10716 = vmatprep.mubr.bf16.mxu1 %v18606_v57  ;;  %v10353_v8 = vpop.f32.mrf.mxu0  ;;  %v14882_v20 = vld [vmem:[%s21720_s1 + $0x2a64] ss:$16 sps:$4 sm:$0xff]  }
 0x287   :  { %v10394_v2 = vpop.f32.mrf.mxu1  ;;  %v18628_v47 = vadd.f32 %v10392_v14, %v10352_v28  ;;  %10646 = vmatpush1.bf16.msra.mxu0 %v14859_v48  ;;  %v14874_v48 = vld [vmem:[%s21720_s1 + $0x2a80] ss:$16 sps:$4 sm:$0xff]   ;;  %v14888_v28 = vld [vmem:[%s21720_s1 + $0x2a44] ss:$16 sps:$4 sm:$0xff]  }
 0x288   :  { %10687 = vmatpush1.bf16.msra.mxu1 %v14862_v51  ;;  %v10354_v21 = vpop.f32.mrf.mxu0  ;;  %10647 = vmatprep.subr.bf16.mxu0 %v14867_v16  ;;  %v14879_v51 = vld [vmem:[%s21720_s1 + $0x2864] ss:$16 sps:$4 sm:$0xff]   ;;  %v14877_v14 = vld [vmem:[%s21720_s1 + $0x2860] ss:$16 sps:$4 sm:$0xff]  }
 0x289   :  { %v10395_v44 = vpop.f32.mrf.mxu1  ;;  %10688 = vmatprep.subr.bf16.mxu1 %v14870_v3  ;;  %v14880_v16 = vld [vmem:[%s21720_s1 + $0x2a60] ss:$16 sps:$4 sm:$0xff]   ;;  %v14885_v3 = vld [vmem:[%s21720_s1 + $0x2844] ss:$16 sps:$4 sm:$0xff]  }
 0x28a   :  { %v14891_v8 = vld [vmem:[%s21720_s1 + $0x2824] ss:$16 sps:$4 sm:$0xff]   ;;  %v14889_v21 = vld [vmem:[%s21720_s1 + $0x2820] ss:$16 sps:$4 sm:$0xff]  }
 0x28b   :  { %10648 = vmatpush1.bf16.msra.mxu0 %v14865_v5  ;;  %v14883_v5 = vld [vmem:[%s21720_s1 + $0x2840] ss:$16 sps:$4 sm:$0xff]   ;;  %v14894_v2 = vld [vmem:[%s21720_s1 + $0x2a24] ss:$16 sps:$4 sm:$0xff]  }
 0x28c   :  { %10689 = vmatpush1.bf16.msra.mxu1 %v14868_v55  ;;  %10649 = vmatprep.subr.bf16.mxu0 %v14873_v61  ;;  %v14886_v55 = vld [vmem:[%s21720_s1 + $0x2a40] ss:$16 sps:$4 sm:$0xff]   ;;  %v14897_v61 = vld [vmem:[%s21720_s1 + $0x2804] ss:$16 sps:$4 sm:$0xff]  }
 0x28d   :  { %10690 = vmatprep.subr.bf16.mxu1 %v14876_v53  ;;  %v14892_v44 = vld [vmem:[%s21720_s1 + $0x2a20] ss:$16 sps:$4 sm:$0xff]   ;;  %v14900_v53 = vld [vmem:[%s21720_s1 + $0x2a04] ss:$16 sps:$4 sm:$0xff]  }
 0x28f   :  { %10650 = vmatpush1.bf16.msra.mxu0 %v14871_v10  ;;  %v14895_v10 = vld [vmem:[%s21720_s1 + $0x2800] ss:$16 sps:$4 sm:$0xff]  }
 0x290   :  { %10691 = vmatpush1.bf16.msra.mxu1 %v14874_v48  ;;  %10651 = vmatprep.subr.bf16.mxu0 %v14879_v51  ;;  %v14898_v48 = vld [vmem:[%s21720_s1 + $0x2a00] ss:$16 sps:$4 sm:$0xff]   ;;  %v14903_v51 = vld [vmem:[%s21720_s1 + $0x29e4] ss:$16 sps:$4 sm:$0xff]  }
 0x291   :  { %10692 = vmatprep.subr.bf16.mxu1 %v14882_v20  ;;  %v14906_v20 = vld [vmem:[%s21720_s1 + $0x2be4] ss:$16 sps:$4 sm:$0xff]  }
 0x293   :  { %10652 = vmatpush1.bf16.msra.mxu0 %v14877_v14  ;;  %v14901_v14 = vld [vmem:[%s21720_s1 + $0x29e0] ss:$16 sps:$4 sm:$0xff]  }
 0x294   :  { %10693 = vmatpush1.bf16.msra.mxu1 %v14880_v16  ;;  %10653 = vmatprep.subr.bf16.mxu0 %v14885_v3  ;;  %v14904_v16 = vld [vmem:[%s21720_s1 + $0x2be0] ss:$16 sps:$4 sm:$0xff]   ;;  %v14909_v3 = vld [vmem:[%s21720_s1 + $0x29c4] ss:$16 sps:$4 sm:$0xff]  }
 0x295   :  { %10694 = vmatprep.subr.bf16.mxu1 %v14888_v28  ;;  %v14912_v28 = vld [vmem:[%s21720_s1 + $0x2bc4] ss:$16 sps:$4 sm:$0xff]  }
 0x297   :  { %10654 = vmatpush1.bf16.msra.mxu0 %v14883_v5  ;;  %v14907_v5 = vld [vmem:[%s21720_s1 + $0x29c0] ss:$16 sps:$4 sm:$0xff]  }
 0x298   :  { %10695 = vmatpush1.bf16.msra.mxu1 %v14886_v55  ;;  %10655 = vmatprep.subr.bf16.mxu0 %v14891_v8  ;;  %v14910_v55 = vld [vmem:[%s21720_s1 + $0x2bc0] ss:$16 sps:$4 sm:$0xff]   ;;  %v14915_v8 = vld [vmem:[%s21720_s1 + $0x29a4] ss:$16 sps:$4 sm:$0xff]  }
 0x299   :  { %10696 = vmatprep.subr.bf16.mxu1 %v14894_v2  ;;  %v14918_v2 = vld [vmem:[%s21720_s1 + $0x2ba4] ss:$16 sps:$4 sm:$0xff]  }
 0x29b   :  { %10656 = vmatpush1.bf16.msra.mxu0 %v14889_v21  ;;  %v14913_v21 = vld [vmem:[%s21720_s1 + $0x29a0] ss:$16 sps:$4 sm:$0xff]  }
 0x29c   :  { %10697 = vmatpush1.bf16.msra.mxu1 %v14892_v44  ;;  %10657 = vmatprep.subr.bf16.mxu0 %v14897_v61  ;;  %v14916_v44 = vld [vmem:[%s21720_s1 + $0x2ba0] ss:$16 sps:$4 sm:$0xff]   ;;  %v14921_v61 = vld [vmem:[%s21720_s1 + $0x2984] ss:$16 sps:$4 sm:$0xff]  }
 0x29d   :  { %10698 = vmatprep.subr.bf16.mxu1 %v14900_v53  ;;  %v14924_v53 = vld [vmem:[%s21720_s1 + $0x2b84] ss:$16 sps:$4 sm:$0xff]  }
 0x29f   :  { %10658 = vmatpush1.bf16.msra.mxu0 %v14895_v10  ;;  %v14919_v10 = vld [vmem:[%s21720_s1 + $0x2980] ss:$16 sps:$4 sm:$0xff]  }
 0x2a0   :  { %10699 = vmatpush1.bf16.msra.mxu1 %v14898_v48  ;;  %10659 = vmatprep.subr.bf16.mxu0 %v14903_v51  ;;  %v14922_v48 = vld [vmem:[%s21720_s1 + $0x2b80] ss:$16 sps:$4 sm:$0xff]   ;;  %v14927_v51 = vld [vmem:[%s21720_s1 + $0x2964] ss:$16 sps:$4 sm:$0xff]  }
 0x2a1   :  { %10700 = vmatprep.subr.bf16.mxu1 %v14906_v20  ;;  %v14930_v20 = vld [vmem:[%s21720_s1 + $0x2b64] ss:$16 sps:$4 sm:$0xff]  }
 0x2a3   :  { %10660 = vmatpush2.bf16.msra.mxu0 %v14901_v14  ;;  %v14925_v14 = vld [vmem:[%s21720_s1 + $0x2960] ss:$16 sps:$4 sm:$0xff]  }
 0x2a4   :  { %10701 = vmatpush2.bf16.msra.mxu1 %v14904_v16  ;;  %10661 = vmatprep.subr.bf16.mxu0 %v14909_v3  ;;  %v14928_v16 = vld [vmem:[%s21720_s1 + $0x2b60] ss:$16 sps:$4 sm:$0xff]   ;;  %v14933_v3 = vld [vmem:[%s21720_s1 + $0x2944] ss:$16 sps:$4 sm:$0xff]  }
 0x2a5   :  { %10702 = vmatprep.subr.bf16.mxu1 %v14912_v28  ;;  %v14936_v28 = vld [vmem:[%s21720_s1 + $0x2b44] ss:$16 sps:$4 sm:$0xff]  }
 0x2a7   :  { %10662 = vmatpush2.bf16.msra.mxu0 %v14907_v5  ;;  %v1871_v5 = vcombine.high %v18531_v11, %v18531_v11  ;;  %v14942_v11 = vld [vmem:[%s21720_s1 + $0x2b24] ss:$16 sps:$4 sm:$0xff]  }
 0x2a8   :  { %10703 = vmatpush2.bf16.msra.mxu1 %v14910_v55  ;;  %10663 = vmatprep.subr.bf16.mxu0 %v14915_v8  ;;  %v14931_v55 = vld [vmem:[%s21720_s1 + $0x2940] ss:$16 sps:$4 sm:$0xff]  }
 0x2a9   :  { %10704 = vmatprep.subr.bf16.mxu1 %v14918_v2  ;;  %v14934_v8 = vld [vmem:[%s21720_s1 + $0x2b40] ss:$16 sps:$4 sm:$0xff]   ;;  %v14939_v2 = vld [vmem:[%s21720_s1 + $0x2924] ss:$16 sps:$4 sm:$0xff]  }
 0x2ab   :  { %10664 = vmatpush2.bf16.msra.mxu0 %v14913_v21  ;;  %v18771_v21 = vrot.slane %v1871_v5, %v16469_v49 }
 0x2ac   :  { %10705 = vmatpush2.bf16.msra.mxu1 %v14916_v44  ;;  %10665 = vmatprep.subr.bf16.mxu0 %v14921_v61  ;;  %v14937_v44 = vld [vmem:[%s21720_s1 + $0x2920] ss:$16 sps:$4 sm:$0xff]  }
 0x2ad   :  { %10706 = vmatprep.subr.bf16.mxu1 %v14924_v53  ;;  %v14940_v61 = vld [vmem:[%s21720_s1 + $0x2b20] ss:$16 sps:$4 sm:$0xff]   ;;  %v14945_v53 = vld [vmem:[%s21720_s1 + $0x2904] ss:$16 sps:$4 sm:$0xff]  }
 0x2af   :  { %10666 = vmatpush2.bf16.msra.mxu0 %v14919_v10  ;;  %v14948_v10 = vld [vmem:[%s21720_s1 + $0x2b04] ss:$16 sps:$4 sm:$0xff]  }
 0x2b0   :  { %10707 = vmatpush2.bf16.msra.mxu1 %v14922_v48  ;;  %10667 = vmatprep.subr.bf16.mxu0 %v14927_v51  ;;  %v1887_v48 = vcombine.high %v18771_v21, %v18771_v21  ;;  %v18789_v51 = vrot.slane %v18547_v62, %v16469_v49  ;;  %v14954_v62 = vld [vmem:[%s21720_s1 + $0x2ee4] ss:$16 sps:$4 sm:$0xff]  }
 0x2b1   :  { %10708 = vmatprep.subr.bf16.mxu1 %v14930_v20  ;;  %v14943_v20 = vld [vmem:[%s21720_s1 + $0x2900] ss:$16 sps:$4 sm:$0xff]  }
 0x2b2   :  { %v18810_v5 = vrot.slane %v1887_v48, %v16469_v49 }
 0x2b3   :  { %10668 = vmatpush2.bf16.msra.mxu0 %v14925_v14  ;;  %v14946_v14 = vld [vmem:[%s21720_s1 + $0x2b00] ss:$16 sps:$4 sm:$0xff]  }
 0x2b4   :  { %10709 = vmatpush2.bf16.msra.mxu1 %v14928_v16  ;;  %10669 = vmatprep.subr.bf16.mxu0 %v14933_v3  ;;  %v14951_v16 = vld [vmem:[%s21720_s1 + $0x2ce4] ss:$16 sps:$4 sm:$0xff]   ;;  %v14949_v3 = vld [vmem:[%s21720_s1 + $0x2ce0] ss:$16 sps:$4 sm:$0xff]  }
 0x2b5   :  { %10710 = vmatprep.subr.bf16.mxu1 %v14936_v28  ;;  %v14952_v28 = vld [vmem:[%s21720_s1 + $0x2ee0] ss:$16 sps:$4 sm:$0xff]  }
 0x2b7   :  { %10670 = vmatpush2.bf16.msra.mxu0 %v14931_v55  ;;  %v18814_v55 = vcombine.high %v18789_v51, %v18789_v51 }
 0x2b8   :  { %10711 = vmatpush2.bf16.msra.mxu1 %v14934_v8  ;;  %10671 = vmatprep.subr.bf16.mxu0 %v14939_v2  ;;  %v14957_v8 = vld [vmem:[%s21720_s1 + $0x2cc4] ss:$16 sps:$4 sm:$0xff]  }
 0x2b9   :  { %10712 = vmatprep.subr.bf16.mxu1 %v14942_v11  ;;  %21729 = vst [vmem:[#allocation6_spill] sm:$0xff] %v18814_v55  ;;  %v14960_v2 = vld [vmem:[%s21720_s1 + $0x2ec4] ss:$16 sps:$4 sm:$0xff]   ;;  %v14955_v11 = vld [vmem:[%s21720_s1 + $0x2cc0] ss:$16 sps:$4 sm:$0xff]  }
 0x2bb   :  { %10672 = vmatpush2.bf16.msra.mxu0 %v14937_v44  ;;  %v14958_v44 = vld [vmem:[%s21720_s1 + $0x2ec0] ss:$16 sps:$4 sm:$0xff]  }
 0x2bc   :  { %10713 = vmatpush2.bf16.msra.mxu1 %v14940_v61  ;;  %10673 = vmatprep.subr.bf16.mxu0 %v14945_v53  ;;  %v18830_v61 = vcombine.high %v18810_v5, %v18810_v5 }
 0x2bd   :  { %10714 = vmatprep.subr.bf16.mxu1 %v14948_v10 }
 0x2bf   :  { %10674 = vmatpush2.bf16.msra.mxu0 %v14943_v20 }
 0x2c0   :  { %10715 = vmatpush2.bf16.msra.mxu1 %v14946_v14  ;;  %10725 = vmatprep.subr.bf16.mxu0 %v14951_v16  ;;  %v14963_v16 = vld [vmem:[%s21720_s1 + $0x2ca4] ss:$16 sps:$4 sm:$0xff]  }
 0x2c1   :  { %10766 = vmatprep.subr.bf16.mxu1 %v14954_v62  ;;  %v14966_v62 = vld [vmem:[%s21720_s1 + $0x2ea4] ss:$16 sps:$4 sm:$0xff]  }
 0x2c2   :  { %v10431_v53 = vpop.f32.mrf.mxu0  ;;  %10676 = vmatmul.mubr.bf16.vlgmr.msra.gmra.mxu0 %v18789_v51 }
 0x2c3   :  { %v10472_v10 = vpop.f32.mrf.mxu1  ;;  %10717 = vmatmul.mubr.bf16.vlgmr.msra.gmra.mxu1 %v18814_v55  ;;  %v10432_v48 = vadd.f32 %v10431_v53, %v18617_v29  ;;  %10726 = vmatpush1.bf16.msra.mxu0 %v14949_v3  ;;  %v14961_v29 = vld [vmem:[%s21720_s1 + $0x2ca0] ss:$16 sps:$4 sm:$0xff]  }
 0x2c4   :  { %10767 = vmatpush1.bf16.msra.mxu1 %v14952_v28  ;;  %v10433_v20 = vpop.f32.mrf.mxu0  ;;  %10727 = vmatprep.subr.bf16.mxu0 %v14957_v8  ;;  %v14964_v3 = vld [vmem:[%s21720_s1 + $0x2ea0] ss:$16 sps:$4 sm:$0xff]  }
 0x2c5   :  { %v10474_v14 = vpop.f32.mrf.mxu1  ;;  %10768 = vmatprep.subr.bf16.mxu1 %v14960_v2  ;;  %v18841_v57 = vadd.f32 %v10472_v10, %v10432_v48  ;;  %v10434_v55 = vadd.f32 %v10433_v20, %v18628_v47  ;;  %10757 = vmatprep.mubr.bf16.mxu0 %v18810_v5  ;;  %v14969_v10 = vld [vmem:[%s21720_s1 + $0x2c84] ss:$16 sps:$4 sm:$0xff]  }
 0x2c6   :  { %10798 = vmatprep.mubr.bf16.mxu1 %v18830_v61  ;;  %v10435_v28 = vpop.f32.mrf.mxu0  ;;  %v14972_v48 = vld [vmem:[%s21720_s1 + $0x2e84] ss:$16 sps:$4 sm:$0xff]  }
 0x2c7   :  { %v10476_v8 = vpop.f32.mrf.mxu1  ;;  %v18852_v2 = vadd.f32 %v10474_v14, %v10434_v55  ;;  %10728 = vmatpush1.bf16.msra.mxu0 %v14955_v11  ;;  %v14967_v55 = vld [vmem:[%s21720_s1 + $0x2c80] ss:$16 sps:$4 sm:$0xff]   ;;  %v14978_v20 = vld [vmem:[%s21720_s1 + $0x2e64] ss:$16 sps:$4 sm:$0xff]  }
 0x2c8   :  { %10769 = vmatpush1.bf16.msra.mxu1 %v14958_v44  ;;  %v10436_v53 = vpop.f32.mrf.mxu0  ;;  %10729 = vmatprep.subr.bf16.mxu0 %v14963_v16  ;;  %v14970_v11 = vld [vmem:[%s21720_s1 + $0x2e80] ss:$16 sps:$4 sm:$0xff]   ;;  %v14975_v44 = vld [vmem:[%s21720_s1 + $0x2c64] ss:$16 sps:$4 sm:$0xff]  }
 0x2c9   :  { %v10477_v47 = vpop.f32.mrf.mxu1  ;;  %10770 = vmatprep.subr.bf16.mxu1 %v14966_v62  ;;  %v14973_v14 = vld [vmem:[%s21720_s1 + $0x2c60] ss:$16 sps:$4 sm:$0xff]   ;;  %v14981_v62 = vld [vmem:[%s21720_s1 + $0x2c44] ss:$16 sps:$4 sm:$0xff]  }
 0x2ca   :  { %v14976_v16 = vld [vmem:[%s21720_s1 + $0x2e60] ss:$16 sps:$4 sm:$0xff]   ;;  %v14987_v8 = vld [vmem:[%s21720_s1 + $0x2c24] ss:$16 sps:$4 sm:$0xff]  }
 0x2cb   :  { %10730 = vmatpush1.bf16.msra.mxu0 %v14961_v29  ;;  %v14984_v29 = vld [vmem:[%s21720_s1 + $0x2e44] ss:$16 sps:$4 sm:$0xff]   ;;  %v14982_v28 = vld [vmem:[%s21720_s1 + $0x2e40] ss:$16 sps:$4 sm:$0xff]  }
 0x2cc   :  { %10771 = vmatpush1.bf16.msra.mxu1 %v14964_v3  ;;  %10731 = vmatprep.subr.bf16.mxu0 %v14969_v10  ;;  %v14979_v3 = vld [vmem:[%s21720_s1 + $0x2c40] ss:$16 sps:$4 sm:$0xff]   ;;  %v14990_v53 = vld [vmem:[%s21720_s1 + $0x2e24] ss:$16 sps:$4 sm:$0xff]  }
 0x2cd   :  { %10772 = vmatprep.subr.bf16.mxu1 %v14972_v48  ;;  %v14985_v47 = vld [vmem:[%s21720_s1 + $0x2c20] ss:$16 sps:$4 sm:$0xff]   ;;  %v14993_v48 = vld [vmem:[%s21720_s1 + $0x2c04] ss:$16 sps:$4 sm:$0xff]  }
 0x2ce   :  { %v14988_v10 = vld [vmem:[%s21720_s1 + $0x2e20] ss:$16 sps:$4 sm:$0xff]  }
 0x2cf   :  { %10732 = vmatpush1.bf16.msra.mxu0 %v14967_v55  ;;  %v14996_v55 = vld [vmem:[%s21720_s1 + $0x2e04] ss:$16 sps:$4 sm:$0xff]  }
 0x2d0   :  { %10773 = vmatpush1.bf16.msra.mxu1 %v14970_v11  ;;  %10733 = vmatprep.subr.bf16.mxu0 %v14975_v44  ;;  %v14991_v11 = vld [vmem:[%s21720_s1 + $0x2c00] ss:$16 sps:$4 sm:$0xff]  }
 0x2d1   :  { %10774 = vmatprep.subr.bf16.mxu1 %v14978_v20  ;;  %v14994_v44 = vld [vmem:[%s21720_s1 + $0x2e00] ss:$16 sps:$4 sm:$0xff]   ;;  %v14999_v20 = vld [vmem:[%s21720_s1 + $0x2de4] ss:$16 sps:$4 sm:$0xff]  }
 0x2d3   :  { %10734 = vmatpush1.bf16.msra.mxu0 %v14973_v14  ;;  %v15002_v14 = vld [vmem:[%s21720_s1 + $0x2fe4] ss:$16 sps:$4 sm:$0xff]  }
 0x2d4   :  { %10775 = vmatpush1.bf16.msra.mxu1 %v14976_v16  ;;  %10735 = vmatprep.subr.bf16.mxu0 %v14981_v62  ;;  %v14997_v16 = vld [vmem:[%s21720_s1 + $0x2de0] ss:$16 sps:$4 sm:$0xff]  }
 0x2d5   :  { %10776 = vmatprep.subr.bf16.mxu1 %v14984_v29  ;;  %v15000_v62 = vld [vmem:[%s21720_s1 + $0x2fe0] ss:$16 sps:$4 sm:$0xff]   ;;  %v15005_v29 = vld [vmem:[%s21720_s1 + $0x2dc4] ss:$16 sps:$4 sm:$0xff]  }
 0x2d7   :  { %10736 = vmatpush1.bf16.msra.mxu0 %v14979_v3  ;;  %v15008_v3 = vld [vmem:[%s21720_s1 + $0x2fc4] ss:$16 sps:$4 sm:$0xff]  }
 0x2d8   :  { %10777 = vmatpush1.bf16.msra.mxu1 %v14982_v28  ;;  %10737 = vmatprep.subr.bf16.mxu0 %v14987_v8  ;;  %v15003_v28 = vld [vmem:[%s21720_s1 + $0x2dc0] ss:$16 sps:$4 sm:$0xff]  }
 0x2d9   :  { %10778 = vmatprep.subr.bf16.mxu1 %v14990_v53  ;;  %v15006_v8 = vld [vmem:[%s21720_s1 + $0x2fc0] ss:$16 sps:$4 sm:$0xff]   ;;  %v15011_v53 = vld [vmem:[%s21720_s1 + $0x2da4] ss:$16 sps:$4 sm:$0xff]  }
 0x2db   :  { %10738 = vmatpush1.bf16.msra.mxu0 %v14985_v47  ;;  %v15014_v47 = vld [vmem:[%s21720_s1 + $0x2fa4] ss:$16 sps:$4 sm:$0xff]  }
 0x2dc   :  { %10779 = vmatpush1.bf16.msra.mxu1 %v14988_v10  ;;  %10739 = vmatprep.subr.bf16.mxu0 %v14993_v48  ;;  %v15009_v10 = vld [vmem:[%s21720_s1 + $0x2da0] ss:$16 sps:$4 sm:$0xff]  }
 0x2dd   :  { %10780 = vmatprep.subr.bf16.mxu1 %v14996_v55  ;;  %v15012_v48 = vld [vmem:[%s21720_s1 + $0x2fa0] ss:$16 sps:$4 sm:$0xff]   ;;  %v15017_v55 = vld [vmem:[%s21720_s1 + $0x2d84] ss:$16 sps:$4 sm:$0xff]  }
 0x2df   :  { %10740 = vmatpush1.bf16.msra.mxu0 %v14991_v11  ;;  %v15020_v11 = vld [vmem:[%s21720_s1 + $0x2f84] ss:$16 sps:$4 sm:$0xff]  }
 0x2e0   :  { %10781 = vmatpush1.bf16.msra.mxu1 %v14994_v44  ;;  %10741 = vmatprep.subr.bf16.mxu0 %v14999_v20  ;;  %v15015_v44 = vld [vmem:[%s21720_s1 + $0x2d80] ss:$16 sps:$4 sm:$0xff]  }
 0x2e1   :  { %10782 = vmatprep.subr.bf16.mxu1 %v15002_v14  ;;  %v15018_v20 = vld [vmem:[%s21720_s1 + $0x2f80] ss:$16 sps:$4 sm:$0xff]   ;;  %v15023_v14 = vld [vmem:[%s21720_s1 + $0x2d64] ss:$16 sps:$4 sm:$0xff]  }
 0x2e3   :  { %10742 = vmatpush2.bf16.msra.mxu0 %v14997_v16  ;;  %v15026_v16 = vld [vmem:[%s21720_s1 + $0x2f64] ss:$16 sps:$4 sm:$0xff]  }
 0x2e4   :  { %10783 = vmatpush2.bf16.msra.mxu1 %v15000_v62  ;;  %10743 = vmatprep.subr.bf16.mxu0 %v15005_v29  ;;  %v15021_v62 = vld [vmem:[%s21720_s1 + $0x2d60] ss:$16 sps:$4 sm:$0xff]  }
 0x2e5   :  { %10784 = vmatprep.subr.bf16.mxu1 %v15008_v3  ;;  %v15024_v29 = vld [vmem:[%s21720_s1 + $0x2f60] ss:$16 sps:$4 sm:$0xff]   ;;  %v15029_v3 = vld [vmem:[%s21720_s1 + $0x2d44] ss:$16 sps:$4 sm:$0xff]  }
 0x2e7   :  { %10744 = vmatpush2.bf16.msra.mxu0 %v15003_v28  ;;  %v15032_v28 = vld [vmem:[%s21720_s1 + $0x2f44] ss:$16 sps:$4 sm:$0xff]  }
 0x2e8   :  { %10785 = vmatpush2.bf16.msra.mxu1 %v15006_v8  ;;  %10745 = vmatprep.subr.bf16.mxu0 %v15011_v53  ;;  %v15027_v8 = vld [vmem:[%s21720_s1 + $0x2d40] ss:$16 sps:$4 sm:$0xff]  }
 0x2e9   :  { %10786 = vmatprep.subr.bf16.mxu1 %v15014_v47  ;;  %v15030_v53 = vld [vmem:[%s21720_s1 + $0x2f40] ss:$16 sps:$4 sm:$0xff]   ;;  %v15035_v47 = vld [vmem:[%s21720_s1 + $0x2d24] ss:$16 sps:$4 sm:$0xff]  }
 0x2eb   :  { %10746 = vmatpush2.bf16.msra.mxu0 %v15009_v10  ;;  %v15038_v10 = vld [vmem:[%s21720_s1 + $0x2f24] ss:$16 sps:$4 sm:$0xff]  }
 0x2ec   :  { %10787 = vmatpush2.bf16.msra.mxu1 %v15012_v48  ;;  %10747 = vmatprep.subr.bf16.mxu0 %v15017_v55  ;;  %v15033_v48 = vld [vmem:[%s21720_s1 + $0x2d20] ss:$16 sps:$4 sm:$0xff]  }
 0x2ed   :  { %10788 = vmatprep.subr.bf16.mxu1 %v15020_v11  ;;  %v15036_v55 = vld [vmem:[%s21720_s1 + $0x2f20] ss:$16 sps:$4 sm:$0xff]   ;;  %v15041_v11 = vld [vmem:[%s21720_s1 + $0x2d04] ss:$16 sps:$4 sm:$0xff]  }
 0x2ef   :  { %10748 = vmatpush2.bf16.msra.mxu0 %v15015_v44  ;;  %v15044_v44 = vld [vmem:[%s21720_s1 + $0x2f04] ss:$16 sps:$4 sm:$0xff]  }
 0x2f0   :  { %10789 = vmatpush2.bf16.msra.mxu1 %v15018_v20  ;;  %10749 = vmatprep.subr.bf16.mxu0 %v15023_v14  ;;  %v19006_v20 = vrot.slane %v18771_v21, %v16469_v49  ;;  %v15039_v14 = vld [vmem:[%s21720_s1 + $0x2d00] ss:$16 sps:$4 sm:$0xff]   ;;  %v15051_v21 = vld [vmem:[%s21720_s1 + $0xec] ss:$16 sps:$4 sm:$0xff]  }
 0x2f1   :  { %10790 = vmatprep.subr.bf16.mxu1 %v15026_v16  ;;  %v15042_v16 = vld [vmem:[%s21720_s1 + $0x2f00] ss:$16 sps:$4 sm:$0xff]  }
 0x2f3   :  { %10750 = vmatpush2.bf16.msra.mxu0 %v15021_v62  ;;  %v15048_v62 = vld [vmem:[%s21720_s1 + $0x30e4] ss:$16 sps:$4 sm:$0xff]  }
 0x2f4   :  { %10791 = vmatpush2.bf16.msra.mxu1 %v15024_v29  ;;  %10751 = vmatprep.subr.bf16.mxu0 %v15029_v3  ;;  %v15046_v29 = vld [vmem:[%s21720_s1 + $0x30e0] ss:$16 sps:$4 sm:$0xff]   ;;  %v15049_v3 = vld [vmem:[%s21720_s1 + $0xe8] ss:$16 sps:$4 sm:$0xff]  }
 0x2f5   :  { %10792 = vmatprep.subr.bf16.mxu1 %v15032_v28  ;;  %v19028_v28 = vcombine.high %v19006_v20, %v19006_v20 }
 0x2f7   :  { %10752 = vmatpush2.bf16.msra.mxu0 %v15027_v8  ;;  %21730 = vst [vmem:[#allocation7_spill] sm:$0xff] %v19028_v28  ;;  %v15054_v8 = vld [vmem:[%s21720_s1 + $0x30c4] ss:$16 sps:$4 sm:$0xff]  }
 0x2f8   :  { %10793 = vmatpush2.bf16.msra.mxu1 %v15030_v53  ;;  %10753 = vmatprep.subr.bf16.mxu0 %v15035_v47  ;;  %v15057_v53 = vld [vmem:[%s21720_s1 + $0xcc] ss:$16 sps:$4 sm:$0xff]   ;;  %v15052_v47 = vld [vmem:[%s21720_s1 + $0x30c0] ss:$16 sps:$4 sm:$0xff]  }
 0x2f9   :  { %10794 = vmatprep.subr.bf16.mxu1 %v15038_v10  ;;  %v15055_v10 = vld [vmem:[%s21720_s1 + $0xc8] ss:$16 sps:$4 sm:$0xff]  }
 0x2fb   :  { %10754 = vmatpush2.bf16.msra.mxu0 %v15033_v48 }
 0x2fc   :  { %10795 = vmatpush2.bf16.msra.mxu1 %v15036_v55  ;;  %10755 = vmatprep.subr.bf16.mxu0 %v15041_v11 }
 0x2fd   :  { %10796 = vmatprep.subr.bf16.mxu1 %v15044_v44 }
 0x2ff   :  { %10756 = vmatpush2.bf16.msra.mxu0 %v15039_v14 }
 0x300   :  { %10797 = vmatpush2.bf16.msra.mxu1 %v15042_v16  ;;  %10807 = vmatprep.subr.bf16.mxu0 %v15048_v62  ;;  %v15060_v16 = vld [vmem:[%s21720_s1 + $0x30a4] ss:$16 sps:$4 sm:$0xff]   ;;  %v15063_v62 = vld [vmem:[%s21720_s1 + $0xac] ss:$16 sps:$4 sm:$0xff]  }
 0x301   :  { %10848 = vmatprep.subr.bf16.mxu1 %v15051_v21 }
 0x302   :  { %v10513_v48 = vpop.f32.mrf.mxu0  ;;  %10758 = vmatmul.mubr.bf16.vlgmr.msra.gmra.mxu0 %v19006_v20 }
 0x303   :  { %v10554_v55 = vpop.f32.mrf.mxu1  ;;  %10799 = vmatmul.mubr.bf16.vlgmr.msra.gmra.mxu1 %v19028_v28  ;;  %v10514_v11 = vadd.f32 %v10513_v48, %v18841_v57  ;;  %10808 = vmatpush1.bf16.msra.mxu0 %v15046_v29  ;;  %v15058_v57 = vld [vmem:[%s21720_s1 + $0x30a0] ss:$16 sps:$4 sm:$0xff]   ;;  %v15061_v29 = vld [vmem:[%s21720_s1 + $0xa8] ss:$16 sps:$4 sm:$0xff]  }
 0x304   :  { %10849 = vmatpush1.bf16.msra.mxu1 %v15049_v3  ;;  %v10515_v44 = vpop.f32.mrf.mxu0  ;;  %10809 = vmatprep.subr.bf16.mxu0 %v15054_v8  ;;  %v16302_v3 = vmov 0  }
 0x305   :  { %v10556_v14 = vpop.f32.mrf.mxu1  ;;  %10850 = vmatprep.subr.bf16.mxu1 %v15057_v53  ;;  %v19051_v21 = vadd.f32 %v10554_v55, %v10514_v11  ;;  %v10516_v28 = vadd.f32 %v10515_v44, %v18852_v2  ;;  %10839 = vmatprep.mubr.bf16.mxu0 %v16302_v3  ;;  %v15066_v11 = vld [vmem:[%s21720_s1 + $0x3084] ss:$16 sps:$4 sm:$0xff]   ;;  %v15069_v44 = vld [vmem:[%s21720_s1 + $0x8c] ss:$16 sps:$4 sm:$0xff]  }
 0x306   :  { %10880 = vmatprep.mubr.bf16.mxu1 %v16497_v60  ;;  %v10517_v8 = vpop.f32.mrf.mxu0  ;;  %v15064_v60 = vld [vmem:[%s21720_s1 + $0x3080] ss:$16 sps:$4 sm:$0xff]  }
 0x307   :  { %v10558_v53 = vpop.f32.mrf.mxu1  ;;  %v19062_v48 = vadd.f32 %v10556_v14, %v10516_v28  ;;  %10810 = vmatpush1.bf16.msra.mxu0 %v15052_v47  ;;  %v15067_v28 = vld [vmem:[%s21720_s1 + $0x88] ss:$16 sps:$4 sm:$0xff]   ;;  %v15072_v47 = vld [vmem:[%s21720_s1 + $0x3064] ss:$16 sps:$4 sm:$0xff]   ;;  %v15070_v14 = vld [vmem:[%s21720_s1 + $0x3060] ss:$16 sps:$4 sm:$0xff]  }
 0x308   :  { %10851 = vmatpush1.bf16.msra.mxu1 %v15055_v10  ;;  %v10518_v2 = vpop.f32.mrf.mxu0  ;;  %10811 = vmatprep.subr.bf16.mxu0 %v15060_v16  ;;  %v15075_v10 = vld [vmem:[%s21720_s1 + $0x6c] ss:$16 sps:$4 sm:$0xff]   ;;  %v15073_v16 = vld [vmem:[%s21720_s1 + $0x68] ss:$16 sps:$4 sm:$0xff]   ;;  %v15084_v53 = vld [vmem:[%s21720_s1 + $0x3024] ss:$16 sps:$4 sm:$0xff]  }
 0x309   :  { %v10559_v55 = vpop.f32.mrf.mxu1  ;;  %10852 = vmatprep.subr.bf16.mxu1 %v15063_v62  ;;  %v15078_v62 = vld [vmem:[%s21720_s1 + $0x3044] ss:$16 sps:$4 sm:$0xff]   ;;  %v15079_v8 = vld [vmem:[%s21720_s1 + $0x48] ss:$16 sps:$4 sm:$0xff]   ;;  %v15087_v2 = vld [vmem:[%s21720_s1 + $0x2c] ss:$16 sps:$4 sm:$0xff]  }
 0x30a   :  { %v15082_v55 = vld [vmem:[%s21720_s1 + $0x3020] ss:$16 sps:$4 sm:$0xff]  }
 0x30b   :  { %10812 = vmatpush1.bf16.msra.mxu0 %v15058_v57  ;;  %v15081_v57 = vld [vmem:[%s21720_s1 + $0x4c] ss:$16 sps:$4 sm:$0xff]  }
 0x30c   :  { %10853 = vmatpush1.bf16.msra.mxu1 %v15061_v29  ;;  %10813 = vmatprep.subr.bf16.mxu0 %v15066_v11  ;;  %v15076_v29 = vld [vmem:[%s21720_s1 + $0x3040] ss:$16 sps:$4 sm:$0xff]   ;;  %v15085_v11 = vld [vmem:[%s21720_s1 + $0x28] ss:$16 sps:$4 sm:$0xff]  }
 0x30d   :  { %10854 = vmatprep.subr.bf16.mxu1 %v15069_v44  ;;  %v15090_v44 = vld [vmem:[%s21720_s1 + $0x3004] ss:$16 sps:$4 sm:$0xff]  }
 0x30f   :  { %10814 = vmatpush1.bf16.msra.mxu0 %v15064_v60  ;;  %v15093_v60 = vld [vmem:[%s21720_s1 + $0xc] ss:$16 sps:$4 sm:$0xff]  }
 0x310   :  { %10855 = vmatpush1.bf16.msra.mxu1 %v15067_v28  ;;  %10815 = vmatprep.subr.bf16.mxu0 %v15072_v47  ;;  %v15088_v28 = vld [vmem:[%s21720_s1 + $0x3000] ss:$16 sps:$4 sm:$0xff]   ;;  %v15091_v47 = vld [vmem:[%s21720_s1 + $0x8] ss:$16 sps:$4 sm:$0xff]  }
 0x311   :  { %10856 = vmatprep.subr.bf16.mxu1 %v15075_v10  ;;  %v12239_v10 = vld.sshfl [vmem:[%s21719_s0 + $0x30] sm:$0x1 pattern:$0x75316420] }
 0x313   :  { %10816 = vmatpush1.bf16.msra.mxu0 %v15070_v14  ;;  %v15096_v14 = vld [vmem:[%s21720_s1 + $0x1ec] ss:$16 sps:$4 sm:$0xff]  }
 0x314   :  { %10857 = vmatpush1.bf16.msra.mxu1 %v15073_v16  ;;  %10817 = vmatprep.subr.bf16.mxu0 %v15078_v62  ;;  %v15099_v16 = vld [vmem:[%s21720_s1 + $0x2ec] ss:$16 sps:$4 sm:$0xff]   ;;  %v15094_v62 = vld [vmem:[%s21720_s1 + $0x1e8] ss:$16 sps:$4 sm:$0xff]  }
 0x315   :  { %10858 = vmatprep.subr.bf16.mxu1 %v15081_v57  ;;  %v15097_v57 = vld [vmem:[%s21720_s1 + $0x2e8] ss:$16 sps:$4 sm:$0xff]  }
 0x317   :  { %10818 = vmatpush1.bf16.msra.mxu0 %v15076_v29  ;;  %v19140_v29 = vrot.slane %v12239_v10, %v16469_v49  ;;  %v15100_v49 = vld [vmem:[%s21720_s1 + $0x1c8] ss:$16 sps:$4 sm:$0xff]  }
 0x318   :  { %10859 = vmatpush1.bf16.msra.mxu1 %v15079_v8  ;;  %10819 = vmatprep.subr.bf16.mxu0 %v15084_v53  ;;  %v15102_v8 = vld [vmem:[%s21720_s1 + $0x1cc] ss:$16 sps:$4 sm:$0xff]   ;;  %v15115_v10 = vld [vmem:[%s21720_s1 + $0x288] ss:$16 sps:$4 sm:$0xff]  }
 0x319   :  { %10860 = vmatprep.subr.bf16.mxu1 %v15087_v2  ;;  %v15105_v53 = vld [vmem:[%s21720_s1 + $0x2cc] ss:$16 sps:$4 sm:$0xff]   ;;  %v15103_v2 = vld [vmem:[%s21720_s1 + $0x2c8] ss:$16 sps:$4 sm:$0xff]  }
 0x31b   :  { %10820 = vmatpush1.bf16.msra.mxu0 %v15082_v55  ;;  %v15108_v55 = vld [vmem:[%s21720_s1 + $0x1ac] ss:$16 sps:$4 sm:$0xff]  }
 0x31c   :  { %10861 = vmatpush1.bf16.msra.mxu1 %v15085_v11  ;;  %10821 = vmatprep.subr.bf16.mxu0 %v15090_v44  ;;  %v15111_v11 = vld [vmem:[%s21720_s1 + $0x2ac] ss:$16 sps:$4 sm:$0xff]   ;;  %v15106_v44 = vld [vmem:[%s21720_s1 + $0x1a8] ss:$16 sps:$4 sm:$0xff]  }
 0x31d   :  { %10862 = vmatprep.subr.bf16.mxu1 %v15093_v60  ;;  %v15109_v60 = vld [vmem:[%s21720_s1 + $0x2a8] ss:$16 sps:$4 sm:$0xff]  }
 0x31f   :  { %10822 = vmatpush1.bf16.msra.mxu0 %v15088_v28  ;;  %v15114_v28 = vld [vmem:[%s21720_s1 + $0x18c] ss:$16 sps:$4 sm:$0xff]  }
 0x320   :  { %10863 = vmatpush1.bf16.msra.mxu1 %v15091_v47  ;;  %10889 = vmatprep.subr.bf16.mxu0 %v15099_v16  ;;  %v15112_v47 = vld [vmem:[%s21720_s1 + $0x188] ss:$16 sps:$4 sm:$0xff]   ;;  %v15123_v16 = vld [vmem:[%s21720_s1 + $0x26c] ss:$16 sps:$4 sm:$0xff]  }
 0x321   :  { %10864 = vmatprep.subr.bf16.mxu1 %v15096_v14  ;;  %v15120_v14 = vld [vmem:[%s21720_s1 + $0x16c] ss:$16 sps:$4 sm:$0xff]  }
 0x322   :  { %10840 = vmatmul.mubr.bf16.vlgmr.msra.gmra.mxu0 %v19140_v29 }
 0x323   :  { %10890 = vmatpush1.bf16.msra.mxu0 %v15097_v57  ;;  %10921 = vmatprep.mubr.bf16.mxu0 %v16510_v0  ;;  %v15117_v0 = vld [vmem:[%s21720_s1 + $0x28c] ss:$16 sps:$4 sm:$0xff]   ;;  %v15121_v57 = vld [vmem:[%s21720_s1 + $0x268] ss:$16 sps:$4 sm:$0xff]  }
 0x324   :  { %10865 = vmatpush2.bf16.msra.mxu1 %v15094_v62  ;;  %10891 = vmatprep.subr.bf16.mxu0 %v15105_v53  ;;  %v15118_v62 = vld [vmem:[%s21720_s1 + $0x168] ss:$16 sps:$4 sm:$0xff]   ;;  %v15129_v53 = vld [vmem:[%s21720_s1 + $0x24c] ss:$16 sps:$4 sm:$0xff]  }
 0x325   :  { %10866 = vmatprep.subr.bf16.mxu1 %v15102_v8  ;;  %v15126_v8 = vld [vmem:[%s21720_s1 + $0x14c] ss:$16 sps:$4 sm:$0xff]  }
 0x327   :  { %10892 = vmatpush1.bf16.msra.mxu0 %v15103_v2  ;;  %v15127_v2 = vld [vmem:[%s21720_s1 + $0x248] ss:$16 sps:$4 sm:$0xff]  }
 0x328   :  { %10867 = vmatpush2.bf16.msra.mxu1 %v15100_v49  ;;  %10893 = vmatprep.subr.bf16.mxu0 %v15111_v11  ;;  %v15124_v49 = vld [vmem:[%s21720_s1 + $0x148] ss:$16 sps:$4 sm:$0xff]   ;;  %v15135_v11 = vld [vmem:[%s21720_s1 + $0x22c] ss:$16 sps:$4 sm:$0xff]  }
 0x329   :  { %10868 = vmatprep.subr.bf16.mxu1 %v15108_v55  ;;  %v15132_v55 = vld [vmem:[%s21720_s1 + $0x12c] ss:$16 sps:$4 sm:$0xff]  }
 0x32b   :  { %10894 = vmatpush1.bf16.msra.mxu0 %v15109_v60  ;;  %v15133_v60 = vld [vmem:[%s21720_s1 + $0x228] ss:$16 sps:$4 sm:$0xff]  }
 0x32c   :  { %10869 = vmatpush2.bf16.msra.mxu1 %v15106_v44  ;;  %10895 = vmatprep.subr.bf16.mxu0 %v15117_v0  ;;  %v15130_v44 = vld [vmem:[%s21720_s1 + $0x128] ss:$16 sps:$4 sm:$0xff]   ;;  %v15141_v0 = vld [vmem:[%s21720_s1 + $0x20c] ss:$16 sps:$4 sm:$0xff]  }
 0x32d   :  { %10870 = vmatprep.subr.bf16.mxu1 %v15114_v28  ;;  %v15138_v28 = vld [vmem:[%s21720_s1 + $0x10c] ss:$16 sps:$4 sm:$0xff]  }
 0x32f   :  { %10896 = vmatpush1.bf16.msra.mxu0 %v15115_v10  ;;  %v15139_v10 = vld [vmem:[%s21720_s1 + $0x208] ss:$16 sps:$4 sm:$0xff]  }
 0x330   :  { %10871 = vmatpush2.bf16.msra.mxu1 %v15112_v47  ;;  %10897 = vmatprep.subr.bf16.mxu0 %v15123_v16  ;;  %v15136_v47 = vld [vmem:[%s21720_s1 + $0x108] ss:$16 sps:$4 sm:$0xff]   ;;  %v15147_v16 = vld [vmem:[%s21720_s1 + $0x4ec] ss:$16 sps:$4 sm:$0xff]  }
 0x331   :  { %10872 = vmatprep.subr.bf16.mxu1 %v15120_v14  ;;  %v15144_v14 = vld [vmem:[%s21720_s1 + $0x3ec] ss:$16 sps:$4 sm:$0xff]  }
 0x333   :  { %10898 = vmatpush1.bf16.msra.mxu0 %v15121_v57  ;;  %v15145_v57 = vld [vmem:[%s21720_s1 + $0x4e8] ss:$16 sps:$4 sm:$0xff]  }
 0x334   :  { %10873 = vmatpush2.bf16.msra.mxu1 %v15118_v62  ;;  %10899 = vmatprep.subr.bf16.mxu0 %v15129_v53  ;;  %v15142_v62 = vld [vmem:[%s21720_s1 + $0x3e8] ss:$16 sps:$4 sm:$0xff]   ;;  %v15153_v53 = vld [vmem:[%s21720_s1 + $0x4cc] ss:$16 sps:$4 sm:$0xff]  }
 0x335   :  { %10874 = vmatprep.subr.bf16.mxu1 %v15126_v8  ;;  %v15150_v8 = vld [vmem:[%s21720_s1 + $0x3cc] ss:$16 sps:$4 sm:$0xff]  }
 0x337   :  { %10900 = vmatpush1.bf16.msra.mxu0 %v15127_v2  ;;  %v15151_v2 = vld [vmem:[%s21720_s1 + $0x4c8] ss:$16 sps:$4 sm:$0xff]  }
 0x338   :  { %10875 = vmatpush2.bf16.msra.mxu1 %v15124_v49  ;;  %10901 = vmatprep.subr.bf16.mxu0 %v15135_v11  ;;  %v15148_v49 = vld [vmem:[%s21720_s1 + $0x3c8] ss:$16 sps:$4 sm:$0xff]  }
 0x339   :  { %10876 = vmatprep.subr.bf16.mxu1 %v15132_v55 }
 0x33b   :  { %10902 = vmatpush1.bf16.msra.mxu0 %v15133_v60 }
 0x33c   :  { %10877 = vmatpush2.bf16.msra.mxu1 %v15130_v44  ;;  %10903 = vmatprep.subr.bf16.mxu0 %v15141_v0  ;;  %v15156_v0 = vld [vmem:[%s21720_s1 + $0x3ac] ss:$16 sps:$4 sm:$0xff]  }
 0x33d   :  { %10878 = vmatprep.subr.bf16.mxu1 %v15138_v28 }
 0x33f   :  { %10904 = vmatpush1.bf16.msra.mxu0 %v15139_v10 }
 0x340   :  { %10879 = vmatpush2.bf16.msra.mxu1 %v15136_v47  ;;  %10905 = vmatprep.subr.bf16.mxu0 %v15144_v14  ;;  %v15159_v47 = vld [vmem:[%s21720_s1 + $0x4ac] ss:$16 sps:$4 sm:$0xff]   ;;  %v15157_v14 = vld [vmem:[%s21720_s1 + $0x4a8] ss:$16 sps:$4 sm:$0xff]  }
 0x341   :  { %10930 = vmatprep.subr.bf16.mxu1 %v15147_v16 }
 0x342   :  { %v10595_v55 = vpop.f32.mrf.mxu0 }
 0x343   :  { %v10636_v11 = vpop.f32.mrf.mxu1  ;;  %10881 = vmatmul.mubr.bf16.vlgmr.msra.gmra.mxu1 %v16547_v13  ;;  %v10596_v44 = vadd.f32 %v10595_v55, %v19051_v21  ;;  %10906 = vmatpush2.bf16.msra.mxu0 %v15142_v62  ;;  %v15154_v21 = vld [vmem:[%s21720_s1 + $0x3a8] ss:$16 sps:$4 sm:$0xff]   ;;  %v15165_v55 = vld [vmem:[%s21720_s1 + $0x48c] ss:$16 sps:$4 sm:$0xff]  }
 0x344   :  { %10931 = vmatpush1.bf16.msra.mxu1 %v15145_v57  ;;  %v10597_v60 = vpop.f32.mrf.mxu0  ;;  %10907 = vmatprep.subr.bf16.mxu0 %v15150_v8 }
 0x345   :  { %v10638_v28 = vpop.f32.mrf.mxu1  ;;  %10932 = vmatprep.subr.bf16.mxu1 %v15153_v53  ;;  %v19260_v10 = vadd.f32 %v10636_v11, %v10596_v44  ;;  %v10598_v13 = vadd.f32 %v10597_v60, %v19062_v48  ;;  %10962 = vmatprep.mubr.bf16.mxu1 %v16559_v17  ;;  %v15162_v48 = vld [vmem:[%s21720_s1 + $0x38c] ss:$16 sps:$4 sm:$0xff]   ;;  %v15160_v17 = vld [vmem:[%s21720_s1 + $0x388] ss:$16 sps:$4 sm:$0xff]  }
 0x346   :  { %v10599_v16 = vpop.f32.mrf.mxu0  ;;  %v15171_v11 = vld [vmem:[%s21720_s1 + $0x46c] ss:$16 sps:$4 sm:$0xff]   ;;  %v15166_v44 = vld [vmem:[%s21720_s1 + $0x368] ss:$16 sps:$4 sm:$0xff]  }
 0x347   :  { %v10640_v62 = vpop.f32.mrf.mxu1  ;;  %v19270_v57 = vadd.f32 %v10638_v28, %v10598_v13  ;;  %10908 = vmatpush2.bf16.msra.mxu0 %v15148_v49  ;;  %v15163_v49 = vld [vmem:[%s21720_s1 + $0x488] ss:$16 sps:$4 sm:$0xff]   ;;  %v15174_v28 = vld [vmem:[%s21720_s1 + $0x34c] ss:$16 sps:$4 sm:$0xff]  }
 0x348   :  { %10933 = vmatpush1.bf16.msra.mxu1 %v15151_v2  ;;  %v10600_v8 = vpop.f32.mrf.mxu0  ;;  %10909 = vmatprep.subr.bf16.mxu0 %v15156_v0  ;;  %v15168_v2 = vld [vmem:[%s21720_s1 + $0x36c] ss:$16 sps:$4 sm:$0xff]   ;;  %v15169_v60 = vld [vmem:[%s21720_s1 + $0x468] ss:$16 sps:$4 sm:$0xff]  }
 0x349   :  { %v10641_v53 = vpop.f32.mrf.mxu1  ;;  %10934 = vmatprep.subr.bf16.mxu1 %v15159_v47  ;;  %v15177_v0 = vld [vmem:[%s21720_s1 + $0x44c] ss:$16 sps:$4 sm:$0xff]   ;;  %v15172_v47 = vld [vmem:[%s21720_s1 + $0x348] ss:$16 sps:$4 sm:$0xff]  }
 0x34a   :  { %v15175_v13 = vld [vmem:[%s21720_s1 + $0x448] ss:$16 sps:$4 sm:$0xff]   ;;  %v15186_v8 = vld [vmem:[%s21720_s1 + $0x30c] ss:$16 sps:$4 sm:$0xff]  }
 0x34b   :  { %10910 = vmatpush2.bf16.msra.mxu0 %v15154_v21  ;;  %v15180_v21 = vld [vmem:[%s21720_s1 + $0x32c] ss:$16 sps:$4 sm:$0xff]   ;;  %v15178_v16 = vld [vmem:[%s21720_s1 + $0x328] ss:$16 sps:$4 sm:$0xff]  }
 0x34c   :  { %10935 = vmatpush1.bf16.msra.mxu1 %v15157_v14  ;;  %10911 = vmatprep.subr.bf16.mxu0 %v15162_v48  ;;  %v15183_v14 = vld [vmem:[%s21720_s1 + $0x42c] ss:$16 sps:$4 sm:$0xff]   ;;  %v15181_v62 = vld [vmem:[%s21720_s1 + $0x428] ss:$16 sps:$4 sm:$0xff]  }
 0x34d   :  { %10936 = vmatprep.subr.bf16.mxu1 %v15165_v55  ;;  %v15189_v53 = vld [vmem:[%s21720_s1 + $0x40c] ss:$16 sps:$4 sm:$0xff]   ;;  %v15184_v48 = vld [vmem:[%s21720_s1 + $0x308] ss:$16 sps:$4 sm:$0xff]  }
 0x34e   :  { %v15187_v55 = vld [vmem:[%s21720_s1 + $0x408] ss:$16 sps:$4 sm:$0xff]  }
 0x34f   :  { %10912 = vmatpush2.bf16.msra.mxu0 %v15160_v17  ;;  %v15192_v17 = vld [vmem:[%s21720_s1 + $0x5ec] ss:$16 sps:$4 sm:$0xff]  }
 0x350   :  { %10937 = vmatpush1.bf16.msra.mxu1 %v15163_v49  ;;  %10913 = vmatprep.subr.bf16.mxu0 %v15168_v2  ;;  %v15195_v49 = vld [vmem:[%s21720_s1 + $0x6ec] ss:$16 sps:$4 sm:$0xff]   ;;  %v15190_v2 = vld [vmem:[%s21720_s1 + $0x5e8] ss:$16 sps:$4 sm:$0xff]  }
 0x351   :  { %10938 = vmatprep.subr.bf16.mxu1 %v15171_v11  ;;  %v15193_v11 = vld [vmem:[%s21720_s1 + $0x6e8] ss:$16 sps:$4 sm:$0xff]  }
 0x353   :  { %10914 = vmatpush2.bf16.msra.mxu0 %v15166_v44  ;;  %v15198_v44 = vld [vmem:[%s21720_s1 + $0x5cc] ss:$16 sps:$4 sm:$0xff]  }
 0x354   :  { %10939 = vmatpush1.bf16.msra.mxu1 %v15169_v60  ;;  %10915 = vmatprep.subr.bf16.mxu0 %v15174_v28  ;;  %v15201_v60 = vld [vmem:[%s21720_s1 + $0x6cc] ss:$16 sps:$4 sm:$0xff]   ;;  %v15196_v28 = vld [vmem:[%s21720_s1 + $0x5c8] ss:$16 sps:$4 sm:$0xff]  }
 0x355   :  { %10940 = vmatprep.subr.bf16.mxu1 %v15177_v0  ;;  %v15199_v0 = vld [vmem:[%s21720_s1 + $0x6c8] ss:$16 sps:$4 sm:$0xff]  }
 0x357   :  { %10916 = vmatpush2.bf16.msra.mxu0 %v15172_v47  ;;  %v15204_v47 = vld [vmem:[%s21720_s1 + $0x5ac] ss:$16 sps:$4 sm:$0xff]  }
 0x358   :  { %10941 = vmatpush1.bf16.msra.mxu1 %v15175_v13  ;;  %10917 = vmatprep.subr.bf16.mxu0 %v15180_v21  ;;  %v15207_v13 = vld [vmem:[%s21720_s1 + $0x6ac] ss:$16 sps:$4 sm:$0xff]   ;;  %v15202_v21 = vld [vmem:[%s21720_s1 + $0x5a8] ss:$16 sps:$4 sm:$0xff]  }
 0x359   :  { %10942 = vmatprep.subr.bf16.mxu1 %v15183_v14  ;;  %v15210_v14 = vld [vmem:[%s21720_s1 + $0x58c] ss:$16 sps:$4 sm:$0xff]  }
 0x35b   :  { %10918 = vmatpush2.bf16.msra.mxu0 %v15178_v16  ;;  %v15213_v16 = vld [vmem:[%s21720_s1 + $0x68c] ss:$16 sps:$4 sm:$0xff]  }
 0x35c   :  { %10943 = vmatpush1.bf16.msra.mxu1 %v15181_v62  ;;  %10919 = vmatprep.subr.bf16.mxu0 %v15186_v8  ;;  %v15208_v62 = vld [vmem:[%s21720_s1 + $0x588] ss:$16 sps:$4 sm:$0xff]   ;;  %v15216_v8 = vld [vmem:[%s21720_s1 + $0x56c] ss:$16 sps:$4 sm:$0xff]  }
 0x35d   :  { %10944 = vmatprep.subr.bf16.mxu1 %v15189_v53  ;;  %v15219_v53 = vld [vmem:[%s21720_s1 + $0x66c] ss:$16 sps:$4 sm:$0xff]  }
 0x35f   :  { %10920 = vmatpush2.bf16.msra.mxu0 %v15184_v48  ;;  %v15214_v48 = vld [vmem:[%s21720_s1 + $0x568] ss:$16 sps:$4 sm:$0xff]  }
 0x360   :  { %10945 = vmatpush1.bf16.msra.mxu1 %v15187_v55  ;;  %10971 = vmatprep.subr.bf16.mxu0 %v15195_v49  ;;  %v15217_v55 = vld [vmem:[%s21720_s1 + $0x668] ss:$16 sps:$4 sm:$0xff]   ;;  %v15225_v49 = vld [vmem:[%s21720_s1 + $0x64c] ss:$16 sps:$4 sm:$0xff]  }
 0x361   :  { %10946 = vmatprep.subr.bf16.mxu1 %v15192_v17  ;;  %v15222_v17 = vld [vmem:[%s21720_s1 + $0x54c] ss:$16 sps:$4 sm:$0xff]  }
 0x362   :  { %10922 = vmatmul.mubr.bf16.vlgmr.msra.gmra.mxu0 %v16563_v18  ;;  %v15205_v18 = vld [vmem:[%s21720_s1 + $0x6a8] ss:$16 sps:$4 sm:$0xff]  }
 0x363   :  { %10972 = vmatpush1.bf16.msra.mxu0 %v15193_v11  ;;  %11003 = vmatprep.mubr.bf16.mxu0 %v16579_v23  ;;  %v15211_v23 = vld [vmem:[%s21720_s1 + $0x688] ss:$16 sps:$4 sm:$0xff]  }
 0x364   :  { %10947 = vmatpush2.bf16.msra.mxu1 %v15190_v2  ;;  %10973 = vmatprep.subr.bf16.mxu0 %v15201_v60  ;;  %v15220_v2 = vld [vmem:[%s21720_s1 + $0x548] ss:$16 sps:$4 sm:$0xff]   ;;  %v15231_v60 = vld [vmem:[%s21720_s1 + $0x62c] ss:$16 sps:$4 sm:$0xff]  }
 0x365   :  { %10948 = vmatprep.subr.bf16.mxu1 %v15198_v44  ;;  %v15223_v11 = vld [vmem:[%s21720_s1 + $0x648] ss:$16 sps:$4 sm:$0xff]   ;;  %v15228_v44 = vld [vmem:[%s21720_s1 + $0x52c] ss:$16 sps:$4 sm:$0xff]  }
 0x367   :  { %10974 = vmatpush1.bf16.msra.mxu0 %v15199_v0 }
 0x368   :  { %10949 = vmatpush2.bf16.msra.mxu1 %v15196_v28  ;;  %10975 = vmatprep.subr.bf16.mxu0 %v15207_v13 }
 0x369   :  { %10950 = vmatprep.subr.bf16.mxu1 %v15204_v47 }
 0x36b   :  { %10976 = vmatpush1.bf16.msra.mxu0 %v15205_v18 }
 0x36c   :  { %10951 = vmatpush2.bf16.msra.mxu1 %v15202_v21  ;;  %10977 = vmatprep.subr.bf16.mxu0 %v15213_v16 }
 0x36d   :  { %10952 = vmatprep.subr.bf16.mxu1 %v15210_v14 }
 0x36f   :  { %10978 = vmatpush1.bf16.msra.mxu0 %v15211_v23 }
 0x370   :  { %10953 = vmatpush2.bf16.msra.mxu1 %v15208_v62  ;;  %10979 = vmatprep.subr.bf16.mxu0 %v15219_v53 }
 0x371   :  { %10954 = vmatprep.subr.bf16.mxu1 %v15216_v8 }
 0x373   :  { %10980 = vmatpush1.bf16.msra.mxu0 %v15217_v55 }
 0x374   :  { %10955 = vmatpush2.bf16.msra.mxu1 %v15214_v48  ;;  %10981 = vmatprep.subr.bf16.mxu0 %v15225_v49 }
 0x375   :  { %10956 = vmatprep.subr.bf16.mxu1 %v15222_v17 }
 0x376   :  { %10 = vsyncpa [#allocation3], 0  ;;  %v15226_v28 = vld [vmem:[%s21720_s1 + $0x528] ss:$16 sps:$4 sm:$0xff]   ;;  %v15234_v47 = vld [vmem:[%s21720_s1 + $0x50c] ss:$16 sps:$4 sm:$0xff]  }
 0x377   :  { %10982 = vmatpush1.bf16.msra.mxu0 %v15223_v11  ;;  %v15229_v0 = vld [vmem:[%s21720_s1 + $0x628] ss:$16 sps:$4 sm:$0xff]   ;;  %v15237_v13 = vld [vmem:[%s21720_s1 + $0x60c] ss:$16 sps:$4 sm:$0xff]   ;;  %s16303_s9 = smov [#allocation2]  }
 0x378   :  { %10957 = vmatpush2.bf16.msra.mxu1 %v15220_v2  ;;  %10983 = vmatprep.subr.bf16.mxu0 %v15231_v60  ;;  %v15232_v21 = vld [vmem:[%s21720_s1 + $0x508] ss:$16 sps:$4 sm:$0xff]   ;;  %v15240_v14 = vld [vmem:[%s21720_s1 + $0x7ec] ss:$16 sps:$4 sm:$0xff]   ;;  %s12231_s10 = sshll.u32 %s16303_s9, 4  ;;  %s12232_s10 = int_to_ptr.vmem [resolvable:$true] %s12231_s10 }
 0x379   :  { %10958 = vmatprep.subr.bf16.mxu1 %v15228_v44  ;;  %v15235_v18 = vld [vmem:[%s21720_s1 + $0x608] ss:$16 sps:$4 sm:$0xff]   ;;  %v15243_v16 = vld [vmem:[%s21720_s1 + $0x8ec] ss:$16 sps:$4 sm:$0xff]   ;;  %s16279_s11 = scalar_lea.vmem %s12232_s10, 32  ;;  %p16284_p1 = scmp.lt.s32.totalorder %s12232_s10, %s12232_s10 }
 0x37a   :  { %v15238_v62 = vld [vmem:[%s21720_s1 + $0x7e8] ss:$16 sps:$4 sm:$0xff]   ;;  %v15246_v8 = vld [vmem:[%s21720_s1 + $0x7cc] ss:$16 sps:$4 sm:$0xff]   ;;  %p16280_p0 = scmp.ne.s32.totalorder %s12232_s10, %s16279_s11  ;;  %p16285_p2 = scmp.lt.s32.totalorder %s16279_s11, %s16279_s11 }
 0x37b   :  { %10984 = vmatpush1.bf16.msra.mxu0 %v15229_v0  ;;  %v15241_v23 = vld [vmem:[%s21720_s1 + $0x8e8] ss:$16 sps:$4 sm:$0xff]   ;;  %v15249_v53 = vld [vmem:[%s21720_s1 + $0x8cc] ss:$16 sps:$4 sm:$0xff]  }
 0x37c   :  { %10959 = vmatpush2.bf16.msra.mxu1 %v15226_v28  ;;  %10985 = vmatprep.subr.bf16.mxu0 %v15237_v13  ;;  %v15244_v49 = vld [vmem:[%s21720_s1 + $0x7c8] ss:$16 sps:$4 sm:$0xff]   ;;  %p16286_p3 = por %p16285_p2, %p16284_p1 }
 0x37d   :  { %10960 = vmatprep.subr.bf16.mxu1 %v15234_v47  ;;  %v15247_v2 = vld [vmem:[%s21720_s1 + $0x8c8] ss:$16 sps:$4 sm:$0xff]  }
 0x37e   :  { %p16287_p4 = pnand %p16286_p3, %p16280_p0 }
 0x37f   :  { %10986 = vmatpush1.bf16.msra.mxu0 %v15235_v18  ;;  %v15253_v18 = vld [vmem:[%s21720_s1 + $0x8a8] ss:$16 sps:$4 sm:$0xff]  }
 0x380   :  { %10961 = vmatpush2.bf16.msra.mxu1 %v15232_v21  ;;  %10987 = vmatprep.subr.bf16.mxu0 %v15240_v14  ;;  %v15250_v21 = vld [vmem:[%s21720_s1 + $0x7a8] ss:$16 sps:$4 sm:$0xff]  }
 0x381   :  { %11012 = vmatprep.subr.bf16.mxu1 %v15243_v16 }
 0x382   :  { %v10677_v48 = vpop.f32.mrf.mxu0 }
 0x383   :  { %v10718_v55 = vpop.f32.mrf.mxu1  ;;  %10963 = vmatmul.mubr.bf16.vlgmr.msra.gmra.mxu1 %v16758_v26  ;;  %v10678_v17 = vadd.f32 %v10677_v48, %v19260_v10  ;;  %10988 = vmatpush2.bf16.msra.mxu0 %v15238_v62  ;;  %v15252_v26 = vld [vmem:[%s21720_s1 + $0x7ac] ss:$16 sps:$4 sm:$0xff]   ;;  %v15256_v62 = vld [vmem:[%s21720_s1 + $0x788] ss:$16 sps:$4 sm:$0xff]  }
 0x384   :  { %11013 = vmatpush1.bf16.msra.mxu1 %v15241_v23  ;;  %v10679_v11 = vpop.f32.mrf.mxu0  ;;  %10989 = vmatprep.subr.bf16.mxu0 %v15246_v8  ;;  %v15255_v10 = vld [vmem:[%s21720_s1 + $0x8ac] ss:$16 sps:$4 sm:$0xff]   ;;  %v15259_v23 = vld [vmem:[%s21720_s1 + $0x888] ss:$16 sps:$4 sm:$0xff]  }
 0x385   :  { %v10720_v44 = vpop.f32.mrf.mxu1  ;;  %11014 = vmatprep.subr.bf16.mxu1 %v15249_v53  ;;  %v19462_v60 = vadd.f32 %v10718_v55, %v10678_v17  ;;  %v10680_v28 = vadd.f32 %v10679_v11, %v19270_v57  ;;  %11044 = vmatprep.mubr.bf16.mxu1 %v16811_v41  ;;  %v15258_v41 = vld [vmem:[%s21720_s1 + $0x78c] ss:$16 sps:$4 sm:$0xff]   ;;  %v15262_v48 = vld [vmem:[%s21720_s1 + $0x768] ss:$16 sps:$4 sm:$0xff]  }
 0x386   :  { %v10681_v0 = vpop.f32.mrf.mxu0  ;;  %v15261_v57 = vld [vmem:[%s21720_s1 + $0x88c] ss:$16 sps:$4 sm:$0xff]   ;;  %v15265_v55 = vld [vmem:[%s21720_s1 + $0x868] ss:$16 sps:$4 sm:$0xff]  }
 0x387   :  { %v10722_v47 = vpop.f32.mrf.mxu1  ;;  %v19466_v13 = vadd.f32 %v10720_v44, %v10680_v28  ;;  %10990 = vmatpush2.bf16.msra.mxu0 %v15244_v49  ;;  %v15264_v8 = vld [vmem:[%s21720_s1 + $0x76c] ss:$16 sps:$4 sm:$0xff]   ;;  %v15271_v11 = vld [vmem:[%s21720_s1 + $0x848] ss:$16 sps:$4 sm:$0xff]  }
 0x388   :  { %11015 = vmatpush1.bf16.msra.mxu1 %v15247_v2  ;;  %v10682_v14 = vpop.f32.mrf.mxu0  ;;  %10991 = vmatprep.subr.bf16.mxu0 %v15252_v26  ;;  %v15267_v53 = vld [vmem:[%s21720_s1 + $0x86c] ss:$16 sps:$4 sm:$0xff]   ;;  %v15268_v2 = vld [vmem:[%s21720_s1 + $0x748] ss:$16 sps:$4 sm:$0xff]  }
 0x389   :  { %v10723_v16 = vpop.f32.mrf.mxu1  ;;  %11016 = vmatprep.subr.bf16.mxu1 %v15255_v10  ;;  %v15270_v17 = vld [vmem:[%s21720_s1 + $0x74c] ss:$16 sps:$4 sm:$0xff]   ;;  %v15274_v10 = vld [vmem:[%s21720_s1 + $0x728] ss:$16 sps:$4 sm:$0xff]  }
 0x38a   :  { %v15273_v49 = vld [vmem:[%s21720_s1 + $0x84c] ss:$16 sps:$4 sm:$0xff]   ;;  %v15277_v28 = vld [vmem:[%s21720_s1 + $0x828] ss:$16 sps:$4 sm:$0xff]  }
 0x38b   :  { %10992 = vmatpush2.bf16.msra.mxu0 %v15250_v21  ;;  %v15276_v44 = vld [vmem:[%s21720_s1 + $0x72c] ss:$16 sps:$4 sm:$0xff]   ;;  %v15280_v21 = vld [vmem:[%s21720_s1 + $0x708] ss:$16 sps:$4 sm:$0xff]  }
 0x38c   :  { %11017 = vmatpush1.bf16.msra.mxu1 %v15253_v18  ;;  %10993 = vmatprep.subr.bf16.mxu0 %v15258_v41  ;;  %v15279_v26 = vld [vmem:[%s21720_s1 + $0x82c] ss:$16 sps:$4 sm:$0xff]   ;;  %v15283_v18 = vld [vmem:[%s21720_s1 + $0x808] ss:$16 sps:$4 sm:$0xff]  }
 0x38d   :  { %11018 = vmatprep.subr.bf16.mxu1 %v15261_v57  ;;  %v15282_v0 = vld [vmem:[%s21720_s1 + $0x70c] ss:$16 sps:$4 sm:$0xff]   ;;  %v15286_v41 = vld [vmem:[%s21720_s1 + $0x9e8] ss:$16 sps:$4 sm:$0xff]  }
 0x38e   :  { %v15285_v47 = vld [vmem:[%s21720_s1 + $0x80c] ss:$16 sps:$4 sm:$0xff]   ;;  %v15289_v57 = vld [vmem:[%s21720_s1 + $0xae8] ss:$16 sps:$4 sm:$0xff]  }
 0x38f   :  { %10994 = vmatpush2.bf16.msra.mxu0 %v15256_v62  ;;  %v15288_v14 = vld [vmem:[%s21720_s1 + $0x9ec] ss:$16 sps:$4 sm:$0xff]  }
 0x390   :  { %11019 = vmatpush1.bf16.msra.mxu1 %v15259_v23  ;;  %10995 = vmatprep.subr.bf16.mxu0 %v15264_v8  ;;  %v15291_v16 = vld [vmem:[%s21720_s1 + $0xaec] ss:$16 sps:$4 sm:$0xff]   ;;  %v15292_v8 = vld [vmem:[%s21720_s1 + $0x9c8] ss:$16 sps:$4 sm:$0xff]  }
 0x391   :  { %11020 = vmatprep.subr.bf16.mxu1 %v15267_v53  ;;  %v15294_v62 = vld [vmem:[%s21720_s1 + $0x9cc] ss:$16 sps:$4 sm:$0xff]   ;;  %v15295_v53 = vld [vmem:[%s21720_s1 + $0xac8] ss:$16 sps:$4 sm:$0xff]  }
 0x392   :  { %v15297_v23 = vld [vmem:[%s21720_s1 + $0xacc] ss:$16 sps:$4 sm:$0xff]  }
 0x393   :  { %10996 = vmatpush2.bf16.msra.mxu0 %v15262_v48  ;;  %v15300_v48 = vld [vmem:[%s21720_s1 + $0x9ac] ss:$16 sps:$4 sm:$0xff]  }
 0x394   :  { %11021 = vmatpush1.bf16.msra.mxu1 %v15265_v55  ;;  %10997 = vmatprep.subr.bf16.mxu0 %v15270_v17  ;;  %v15298_v55 = vld [vmem:[%s21720_s1 + $0x9a8] ss:$16 sps:$4 sm:$0xff]  }
 0x395   :  { %11022 = vmatprep.subr.bf16.mxu1 %v15273_v49  ;;  %v15301_v17 = vld [vmem:[%s21720_s1 + $0xaa8] ss:$16 sps:$4 sm:$0xff]   ;;  %v15306_v49 = vld [vmem:[%s21720_s1 + $0x98c] ss:$16 sps:$4 sm:$0xff]  }
 0x397   :  { %10998 = vmatpush2.bf16.msra.mxu0 %v15268_v2  ;;  %v15304_v2 = vld [vmem:[%s21720_s1 + $0x988] ss:$16 sps:$4 sm:$0xff]  }
 0x398   :  { %11023 = vmatpush1.bf16.msra.mxu1 %v15271_v11  ;;  %10999 = vmatprep.subr.bf16.mxu0 %v15276_v44  ;;  %v15307_v11 = vld [vmem:[%s21720_s1 + $0xa88] ss:$16 sps:$4 sm:$0xff]   ;;  %v15312_v44 = vld [vmem:[%s21720_s1 + $0x96c] ss:$16 sps:$4 sm:$0xff]  }
 0x399   :  { %11024 = vmatprep.subr.bf16.mxu1 %v15279_v26  ;;  %v15315_v26 = vld [vmem:[%s21720_s1 + $0xa6c] ss:$16 sps:$4 sm:$0xff]  }
 0x39b   :  { %11000 = vmatpush2.bf16.msra.mxu0 %v15274_v10  ;;  %v15310_v10 = vld [vmem:[%s21720_s1 + $0x968] ss:$16 sps:$4 sm:$0xff]  }
 0x39c   :  { %11025 = vmatpush1.bf16.msra.mxu1 %v15277_v28  ;;  %11001 = vmatprep.subr.bf16.mxu0 %v15282_v0  ;;  %v15313_v28 = vld [vmem:[%s21720_s1 + $0xa68] ss:$16 sps:$4 sm:$0xff]   ;;  %v15318_v0 = vld [vmem:[%s21720_s1 + $0x94c] ss:$16 sps:$4 sm:$0xff]  }
 0x39d   :  { %11026 = vmatprep.subr.bf16.mxu1 %v15285_v47  ;;  %v15321_v47 = vld [vmem:[%s21720_s1 + $0xa4c] ss:$16 sps:$4 sm:$0xff]  }
 0x39f   :  { %11002 = vmatpush2.bf16.msra.mxu0 %v15280_v21  ;;  %v15316_v21 = vld [vmem:[%s21720_s1 + $0x948] ss:$16 sps:$4 sm:$0xff]  }
 0x3a0   :  { %11027 = vmatpush1.bf16.msra.mxu1 %v15283_v18  ;;  %11053 = vmatprep.subr.bf16.mxu0 %v15291_v16  ;;  %v15319_v18 = vld [vmem:[%s21720_s1 + $0xa48] ss:$16 sps:$4 sm:$0xff]   ;;  %v15327_v16 = vld [vmem:[%s21720_s1 + $0xa2c] ss:$16 sps:$4 sm:$0xff]  }
 0x3a1   :  { %11028 = vmatprep.subr.bf16.mxu1 %v15288_v14  ;;  %v15324_v14 = vld [vmem:[%s21720_s1 + $0x92c] ss:$16 sps:$4 sm:$0xff]  }
 0x3a2   :  { %11004 = vmatmul.mubr.bf16.vlgmr.msra.gmra.mxu0 %v16771_v6  ;;  %v15303_v6 = vld [vmem:[%s21720_s1 + $0xaac] ss:$16 sps:$4 sm:$0xff]  }
 0x3a3   :  { %11054 = vmatpush1.bf16.msra.mxu0 %v15289_v57  ;;  %11085 = vmatprep.mubr.bf16.mxu0 %v16816_v43  ;;  %v15309_v43 = vld [vmem:[%s21720_s1 + $0xa8c] ss:$16 sps:$4 sm:$0xff]   ;;  %v15325_v57 = vld [vmem:[%s21720_s1 + $0xa28] ss:$16 sps:$4 sm:$0xff]  }
 0x3a4   :  { %11029 = vmatpush2.bf16.msra.mxu1 %v15286_v41  ;;  %11055 = vmatprep.subr.bf16.mxu0 %v15297_v23  ;;  %v15322_v41 = vld [vmem:[%s21720_s1 + $0x928] ss:$16 sps:$4 sm:$0xff]   ;;  %v15333_v23 = vld [vmem:[%s21720_s1 + $0xa0c] ss:$16 sps:$4 sm:$0xff]  }
 0x3a5   :  { %11030 = vmatprep.subr.bf16.mxu1 %v15294_v62  ;;  %v15330_v62 = vld [vmem:[%s21720_s1 + $0x90c] ss:$16 sps:$4 sm:$0xff]  }
 0x3a7   :  { %11056 = vmatpush1.bf16.msra.mxu0 %v15295_v53  ;;  %v15331_v53 = vld [vmem:[%s21720_s1 + $0xa08] ss:$16 sps:$4 sm:$0xff]  }
 0x3a8   :  { %11031 = vmatpush2.bf16.msra.mxu1 %v15292_v8  ;;  %11057 = vmatprep.subr.bf16.mxu0 %v15303_v6  ;;  %v15328_v8 = vld [vmem:[%s21720_s1 + $0x908] ss:$16 sps:$4 sm:$0xff]   ;;  %v15339_v6 = vld [vmem:[%s21720_s1 + $0xcec] ss:$16 sps:$4 sm:$0xff]  }
 0x3a9   :  { %11032 = vmatprep.subr.bf16.mxu1 %v15300_v48  ;;  %v15336_v48 = vld [vmem:[%s21720_s1 + $0xbec] ss:$16 sps:$4 sm:$0xff]  }
 0x3ab   :  { %11058 = vmatpush1.bf16.msra.mxu0 %v15301_v17  ;;  %v15337_v17 = vld [vmem:[%s21720_s1 + $0xce8] ss:$16 sps:$4 sm:$0xff]  }
 0x3ac   :  { %11033 = vmatpush2.bf16.msra.mxu1 %v15298_v55  ;;  %11059 = vmatprep.subr.bf16.mxu0 %v15309_v43  ;;  %v15334_v55 = vld [vmem:[%s21720_s1 + $0xbe8] ss:$16 sps:$4 sm:$0xff]   ;;  %v15345_v43 = vld [vmem:[%s21720_s1 + $0xccc] ss:$16 sps:$4 sm:$0xff]  }
 0x3ad   :  { %11034 = vmatprep.subr.bf16.mxu1 %v15306_v49  ;;  %v15342_v49 = vld [vmem:[%s21720_s1 + $0xbcc] ss:$16 sps:$4 sm:$0xff]  }
 0x3af   :  { %11060 = vmatpush1.bf16.msra.mxu0 %v15307_v11 }
 0x3b0   :  { %11035 = vmatpush2.bf16.msra.mxu1 %v15304_v2  ;;  %11061 = vmatprep.subr.bf16.mxu0 %v15315_v26  ;;  %v15340_v26 = vld [vmem:[%s21720_s1 + $0xbc8] ss:$16 sps:$4 sm:$0xff]  }
 0x3b1   :  { %11036 = vmatprep.subr.bf16.mxu1 %v15312_v44 }
 0x3b3   :  { %11062 = vmatpush1.bf16.msra.mxu0 %v15313_v28 }
 0x3b4   :  { %11037 = vmatpush2.bf16.msra.mxu1 %v15310_v10  ;;  %11063 = vmatprep.subr.bf16.mxu0 %v15321_v47  ;;  %v15343_v10 = vld [vmem:[%s21720_s1 + $0xcc8] ss:$16 sps:$4 sm:$0xff]  }
 0x3b5   :  { %11038 = vmatprep.subr.bf16.mxu1 %v15318_v0 }
 0x3b7   :  { %11064 = vmatpush1.bf16.msra.mxu0 %v15319_v18 }
 0x3b8   :  { %11039 = vmatpush2.bf16.msra.mxu1 %v15316_v21  ;;  %11065 = vmatprep.subr.bf16.mxu0 %v15327_v16 }
 0x3b9   :  { %11040 = vmatprep.subr.bf16.mxu1 %v15324_v14 }
 0x3bb   :  { %11066 = vmatpush1.bf16.msra.mxu0 %v15325_v57  ;;  %v15349_v57 = vld [vmem:[%s21720_s1 + $0xca8] ss:$16 sps:$4 sm:$0xff]  }
 0x3bc   :  { %11041 = vmatpush2.bf16.msra.mxu1 %v15322_v41  ;;  %11067 = vmatprep.subr.bf16.mxu0 %v15333_v23  ;;  %v15346_v41 = vld [vmem:[%s21720_s1 + $0xba8] ss:$16 sps:$4 sm:$0xff]  }
 0x3bd   :  { %11042 = vmatprep.subr.bf16.mxu1 %v15330_v62 }
 0x3bf   :  { %11068 = vmatpush1.bf16.msra.mxu0 %v15331_v53  ;;  %v15355_v53 = vld [vmem:[%s21720_s1 + $0xc88] ss:$16 sps:$4 sm:$0xff]  }
 0x3c0   :  { %11043 = vmatpush2.bf16.msra.mxu1 %v15328_v8  ;;  %11069 = vmatprep.subr.bf16.mxu0 %v15336_v48  ;;  %v15352_v8 = vld [vmem:[%s21720_s1 + $0xb88] ss:$16 sps:$4 sm:$0xff]   ;;  %v15360_v48 = vld [vmem:[%s21720_s1 + $0xb6c] ss:$16 sps:$4 sm:$0xff]  }
 0x3c1   :  { %11094 = vmatprep.subr.bf16.mxu1 %v15339_v6  ;;  %v15363_v6 = vld [vmem:[%s21720_s1 + $0xc6c] ss:$16 sps:$4 sm:$0xff]  }
 0x3c2   :  { %v10759_v2 = vpop.f32.mrf.mxu0 }
 0x3c3   :  { %v10800_v11 = vpop.f32.mrf.mxu1  ;;  %11045 = vmatmul.mubr.bf16.vlgmr.msra.gmra.mxu1 %v16987_v50  ;;  %v10760_v44 = vadd.f32 %v10759_v2, %v19462_v60  ;;  %11070 = vmatpush2.bf16.msra.mxu0 %v15334_v55  ;;  %v15348_v50 = vld [vmem:[%s21720_s1 + $0xbac] ss:$16 sps:$4 sm:$0xff]   ;;  %v15358_v55 = vld [vmem:[%s21720_s1 + $0xb68] ss:$16 sps:$4 sm:$0xff]  }
 0x3c4   :  { %11095 = vmatpush1.bf16.msra.mxu1 %v15337_v17  ;;  %v10761_v28 = vpop.f32.mrf.mxu0  ;;  %11071 = vmatprep.subr.bf16.mxu0 %v15342_v49  ;;  %v15351_v60 = vld [vmem:[%s21720_s1 + $0xcac] ss:$16 sps:$4 sm:$0xff]   ;;  %v15361_v17 = vld [vmem:[%s21720_s1 + $0xc68] ss:$16 sps:$4 sm:$0xff]  }
 0x3c5   :  { %v10802_v0 = vpop.f32.mrf.mxu1  ;;  %11096 = vmatprep.subr.bf16.mxu1 %v15345_v43  ;;  %v19664_v47 = vadd.f32 %v10800_v11, %v10760_v44  ;;  %v10762_v21 = vadd.f32 %v10761_v28, %v19466_v13  ;;  %11126 = vmatprep.mubr.bf16.mxu1 %v16999_v54  ;;  %v15354_v54 = vld [vmem:[%s21720_s1 + $0xb8c] ss:$16 sps:$4 sm:$0xff]   ;;  %v15364_v2 = vld [vmem:[%s21720_s1 + $0xb48] ss:$16 sps:$4 sm:$0xff]  }
 0x3c6   :  { %v10763_v18 = vpop.f32.mrf.mxu0  ;;  %v15357_v13 = vld [vmem:[%s21720_s1 + $0xc8c] ss:$16 sps:$4 sm:$0xff]   ;;  %v15367_v11 = vld [vmem:[%s21720_s1 + $0xc48] ss:$16 sps:$4 sm:$0xff]  }
 0x3c7   :  { %v10804_v14 = vpop.f32.mrf.mxu1  ;;  %v19668_v16 = vadd.f32 %v10802_v0, %v10762_v21  ;;  %11072 = vmatpush2.bf16.msra.mxu0 %v15340_v26  ;;  %v15366_v49 = vld [vmem:[%s21720_s1 + $0xb4c] ss:$16 sps:$4 sm:$0xff]   ;;  %v15373_v28 = vld [vmem:[%s21720_s1 + $0xc28] ss:$16 sps:$4 sm:$0xff]  }
 0x3c8   :  { %11097 = vmatpush1.bf16.msra.mxu1 %v15343_v10  ;;  %v10764_v62 = vpop.f32.mrf.mxu0  ;;  %11073 = vmatprep.subr.bf16.mxu0 %v15348_v50  ;;  %v15369_v43 = vld [vmem:[%s21720_s1 + $0xc4c] ss:$16 sps:$4 sm:$0xff]   ;;  %v15370_v10 = vld [vmem:[%s21720_s1 + $0xb28] ss:$16 sps:$4 sm:$0xff]  }
 0x3c9   :  { %v10805_v23 = vpop.f32.mrf.mxu1  ;;  %11098 = vmatprep.subr.bf16.mxu1 %v15351_v60  ;;  %v15372_v44 = vld [vmem:[%s21720_s1 + $0xb2c] ss:$16 sps:$4 sm:$0xff]   ;;  %v15376_v60 = vld [vmem:[%s21720_s1 + $0xb08] ss:$16 sps:$4 sm:$0xff]  }
 0x3ca   :  { %v15375_v26 = vld [vmem:[%s21720_s1 + $0xc2c] ss:$16 sps:$4 sm:$0xff]   ;;  %v15379_v21 = vld [vmem:[%s21720_s1 + $0xc08] ss:$16 sps:$4 sm:$0xff]  }
 0x3cb   :  { %11074 = vmatpush2.bf16.msra.mxu0 %v15346_v41  ;;  %v15378_v0 = vld [vmem:[%s21720_s1 + $0xb0c] ss:$16 sps:$4 sm:$0xff]   ;;  %v15382_v41 = vld [vmem:[%s21720_s1 + $0xde8] ss:$16 sps:$4 sm:$0xff]  }
 0x3cc   :  { %11099 = vmatpush1.bf16.msra.mxu1 %v15349_v57  ;;  %11075 = vmatprep.subr.bf16.mxu0 %v15354_v54  ;;  %v15381_v50 = vld [vmem:[%s21720_s1 + $0xc0c] ss:$16 sps:$4 sm:$0xff]   ;;  %v15385_v57 = vld [vmem:[%s21720_s1 + $0xee8] ss:$16 sps:$4 sm:$0xff]  }
 0x3cd   :  { %11100 = vmatprep.subr.bf16.mxu1 %v15357_v13  ;;  %v15384_v18 = vld [vmem:[%s21720_s1 + $0xdec] ss:$16 sps:$4 sm:$0xff]  }
 0x3ce   :  { %v15387_v14 = vld [vmem:[%s21720_s1 + $0xeec] ss:$16 sps:$4 sm:$0xff]  }
 0x3cf   :  { %11076 = vmatpush2.bf16.msra.mxu0 %v15352_v8  ;;  %v15390_v62 = vld [vmem:[%s21720_s1 + $0xdcc] ss:$16 sps:$4 sm:$0xff]   ;;  %v15388_v8 = vld [vmem:[%s21720_s1 + $0xdc8] ss:$16 sps:$4 sm:$0xff]  }
 0x3d0   :  { %11101 = vmatpush1.bf16.msra.mxu1 %v15355_v53  ;;  %11077 = vmatprep.subr.bf16.mxu0 %v15360_v48  ;;  %v15393_v23 = vld [vmem:[%s21720_s1 + $0xecc] ss:$16 sps:$4 sm:$0xff]   ;;  %v15391_v53 = vld [vmem:[%s21720_s1 + $0xec8] ss:$16 sps:$4 sm:$0xff]  }
 0x3d1   :  { %11102 = vmatprep.subr.bf16.mxu1 %v15363_v6 }
 0x3d3   :  { %11078 = vmatpush2.bf16.msra.mxu0 %v15358_v55 }
 0x3d4   :  { %11103 = vmatpush1.bf16.msra.mxu1 %v15361_v17  ;;  %11079 = vmatprep.subr.bf16.mxu0 %v15366_v49  ;;  %v15394_v17 = vld [vmem:[%s21720_s1 + $0xda8] ss:$16 sps:$4 sm:$0xff]  }
 0x3d5   :  { %11104 = vmatprep.subr.bf16.mxu1 %v15369_v43  ;;  %v15397_v49 = vld [vmem:[%s21720_s1 + $0xea8] ss:$16 sps:$4 sm:$0xff]  }
 0x3d7   :  { %11080 = vmatpush2.bf16.msra.mxu0 %v15364_v2  ;;  %v15400_v2 = vld [vmem:[%s21720_s1 + $0xd88] ss:$16 sps:$4 sm:$0xff]  }
 0x3d8   :  { %11105 = vmatpush1.bf16.msra.mxu1 %v15367_v11  ;;  %11081 = vmatprep.subr.bf16.mxu0 %v15372_v44  ;;  %v15403_v11 = vld [vmem:[%s21720_s1 + $0xe88] ss:$16 sps:$4 sm:$0xff]   ;;  %v15408_v44 = vld [vmem:[%s21720_s1 + $0xd6c] ss:$16 sps:$4 sm:$0xff]  }
 0x3d9   :  { %11106 = vmatprep.subr.bf16.mxu1 %v15375_v26  ;;  %v15411_v26 = vld [vmem:[%s21720_s1 + $0xe6c] ss:$16 sps:$4 sm:$0xff]  }
 0x3db   :  { %11082 = vmatpush2.bf16.msra.mxu0 %v15370_v10  ;;  %v15406_v10 = vld [vmem:[%s21720_s1 + $0xd68] ss:$16 sps:$4 sm:$0xff]  }
 0x3dc   :  { %11107 = vmatpush1.bf16.msra.mxu1 %v15373_v28  ;;  %11083 = vmatprep.subr.bf16.mxu0 %v15378_v0  ;;  %v15409_v28 = vld [vmem:[%s21720_s1 + $0xe68] ss:$16 sps:$4 sm:$0xff]   ;;  %v15414_v0 = vld [vmem:[%s21720_s1 + $0xd4c] ss:$16 sps:$4 sm:$0xff]  }
 0x3dd   :  { %11108 = vmatprep.subr.bf16.mxu1 %v15381_v50  ;;  %v15417_v50 = vld [vmem:[%s21720_s1 + $0xe4c] ss:$16 sps:$4 sm:$0xff]  }
 0x3df   :  { %11084 = vmatpush2.bf16.msra.mxu0 %v15376_v60  ;;  %v15412_v60 = vld [vmem:[%s21720_s1 + $0xd48] ss:$16 sps:$4 sm:$0xff]  }
 0x3e0   :  { %11109 = vmatpush1.bf16.msra.mxu1 %v15379_v21  ;;  %11135 = vmatprep.subr.bf16.mxu0 %v15387_v14  ;;  %v15415_v21 = vld [vmem:[%s21720_s1 + $0xe48] ss:$16 sps:$4 sm:$0xff]   ;;  %v15423_v14 = vld [vmem:[%s21720_s1 + $0xe2c] ss:$16 sps:$4 sm:$0xff]  }
 0x3e1   :  { %11110 = vmatprep.subr.bf16.mxu1 %v15384_v18  ;;  %v15420_v18 = vld [vmem:[%s21720_s1 + $0xd2c] ss:$16 sps:$4 sm:$0xff]  }
 0x3e2   :  { %v10841_v54 = vpop.f32.mrf.mxu0  ;;  %11086 = vmatmul.mubr.bf16.vlgmr.msra.gmra.mxu0 %v17003_v35  ;;  %v15396_v35 = vld [vmem:[%s21720_s1 + $0xdac] ss:$16 sps:$4 sm:$0xff]  }
 0x3e3   :  { %v19756_v13 = vadd.f32 %v10841_v54, %v19664_v47  ;;  %11136 = vmatpush1.bf16.msra.mxu0 %v15385_v57  ;;  %v15399_v47 = vld [vmem:[%s21720_s1 + $0xeac] ss:$16 sps:$4 sm:$0xff]   ;;  %11167 = vmatprep.mubr.bf16.mxu0 %v17019_v59  ;;  %v15421_v57 = vld [vmem:[%s21720_s1 + $0xe28] ss:$16 sps:$4 sm:$0xff]  }
 0x3e4   :  { %11111 = vmatpush2.bf16.msra.mxu1 %v15382_v41  ;;  %v10843_v48 = vpop.f32.mrf.mxu0  ;;  %11137 = vmatprep.subr.bf16.mxu0 %v15393_v23  ;;  %v15405_v59 = vld [vmem:[%s21720_s1 + $0xe8c] ss:$16 sps:$4 sm:$0xff]   ;;  %v15418_v41 = vld [vmem:[%s21720_s1 + $0xd28] ss:$16 sps:$4 sm:$0xff]  }
 0x3e5   :  { %11112 = vmatprep.subr.bf16.mxu1 %v15390_v62  ;;  %v19771_v6 = vadd.f32 %v10843_v48, %v19668_v16  ;;  %v15402_v16 = vld [vmem:[%s21720_s1 + $0xd8c] ss:$16 sps:$4 sm:$0xff]   ;;  %v15424_v54 = vld [vmem:[%s21720_s1 + $0xd08] ss:$16 sps:$4 sm:$0xff]  }
 0x3e6   :  { %v10845_v55 = vpop.f32.mrf.mxu0  ;;  %v15426_v62 = vld [vmem:[%s21720_s1 + $0xd0c] ss:$16 sps:$4 sm:$0xff]  }
 0x3e7   :  { %11138 = vmatpush1.bf16.msra.mxu0 %v15391_v53  ;;  %v15429_v23 = vld [vmem:[%s21720_s1 + $0xe0c] ss:$16 sps:$4 sm:$0xff]  }
 0x3e8   :  { %11113 = vmatpush2.bf16.msra.mxu1 %v15388_v8  ;;  %v10846_v43 = vpop.f32.mrf.mxu0  ;;  %11139 = vmatprep.subr.bf16.mxu0 %v15399_v47  ;;  %v15427_v8 = vld [vmem:[%s21720_s1 + $0xe08] ss:$16 sps:$4 sm:$0xff]   ;;  %v15432_v53 = vld [vmem:[%s21720_s1 + $0xfec] ss:$16 sps:$4 sm:$0xff]  }
 0x3e9   :  { %11114 = vmatprep.subr.bf16.mxu1 %v15396_v35  ;;  %v15435_v48 = vld [vmem:[%s21720_s1 + $0x10ec] ss:$16 sps:$4 sm:$0xff]   ;;  %v15430_v35 = vld [vmem:[%s21720_s1 + $0xfe8] ss:$16 sps:$4 sm:$0xff]  }
 0x3ea   :  { %v15433_v47 = vld [vmem:[%s21720_s1 + $0x10e8] ss:$16 sps:$4 sm:$0xff]   ;;  %v15438_v55 = vld [vmem:[%s21720_s1 + $0xfcc] ss:$16 sps:$4 sm:$0xff]  }
 0x3eb   :  { %11140 = vmatpush1.bf16.msra.mxu0 %v15397_v49  ;;  %v15436_v43 = vld [vmem:[%s21720_s1 + $0xfc8] ss:$16 sps:$4 sm:$0xff]  }
 0x3ec   :  { %11115 = vmatpush2.bf16.msra.mxu1 %v15394_v17  ;;  %11141 = vmatprep.subr.bf16.mxu0 %v15405_v59  ;;  %v15441_v17 = vld [vmem:[%s21720_s1 + $0x10cc] ss:$16 sps:$4 sm:$0xff]  }
 0x3ed   :  { %11116 = vmatprep.subr.bf16.mxu1 %v15402_v16  ;;  %v15439_v16 = vld [vmem:[%s21720_s1 + $0x10c8] ss:$16 sps:$4 sm:$0xff]  }
 0x3ef   :  { %11142 = vmatpush1.bf16.msra.mxu0 %v15403_v11 }
 0x3f0   :  { %11117 = vmatpush2.bf16.msra.mxu1 %v15400_v2  ;;  %11143 = vmatprep.subr.bf16.mxu0 %v15411_v26  ;;  %v15444_v2 = vld [vmem:[%s21720_s1 + $0xfac] ss:$16 sps:$4 sm:$0xff]   ;;  %v15445_v26 = vld [vmem:[%s21720_s1 + $0x10a8] ss:$16 sps:$4 sm:$0xff]  }
 0x3f1   :  { %11118 = vmatprep.subr.bf16.mxu1 %v15408_v44  ;;  %v15442_v44 = vld [vmem:[%s21720_s1 + $0xfa8] ss:$16 sps:$4 sm:$0xff]  }
 0x3f3   :  { %11144 = vmatpush1.bf16.msra.mxu0 %v15409_v28  ;;  %v15450_v28 = vld [vmem:[%s21720_s1 + $0xf8c] ss:$16 sps:$4 sm:$0xff]  }
 0x3f4   :  { %11119 = vmatpush2.bf16.msra.mxu1 %v15406_v10  ;;  %11145 = vmatprep.subr.bf16.mxu0 %v15417_v50  ;;  %v15451_v50 = vld [vmem:[%s21720_s1 + $0x1088] ss:$16 sps:$4 sm:$0xff]  }
 0x3f5   :  { %11120 = vmatprep.subr.bf16.mxu1 %v15414_v0  ;;  %v15448_v0 = vld [vmem:[%s21720_s1 + $0xf88] ss:$16 sps:$4 sm:$0xff]  }
 0x3f7   :  { %11146 = vmatpush1.bf16.msra.mxu0 %v15415_v21  ;;  %v15459_v21 = vld [vmem:[%s21720_s1 + $0x106c] ss:$16 sps:$4 sm:$0xff]  }
 0x3f8   :  { %11121 = vmatpush2.bf16.msra.mxu1 %v15412_v60  ;;  %11147 = vmatprep.subr.bf16.mxu0 %v15423_v14  ;;  %v15456_v60 = vld [vmem:[%s21720_s1 + $0xf6c] ss:$16 sps:$4 sm:$0xff]   ;;  %v15457_v14 = vld [vmem:[%s21720_s1 + $0x1068] ss:$16 sps:$4 sm:$0xff]  }
 0x3f9   :  { %11122 = vmatprep.subr.bf16.mxu1 %v15420_v18  ;;  %v15454_v18 = vld [vmem:[%s21720_s1 + $0xf68] ss:$16 sps:$4 sm:$0xff]  }
 0x3fb   :  { %11148 = vmatpush1.bf16.msra.mxu0 %v15421_v57  ;;  %v15465_v57 = vld [vmem:[%s21720_s1 + $0x104c] ss:$16 sps:$4 sm:$0xff]  }
 0x3fc   :  { %11123 = vmatpush2.bf16.msra.mxu1 %v15418_v41  ;;  %11149 = vmatprep.subr.bf16.mxu0 %v15429_v23  ;;  %v15462_v41 = vld [vmem:[%s21720_s1 + $0xf4c] ss:$16 sps:$4 sm:$0xff]   ;;  %v15463_v23 = vld [vmem:[%s21720_s1 + $0x1048] ss:$16 sps:$4 sm:$0xff]  }
 0x3fd   :  { %11124 = vmatprep.subr.bf16.mxu1 %v15426_v62  ;;  %v15460_v62 = vld [vmem:[%s21720_s1 + $0xf48] ss:$16 sps:$4 sm:$0xff]  }
 0x3ff   :  { %11150 = vmatpush1.bf16.msra.mxu0 %v15427_v8  ;;  %v15471_v8 = vld [vmem:[%s21720_s1 + $0x102c] ss:$16 sps:$4 sm:$0xff]  }
 0x400   :  { %11125 = vmatpush2.bf16.msra.mxu1 %v15424_v54  ;;  %11151 = vmatprep.subr.bf16.mxu0 %v15432_v53  ;;  %v15468_v54 = vld [vmem:[%s21720_s1 + $0xf2c] ss:$16 sps:$4 sm:$0xff]   ;;  %v15466_v53 = vld [vmem:[%s21720_s1 + $0xf28] ss:$16 sps:$4 sm:$0xff]  }
 0x401   :  { %11176 = vmatprep.subr.bf16.mxu1 %v15435_v48  ;;  %v15469_v48 = vld [vmem:[%s21720_s1 + $0x1028] ss:$16 sps:$4 sm:$0xff]  }
 0x403   :  { %v19858_v49 = vpop.f32.mrf.mxu1  ;;  %11127 = vmatmul.mubr.bf16.vlgmr.msra.gmra.mxu1 %v17215_v15  ;;  %11152 = vmatpush2.bf16.msra.mxu0 %v15430_v35  ;;  %v15447_v15 = vld [vmem:[%s21720_s1 + $0x10ac] ss:$16 sps:$4 sm:$0xff]  }
 0x404   :  { %11177 = vmatpush1.bf16.msra.mxu1 %v15433_v47  ;;  %11153 = vmatprep.subr.bf16.mxu0 %v15438_v55  ;;  %v15474_v35 = vld [vmem:[%s21720_s1 + $0xf0c] ss:$16 sps:$4 sm:$0xff]   ;;  %v1609_v55 = vsub.s32 2, %v16451_v42 }
 0x405   :  { %v19867_v59 = vpop.f32.mrf.mxu1  ;;  %11178 = vmatprep.subr.bf16.mxu1 %v15441_v17  ;;  %11208 = vmatprep.mubr.bf16.mxu1 %v17226_v22  ;;  %v15453_v22 = vld [vmem:[%s21720_s1 + $0x108c] ss:$16 sps:$4 sm:$0xff]   ;;  %v1613_v17 = vsub.s32 3, %v16451_v42 }
 0x406   :  { %v15477_v47 = vld [vmem:[%s21720_s1 + $0x100c] ss:$16 sps:$4 sm:$0xff]  }
 0x407   :  { %v10886_v11 = vpop.f32.mrf.mxu1  ;;  %11154 = vmatpush2.bf16.msra.mxu0 %v15436_v43  ;;  %v15472_v43 = vld [vmem:[%s21720_s1 + $0xf08] ss:$16 sps:$4 sm:$0xff]   ;;  %v15483_v42 = vld [vmem:[%s21720_s1 + $0x12ec] ss:$16 sps:$4 sm:$0xff]  }
 0x408   :  { %11179 = vmatpush1.bf16.msra.mxu1 %v15439_v16  ;;  %11155 = vmatprep.subr.bf16.mxu0 %v15444_v2  ;;  %v15475_v16 = vld [vmem:[%s21720_s1 + $0x1008] ss:$16 sps:$4 sm:$0xff]   ;;  %v15480_v2 = vld [vmem:[%s21720_s1 + $0x11ec] ss:$16 sps:$4 sm:$0xff]  }
 0x409   :  { %v10887_v10 = vpop.f32.mrf.mxu1  ;;  %11180 = vmatprep.subr.bf16.mxu1 %v15447_v15  ;;  %v16278_v15 = vld [vmem:[%s21721_s2] sm:$0xf] }
 0x40a   :  { %v1610_v11 = vrot.slane %v16278_v15, %v1609_v55  ;;  %v15481_v10 = vld [vmem:[%s21720_s1 + $0x12e8] ss:$16 sps:$4 sm:$0xff]  }
 0x40b   :  { %11156 = vmatpush2.bf16.msra.mxu0 %v15442_v44  ;;  %v1614_v44 = vrot.slane %v16278_v15, %v1613_v17  ;;  %v15502_v55 = vld [vmem:[%s21720_s1 + $0x1168] ss:$16 sps:$4 sm:$0xff]   ;;  %v15516_v15 = vld [vmem:[%s21720_s1 + $0x112c] ss:$16 sps:$4 sm:$0xff]  }
 0x40c   :  { %11181 = vmatpush1.bf16.msra.mxu1 %v15445_v26  ;;  %11157 = vmatprep.subr.bf16.mxu0 %v15450_v28  ;;  %v15478_v26 = vld [vmem:[%s21720_s1 + $0x11e8] ss:$16 sps:$4 sm:$0xff]   ;;  %v15486_v28 = vld [vmem:[%s21720_s1 + $0x11cc] ss:$16 sps:$4 sm:$0xff]  }
 0x40d   :  { %11182 = vmatprep.subr.bf16.mxu1 %v15453_v22  ;;  %v15489_v22 = vld [vmem:[%s21720_s1 + $0x12cc] ss:$16 sps:$4 sm:$0xff]   ;;  %v15505_v17 = vld [vmem:[%s21720_s1 + $0x1268] ss:$16 sps:$4 sm:$0xff]  }
 0x40f   :  { %11158 = vmatpush2.bf16.msra.mxu0 %v15448_v0  ;;  %v10883_v0 = vadd.f32 %v19858_v49, %v1610_v11  ;;  %v15495_v49 = vld [vmem:[%s21720_s1 + $0x12ac] ss:$16 sps:$4 sm:$0xff]  }
 0x410   :  { %11183 = vmatpush1.bf16.msra.mxu1 %v15451_v50  ;;  %11159 = vmatprep.subr.bf16.mxu0 %v15456_v60  ;;  %v10885_v60 = vadd.f32 %v19867_v59, %v1614_v44  ;;  %v15519_v11 = vld [vmem:[%s21720_s1 + $0x122c] ss:$16 sps:$4 sm:$0xff]   ;;  %v15514_v44 = vld [vmem:[%s21720_s1 + $0x1128] ss:$16 sps:$4 sm:$0xff]  }
 0x411   :  { %11184 = vmatprep.subr.bf16.mxu1 %v15459_v21 }
 0x413   :  { %11160 = vmatpush2.bf16.msra.mxu0 %v15454_v18  ;;  %v15484_v18 = vld [vmem:[%s21720_s1 + $0x11c8] ss:$16 sps:$4 sm:$0xff]  }
 0x414   :  { %11185 = vmatpush1.bf16.msra.mxu1 %v15457_v14  ;;  %11161 = vmatprep.subr.bf16.mxu0 %v15462_v41  ;;  %v15487_v14 = vld [vmem:[%s21720_s1 + $0x12c8] ss:$16 sps:$4 sm:$0xff]  }
 0x415   :  { %11186 = vmatprep.subr.bf16.mxu1 %v15465_v57 }
 0x417   :  { %11162 = vmatpush2.bf16.msra.mxu0 %v15460_v62  ;;  %v15490_v62 = vld [vmem:[%s21720_s1 + $0x11a8] ss:$16 sps:$4 sm:$0xff]  }
 0x418   :  { %11187 = vmatpush1.bf16.msra.mxu1 %v15463_v23  ;;  %11163 = vmatprep.subr.bf16.mxu0 %v15468_v54  ;;  %v15493_v23 = vld [vmem:[%s21720_s1 + $0x12a8] ss:$16 sps:$4 sm:$0xff]  }
 0x419   :  { %11188 = vmatprep.subr.bf16.mxu1 %v15471_v8  ;;  %v15498_v8 = vld [vmem:[%s21720_s1 + $0x118c] ss:$16 sps:$4 sm:$0xff]  }
 0x41b   :  { %11164 = vmatpush2.bf16.msra.mxu0 %v15466_v53  ;;  %v15496_v53 = vld [vmem:[%s21720_s1 + $0x1188] ss:$16 sps:$4 sm:$0xff]  }
 0x41c   :  { %11189 = vmatpush1.bf16.msra.mxu1 %v15469_v48  ;;  %11165 = vmatprep.subr.bf16.mxu0 %v15474_v35  ;;  %v15499_v48 = vld [vmem:[%s21720_s1 + $0x1288] ss:$16 sps:$4 sm:$0xff]   ;;  %v15504_v35 = vld [vmem:[%s21720_s1 + $0x116c] ss:$16 sps:$4 sm:$0xff]  }
 0x41d   :  { %11190 = vmatprep.subr.bf16.mxu1 %v15477_v47  ;;  %v15507_v47 = vld [vmem:[%s21720_s1 + $0x126c] ss:$16 sps:$4 sm:$0xff]  }
 0x41f   :  { %11166 = vmatpush2.bf16.msra.mxu0 %v15472_v43  ;;  %v15510_v43 = vld [vmem:[%s21720_s1 + $0x114c] ss:$16 sps:$4 sm:$0xff]  }
 0x420   :  { %11191 = vmatpush1.bf16.msra.mxu1 %v15475_v16  ;;  %11217 = vmatprep.subr.bf16.mxu0 %v15483_v42  ;;  %v15513_v16 = vld [vmem:[%s21720_s1 + $0x124c] ss:$16 sps:$4 sm:$0xff]   ;;  %v15511_v42 = vld [vmem:[%s21720_s1 + $0x1248] ss:$16 sps:$4 sm:$0xff]  }
 0x421   :  { %11192 = vmatprep.subr.bf16.mxu1 %v15480_v2  ;;  %v15508_v2 = vld [vmem:[%s21720_s1 + $0x1148] ss:$16 sps:$4 sm:$0xff]  }
 0x422   :  { %v10923_v50 = vpop.f32.mrf.mxu0  ;;  %11168 = vmatmul.mubr.bf16.vlgmr.msra.gmra.mxu0 %v17230_v39  ;;  %v15492_v39 = vld [vmem:[%s21720_s1 + $0x11ac] ss:$16 sps:$4 sm:$0xff]  }
 0x423   :  { %v19968_v21 = vadd.f32 %v10923_v50, %v10883_v0  ;;  %11218 = vmatpush1.bf16.msra.mxu0 %v15481_v10  ;;  %11249 = vmatprep.mubr.bf16.mxu0 %v17246_v31  ;;  %v15501_v31 = vld [vmem:[%s21720_s1 + $0x128c] ss:$16 sps:$4 sm:$0xff]   ;;  %v15523_v0 = vld [vmem:[%s21720_s1 + $0x1208] ss:$16 sps:$4 sm:$0xff]  }
 0x424   :  { %11193 = vmatpush2.bf16.msra.mxu1 %v15478_v26  ;;  %v10925_v41 = vpop.f32.mrf.mxu0  ;;  %11219 = vmatprep.subr.bf16.mxu0 %v15489_v22  ;;  %v15517_v26 = vld [vmem:[%s21720_s1 + $0x1228] ss:$16 sps:$4 sm:$0xff]   ;;  %v15522_v10 = vld [vmem:[%s21720_s1 + $0x110c] ss:$16 sps:$4 sm:$0xff]  }
 0x425   :  { %11194 = vmatprep.subr.bf16.mxu1 %v15486_v28  ;;  %v19982_v59 = vadd.f32 %v10925_v41, %v10885_v60  ;;  %v15525_v28 = vld [vmem:[%s21720_s1 + $0x120c] ss:$16 sps:$4 sm:$0xff]   ;;  %v15520_v22 = vld [vmem:[%s21720_s1 + $0x1108] ss:$16 sps:$4 sm:$0xff]  }
 0x426   :  { %v10927_v57 = vpop.f32.mrf.mxu0  ;;  %v15528_v50 = vld [vmem:[%s21720_s1 + $0x13ec] ss:$16 sps:$4 sm:$0xff]  }
 0x427   :  { %11220 = vmatpush1.bf16.msra.mxu0 %v15487_v14  ;;  %v15531_v60 = vld [vmem:[%s21720_s1 + $0x14ec] ss:$16 sps:$4 sm:$0xff]   ;;  %v15529_v14 = vld [vmem:[%s21720_s1 + $0x14e8] ss:$16 sps:$4 sm:$0xff]  }
 0x428   :  { %11195 = vmatpush2.bf16.msra.mxu1 %v15484_v18  ;;  %v10928_v54 = vpop.f32.mrf.mxu0  ;;  %11221 = vmatprep.subr.bf16.mxu0 %v15495_v49  ;;  %v15526_v18 = vld [vmem:[%s21720_s1 + $0x13e8] ss:$16 sps:$4 sm:$0xff]   ;;  %v15534_v41 = vld [vmem:[%s21720_s1 + $0x13cc] ss:$16 sps:$4 sm:$0xff]  }
 0x429   :  { %11196 = vmatprep.subr.bf16.mxu1 %v15492_v39  ;;  %v15537_v39 = vld [vmem:[%s21720_s1 + $0x14cc] ss:$16 sps:$4 sm:$0xff]  }
 0x42b   :  { %11222 = vmatpush1.bf16.msra.mxu0 %v15493_v23  ;;  %v15535_v23 = vld [vmem:[%s21720_s1 + $0x14c8] ss:$16 sps:$4 sm:$0xff]  }
 0x42c   :  { %11197 = vmatpush2.bf16.msra.mxu1 %v15490_v62  ;;  %11223 = vmatprep.subr.bf16.mxu0 %v15501_v31  ;;  %v15532_v62 = vld [vmem:[%s21720_s1 + $0x13c8] ss:$16 sps:$4 sm:$0xff]  }
 0x42d   :  { %11198 = vmatprep.subr.bf16.mxu1 %v15498_v8 }
 0x42f   :  { %11224 = vmatpush1.bf16.msra.mxu0 %v15499_v48  ;;  %v15541_v48 = vld [vmem:[%s21720_s1 + $0x14a8] ss:$16 sps:$4 sm:$0xff]  }
 0x430   :  { %11199 = vmatpush2.bf16.msra.mxu1 %v15496_v53  ;;  %11225 = vmatprep.subr.bf16.mxu0 %v15507_v47  ;;  %v15538_v53 = vld [vmem:[%s21720_s1 + $0x13a8] ss:$16 sps:$4 sm:$0xff]  }
 0x431   :  { %11200 = vmatprep.subr.bf16.mxu1 %v15504_v35  ;;  %v15544_v47 = vld [vmem:[%s21720_s1 + $0x1388] ss:$16 sps:$4 sm:$0xff]  }
 0x433   :  { %11226 = vmatpush1.bf16.msra.mxu0 %v15505_v17  ;;  %v15552_v17 = vld [vmem:[%s21720_s1 + $0x136c] ss:$16 sps:$4 sm:$0xff]  }
 0x434   :  { %11201 = vmatpush2.bf16.msra.mxu1 %v15502_v55  ;;  %11227 = vmatprep.subr.bf16.mxu0 %v15513_v16  ;;  %v15547_v55 = vld [vmem:[%s21720_s1 + $0x1488] ss:$16 sps:$4 sm:$0xff]  }
 0x435   :  { %11202 = vmatprep.subr.bf16.mxu1 %v15510_v43  ;;  %v15555_v43 = vld [vmem:[%s21720_s1 + $0x146c] ss:$16 sps:$4 sm:$0xff]   ;;  %v15550_v16 = vld [vmem:[%s21720_s1 + $0x1368] ss:$16 sps:$4 sm:$0xff]  }
 0x437   :  { %11228 = vmatpush1.bf16.msra.mxu0 %v15511_v42  ;;  %v15558_v42 = vld [vmem:[%s21720_s1 + $0x134c] ss:$16 sps:$4 sm:$0xff]  }
 0x438   :  { %11203 = vmatpush2.bf16.msra.mxu1 %v15508_v2  ;;  %11229 = vmatprep.subr.bf16.mxu0 %v15519_v11  ;;  %v15553_v2 = vld [vmem:[%s21720_s1 + $0x1468] ss:$16 sps:$4 sm:$0xff]  }
 0x439   :  { %11204 = vmatprep.subr.bf16.mxu1 %v15516_v15  ;;  %v15561_v15 = vld [vmem:[%s21720_s1 + $0x144c] ss:$16 sps:$4 sm:$0xff]   ;;  %v15556_v11 = vld [vmem:[%s21720_s1 + $0x1348] ss:$16 sps:$4 sm:$0xff]  }
 0x43b   :  { %11230 = vmatpush1.bf16.msra.mxu0 %v15517_v26  ;;  %v15564_v26 = vld [vmem:[%s21720_s1 + $0x132c] ss:$16 sps:$4 sm:$0xff]  }
 0x43c   :  { %11205 = vmatpush2.bf16.msra.mxu1 %v15514_v44  ;;  %11231 = vmatprep.subr.bf16.mxu0 %v15525_v28  ;;  %v15559_v44 = vld [vmem:[%s21720_s1 + $0x1448] ss:$16 sps:$4 sm:$0xff]  }
 0x43d   :  { %11206 = vmatprep.subr.bf16.mxu1 %v15522_v10  ;;  %v15567_v10 = vld [vmem:[%s21720_s1 + $0x142c] ss:$16 sps:$4 sm:$0xff]   ;;  %v15562_v28 = vld [vmem:[%s21720_s1 + $0x1328] ss:$16 sps:$4 sm:$0xff]  }
 0x43f   :  { %11232 = vmatpush1.bf16.msra.mxu0 %v15523_v0  ;;  %v15570_v0 = vld [vmem:[%s21720_s1 + $0x130c] ss:$16 sps:$4 sm:$0xff]  }
 0x440   :  { %11207 = vmatpush2.bf16.msra.mxu1 %v15520_v22  ;;  %11233 = vmatprep.subr.bf16.mxu0 %v15528_v50  ;;  %v15565_v22 = vld [vmem:[%s21720_s1 + $0x1428] ss:$16 sps:$4 sm:$0xff]   ;;  %v15573_v50 = vld [vmem:[%s21720_s1 + $0x140c] ss:$16 sps:$4 sm:$0xff]  }
 0x441   :  { %11258 = vmatprep.subr.bf16.mxu1 %v15531_v60  ;;  %v15568_v60 = vld [vmem:[%s21720_s1 + $0x1308] ss:$16 sps:$4 sm:$0xff]  }
 0x443   :  { %v10964_v49 = vpop.f32.mrf.mxu1  ;;  %11209 = vmatmul.mubr.bf16.vlgmr.msra.gmra.mxu1 %v17433_v12  ;;  %11234 = vmatpush2.bf16.msra.mxu0 %v15526_v18  ;;  %v15540_v12 = vld [vmem:[%s21720_s1 + $0x13ac] ss:$16 sps:$4 sm:$0xff]   ;;  %v15571_v18 = vld [vmem:[%s21720_s1 + $0x1408] ss:$16 sps:$4 sm:$0xff]  }
 0x444   :  { %v20071_v57 = vadd.f32 %v10964_v49, %v19968_v21  ;;  %11259 = vmatpush1.bf16.msra.mxu1 %v15529_v14  ;;  %11235 = vmatprep.subr.bf16.mxu0 %v15534_v41  ;;  %v15543_v21 = vld [vmem:[%s21720_s1 + $0x14ac] ss:$16 sps:$4 sm:$0xff]   ;;  %v15577_v49 = vld [vmem:[%s21720_s1 + $0x16e8] ss:$16 sps:$4 sm:$0xff]  }
 0x445   :  { %v10966_v54 = vpop.f32.mrf.mxu1  ;;  %11260 = vmatprep.subr.bf16.mxu1 %v15537_v39  ;;  %11290 = vmatprep.mubr.bf16.mxu1 %v17454_v24  ;;  %v15549_v24 = vld [vmem:[%s21720_s1 + $0x148c] ss:$16 sps:$4 sm:$0xff]   ;;  %v15574_v39 = vld [vmem:[%s21720_s1 + $0x15e8] ss:$16 sps:$4 sm:$0xff]  }
 0x446   :  { %v20086_v8 = vadd.f32 %v10966_v54, %v19982_v59  ;;  %v15546_v59 = vld [vmem:[%s21720_s1 + $0x138c] ss:$16 sps:$4 sm:$0xff]  }
 0x447   :  { %v10968_v31 = vpop.f32.mrf.mxu1  ;;  %11236 = vmatpush2.bf16.msra.mxu0 %v15532_v62  ;;  %v15576_v14 = vld [vmem:[%s21720_s1 + $0x15ec] ss:$16 sps:$4 sm:$0xff]  }
 0x448   :  { %11261 = vmatpush1.bf16.msra.mxu1 %v15535_v23  ;;  %11237 = vmatprep.subr.bf16.mxu0 %v15540_v12  ;;  %v15579_v41 = vld [vmem:[%s21720_s1 + $0x16ec] ss:$16 sps:$4 sm:$0xff]   ;;  %v15583_v31 = vld [vmem:[%s21720_s1 + $0x16c8] ss:$16 sps:$4 sm:$0xff]  }
 0x449   :  { %v10969_v35 = vpop.f32.mrf.mxu1  ;;  %11262 = vmatprep.subr.bf16.mxu1 %v15543_v21  ;;  %v15582_v62 = vld [vmem:[%s21720_s1 + $0x15cc] ss:$16 sps:$4 sm:$0xff]   ;;  %v15580_v21 = vld [vmem:[%s21720_s1 + $0x15c8] ss:$16 sps:$4 sm:$0xff]  }
 0x44a   :  { %v15585_v23 = vld [vmem:[%s21720_s1 + $0x16cc] ss:$16 sps:$4 sm:$0xff]  }
 0x44b   :  { %11238 = vmatpush2.bf16.msra.mxu0 %v15538_v53 }
 0x44c   :  { %11263 = vmatpush1.bf16.msra.mxu1 %v15541_v48  ;;  %11239 = vmatprep.subr.bf16.mxu0 %v15546_v59  ;;  %v15586_v59 = vld [vmem:[%s21720_s1 + $0x15a8] ss:$16 sps:$4 sm:$0xff]  }
 0x44d   :  { %11264 = vmatprep.subr.bf16.mxu1 %v15549_v24  ;;  %v15589_v24 = vld [vmem:[%s21720_s1 + $0x16a8] ss:$16 sps:$4 sm:$0xff]  }
 0x44f   :  { %11240 = vmatpush2.bf16.msra.mxu0 %v15544_v47 }
 0x450   :  { %11265 = vmatpush1.bf16.msra.mxu1 %v15547_v55  ;;  %11241 = vmatprep.subr.bf16.mxu0 %v15552_v17  ;;  %v15592_v55 = vld [vmem:[%s21720_s1 + $0x1588] ss:$16 sps:$4 sm:$0xff]  }
 0x451   :  { %11266 = vmatprep.subr.bf16.mxu1 %v15555_v43  ;;  %v15595_v17 = vld [vmem:[%s21720_s1 + $0x1688] ss:$16 sps:$4 sm:$0xff]   ;;  %v15600_v43 = vld [vmem:[%s21720_s1 + $0x156c] ss:$16 sps:$4 sm:$0xff]  }
 0x453   :  { %11242 = vmatpush2.bf16.msra.mxu0 %v15550_v16  ;;  %v15603_v16 = vld [vmem:[%s21720_s1 + $0x166c] ss:$16 sps:$4 sm:$0xff]  }
 0x454   :  { %11267 = vmatpush1.bf16.msra.mxu1 %v15553_v2  ;;  %11243 = vmatprep.subr.bf16.mxu0 %v15558_v42  ;;  %v15598_v2 = vld [vmem:[%s21720_s1 + $0x1568] ss:$16 sps:$4 sm:$0xff]  }
 0x455   :  { %11268 = vmatprep.subr.bf16.mxu1 %v15561_v15  ;;  %v15601_v42 = vld [vmem:[%s21720_s1 + $0x1668] ss:$16 sps:$4 sm:$0xff]   ;;  %v15606_v15 = vld [vmem:[%s21720_s1 + $0x154c] ss:$16 sps:$4 sm:$0xff]  }
 0x457   :  { %11244 = vmatpush2.bf16.msra.mxu0 %v15556_v11  ;;  %v15609_v11 = vld [vmem:[%s21720_s1 + $0x164c] ss:$16 sps:$4 sm:$0xff]  }
 0x458   :  { %11269 = vmatpush1.bf16.msra.mxu1 %v15559_v44  ;;  %11245 = vmatprep.subr.bf16.mxu0 %v15564_v26  ;;  %v15604_v44 = vld [vmem:[%s21720_s1 + $0x1548] ss:$16 sps:$4 sm:$0xff]  }
 0x459   :  { %11270 = vmatprep.subr.bf16.mxu1 %v15567_v10  ;;  %v15607_v26 = vld [vmem:[%s21720_s1 + $0x1648] ss:$16 sps:$4 sm:$0xff]   ;;  %v15612_v10 = vld [vmem:[%s21720_s1 + $0x152c] ss:$16 sps:$4 sm:$0xff]  }
 0x45b   :  { %11246 = vmatpush2.bf16.msra.mxu0 %v15562_v28  ;;  %v15615_v28 = vld [vmem:[%s21720_s1 + $0x162c] ss:$16 sps:$4 sm:$0xff]  }
 0x45c   :  { %11271 = vmatpush1.bf16.msra.mxu1 %v15565_v22  ;;  %11247 = vmatprep.subr.bf16.mxu0 %v15570_v0  ;;  %v15610_v22 = vld [vmem:[%s21720_s1 + $0x1528] ss:$16 sps:$4 sm:$0xff]  }
 0x45d   :  { %11272 = vmatprep.subr.bf16.mxu1 %v15573_v50  ;;  %v15613_v0 = vld [vmem:[%s21720_s1 + $0x1628] ss:$16 sps:$4 sm:$0xff]   ;;  %v15618_v50 = vld [vmem:[%s21720_s1 + $0x150c] ss:$16 sps:$4 sm:$0xff]  }
 0x45f   :  { %11248 = vmatpush2.bf16.msra.mxu0 %v15568_v60  ;;  %v15621_v60 = vld [vmem:[%s21720_s1 + $0x160c] ss:$16 sps:$4 sm:$0xff]  }
 0x460   :  { %11273 = vmatpush1.bf16.msra.mxu1 %v15571_v18  ;;  %11299 = vmatprep.subr.bf16.mxu0 %v15579_v41  ;;  %v15616_v18 = vld [vmem:[%s21720_s1 + $0x1508] ss:$16 sps:$4 sm:$0xff]   ;;  %v15624_v41 = vld [vmem:[%s21720_s1 + $0x17ec] ss:$16 sps:$4 sm:$0xff]  }
 0x461   :  { %11274 = vmatprep.subr.bf16.mxu1 %v15576_v14  ;;  %v15619_v14 = vld [vmem:[%s21720_s1 + $0x1608] ss:$16 sps:$4 sm:$0xff]  }
 0x462   :  { %v11005_v54 = vpop.f32.mrf.mxu0  ;;  %11250 = vmatmul.mubr.bf16.vlgmr.msra.gmra.mxu0 %v17458_v25  ;;  %v15588_v25 = vld [vmem:[%s21720_s1 + $0x15ac] ss:$16 sps:$4 sm:$0xff]  }
 0x463   :  { %v20175_v12 = vadd.f32 %v11005_v54, %v20071_v57  ;;  %11300 = vmatpush1.bf16.msra.mxu0 %v15577_v49  ;;  %v15591_v57 = vld [vmem:[%s21720_s1 + $0x16ac] ss:$16 sps:$4 sm:$0xff]   ;;  %11331 = vmatprep.mubr.bf16.mxu0 %v17474_v33  ;;  %v15622_v49 = vld [vmem:[%s21720_s1 + $0x17e8] ss:$16 sps:$4 sm:$0xff]  }
 0x464   :  { %11275 = vmatpush2.bf16.msra.mxu1 %v15574_v39  ;;  %v11007_v53 = vpop.f32.mrf.mxu0  ;;  %11301 = vmatprep.subr.bf16.mxu0 %v15585_v23  ;;  %v15597_v33 = vld [vmem:[%s21720_s1 + $0x168c] ss:$16 sps:$4 sm:$0xff]  }
 0x465   :  { %11276 = vmatprep.subr.bf16.mxu1 %v15582_v62  ;;  %v20190_v48 = vadd.f32 %v11007_v53, %v20086_v8  ;;  %v15594_v8 = vld [vmem:[%s21720_s1 + $0x158c] ss:$16 sps:$4 sm:$0xff]   ;;  %v15625_v62 = vld [vmem:[%s21720_s1 + $0x18e8] ss:$16 sps:$4 sm:$0xff]  }
 0x466   :  { %v11009_v35 = vpop.f32.mrf.mxu0  ;;  %v15627_v39 = vld [vmem:[%s21720_s1 + $0x18ec] ss:$16 sps:$4 sm:$0xff]   ;;  %v15628_v53 = vld [vmem:[%s21720_s1 + $0x17c8] ss:$16 sps:$4 sm:$0xff]  }
 0x467   :  { %11302 = vmatpush1.bf16.msra.mxu0 %v15583_v31  ;;  %v15630_v23 = vld [vmem:[%s21720_s1 + $0x17cc] ss:$16 sps:$4 sm:$0xff]  }
 0x468   :  { %11277 = vmatpush2.bf16.msra.mxu1 %v15580_v21  ;;  %v11010_v47 = vpop.f32.mrf.mxu0  ;;  %11303 = vmatprep.subr.bf16.mxu0 %v15591_v57  ;;  %v15633_v54 = vld [vmem:[%s21720_s1 + $0x18cc] ss:$16 sps:$4 sm:$0xff]  }
 0x469   :  { %11278 = vmatprep.subr.bf16.mxu1 %v15588_v25  ;;  %v15631_v25 = vld [vmem:[%s21720_s1 + $0x18c8] ss:$16 sps:$4 sm:$0xff]  }
 0x46a   :  { %v15637_v47 = vld [vmem:[%s21720_s1 + $0x18a8] ss:$16 sps:$4 sm:$0xff]  }
 0x46b   :  { %11304 = vmatpush1.bf16.msra.mxu0 %v15589_v24  ;;  %v15634_v24 = vld [vmem:[%s21720_s1 + $0x17a8] ss:$16 sps:$4 sm:$0xff]  }
 0x46c   :  { %11279 = vmatpush2.bf16.msra.mxu1 %v15586_v59  ;;  %11305 = vmatprep.subr.bf16.mxu0 %v15597_v33  ;;  %v15640_v33 = vld [vmem:[%s21720_s1 + $0x1788] ss:$16 sps:$4 sm:$0xff]  }
 0x46d   :  { %11280 = vmatprep.subr.bf16.mxu1 %v15594_v8 }
 0x46f   :  { %11306 = vmatpush1.bf16.msra.mxu0 %v15595_v17  ;;  %v15648_v17 = vld [vmem:[%s21720_s1 + $0x176c] ss:$16 sps:$4 sm:$0xff]  }
 0x470   :  { %11281 = vmatpush2.bf16.msra.mxu1 %v15592_v55  ;;  %11307 = vmatprep.subr.bf16.mxu0 %v15603_v16  ;;  %v15643_v55 = vld [vmem:[%s21720_s1 + $0x1888] ss:$16 sps:$4 sm:$0xff]  }
 0x471   :  { %11282 = vmatprep.subr.bf16.mxu1 %v15600_v43  ;;  %v15651_v43 = vld [vmem:[%s21720_s1 + $0x186c] ss:$16 sps:$4 sm:$0xff]   ;;  %v15646_v16 = vld [vmem:[%s21720_s1 + $0x1768] ss:$16 sps:$4 sm:$0xff]  }
 0x473   :  { %11308 = vmatpush1.bf16.msra.mxu0 %v15601_v42  ;;  %v15654_v42 = vld [vmem:[%s21720_s1 + $0x174c] ss:$16 sps:$4 sm:$0xff]  }
 0x474   :  { %11283 = vmatpush2.bf16.msra.mxu1 %v15598_v2  ;;  %11309 = vmatprep.subr.bf16.mxu0 %v15609_v11  ;;  %v15649_v2 = vld [vmem:[%s21720_s1 + $0x1868] ss:$16 sps:$4 sm:$0xff]  }
 0x475   :  { %11284 = vmatprep.subr.bf16.mxu1 %v15606_v15  ;;  %v15657_v15 = vld [vmem:[%s21720_s1 + $0x184c] ss:$16 sps:$4 sm:$0xff]   ;;  %v15652_v11 = vld [vmem:[%s21720_s1 + $0x1748] ss:$16 sps:$4 sm:$0xff]  }
 0x477   :  { %11310 = vmatpush1.bf16.msra.mxu0 %v15607_v26  ;;  %v15660_v26 = vld [vmem:[%s21720_s1 + $0x172c] ss:$16 sps:$4 sm:$0xff]  }
 0x478   :  { %11285 = vmatpush2.bf16.msra.mxu1 %v15604_v44  ;;  %11311 = vmatprep.subr.bf16.mxu0 %v15615_v28  ;;  %v15655_v44 = vld [vmem:[%s21720_s1 + $0x1848] ss:$16 sps:$4 sm:$0xff]  }
 0x479   :  { %11286 = vmatprep.subr.bf16.mxu1 %v15612_v10  ;;  %v15663_v10 = vld [vmem:[%s21720_s1 + $0x182c] ss:$16 sps:$4 sm:$0xff]   ;;  %v15658_v28 = vld [vmem:[%s21720_s1 + $0x1728] ss:$16 sps:$4 sm:$0xff]  }
 0x47b   :  { %11312 = vmatpush1.bf16.msra.mxu0 %v15613_v0  ;;  %v15666_v0 = vld [vmem:[%s21720_s1 + $0x170c] ss:$16 sps:$4 sm:$0xff]  }
 0x47c   :  { %11287 = vmatpush2.bf16.msra.mxu1 %v15610_v22  ;;  %11313 = vmatprep.subr.bf16.mxu0 %v15621_v60  ;;  %v15661_v22 = vld [vmem:[%s21720_s1 + $0x1828] ss:$16 sps:$4 sm:$0xff]  }
 0x47d   :  { %11288 = vmatprep.subr.bf16.mxu1 %v15618_v50  ;;  %v15669_v50 = vld [vmem:[%s21720_s1 + $0x180c] ss:$16 sps:$4 sm:$0xff]   ;;  %v15664_v60 = vld [vmem:[%s21720_s1 + $0x1708] ss:$16 sps:$4 sm:$0xff]  }
 0x47f   :  { %11314 = vmatpush1.bf16.msra.mxu0 %v15619_v14  ;;  %v15672_v14 = vld [vmem:[%s21720_s1 + $0x19ec] ss:$16 sps:$4 sm:$0xff]  }
 0x480   :  { %11289 = vmatpush2.bf16.msra.mxu1 %v15616_v18  ;;  %11315 = vmatprep.subr.bf16.mxu0 %v15624_v41  ;;  %v15667_v18 = vld [vmem:[%s21720_s1 + $0x1808] ss:$16 sps:$4 sm:$0xff]   ;;  %v15675_v41 = vld [vmem:[%s21720_s1 + $0x1aec] ss:$16 sps:$4 sm:$0xff]  }
 0x481   :  { %11340 = vmatprep.subr.bf16.mxu1 %v15627_v39  ;;  %v15670_v39 = vld [vmem:[%s21720_s1 + $0x19e8] ss:$16 sps:$4 sm:$0xff]  }
 0x483   :  { %v11046_v21 = vpop.f32.mrf.mxu1  ;;  %11291 = vmatmul.mubr.bf16.vlgmr.msra.gmra.mxu1 %v17661_v4  ;;  %11316 = vmatpush2.bf16.msra.mxu0 %v15622_v49  ;;  %v15636_v4 = vld [vmem:[%s21720_s1 + $0x17ac] ss:$16 sps:$4 sm:$0xff]   ;;  %v15673_v49 = vld [vmem:[%s21720_s1 + $0x1ae8] ss:$16 sps:$4 sm:$0xff]  }
 0x484   :  { %v20279_v31 = vadd.f32 %v11046_v21, %v20175_v12  ;;  %11341 = vmatpush1.bf16.msra.mxu1 %v15625_v62  ;;  %11317 = vmatprep.subr.bf16.mxu0 %v15630_v23  ;;  %v15639_v12 = vld [vmem:[%s21720_s1 + $0x18ac] ss:$16 sps:$4 sm:$0xff]  }
 0x485   :  { %v11048_v57 = vpop.f32.mrf.mxu1  ;;  %11342 = vmatprep.subr.bf16.mxu1 %v15633_v54  ;;  %11372 = vmatprep.mubr.bf16.mxu1 %v17682_v30  ;;  %v15645_v30 = vld [vmem:[%s21720_s1 + $0x188c] ss:$16 sps:$4 sm:$0xff]  }
 0x486   :  { %v20294_v35 = vadd.f32 %v11048_v57, %v20190_v48  ;;  %v15642_v48 = vld [vmem:[%s21720_s1 + $0x178c] ss:$16 sps:$4 sm:$0xff]  }
 0x487   :  { %v11050_v59 = vpop.f32.mrf.mxu1  ;;  %11318 = vmatpush2.bf16.msra.mxu0 %v15628_v53  ;;  %v15678_v62 = vld [vmem:[%s21720_s1 + $0x19cc] ss:$16 sps:$4 sm:$0xff]   ;;  %v15676_v53 = vld [vmem:[%s21720_s1 + $0x19c8] ss:$16 sps:$4 sm:$0xff]  }
 0x488   :  { %11343 = vmatpush1.bf16.msra.mxu1 %v15631_v25  ;;  %11319 = vmatprep.subr.bf16.mxu0 %v15636_v4  ;;  %v15681_v23 = vld [vmem:[%s21720_s1 + $0x1acc] ss:$16 sps:$4 sm:$0xff]   ;;  %v15679_v25 = vld [vmem:[%s21720_s1 + $0x1ac8] ss:$16 sps:$4 sm:$0xff]  }
 0x489   :  { %v11051_v8 = vpop.f32.mrf.mxu1  ;;  %11344 = vmatprep.subr.bf16.mxu1 %v15639_v12  ;;  %v15682_v59 = vld [vmem:[%s21720_s1 + $0x19a8] ss:$16 sps:$4 sm:$0xff]  }
 0x48a   :  { %v15688_v8 = vld [vmem:[%s21720_s1 + $0x1988] ss:$16 sps:$4 sm:$0xff]  }
 0x48b   :  { %11320 = vmatpush2.bf16.msra.mxu0 %v15634_v24  ;;  %v15685_v24 = vld [vmem:[%s21720_s1 + $0x1aa8] ss:$16 sps:$4 sm:$0xff]  }
 0x48c   :  { %11345 = vmatpush1.bf16.msra.mxu1 %v15637_v47  ;;  %11321 = vmatprep.subr.bf16.mxu0 %v15642_v48  ;;  %v15691_v48 = vld [vmem:[%s21720_s1 + $0x1a88] ss:$16 sps:$4 sm:$0xff]  }
 0x48d   :  { %11346 = vmatprep.subr.bf16.mxu1 %v15645_v30  ;;  %v15696_v30 = vld [vmem:[%s21720_s1 + $0x196c] ss:$16 sps:$4 sm:$0xff]  }
 0x48f   :  { %11322 = vmatpush2.bf16.msra.mxu0 %v15640_v33  ;;  %v15699_v33 = vld [vmem:[%s21720_s1 + $0x1a6c] ss:$16 sps:$4 sm:$0xff]  }
 0x490   :  { %11347 = vmatpush1.bf16.msra.mxu1 %v15643_v55  ;;  %11323 = vmatprep.subr.bf16.mxu0 %v15648_v17  ;;  %v15694_v55 = vld [vmem:[%s21720_s1 + $0x1968] ss:$16 sps:$4 sm:$0xff]  }
 0x491   :  { %11348 = vmatprep.subr.bf16.mxu1 %v15651_v43  ;;  %v15697_v17 = vld [vmem:[%s21720_s1 + $0x1a68] ss:$16 sps:$4 sm:$0xff]   ;;  %v15702_v43 = vld [vmem:[%s21720_s1 + $0x194c] ss:$16 sps:$4 sm:$0xff]  }
 0x493   :  { %11324 = vmatpush2.bf16.msra.mxu0 %v15646_v16  ;;  %v15705_v16 = vld [vmem:[%s21720_s1 + $0x1a4c] ss:$16 sps:$4 sm:$0xff]  }
 0x494   :  { %11349 = vmatpush1.bf16.msra.mxu1 %v15649_v2  ;;  %11325 = vmatprep.subr.bf16.mxu0 %v15654_v42  ;;  %v15700_v2 = vld [vmem:[%s21720_s1 + $0x1948] ss:$16 sps:$4 sm:$0xff]  }
 0x495   :  { %11350 = vmatprep.subr.bf16.mxu1 %v15657_v15  ;;  %v15703_v42 = vld [vmem:[%s21720_s1 + $0x1a48] ss:$16 sps:$4 sm:$0xff]   ;;  %v15708_v15 = vld [vmem:[%s21720_s1 + $0x192c] ss:$16 sps:$4 sm:$0xff]  }
 0x497   :  { %11326 = vmatpush2.bf16.msra.mxu0 %v15652_v11  ;;  %v15711_v11 = vld [vmem:[%s21720_s1 + $0x1a2c] ss:$16 sps:$4 sm:$0xff]  }
 0x498   :  { %11351 = vmatpush1.bf16.msra.mxu1 %v15655_v44  ;;  %11327 = vmatprep.subr.bf16.mxu0 %v15660_v26  ;;  %v15706_v44 = vld [vmem:[%s21720_s1 + $0x1928] ss:$16 sps:$4 sm:$0xff]  }
 0x499   :  { %11352 = vmatprep.subr.bf16.mxu1 %v15663_v10  ;;  %v15709_v26 = vld [vmem:[%s21720_s1 + $0x1a28] ss:$16 sps:$4 sm:$0xff]   ;;  %v15714_v10 = vld [vmem:[%s21720_s1 + $0x190c] ss:$16 sps:$4 sm:$0xff]  }
 0x49b   :  { %11328 = vmatpush2.bf16.msra.mxu0 %v15658_v28  ;;  %v15717_v28 = vld [vmem:[%s21720_s1 + $0x1a0c] ss:$16 sps:$4 sm:$0xff]  }
 0x49c   :  { %11353 = vmatpush1.bf16.msra.mxu1 %v15661_v22  ;;  %11329 = vmatprep.subr.bf16.mxu0 %v15666_v0  ;;  %v15712_v22 = vld [vmem:[%s21720_s1 + $0x1908] ss:$16 sps:$4 sm:$0xff]  }
 0x49d   :  { %11354 = vmatprep.subr.bf16.mxu1 %v15669_v50  ;;  %v15715_v0 = vld [vmem:[%s21720_s1 + $0x1a08] ss:$16 sps:$4 sm:$0xff]   ;;  %v15720_v50 = vld [vmem:[%s21720_s1 + $0x1bec] ss:$16 sps:$4 sm:$0xff]  }
 0x49f   :  { %11330 = vmatpush2.bf16.msra.mxu0 %v15664_v60  ;;  %v15723_v60 = vld [vmem:[%s21720_s1 + $0x1cec] ss:$16 sps:$4 sm:$0xff]  }
 0x4a0   :  { %11355 = vmatpush1.bf16.msra.mxu1 %v15667_v18  ;;  %11381 = vmatprep.subr.bf16.mxu0 %v15675_v41  ;;  %v15718_v18 = vld [vmem:[%s21720_s1 + $0x1be8] ss:$16 sps:$4 sm:$0xff]   ;;  %v15726_v41 = vld [vmem:[%s21720_s1 + $0x1bcc] ss:$16 sps:$4 sm:$0xff]  }
 0x4a1   :  { %11356 = vmatprep.subr.bf16.mxu1 %v15672_v14  ;;  %v15721_v14 = vld [vmem:[%s21720_s1 + $0x1ce8] ss:$16 sps:$4 sm:$0xff]  }
 0x4a2   :  { %v11087_v54 = vpop.f32.mrf.mxu0  ;;  %11332 = vmatmul.mubr.bf16.vlgmr.msra.gmra.mxu0 %v17686_v34  ;;  %v15684_v34 = vld [vmem:[%s21720_s1 + $0x19ac] ss:$16 sps:$4 sm:$0xff]  }
 0x4a3   :  { %v20383_v21 = vadd.f32 %v11087_v54, %v20279_v31  ;;  %11382 = vmatpush1.bf16.msra.mxu0 %v15673_v49  ;;  %v15687_v31 = vld [vmem:[%s21720_s1 + $0x1aac] ss:$16 sps:$4 sm:$0xff]   ;;  %11413 = vmatprep.mubr.bf16.mxu0 %v17702_v40  ;;  %v15727_v54 = vld [vmem:[%s21720_s1 + $0x1cc8] ss:$16 sps:$4 sm:$0xff]  }
 0x4a4   :  { %11357 = vmatpush2.bf16.msra.mxu1 %v15670_v39  ;;  %v11089_v57 = vpop.f32.mrf.mxu0  ;;  %11383 = vmatprep.subr.bf16.mxu0 %v15681_v23  ;;  %v15693_v40 = vld [vmem:[%s21720_s1 + $0x1a8c] ss:$16 sps:$4 sm:$0xff]   ;;  %v15724_v23 = vld [vmem:[%s21720_s1 + $0x1bc8] ss:$16 sps:$4 sm:$0xff]  }
 0x4a5   :  { %11358 = vmatprep.subr.bf16.mxu1 %v15678_v62  ;;  %v20398_v4 = vadd.f32 %v11089_v57, %v20294_v35  ;;  %v15690_v35 = vld [vmem:[%s21720_s1 + $0x198c] ss:$16 sps:$4 sm:$0xff]  }
 0x4a6   :  { %v11091_v12 = vpop.f32.mrf.mxu0  ;;  %v15729_v39 = vld [vmem:[%s21720_s1 + $0x1ccc] ss:$16 sps:$4 sm:$0xff]  }
 0x4a7   :  { %11384 = vmatpush1.bf16.msra.mxu0 %v15679_v25 }
 0x4a8   :  { %11359 = vmatpush2.bf16.msra.mxu1 %v15676_v53  ;;  %v11092_v47 = vpop.f32.mrf.mxu0  ;;  %11385 = vmatprep.subr.bf16.mxu0 %v15687_v31  ;;  %v15733_v31 = vld [vmem:[%s21720_s1 + $0x1ca8] ss:$16 sps:$4 sm:$0xff]  }
 0x4a9   :  { %11360 = vmatprep.subr.bf16.mxu1 %v15684_v34  ;;  %v15730_v34 = vld [vmem:[%s21720_s1 + $0x1ba8] ss:$16 sps:$4 sm:$0xff]   ;;  %v15744_v47 = vld [vmem:[%s21720_s1 + $0x1b6c] ss:$16 sps:$4 sm:$0xff]  }
 0x4ab   :  { %11386 = vmatpush1.bf16.msra.mxu0 %v15685_v24  ;;  %v15739_v24 = vld [vmem:[%s21720_s1 + $0x1c88] ss:$16 sps:$4 sm:$0xff]  }
 0x4ac   :  { %11361 = vmatpush2.bf16.msra.mxu1 %v15682_v59  ;;  %11387 = vmatprep.subr.bf16.mxu0 %v15693_v40  ;;  %v15736_v59 = vld [vmem:[%s21720_s1 + $0x1b88] ss:$16 sps:$4 sm:$0xff]  }
 0x4ad   :  { %11362 = vmatprep.subr.bf16.mxu1 %v15690_v35  ;;  %v15747_v35 = vld [vmem:[%s21720_s1 + $0x1c6c] ss:$16 sps:$4 sm:$0xff]   ;;  %v15742_v40 = vld [vmem:[%s21720_s1 + $0x1b68] ss:$16 sps:$4 sm:$0xff]  }
 0x4af   :  { %11388 = vmatpush1.bf16.msra.mxu0 %v15691_v48  ;;  %v15750_v48 = vld [vmem:[%s21720_s1 + $0x1b4c] ss:$16 sps:$4 sm:$0xff]  }
 0x4b0   :  { %11363 = vmatpush2.bf16.msra.mxu1 %v15688_v8  ;;  %11389 = vmatprep.subr.bf16.mxu0 %v15699_v33  ;;  %v15745_v8 = vld [vmem:[%s21720_s1 + $0x1c68] ss:$16 sps:$4 sm:$0xff]  }
 0x4b1   :  { %11364 = vmatprep.subr.bf16.mxu1 %v15696_v30  ;;  %v15753_v30 = vld [vmem:[%s21720_s1 + $0x1c4c] ss:$16 sps:$4 sm:$0xff]   ;;  %v15748_v33 = vld [vmem:[%s21720_s1 + $0x1b48] ss:$16 sps:$4 sm:$0xff]  }
 0x4b3   :  { %11390 = vmatpush1.bf16.msra.mxu0 %v15697_v17  ;;  %v15756_v17 = vld [vmem:[%s21720_s1 + $0x1b2c] ss:$16 sps:$4 sm:$0xff]  }
 0x4b4   :  { %11365 = vmatpush2.bf16.msra.mxu1 %v15694_v55  ;;  %11391 = vmatprep.subr.bf16.mxu0 %v15705_v16  ;;  %v15751_v55 = vld [vmem:[%s21720_s1 + $0x1c48] ss:$16 sps:$4 sm:$0xff]  }
 0x4b5   :  { %11366 = vmatprep.subr.bf16.mxu1 %v15702_v43  ;;  %v15759_v43 = vld [vmem:[%s21720_s1 + $0x1c2c] ss:$16 sps:$4 sm:$0xff]   ;;  %v15754_v16 = vld [vmem:[%s21720_s1 + $0x1b28] ss:$16 sps:$4 sm:$0xff]  }
 0x4b7   :  { %11392 = vmatpush1.bf16.msra.mxu0 %v15703_v42  ;;  %v15762_v42 = vld [vmem:[%s21720_s1 + $0x1b0c] ss:$16 sps:$4 sm:$0xff]  }
 0x4b8   :  { %11367 = vmatpush2.bf16.msra.mxu1 %v15700_v2  ;;  %11393 = vmatprep.subr.bf16.mxu0 %v15711_v11  ;;  %v15757_v2 = vld [vmem:[%s21720_s1 + $0x1c28] ss:$16 sps:$4 sm:$0xff]  }
 0x4b9   :  { %11368 = vmatprep.subr.bf16.mxu1 %v15708_v15  ;;  %v15765_v15 = vld [vmem:[%s21720_s1 + $0x1c0c] ss:$16 sps:$4 sm:$0xff]   ;;  %v15760_v11 = vld [vmem:[%s21720_s1 + $0x1b08] ss:$16 sps:$4 sm:$0xff]  }
 0x4bb   :  { %11394 = vmatpush1.bf16.msra.mxu0 %v15709_v26  ;;  %v15768_v26 = vld [vmem:[%s21720_s1 + $0x1dec] ss:$16 sps:$4 sm:$0xff]  }
 0x4bc   :  { %11369 = vmatpush2.bf16.msra.mxu1 %v15706_v44  ;;  %11395 = vmatprep.subr.bf16.mxu0 %v15717_v28  ;;  %v15763_v44 = vld [vmem:[%s21720_s1 + $0x1c08] ss:$16 sps:$4 sm:$0xff]  }
 0x4bd   :  { %11370 = vmatprep.subr.bf16.mxu1 %v15714_v10  ;;  %v15771_v10 = vld [vmem:[%s21720_s1 + $0x1eec] ss:$16 sps:$4 sm:$0xff]   ;;  %v15766_v28 = vld [vmem:[%s21720_s1 + $0x1de8] ss:$16 sps:$4 sm:$0xff]  }
 0x4bf   :  { %11396 = vmatpush1.bf16.msra.mxu0 %v15715_v0  ;;  %v15774_v0 = vld [vmem:[%s21720_s1 + $0x1dcc] ss:$16 sps:$4 sm:$0xff]  }
 0x4c0   :  { %11371 = vmatpush2.bf16.msra.mxu1 %v15712_v22  ;;  %11397 = vmatprep.subr.bf16.mxu0 %v15720_v50  ;;  %v15769_v22 = vld [vmem:[%s21720_s1 + $0x1ee8] ss:$16 sps:$4 sm:$0xff]   ;;  %v15777_v50 = vld [vmem:[%s21720_s1 + $0x1ecc] ss:$16 sps:$4 sm:$0xff]  }
 0x4c1   :  { %11422 = vmatprep.subr.bf16.mxu1 %v15723_v60 }
 0x4c3   :  { %v11128_v49 = vpop.f32.mrf.mxu1  ;;  %11373 = vmatmul.mubr.bf16.vlgmr.msra.gmra.mxu1 %v17885_v46  ;;  %11398 = vmatpush2.bf16.msra.mxu0 %v15718_v18  ;;  %v15732_v46 = vld [vmem:[%s21720_s1 + $0x1bac] ss:$16 sps:$4 sm:$0xff]  }
 0x4c4   :  { %v20487_v62 = vadd.f32 %v11128_v49, %v20383_v21  ;;  %11423 = vmatpush1.bf16.msra.mxu1 %v15721_v14  ;;  %11399 = vmatprep.subr.bf16.mxu0 %v15726_v41  ;;  %v15735_v21 = vld [vmem:[%s21720_s1 + $0x1cac] ss:$16 sps:$4 sm:$0xff]   ;;  %v15772_v14 = vld [vmem:[%s21720_s1 + $0x1dc8] ss:$16 sps:$4 sm:$0xff]  }
 0x4c5   :  { %v11130_v53 = vpop.f32.mrf.mxu1  ;;  %11424 = vmatprep.subr.bf16.mxu1 %v15729_v39  ;;  %11454 = vmatprep.mubr.bf16.mxu1 %v17906_v45  ;;  %v15741_v45 = vld [vmem:[%s21720_s1 + $0x1c8c] ss:$16 sps:$4 sm:$0xff]   ;;  %v15775_v41 = vld [vmem:[%s21720_s1 + $0x1ec8] ss:$16 sps:$4 sm:$0xff]  }
 0x4c6   :  { %v20502_v25 = vadd.f32 %v11130_v53, %v20398_v4  ;;  %v15738_v4 = vld [vmem:[%s21720_s1 + $0x1b8c] ss:$16 sps:$4 sm:$0xff]   ;;  %v15781_v53 = vld [vmem:[%s21720_s1 + $0x1ea8] ss:$16 sps:$4 sm:$0xff]  }
 0x4c7   :  { %v11132_v57 = vpop.f32.mrf.mxu1  ;;  %11400 = vmatpush2.bf16.msra.mxu0 %v15724_v23  ;;  %v15783_v49 = vld [vmem:[%s21720_s1 + $0x1eac] ss:$16 sps:$4 sm:$0xff]  }
 0x4c8   :  { %11425 = vmatpush1.bf16.msra.mxu1 %v15727_v54  ;;  %11401 = vmatprep.subr.bf16.mxu0 %v15732_v46  ;;  %v15778_v54 = vld [vmem:[%s21720_s1 + $0x1da8] ss:$16 sps:$4 sm:$0xff]  }
 0x4c9   :  { %v11133_v12 = vpop.f32.mrf.mxu1  ;;  %11426 = vmatprep.subr.bf16.mxu1 %v15735_v21  ;;  %v15786_v21 = vld [vmem:[%s21720_s1 + $0x1d8c] ss:$16 sps:$4 sm:$0xff]   ;;  %v15787_v57 = vld [vmem:[%s21720_s1 + $0x1e88] ss:$16 sps:$4 sm:$0xff]  }
 0x4ca   :  { %v15790_v12 = vld [vmem:[%s21720_s1 + $0x1d68] ss:$16 sps:$4 sm:$0xff]  }
 0x4cb   :  { %11402 = vmatpush2.bf16.msra.mxu0 %v15730_v34  ;;  %v15792_v34 = vld [vmem:[%s21720_s1 + $0x1d6c] ss:$16 sps:$4 sm:$0xff]  }
 0x4cc   :  { %11427 = vmatpush1.bf16.msra.mxu1 %v15733_v31  ;;  %11403 = vmatprep.subr.bf16.mxu0 %v15738_v4  ;;  %v15795_v31 = vld [vmem:[%s21720_s1 + $0x1e6c] ss:$16 sps:$4 sm:$0xff]   ;;  %v15793_v4 = vld [vmem:[%s21720_s1 + $0x1e68] ss:$16 sps:$4 sm:$0xff]  }
 0x4cd   :  { %11428 = vmatprep.subr.bf16.mxu1 %v15741_v45  ;;  %v15798_v45 = vld [vmem:[%s21720_s1 + $0x1d4c] ss:$16 sps:$4 sm:$0xff]  }
 0x4cf   :  { %11404 = vmatpush2.bf16.msra.mxu0 %v15736_v59  ;;  %v15801_v59 = vld [vmem:[%s21720_s1 + $0x1e4c] ss:$16 sps:$4 sm:$0xff]  }
 0x4d0   :  { %11429 = vmatpush1.bf16.msra.mxu1 %v15739_v24  ;;  %11405 = vmatprep.subr.bf16.mxu0 %v15744_v47  ;;  %v15796_v24 = vld [vmem:[%s21720_s1 + $0x1d48] ss:$16 sps:$4 sm:$0xff]  }
 0x4d1   :  { %11430 = vmatprep.subr.bf16.mxu1 %v15747_v35  ;;  %v15799_v47 = vld [vmem:[%s21720_s1 + $0x1e48] ss:$16 sps:$4 sm:$0xff]   ;;  %v15804_v35 = vld [vmem:[%s21720_s1 + $0x1d2c] ss:$16 sps:$4 sm:$0xff]  }
 0x4d3   :  { %11406 = vmatpush2.bf16.msra.mxu0 %v15742_v40  ;;  %v15807_v40 = vld [vmem:[%s21720_s1 + $0x1e2c] ss:$16 sps:$4 sm:$0xff]  }
 0x4d4   :  { %11431 = vmatpush1.bf16.msra.mxu1 %v15745_v8  ;;  %11407 = vmatprep.subr.bf16.mxu0 %v15750_v48  ;;  %v15802_v8 = vld [vmem:[%s21720_s1 + $0x1d28] ss:$16 sps:$4 sm:$0xff]  }
 0x4d5   :  { %11432 = vmatprep.subr.bf16.mxu1 %v15753_v30  ;;  %v15805_v48 = vld [vmem:[%s21720_s1 + $0x1e28] ss:$16 sps:$4 sm:$0xff]   ;;  %v15810_v30 = vld [vmem:[%s21720_s1 + $0x1d0c] ss:$16 sps:$4 sm:$0xff]  }
 0x4d7   :  { %11408 = vmatpush2.bf16.msra.mxu0 %v15748_v33  ;;  %v15813_v33 = vld [vmem:[%s21720_s1 + $0x1e0c] ss:$16 sps:$4 sm:$0xff]  }
 0x4d8   :  { %11433 = vmatpush1.bf16.msra.mxu1 %v15751_v55  ;;  %11409 = vmatprep.subr.bf16.mxu0 %v15756_v17  ;;  %v15808_v55 = vld [vmem:[%s21720_s1 + $0x1d08] ss:$16 sps:$4 sm:$0xff]  }
 0x4d9   :  { %11434 = vmatprep.subr.bf16.mxu1 %v15759_v43  ;;  %v15811_v17 = vld [vmem:[%s21720_s1 + $0x1e08] ss:$16 sps:$4 sm:$0xff]   ;;  %v15816_v43 = vld [vmem:[%s21720_s1 + $0x1fec] ss:$16 sps:$4 sm:$0xff]  }
 0x4db   :  { %11410 = vmatpush2.bf16.msra.mxu0 %v15754_v16  ;;  %v15819_v16 = vld [vmem:[%s21720_s1 + $0x20ec] ss:$16 sps:$4 sm:$0xff]  }
 0x4dc   :  { %11435 = vmatpush1.bf16.msra.mxu1 %v15757_v2  ;;  %11411 = vmatprep.subr.bf16.mxu0 %v15762_v42  ;;  %v15814_v2 = vld [vmem:[%s21720_s1 + $0x1fe8] ss:$16 sps:$4 sm:$0xff]  }
 0x4dd   :  { %11436 = vmatprep.subr.bf16.mxu1 %v15765_v15  ;;  %v15817_v42 = vld [vmem:[%s21720_s1 + $0x20e8] ss:$16 sps:$4 sm:$0xff]   ;;  %v15822_v15 = vld [vmem:[%s21720_s1 + $0x1fcc] ss:$16 sps:$4 sm:$0xff]  }
 0x4df   :  { %11412 = vmatpush2.bf16.msra.mxu0 %v15760_v11  ;;  %v15825_v11 = vld [vmem:[%s21720_s1 + $0x20cc] ss:$16 sps:$4 sm:$0xff]  }
 0x4e0   :  { %11437 = vmatpush1.bf16.msra.mxu1 %v15763_v44  ;;  %11463 = vmatprep.subr.bf16.mxu0 %v15771_v10  ;;  %v15820_v10 = vld [vmem:[%s21720_s1 + $0x1fc8] ss:$16 sps:$4 sm:$0xff]  }
 0x4e1   :  { %11438 = vmatprep.subr.bf16.mxu1 %v15768_v26 }
 0x4e2   :  { %v11169_v60 = vpop.f32.mrf.mxu0  ;;  %11414 = vmatmul.mubr.bf16.vlgmr.msra.gmra.mxu0 %v17910_v58  ;;  %v15780_v58 = vld [vmem:[%s21720_s1 + $0x1dac] ss:$16 sps:$4 sm:$0xff]  }
 0x4e3   :  { %v20591_v18 = vadd.f32 %v11169_v60, %v20487_v62  ;;  %11464 = vmatpush1.bf16.msra.mxu0 %v15769_v22  ;;  %11495 = vmatprep.mubr.bf16.mxu0 %v17926_v1  ;;  %v15789_v1 = vld [vmem:[%s21720_s1 + $0x1e8c] ss:$16 sps:$4 sm:$0xff]  }
 0x4e4   :  { %11439 = vmatpush2.bf16.msra.mxu1 %v15766_v28  ;;  %v11171_v39 = vpop.f32.mrf.mxu0  ;;  %11465 = vmatprep.subr.bf16.mxu0 %v15777_v50  ;;  %v15823_v28 = vld [vmem:[%s21720_s1 + $0x20c8] ss:$16 sps:$4 sm:$0xff]  }
 0x4e5   :  { %11440 = vmatprep.subr.bf16.mxu1 %v15774_v0  ;;  %v20606_v62 = vadd.f32 %v11171_v39, %v20502_v25  ;;  %v15784_v25 = vld [vmem:[%s21720_s1 + $0x1d88] ss:$16 sps:$4 sm:$0xff]   ;;  %v15831_v0 = vld [vmem:[%s21720_s1 + $0x20ac] ss:$16 sps:$4 sm:$0xff]  }
 0x4e6   :  { %v11173_v23 = vpop.f32.mrf.mxu0  ;;  %v15834_v39 = vld [vmem:[%s21720_s1 + $0x1f8c] ss:$16 sps:$4 sm:$0xff]  }
 0x4e7   :  { %11466 = vmatpush1.bf16.msra.mxu0 %v15775_v41  ;;  %v15843_v23 = vld [vmem:[%s21720_s1 + $0x206c] ss:$16 sps:$4 sm:$0xff]  }
 0x4e8   :  { %11441 = vmatpush2.bf16.msra.mxu1 %v15772_v14  ;;  %v11174_v46 = vpop.f32.mrf.mxu0  ;;  %11467 = vmatprep.subr.bf16.mxu0 %v15783_v49  ;;  %v15829_v14 = vld [vmem:[%s21720_s1 + $0x20a8] ss:$16 sps:$4 sm:$0xff]  }
 0x4e9   :  { %11442 = vmatprep.subr.bf16.mxu1 %v15780_v58  ;;  %v15832_v58 = vld [vmem:[%s21720_s1 + $0x1f88] ss:$16 sps:$4 sm:$0xff]   ;;  %v15846_v46 = vld [vmem:[%s21720_s1 + $0x1f4c] ss:$16 sps:$4 sm:$0xff]  }
 0x4ea   :  { %v15835_v49 = vld [vmem:[%s21720_s1 + $0x2088] ss:$16 sps:$4 sm:$0xff]  }
 0x4eb   :  { %11468 = vmatpush1.bf16.msra.mxu0 %v15781_v53  ;;  %v15841_v53 = vld [vmem:[%s21720_s1 + $0x2068] ss:$16 sps:$4 sm:$0xff]  }
 0x4ec   :  { %11443 = vmatpush2.bf16.msra.mxu1 %v15778_v54  ;;  %11469 = vmatprep.subr.bf16.mxu0 %v15789_v1  ;;  %v15838_v54 = vld [vmem:[%s21720_s1 + $0x1f68] ss:$16 sps:$4 sm:$0xff]  }
 0x4ed   :  { %11444 = vmatprep.subr.bf16.mxu1 %v15786_v21  ;;  %v15849_v21 = vld [vmem:[%s21720_s1 + $0x204c] ss:$16 sps:$4 sm:$0xff]   ;;  %v15844_v1 = vld [vmem:[%s21720_s1 + $0x1f48] ss:$16 sps:$4 sm:$0xff]  }
 0x4ef   :  { %11470 = vmatpush1.bf16.msra.mxu0 %v15787_v57  ;;  %v15852_v57 = vld [vmem:[%s21720_s1 + $0x1f2c] ss:$16 sps:$4 sm:$0xff]  }
 0x4f0   :  { %11445 = vmatpush2.bf16.msra.mxu1 %v15784_v25  ;;  %11471 = vmatprep.subr.bf16.mxu0 %v15795_v31  ;;  %v15847_v25 = vld [vmem:[%s21720_s1 + $0x2048] ss:$16 sps:$4 sm:$0xff]  }
 0x4f1   :  { %11446 = vmatprep.subr.bf16.mxu1 %v15792_v34  ;;  %v15855_v34 = vld [vmem:[%s21720_s1 + $0x202c] ss:$16 sps:$4 sm:$0xff]   ;;  %v15850_v31 = vld [vmem:[%s21720_s1 + $0x1f28] ss:$16 sps:$4 sm:$0xff]  }
 0x4f3   :  { %11472 = vmatpush1.bf16.msra.mxu0 %v15793_v4  ;;  %v15858_v4 = vld [vmem:[%s21720_s1 + $0x1f0c] ss:$16 sps:$4 sm:$0xff]  }
 0x4f4   :  { %11447 = vmatpush2.bf16.msra.mxu1 %v15790_v12  ;;  %11473 = vmatprep.subr.bf16.mxu0 %v15801_v59  ;;  %v15853_v12 = vld [vmem:[%s21720_s1 + $0x2028] ss:$16 sps:$4 sm:$0xff]  }
 0x4f5   :  { %11448 = vmatprep.subr.bf16.mxu1 %v15798_v45  ;;  %v15861_v45 = vld [vmem:[%s21720_s1 + $0x200c] ss:$16 sps:$4 sm:$0xff]   ;;  %v15856_v59 = vld [vmem:[%s21720_s1 + $0x1f08] ss:$16 sps:$4 sm:$0xff]  }
 0x4f7   :  { %11474 = vmatpush1.bf16.msra.mxu0 %v15799_v47  ;;  %v15864_v47 = vld [vmem:[%s21720_s1 + $0x21ec] ss:$16 sps:$4 sm:$0xff]  }
 0x4f8   :  { %11449 = vmatpush2.bf16.msra.mxu1 %v15796_v24  ;;  %11475 = vmatprep.subr.bf16.mxu0 %v15807_v40  ;;  %v15859_v24 = vld [vmem:[%s21720_s1 + $0x2008] ss:$16 sps:$4 sm:$0xff]  }
 0x4f9   :  { %11450 = vmatprep.subr.bf16.mxu1 %v15804_v35  ;;  %v15867_v35 = vld [vmem:[%s21720_s1 + $0x22ec] ss:$16 sps:$4 sm:$0xff]   ;;  %v15862_v40 = vld [vmem:[%s21720_s1 + $0x21e8] ss:$16 sps:$4 sm:$0xff]  }
 0x4fb   :  { %11476 = vmatpush1.bf16.msra.mxu0 %v15805_v48  ;;  %v15870_v48 = vld [vmem:[%s21720_s1 + $0x21cc] ss:$16 sps:$4 sm:$0xff]  }
 0x4fc   :  { %11451 = vmatpush2.bf16.msra.mxu1 %v15802_v8  ;;  %11477 = vmatprep.subr.bf16.mxu0 %v15813_v33  ;;  %v15865_v8 = vld [vmem:[%s21720_s1 + $0x22e8] ss:$16 sps:$4 sm:$0xff]  }
 0x4fd   :  { %11452 = vmatprep.subr.bf16.mxu1 %v15810_v30  ;;  %v15873_v30 = vld [vmem:[%s21720_s1 + $0x22cc] ss:$16 sps:$4 sm:$0xff]  }
 0x4ff   :  { %11478 = vmatpush1.bf16.msra.mxu0 %v15811_v17  ;;  %v15868_v17 = vld [vmem:[%s21720_s1 + $0x21c8] ss:$16 sps:$4 sm:$0xff]  }
 0x500   :  { %11453 = vmatpush2.bf16.msra.mxu1 %v15808_v55  ;;  %11479 = vmatprep.subr.bf16.mxu0 %v15816_v43  ;;  %v15871_v43 = vld [vmem:[%s21720_s1 + $0x22c8] ss:$16 sps:$4 sm:$0xff]  }
 0x501   :  { %11504 = vmatprep.subr.bf16.mxu1 %v15819_v16 }
 0x503   :  { %v11210_v44 = vpop.f32.mrf.mxu1  ;;  %11455 = vmatmul.mubr.bf16.vlgmr.msra.gmra.mxu1 %v18113_v27  ;;  %11480 = vmatpush2.bf16.msra.mxu0 %v15814_v2  ;;  %v15828_v27 = vld [vmem:[%s21720_s1 + $0x1fac] ss:$16 sps:$4 sm:$0xff]  }
 0x504   :  { %v20695_v26 = vadd.f32 %v11210_v44, %v20591_v18  ;;  %11505 = vmatpush1.bf16.msra.mxu1 %v15817_v42  ;;  %11481 = vmatprep.subr.bf16.mxu0 %v15822_v15  ;;  %v15826_v18 = vld [vmem:[%s21720_s1 + $0x1fa8] ss:$16 sps:$4 sm:$0xff]   ;;  %v15879_v2 = vld [vmem:[%s21720_s1 + $0x22ac] ss:$16 sps:$4 sm:$0xff]  }
 0x505   :  { %v11212_v22 = vpop.f32.mrf.mxu1  ;;  %11506 = vmatprep.subr.bf16.mxu1 %v15825_v11  ;;  %11536 = vmatprep.mubr.bf16.mxu1 %v18134_v38  ;;  %v15837_v38 = vld [vmem:[%s21720_s1 + $0x208c] ss:$16 sps:$4 sm:$0xff]   ;;  %v15874_v11 = vld [vmem:[%s21720_s1 + $0x21a8] ss:$16 sps:$4 sm:$0xff]  }
 0x506   :  { %v20710_v50 = vadd.f32 %v11212_v22, %v20606_v62  ;;  %v15840_v62 = vld [vmem:[%s21720_s1 + $0x1f6c] ss:$16 sps:$4 sm:$0xff]   ;;  %v15877_v44 = vld [vmem:[%s21720_s1 + $0x22a8] ss:$16 sps:$4 sm:$0xff]  }
 0x507   :  { %v11214_v60 = vpop.f32.mrf.mxu1  ;;  %11482 = vmatpush2.bf16.msra.mxu0 %v15820_v10  ;;  %v15882_v10 = vld [vmem:[%s21720_s1 + $0x218c] ss:$16 sps:$4 sm:$0xff]   ;;  %v15883_v22 = vld [vmem:[%s21720_s1 + $0x2288] ss:$16 sps:$4 sm:$0xff]  }
 0x508   :  { %11507 = vmatpush1.bf16.msra.mxu1 %v15823_v28  ;;  %11483 = vmatprep.subr.bf16.mxu0 %v15828_v27  ;;  %v15880_v28 = vld [vmem:[%s21720_s1 + $0x2188] ss:$16 sps:$4 sm:$0xff]   ;;  %v15888_v27 = vld [vmem:[%s21720_s1 + $0x216c] ss:$16 sps:$4 sm:$0xff]  }
 0x509   :  { %v11215_v41 = vpop.f32.mrf.mxu1  ;;  %11508 = vmatprep.subr.bf16.mxu1 %v15831_v0  ;;  %v15891_v0 = vld [vmem:[%s21720_s1 + $0x226c] ss:$16 sps:$4 sm:$0xff]   ;;  %v15889_v60 = vld [vmem:[%s21720_s1 + $0x2268] ss:$16 sps:$4 sm:$0xff]  }
 0x50a   :  { %v15892_v41 = vld [vmem:[%s21720_s1 + $0x2148] ss:$16 sps:$4 sm:$0xff]  }
 0x50b   :  { %11484 = vmatpush2.bf16.msra.mxu0 %v15826_v18  ;;  %v15894_v18 = vld [vmem:[%s21720_s1 + $0x214c] ss:$16 sps:$4 sm:$0xff]  }
 0x50c   :  { %11509 = vmatpush1.bf16.msra.mxu1 %v15829_v14  ;;  %11485 = vmatprep.subr.bf16.mxu0 %v15834_v39  ;;  %v15897_v14 = vld [vmem:[%s21720_s1 + $0x224c] ss:$16 sps:$4 sm:$0xff]   ;;  %v15895_v39 = vld [vmem:[%s21720_s1 + $0x2248] ss:$16 sps:$4 sm:$0xff]  }
 0x50d   :  { %11510 = vmatprep.subr.bf16.mxu1 %v15837_v38  ;;  %v15900_v38 = vld [vmem:[%s21720_s1 + $0x212c] ss:$16 sps:$4 sm:$0xff]  }
 0x50f   :  { %11486 = vmatpush2.bf16.msra.mxu0 %v15832_v58  ;;  %v15903_v58 = vld [vmem:[%s21720_s1 + $0x222c] ss:$16 sps:$4 sm:$0xff]  }
 0x510   :  { %11511 = vmatpush1.bf16.msra.mxu1 %v15835_v49  ;;  %11487 = vmatprep.subr.bf16.mxu0 %v15840_v62  ;;  %v15898_v49 = vld [vmem:[%s21720_s1 + $0x2128] ss:$16 sps:$4 sm:$0xff]  }
 0x511   :  { %11512 = vmatprep.subr.bf16.mxu1 %v15843_v23  ;;  %v15901_v62 = vld [vmem:[%s21720_s1 + $0x2228] ss:$16 sps:$4 sm:$0xff]   ;;  %v15906_v23 = vld [vmem:[%s21720_s1 + $0x210c] ss:$16 sps:$4 sm:$0xff]  }
 0x513   :  { %11488 = vmatpush2.bf16.msra.mxu0 %v15838_v54  ;;  %v15909_v54 = vld [vmem:[%s21720_s1 + $0x220c] ss:$16 sps:$4 sm:$0xff]  }
 0x514   :  { %11513 = vmatpush1.bf16.msra.mxu1 %v15841_v53  ;;  %11489 = vmatprep.subr.bf16.mxu0 %v15846_v46  ;;  %v15904_v53 = vld [vmem:[%s21720_s1 + $0x2108] ss:$16 sps:$4 sm:$0xff]  }
 0x515   :  { %11514 = vmatprep.subr.bf16.mxu1 %v15849_v21  ;;  %v15907_v46 = vld [vmem:[%s21720_s1 + $0x2208] ss:$16 sps:$4 sm:$0xff]   ;;  %v15912_v21 = vld [vmem:[%s21720_s1 + $0x23ec] ss:$16 sps:$4 sm:$0xff]  }
 0x517   :  { %11490 = vmatpush2.bf16.msra.mxu0 %v15844_v1  ;;  %v15915_v1 = vld [vmem:[%s21720_s1 + $0x24ec] ss:$16 sps:$4 sm:$0xff]  }
 0x518   :  { %11515 = vmatpush1.bf16.msra.mxu1 %v15847_v25  ;;  %11491 = vmatprep.subr.bf16.mxu0 %v15852_v57  ;;  %v15910_v25 = vld [vmem:[%s21720_s1 + $0x23e8] ss:$16 sps:$4 sm:$0xff]  }
 0x519   :  { %11516 = vmatprep.subr.bf16.mxu1 %v15855_v34  ;;  %v15913_v57 = vld [vmem:[%s21720_s1 + $0x24e8] ss:$16 sps:$4 sm:$0xff]   ;;  %v15918_v34 = vld [vmem:[%s21720_s1 + $0x23cc] ss:$16 sps:$4 sm:$0xff]  }
 0x51b   :  { %11492 = vmatpush2.bf16.msra.mxu0 %v15850_v31  ;;  %v15921_v31 = vld [vmem:[%s21720_s1 + $0x24cc] ss:$16 sps:$4 sm:$0xff]  }
 0x51c   :  { %11517 = vmatpush1.bf16.msra.mxu1 %v15853_v12  ;;  %11493 = vmatprep.subr.bf16.mxu0 %v15858_v4 }
 0x51d   :  { %11518 = vmatprep.subr.bf16.mxu1 %v15861_v45  ;;  %v15916_v45 = vld [vmem:[%s21720_s1 + $0x23c8] ss:$16 sps:$4 sm:$0xff]  }
 0x51f   :  { %11494 = vmatpush2.bf16.msra.mxu0 %v15856_v59  ;;  %v15919_v59 = vld [vmem:[%s21720_s1 + $0x24c8] ss:$16 sps:$4 sm:$0xff]  }
 0x520   :  { %11519 = vmatpush1.bf16.msra.mxu1 %v15859_v24  ;;  %11545 = vmatprep.subr.bf16.mxu0 %v15867_v35 }
 0x521   :  { %11520 = vmatprep.subr.bf16.mxu1 %v15864_v47  ;;  %v15927_v47 = vld [vmem:[%s21720_s1 + $0x24ac] ss:$16 sps:$4 sm:$0xff]  }
 0x522   :  { %v11251_v33 = vpop.f32.mrf.mxu0  ;;  %11496 = vmatmul.mubr.bf16.vlgmr.msra.gmra.mxu0 %v18138_v32  ;;  %v15876_v32 = vld [vmem:[%s21720_s1 + $0x21ac] ss:$16 sps:$4 sm:$0xff]  }
 0x523   :  { %v20799_v55 = vadd.f32 %v11251_v33, %v20695_v26  ;;  %11546 = vmatpush1.bf16.msra.mxu0 %v15865_v8  ;;  %11577 = vmatprep.mubr.bf16.mxu0 %v18154_v52  ;;  %v15885_v52 = vld [vmem:[%s21720_s1 + $0x228c] ss:$16 sps:$4 sm:$0xff]   ;;  %v15922_v8 = vld [vmem:[%s21720_s1 + $0x23a8] ss:$16 sps:$4 sm:$0xff]  }
 0x524   :  { %11521 = vmatpush2.bf16.msra.mxu1 %v15862_v40  ;;  %v11253_v16 = vpop.f32.mrf.mxu0  ;;  %11547 = vmatprep.subr.bf16.mxu0 %v15873_v30  ;;  %v15930_v33 = vld [vmem:[%s21720_s1 + $0x238c] ss:$16 sps:$4 sm:$0xff]  }
 0x525   :  { %11522 = vmatprep.subr.bf16.mxu1 %v15870_v48  ;;  %v20814_v42 = vadd.f32 %v11253_v16, %v20710_v50  ;;  %v15886_v50 = vld [vmem:[%s21720_s1 + $0x2168] ss:$16 sps:$4 sm:$0xff]   ;;  %v15939_v16 = vld [vmem:[%s21720_s1 + $0x246c] ss:$16 sps:$4 sm:$0xff]  }
 0x526   :  { %v11255_v15 = vpop.f32.mrf.mxu0  ;;  %v15925_v48 = vld [vmem:[%s21720_s1 + $0x24a8] ss:$16 sps:$4 sm:$0xff]  }
 0x527   :  { %11548 = vmatpush1.bf16.msra.mxu0 %v15871_v43  ;;  %v15936_v43 = vld [vmem:[%s21720_s1 + $0x236c] ss:$16 sps:$4 sm:$0xff]  }
 0x528   :  { %11523 = vmatpush2.bf16.msra.mxu1 %v15868_v17  ;;  %v11256_v26 = vpop.f32.mrf.mxu0  ;;  %11549 = vmatprep.subr.bf16.mxu0 %v15879_v2  ;;  %v15931_v17 = vld [vmem:[%s21720_s1 + $0x2488] ss:$16 sps:$4 sm:$0xff]   ;;  %v15945_v15 = vld [vmem:[%s21720_s1 + $0x244c] ss:$16 sps:$4 sm:$0xff]  }
 0x529   :  { %11524 = vmatprep.subr.bf16.mxu1 %v15876_v32  ;;  %v15934_v32 = vld [vmem:[%s21720_s1 + $0x2368] ss:$16 sps:$4 sm:$0xff]   ;;  %v15948_v26 = vld [vmem:[%s21720_s1 + $0x232c] ss:$16 sps:$4 sm:$0xff]  }
 0x52a   :  { %v15937_v2 = vld [vmem:[%s21720_s1 + $0x2468] ss:$16 sps:$4 sm:$0xff]  }
 0x52b   :  { %11550 = vmatpush1.bf16.msra.mxu0 %v15877_v44  ;;  %v15943_v44 = vld [vmem:[%s21720_s1 + $0x2448] ss:$16 sps:$4 sm:$0xff]  }
 0x52c   :  { %11525 = vmatpush2.bf16.msra.mxu1 %v15874_v11  ;;  %11551 = vmatprep.subr.bf16.mxu0 %v15885_v52  ;;  %v15940_v11 = vld [vmem:[%s21720_s1 + $0x2348] ss:$16 sps:$4 sm:$0xff]  }
 0x52d   :  { %11526 = vmatprep.subr.bf16.mxu1 %v15882_v10  ;;  %v15951_v10 = vld [vmem:[%s21720_s1 + $0x242c] ss:$16 sps:$4 sm:$0xff]   ;;  %v15946_v52 = vld [vmem:[%s21720_s1 + $0x2328] ss:$16 sps:$4 sm:$0xff]  }
 0x52f   :  { %11552 = vmatpush1.bf16.msra.mxu0 %v15883_v22  ;;  %v15954_v22 = vld [vmem:[%s21720_s1 + $0x230c] ss:$16 sps:$4 sm:$0xff]  }
 0x530   :  { %11527 = vmatpush2.bf16.msra.mxu1 %v15880_v28  ;;  %11553 = vmatprep.subr.bf16.mxu0 %v15891_v0  ;;  %v15949_v28 = vld [vmem:[%s21720_s1 + $0x2428] ss:$16 sps:$4 sm:$0xff]  }
 0x531   :  { %11528 = vmatprep.subr.bf16.mxu1 %v15888_v27  ;;  %v15957_v27 = vld [vmem:[%s21720_s1 + $0x240c] ss:$16 sps:$4 sm:$0xff]   ;;  %v15952_v0 = vld [vmem:[%s21720_s1 + $0x2308] ss:$16 sps:$4 sm:$0xff]  }
 0x533   :  { %11554 = vmatpush1.bf16.msra.mxu0 %v15889_v60  ;;  %v15960_v60 = vld [vmem:[%s21720_s1 + $0x25ec] ss:$16 sps:$4 sm:$0xff]  }
 0x534   :  { %11529 = vmatpush2.bf16.msra.mxu1 %v15886_v50  ;;  %11555 = vmatprep.subr.bf16.mxu0 %v15897_v14  ;;  %v15955_v50 = vld [vmem:[%s21720_s1 + $0x2408] ss:$16 sps:$4 sm:$0xff]  }
 0x535   :  { %11530 = vmatprep.subr.bf16.mxu1 %v15894_v18  ;;  %v15963_v18 = vld [vmem:[%s21720_s1 + $0x26ec] ss:$16 sps:$4 sm:$0xff]   ;;  %v15958_v14 = vld [vmem:[%s21720_s1 + $0x25e8] ss:$16 sps:$4 sm:$0xff]  }
 0x537   :  { %11556 = vmatpush1.bf16.msra.mxu0 %v15895_v39  ;;  %v15966_v39 = vld [vmem:[%s21720_s1 + $0x25cc] ss:$16 sps:$4 sm:$0xff]  }
 0x538   :  { %11531 = vmatpush2.bf16.msra.mxu1 %v15892_v41  ;;  %11557 = vmatprep.subr.bf16.mxu0 %v15903_v58  ;;  %v15961_v41 = vld [vmem:[%s21720_s1 + $0x26e8] ss:$16 sps:$4 sm:$0xff]  }
 0x539   :  { %11532 = vmatprep.subr.bf16.mxu1 %v15900_v38  ;;  %v15969_v38 = vld [vmem:[%s21720_s1 + $0x26cc] ss:$16 sps:$4 sm:$0xff]  }
 0x53b   :  { %11558 = vmatpush1.bf16.msra.mxu0 %v15901_v62  ;;  %v15964_v62 = vld [vmem:[%s21720_s1 + $0x25c8] ss:$16 sps:$4 sm:$0xff]  }
 0x53c   :  { %11533 = vmatpush2.bf16.msra.mxu1 %v15898_v49  ;;  %11559 = vmatprep.subr.bf16.mxu0 %v15909_v54 }
 0x53d   :  { %11534 = vmatprep.subr.bf16.mxu1 %v15906_v23  ;;  %v15967_v23 = vld [vmem:[%s21720_s1 + $0x26c8] ss:$16 sps:$4 sm:$0xff]  }
 0x53f   :  { %11560 = vmatpush1.bf16.msra.mxu0 %v15907_v46 }
 0x540   :  { %11535 = vmatpush2.bf16.msra.mxu1 %v15904_v53  ;;  %11561 = vmatprep.subr.bf16.mxu0 %v15912_v21  ;;  %v15975_v53 = vld [vmem:[%s21720_s1 + $0x26ac] ss:$16 sps:$4 sm:$0xff]  }
 0x541   :  { %11586 = vmatprep.subr.bf16.mxu1 %v15915_v1  ;;  %v15970_v1 = vld [vmem:[%s21720_s1 + $0x25a8] ss:$16 sps:$4 sm:$0xff]  }
 0x543   :  { %v11292_v12 = vpop.f32.mrf.mxu1  ;;  %11537 = vmatmul.mubr.bf16.vlgmr.msra.gmra.mxu1 %v18337_v63  ;;  %11562 = vmatpush2.bf16.msra.mxu0 %v15910_v25  ;;  %v15924_v63 = vld [vmem:[%s21720_s1 + $0x23ac] ss:$16 sps:$4 sm:$0xff]   ;;  %v15973_v25 = vld [vmem:[%s21720_s1 + $0x26a8] ss:$16 sps:$4 sm:$0xff]  }
 0x544   :  { %v20903_v4 = vadd.f32 %v11292_v12, %v20799_v55  ;;  %11587 = vmatpush1.bf16.msra.mxu1 %v15913_v57  ;;  %11563 = vmatprep.subr.bf16.mxu0 %v15918_v34  ;;  %v15928_v55 = vld [vmem:[%s21720_s1 + $0x2388] ss:$16 sps:$4 sm:$0xff]   ;;  %v15978_v34 = vld [vmem:[%s21720_s1 + $0x258c] ss:$16 sps:$4 sm:$0xff]  }
 0x545   :  { %v11294_v24 = vpop.f32.mrf.mxu1  ;;  %11588 = vmatprep.subr.bf16.mxu1 %v15921_v31  ;;  %11618 = vmatprep.mubr.bf16.mxu1 %v18358_v9  ;;  %v15933_v9 = vld [vmem:[%s21720_s1 + $0x248c] ss:$16 sps:$4 sm:$0xff]   ;;  %v15976_v31 = vld [vmem:[%s21720_s1 + $0x2588] ss:$16 sps:$4 sm:$0xff]  }
 0x546   :  { %v20918_v35 = vadd.f32 %v11294_v24, %v20814_v42  ;;  %v15942_v42 = vld [vmem:[%s21720_s1 + $0x234c] ss:$16 sps:$4 sm:$0xff]   ;;  %v15979_v12 = vld [vmem:[%s21720_s1 + $0x2688] ss:$16 sps:$4 sm:$0xff]  }
 0x547   :  { %v11296_v40 = vpop.f32.mrf.mxu1  ;;  %11564 = vmatpush2.bf16.msra.mxu0 %v15916_v45  ;;  %v15987_v45 = vld [vmem:[%s21720_s1 + $0x266c] ss:$16 sps:$4 sm:$0xff]   ;;  %v15985_v24 = vld [vmem:[%s21720_s1 + $0x2668] ss:$16 sps:$4 sm:$0xff]  }
 0x548   :  { %11589 = vmatpush1.bf16.msra.mxu1 %v15919_v59  ;;  %11565 = vmatprep.subr.bf16.mxu0 %v15924_v63  ;;  %v15982_v59 = vld [vmem:[%s21720_s1 + $0x2568] ss:$16 sps:$4 sm:$0xff]   ;;  %v15990_v63 = vld [vmem:[%s21720_s1 + $0x254c] ss:$16 sps:$4 sm:$0xff]  }
 0x549   :  { %v11297_v30 = vpop.f32.mrf.mxu1  ;;  %11590 = vmatprep.subr.bf16.mxu1 %v15927_v47  ;;  %v15993_v47 = vld [vmem:[%s21720_s1 + $0x264c] ss:$16 sps:$4 sm:$0xff]   ;;  %v15991_v40 = vld [vmem:[%s21720_s1 + $0x2648] ss:$16 sps:$4 sm:$0xff]  }
 0x54a   :  { %v15994_v30 = vld [vmem:[%s21720_s1 + $0x2528] ss:$16 sps:$4 sm:$0xff]  }
 0x54b   :  { %11566 = vmatpush2.bf16.msra.mxu0 %v15922_v8  ;;  %v15996_v8 = vld [vmem:[%s21720_s1 + $0x252c] ss:$16 sps:$4 sm:$0xff]  }
 0x54c   :  { %11591 = vmatpush1.bf16.msra.mxu1 %v15925_v48  ;;  %11567 = vmatprep.subr.bf16.mxu0 %v15930_v33  ;;  %v15999_v48 = vld [vmem:[%s21720_s1 + $0x262c] ss:$16 sps:$4 sm:$0xff]   ;;  %v15997_v33 = vld [vmem:[%s21720_s1 + $0x2628] ss:$16 sps:$4 sm:$0xff]  }
 0x54d   :  { %11592 = vmatprep.subr.bf16.mxu1 %v15933_v9  ;;  %v16002_v9 = vld [vmem:[%s21720_s1 + $0x250c] ss:$16 sps:$4 sm:$0xff]  }
 0x54f   :  { %11568 = vmatpush2.bf16.msra.mxu0 %v15928_v55  ;;  %v16005_v55 = vld [vmem:[%s21720_s1 + $0x260c] ss:$16 sps:$4 sm:$0xff]  }
 0x550   :  { %11593 = vmatpush1.bf16.msra.mxu1 %v15931_v17  ;;  %11569 = vmatprep.subr.bf16.mxu0 %v15936_v43  ;;  %v16000_v17 = vld [vmem:[%s21720_s1 + $0x2508] ss:$16 sps:$4 sm:$0xff]  }
 0x551   :  { %11594 = vmatprep.subr.bf16.mxu1 %v15939_v16  ;;  %v16003_v43 = vld [vmem:[%s21720_s1 + $0x2608] ss:$16 sps:$4 sm:$0xff]   ;;  %v16008_v16 = vld [vmem:[%s21720_s1 + $0x27ec] ss:$16 sps:$4 sm:$0xff]  }
 0x553   :  { %11570 = vmatpush2.bf16.msra.mxu0 %v15934_v32  ;;  %v16011_v32 = vld [vmem:[%s21720_s1 + $0x28ec] ss:$16 sps:$4 sm:$0xff]  }
 0x554   :  { %11595 = vmatpush1.bf16.msra.mxu1 %v15937_v2  ;;  %11571 = vmatprep.subr.bf16.mxu0 %v15942_v42  ;;  %v16006_v2 = vld [vmem:[%s21720_s1 + $0x27e8] ss:$16 sps:$4 sm:$0xff]  }
 0x555   :  { %11596 = vmatprep.subr.bf16.mxu1 %v15945_v15  ;;  %v16009_v42 = vld [vmem:[%s21720_s1 + $0x28e8] ss:$16 sps:$4 sm:$0xff]   ;;  %v16014_v15 = vld [vmem:[%s21720_s1 + $0x27cc] ss:$16 sps:$4 sm:$0xff]  }
 0x557   :  { %11572 = vmatpush2.bf16.msra.mxu0 %v15940_v11  ;;  %v16017_v11 = vld [vmem:[%s21720_s1 + $0x28cc] ss:$16 sps:$4 sm:$0xff]  }
 0x558   :  { %11597 = vmatpush1.bf16.msra.mxu1 %v15943_v44  ;;  %11573 = vmatprep.subr.bf16.mxu0 %v15948_v26 }
 0x559   :  { %11598 = vmatprep.subr.bf16.mxu1 %v15951_v10  ;;  %v16012_v10 = vld [vmem:[%s21720_s1 + $0x27c8] ss:$16 sps:$4 sm:$0xff]  }
 0x55b   :  { %11574 = vmatpush2.bf16.msra.mxu0 %v15946_v52  ;;  %v16015_v52 = vld [vmem:[%s21720_s1 + $0x28c8] ss:$16 sps:$4 sm:$0xff]  }
 0x55c   :  { %11599 = vmatpush1.bf16.msra.mxu1 %v15949_v28  ;;  %11575 = vmatprep.subr.bf16.mxu0 %v15954_v22  ;;  %v16023_v22 = vld [vmem:[%s21720_s1 + $0x28ac] ss:$16 sps:$4 sm:$0xff]  }
 0x55d   :  { %11600 = vmatprep.subr.bf16.mxu1 %v15957_v27 }
 0x55f   :  { %11576 = vmatpush2.bf16.msra.mxu0 %v15952_v0 }
 0x560   :  { %11601 = vmatpush1.bf16.msra.mxu1 %v15955_v50  ;;  %11627 = vmatprep.subr.bf16.mxu0 %v15963_v18  ;;  %v16018_v50 = vld [vmem:[%s21720_s1 + $0x27a8] ss:$16 sps:$4 sm:$0xff]  }
 0x561   :  { %11602 = vmatprep.subr.bf16.mxu1 %v15960_v60  ;;  %v16021_v60 = vld [vmem:[%s21720_s1 + $0x28a8] ss:$16 sps:$4 sm:$0xff]  }
 0x562   :  { %v11333_v58 = vpop.f32.mrf.mxu0  ;;  %11578 = vmatmul.mubr.bf16.vlgmr.msra.gmra.mxu0 %v18362_v56  ;;  %v15972_v56 = vld [vmem:[%s21720_s1 + $0x25ac] ss:$16 sps:$4 sm:$0xff]  }
 0x563   :  { %v21007_v49 = vadd.f32 %v11333_v58, %v20903_v4  ;;  %11628 = vmatpush1.bf16.msra.mxu0 %v15961_v41  ;;  %11659 = vmatprep.mubr.bf16.mxu0 %v18378_v7  ;;  %v15981_v7 = vld [vmem:[%s21720_s1 + $0x268c] ss:$16 sps:$4 sm:$0xff]   ;;  %v16024_v41 = vld [vmem:[%s21720_s1 + $0x2788] ss:$16 sps:$4 sm:$0xff]  }
 0x564   :  { %11603 = vmatpush2.bf16.msra.mxu1 %v15958_v14  ;;  %v11335_v54 = vpop.f32.mrf.mxu0  ;;  %11629 = vmatprep.subr.bf16.mxu0 %v15969_v38  ;;  %v15984_v4 = vld [vmem:[%s21720_s1 + $0x256c] ss:$16 sps:$4 sm:$0xff]  }
 0x565   :  { %11604 = vmatprep.subr.bf16.mxu1 %v15966_v39  ;;  %v21022_v46 = vadd.f32 %v11335_v54, %v20918_v35  ;;  %v15988_v35 = vld [vmem:[%s21720_s1 + $0x2548] ss:$16 sps:$4 sm:$0xff]   ;;  %v16026_v14 = vld [vmem:[%s21720_s1 + $0x278c] ss:$16 sps:$4 sm:$0xff]  }
 0x566   :  { %v11337_v21 = vpop.f32.mrf.mxu0  ;;  %v16027_v39 = vld [vmem:[%s21720_s1 + $0x2888] ss:$16 sps:$4 sm:$0xff]   ;;  %v16032_v38 = vld [vmem:[%s21720_s1 + $0x276c] ss:$16 sps:$4 sm:$0xff]  }
 0x567   :  { %11630 = vmatpush1.bf16.msra.mxu0 %v15967_v23  ;;  %v16035_v58 = vld [vmem:[%s21720_s1 + $0x286c] ss:$16 sps:$4 sm:$0xff]  }
 0x568   :  { %11605 = vmatpush2.bf16.msra.mxu1 %v15964_v62  ;;  %v11338_v57 = vpop.f32.mrf.mxu0  ;;  %11631 = vmatprep.subr.bf16.mxu0 %v15975_v53  ;;  %v16033_v62 = vld [vmem:[%s21720_s1 + $0x2868] ss:$16 sps:$4 sm:$0xff]   ;;  %v16038_v23 = vld [vmem:[%s21720_s1 + $0x274c] ss:$16 sps:$4 sm:$0xff]  }
 0x569   :  { %11606 = vmatprep.subr.bf16.mxu1 %v15972_v56  ;;  %v16041_v54 = vld [vmem:[%s21720_s1 + $0x284c] ss:$16 sps:$4 sm:$0xff]   ;;  %v16036_v56 = vld [vmem:[%s21720_s1 + $0x2748] ss:$16 sps:$4 sm:$0xff]  }
 0x56a   :  { %v16039_v53 = vld [vmem:[%s21720_s1 + $0x2848] ss:$16 sps:$4 sm:$0xff]   ;;  %v16047_v21 = vld [vmem:[%s21720_s1 + $0x282c] ss:$16 sps:$4 sm:$0xff]  }
 0x56b   :  { %11632 = vmatpush1.bf16.msra.mxu0 %v15973_v25  ;;  %v16045_v25 = vld [vmem:[%s21720_s1 + $0x2828] ss:$16 sps:$4 sm:$0xff]   ;;  %v16050_v57 = vld [vmem:[%s21720_s1 + $0x270c] ss:$16 sps:$4 sm:$0xff]  }
 0x56c   :  { %11607 = vmatpush2.bf16.msra.mxu1 %v15970_v1  ;;  %11633 = vmatprep.subr.bf16.mxu0 %v15981_v7  ;;  %v16042_v1 = vld [vmem:[%s21720_s1 + $0x2728] ss:$16 sps:$4 sm:$0xff]  }
 0x56d   :  { %11608 = vmatprep.subr.bf16.mxu1 %v15978_v34  ;;  %v16053_v34 = vld [vmem:[%s21720_s1 + $0x280c] ss:$16 sps:$4 sm:$0xff]   ;;  %v16048_v7 = vld [vmem:[%s21720_s1 + $0x2708] ss:$16 sps:$4 sm:$0xff]  }
 0x56f   :  { %11634 = vmatpush1.bf16.msra.mxu0 %v15979_v12  ;;  %v16056_v12 = vld [vmem:[%s21720_s1 + $0x29ec] ss:$16 sps:$4 sm:$0xff]  }
 0x570   :  { %11609 = vmatpush2.bf16.msra.mxu1 %v15976_v31  ;;  %11635 = vmatprep.subr.bf16.mxu0 %v15987_v45  ;;  %v16051_v31 = vld [vmem:[%s21720_s1 + $0x2808] ss:$16 sps:$4 sm:$0xff]  }
 0x571   :  { %11610 = vmatprep.subr.bf16.mxu1 %v15984_v4  ;;  %v16059_v4 = vld [vmem:[%s21720_s1 + $0x2aec] ss:$16 sps:$4 sm:$0xff]   ;;  %v16054_v45 = vld [vmem:[%s21720_s1 + $0x29e8] ss:$16 sps:$4 sm:$0xff]  }
 0x573   :  { %11636 = vmatpush1.bf16.msra.mxu0 %v15985_v24  ;;  %v16062_v24 = vld [vmem:[%s21720_s1 + $0x29cc] ss:$16 sps:$4 sm:$0xff]  }
 0x574   :  { %11611 = vmatpush2.bf16.msra.mxu1 %v15982_v59  ;;  %11637 = vmatprep.subr.bf16.mxu0 %v15993_v47  ;;  %v16057_v59 = vld [vmem:[%s21720_s1 + $0x2ae8] ss:$16 sps:$4 sm:$0xff]  }
 0x575   :  { %11612 = vmatprep.subr.bf16.mxu1 %v15990_v63  ;;  %v16065_v63 = vld [vmem:[%s21720_s1 + $0x2acc] ss:$16 sps:$4 sm:$0xff]  }
 0x577   :  { %11638 = vmatpush1.bf16.msra.mxu0 %v15991_v40  ;;  %v16060_v40 = vld [vmem:[%s21720_s1 + $0x29c8] ss:$16 sps:$4 sm:$0xff]  }
 0x578   :  { %11613 = vmatpush2.bf16.msra.mxu1 %v15988_v35  ;;  %11639 = vmatprep.subr.bf16.mxu0 %v15999_v48 }
 0x579   :  { %11614 = vmatprep.subr.bf16.mxu1 %v15996_v8  ;;  %v16063_v8 = vld [vmem:[%s21720_s1 + $0x2ac8] ss:$16 sps:$4 sm:$0xff]  }
 0x57b   :  { %11640 = vmatpush1.bf16.msra.mxu0 %v15997_v33 }
 0x57c   :  { %11615 = vmatpush2.bf16.msra.mxu1 %v15994_v30  ;;  %11641 = vmatprep.subr.bf16.mxu0 %v16005_v55  ;;  %v16071_v30 = vld [vmem:[%s21720_s1 + $0x2aac] ss:$16 sps:$4 sm:$0xff]  }
 0x57d   :  { %11616 = vmatprep.subr.bf16.mxu1 %v16002_v9  ;;  %v21731_v9 = vld [vmem:[#allocation5_spill] sm:$0xff] }
 0x57f   :  { %11642 = vmatpush1.bf16.msra.mxu0 %v16003_v43  ;;  %v16069_v43 = vld [vmem:[%s21720_s1 + $0x2aa8] ss:$16 sps:$4 sm:$0xff]  }
 0x580   :  { %11617 = vmatpush2.bf16.msra.mxu1 %v16000_v17  ;;  %11643 = vmatprep.subr.bf16.mxu0 %v16008_v16  ;;  %v16066_v17 = vld [vmem:[%s21720_s1 + $0x29a8] ss:$16 sps:$4 sm:$0xff]  }
 0x581   :  { %11668 = vmatprep.subr.bf16.mxu1 %v16011_v32  ;;  %v16074_v32 = vld [vmem:[%s21720_s1 + $0x298c] ss:$16 sps:$4 sm:$0xff]  }
 0x583   :  { %v11374_v44 = vpop.f32.mrf.mxu1  ;;  %11619 = vmatmul.mubr.bf16.vlgmr.msra.gmra.mxu1 %v18565_v19  ;;  %11644 = vmatpush2.bf16.msra.mxu0 %v16006_v2  ;;  %v16020_v19 = vld [vmem:[%s21720_s1 + $0x27ac] ss:$16 sps:$4 sm:$0xff]  }
 0x584   :  { %v21111_v26 = vadd.f32 %v11374_v44, %v21007_v49  ;;  %11669 = vmatpush1.bf16.msra.mxu1 %v16009_v42  ;;  %11645 = vmatprep.subr.bf16.mxu0 %v16014_v15  ;;  %v16030_v49 = vld [vmem:[%s21720_s1 + $0x2768] ss:$16 sps:$4 sm:$0xff]   ;;  %v16077_v2 = vld [vmem:[%s21720_s1 + $0x2a8c] ss:$16 sps:$4 sm:$0xff]  }
 0x585   :  { %v11376_v28 = vpop.f32.mrf.mxu1  ;;  %11670 = vmatprep.subr.bf16.mxu1 %v16017_v11  ;;  %11700 = vmatprep.mubr.bf16.mxu1 %v18586_v36  ;;  %v16029_v36 = vld [vmem:[%s21720_s1 + $0x288c] ss:$16 sps:$4 sm:$0xff]   ;;  %v16072_v42 = vld [vmem:[%s21720_s1 + $0x2988] ss:$16 sps:$4 sm:$0xff]  }
 0x586   :  { %v21126_v27 = vadd.f32 %v11376_v28, %v21022_v46  ;;  %v16044_v46 = vld [vmem:[%s21720_s1 + $0x272c] ss:$16 sps:$4 sm:$0xff]   ;;  %v16075_v15 = vld [vmem:[%s21720_s1 + $0x2a88] ss:$16 sps:$4 sm:$0xff]  }
 0x587   :  { %v11378_v0 = vpop.f32.mrf.mxu1  ;;  %11646 = vmatpush2.bf16.msra.mxu0 %v16012_v10  ;;  %v16080_v11 = vld [vmem:[%s21720_s1 + $0x296c] ss:$16 sps:$4 sm:$0xff]   ;;  %v16081_v10 = vld [vmem:[%s21720_s1 + $0x2a68] ss:$16 sps:$4 sm:$0xff]  }
 0x588   :  { %11671 = vmatpush1.bf16.msra.mxu1 %v16015_v52  ;;  %11647 = vmatprep.subr.bf16.mxu0 %v16020_v19  ;;  %v16083_v44 = vld [vmem:[%s21720_s1 + $0x2a6c] ss:$16 sps:$4 sm:$0xff]   ;;  %v16084_v19 = vld [vmem:[%s21720_s1 + $0x2948] ss:$16 sps:$4 sm:$0xff]  }
 0x589   :  { %v11379_v18 = vpop.f32.mrf.mxu1  ;;  %11672 = vmatprep.subr.bf16.mxu1 %v16023_v22  ;;  %v16086_v52 = vld [vmem:[%s21720_s1 + $0x294c] ss:$16 sps:$4 sm:$0xff]   ;;  %v16087_v22 = vld [vmem:[%s21720_s1 + $0x2a48] ss:$16 sps:$4 sm:$0xff]  }
 0x58a   :  { %v16089_v28 = vld [vmem:[%s21720_s1 + $0x2a4c] ss:$16 sps:$4 sm:$0xff]  }
 0x58b   :  { %11648 = vmatpush2.bf16.msra.mxu0 %v16018_v50  ;;  %v16095_v0 = vld [vmem:[%s21720_s1 + $0x2a2c] ss:$16 sps:$4 sm:$0xff]   ;;  %v16090_v50 = vld [vmem:[%s21720_s1 + $0x2928] ss:$16 sps:$4 sm:$0xff]  }
 0x58c   :  { %11673 = vmatpush1.bf16.msra.mxu1 %v16021_v60  ;;  %11649 = vmatprep.subr.bf16.mxu0 %v16026_v14  ;;  %v16093_v60 = vld [vmem:[%s21720_s1 + $0x2a28] ss:$16 sps:$4 sm:$0xff]   ;;  %v16098_v18 = vld [vmem:[%s21720_s1 + $0x290c] ss:$16 sps:$4 sm:$0xff]  }
 0x58d   :  { %11674 = vmatprep.subr.bf16.mxu1 %v16029_v36  ;;  %v16101_v14 = vld [vmem:[%s21720_s1 + $0x2a0c] ss:$16 sps:$4 sm:$0xff]   ;;  %v16096_v36 = vld [vmem:[%s21720_s1 + $0x2908] ss:$16 sps:$4 sm:$0xff]  }
 0x58f   :  { %11650 = vmatpush2.bf16.msra.mxu0 %v16024_v41  ;;  %v16099_v41 = vld [vmem:[%s21720_s1 + $0x2a08] ss:$16 sps:$4 sm:$0xff]  }
 0x590   :  { %11675 = vmatpush1.bf16.msra.mxu1 %v16027_v39  ;;  %11651 = vmatprep.subr.bf16.mxu0 %v16032_v38  ;;  %v16104_v39 = vld [vmem:[%s21720_s1 + $0x2bec] ss:$16 sps:$4 sm:$0xff]  }
 0x591   :  { %11676 = vmatprep.subr.bf16.mxu1 %v16035_v58  ;;  %v16107_v38 = vld [vmem:[%s21720_s1 + $0x2cec] ss:$16 sps:$4 sm:$0xff]   ;;  %v16102_v58 = vld [vmem:[%s21720_s1 + $0x2be8] ss:$16 sps:$4 sm:$0xff]  }
 0x593   :  { %11652 = vmatpush2.bf16.msra.mxu0 %v16030_v49  ;;  %v16105_v49 = vld [vmem:[%s21720_s1 + $0x2ce8] ss:$16 sps:$4 sm:$0xff]  }
 0x594   :  { %11677 = vmatpush1.bf16.msra.mxu1 %v16033_v62  ;;  %11653 = vmatprep.subr.bf16.mxu0 %v16038_v23  ;;  %v16110_v62 = vld [vmem:[%s21720_s1 + $0x2bcc] ss:$16 sps:$4 sm:$0xff]  }
 0x595   :  { %11678 = vmatprep.subr.bf16.mxu1 %v16041_v54  ;;  %v16113_v23 = vld [vmem:[%s21720_s1 + $0x2ccc] ss:$16 sps:$4 sm:$0xff]  }
 0x597   :  { %11654 = vmatpush2.bf16.msra.mxu0 %v16036_v56 }
 0x598   :  { %11679 = vmatpush1.bf16.msra.mxu1 %v16039_v53  ;;  %11655 = vmatprep.subr.bf16.mxu0 %v16044_v46  ;;  %v16108_v53 = vld [vmem:[%s21720_s1 + $0x2bc8] ss:$16 sps:$4 sm:$0xff]  }
 0x599   :  { %11680 = vmatprep.subr.bf16.mxu1 %v16047_v21  ;;  %v16111_v46 = vld [vmem:[%s21720_s1 + $0x2cc8] ss:$16 sps:$4 sm:$0xff]  }
 0x59b   :  { %11656 = vmatpush2.bf16.msra.mxu0 %v16042_v1  ;;  %v16119_v1 = vld [vmem:[%s21720_s1 + $0x2cac] ss:$16 sps:$4 sm:$0xff]  }
 0x59c   :  { %11681 = vmatpush1.bf16.msra.mxu1 %v16045_v25  ;;  %11657 = vmatprep.subr.bf16.mxu0 %v16050_v57 }
 0x59d   :  { %11682 = vmatprep.subr.bf16.mxu1 %v16053_v34  ;;  %v16114_v34 = vld [vmem:[%s21720_s1 + $0x2ba8] ss:$16 sps:$4 sm:$0xff]  }
 0x59f   :  { %11658 = vmatpush2.bf16.msra.mxu0 %v16048_v7  ;;  %v16117_v7 = vld [vmem:[%s21720_s1 + $0x2ca8] ss:$16 sps:$4 sm:$0xff]  }
 0x5a0   :  { %11683 = vmatpush1.bf16.msra.mxu1 %v16051_v31  ;;  %11709 = vmatprep.subr.bf16.mxu0 %v16059_v4  ;;  %v16120_v4 = vld [vmem:[%s21720_s1 + $0x2b88] ss:$16 sps:$4 sm:$0xff]  }
 0x5a1   :  { %11684 = vmatprep.subr.bf16.mxu1 %v16056_v12  ;;  %v16122_v12 = vld [vmem:[%s21720_s1 + $0x2b8c] ss:$16 sps:$4 sm:$0xff]  }
 0x5a2   :  { %v11415_v47 = vpop.f32.mrf.mxu0  ;;  %11660 = vmatmul.mubr.bf16.vlgmr.msra.gmra.mxu0 %v18590_v37  ;;  %v16068_v37 = vld [vmem:[%s21720_s1 + $0x29ac] ss:$16 sps:$4 sm:$0xff]  }
 0x5a3   :  { %v21215_v35 = vadd.f32 %v11415_v47, %v21111_v26  ;;  %11710 = vmatpush1.bf16.msra.mxu0 %v16057_v59  ;;  %11741 = vmatprep.mubr.bf16.mxu0 %v21731_v9  ;;  %v16078_v26 = vld [vmem:[%s21720_s1 + $0x2968] ss:$16 sps:$4 sm:$0xff]   ;;  %v16128_v59 = vld [vmem:[%s21720_s1 + $0x2b6c] ss:$16 sps:$4 sm:$0xff]  }
 0x5a4   :  { %11685 = vmatpush2.bf16.msra.mxu1 %v16054_v45  ;;  %v11417_v48 = vpop.f32.mrf.mxu0  ;;  %11711 = vmatprep.subr.bf16.mxu0 %v16065_v63  ;;  %v16123_v45 = vld [vmem:[%s21720_s1 + $0x2c88] ss:$16 sps:$4 sm:$0xff]  }
 0x5a5   :  { %11686 = vmatprep.subr.bf16.mxu1 %v16062_v24  ;;  %v21230_v33 = vadd.f32 %v11417_v48, %v21126_v27  ;;  %v16092_v27 = vld [vmem:[%s21720_s1 + $0x292c] ss:$16 sps:$4 sm:$0xff]   ;;  %v16126_v63 = vld [vmem:[%s21720_s1 + $0x2b68] ss:$16 sps:$4 sm:$0xff]  }
 0x5a6   :  { %v11419_v55 = vpop.f32.mrf.mxu0  ;;  %v16131_v24 = vld [vmem:[%s21720_s1 + $0x2c6c] ss:$16 sps:$4 sm:$0xff]   ;;  %v16129_v47 = vld [vmem:[%s21720_s1 + $0x2c68] ss:$16 sps:$4 sm:$0xff]  }
 0x5a7   :  { %11712 = vmatpush1.bf16.msra.mxu0 %v16063_v8  ;;  %v16132_v8 = vld [vmem:[%s21720_s1 + $0x2b48] ss:$16 sps:$4 sm:$0xff]   ;;  %v16146_v55 = vld [vmem:[%s21720_s1 + $0x2b0c] ss:$16 sps:$4 sm:$0xff]  }
 0x5a8   :  { %11687 = vmatpush2.bf16.msra.mxu1 %v16060_v40  ;;  %v11420_v16 = vpop.f32.mrf.mxu0  ;;  %11713 = vmatprep.subr.bf16.mxu0 %v16071_v30  ;;  %v16137_v40 = vld [vmem:[%s21720_s1 + $0x2c4c] ss:$16 sps:$4 sm:$0xff]   ;;  %v16135_v48 = vld [vmem:[%s21720_s1 + $0x2c48] ss:$16 sps:$4 sm:$0xff]  }
 0x5a9   :  { %11688 = vmatprep.subr.bf16.mxu1 %v16068_v37  ;;  %v16140_v37 = vld [vmem:[%s21720_s1 + $0x2b2c] ss:$16 sps:$4 sm:$0xff]   ;;  %v16141_v9 = vld [vmem:[%s21720_s1 + $0x2c28] ss:$16 sps:$4 sm:$0xff]  }
 0x5aa   :  { %v16143_v30 = vld [vmem:[%s21720_s1 + $0x2c2c] ss:$16 sps:$4 sm:$0xff]   ;;  %v16147_v16 = vld [vmem:[%s21720_s1 + $0x2c08] ss:$16 sps:$4 sm:$0xff]  }
 0x5ab   :  { %11714 = vmatpush1.bf16.msra.mxu0 %v16069_v43  ;;  %v16144_v43 = vld [vmem:[%s21720_s1 + $0x2b08] ss:$16 sps:$4 sm:$0xff]  }
 0x5ac   :  { %11689 = vmatpush2.bf16.msra.mxu1 %v16066_v17  ;;  %11715 = vmatprep.subr.bf16.mxu0 %v16077_v2  ;;  %v16149_v17 = vld [vmem:[%s21720_s1 + $0x2c0c] ss:$16 sps:$4 sm:$0xff]  }
 0x5ad   :  { %11690 = vmatprep.subr.bf16.mxu1 %v16074_v32  ;;  %v16152_v32 = vld [vmem:[%s21720_s1 + $0x2dec] ss:$16 sps:$4 sm:$0xff]  }
 0x5ae   :  { %v16155_v2 = vld [vmem:[%s21720_s1 + $0x2eec] ss:$16 sps:$4 sm:$0xff]  }
 0x5af   :  { %11716 = vmatpush1.bf16.msra.mxu0 %v16075_v15  ;;  %v16153_v15 = vld [vmem:[%s21720_s1 + $0x2ee8] ss:$16 sps:$4 sm:$0xff]  }
 0x5b0   :  { %11691 = vmatpush2.bf16.msra.mxu1 %v16072_v42  ;;  %11717 = vmatprep.subr.bf16.mxu0 %v16083_v44  ;;  %v16150_v42 = vld [vmem:[%s21720_s1 + $0x2de8] ss:$16 sps:$4 sm:$0xff]   ;;  %v16161_v44 = vld [vmem:[%s21720_s1 + $0x2ecc] ss:$16 sps:$4 sm:$0xff]  }
 0x5b1   :  { %11692 = vmatprep.subr.bf16.mxu1 %v16080_v11  ;;  %v16158_v11 = vld [vmem:[%s21720_s1 + $0x2dcc] ss:$16 sps:$4 sm:$0xff]  }
 0x5b3   :  { %11718 = vmatpush1.bf16.msra.mxu0 %v16081_v10  ;;  %v21732_v10 = vld [vmem:[#allocation6_spill] sm:$0xff] }
 0x5b4   :  { %11693 = vmatpush2.bf16.msra.mxu1 %v16078_v26  ;;  %11719 = vmatprep.subr.bf16.mxu0 %v16089_v28  ;;  %v16156_v28 = vld [vmem:[%s21720_s1 + $0x2dc8] ss:$16 sps:$4 sm:$0xff]  }
 0x5b5   :  { %11694 = vmatprep.subr.bf16.mxu1 %v16086_v52 }
 0x5b7   :  { %11720 = vmatpush1.bf16.msra.mxu0 %v16087_v22 }
 0x5b8   :  { %11695 = vmatpush2.bf16.msra.mxu1 %v16084_v19  ;;  %11721 = vmatprep.subr.bf16.mxu0 %v16095_v0  ;;  %v16159_v19 = vld [vmem:[%s21720_s1 + $0x2ec8] ss:$16 sps:$4 sm:$0xff]   ;;  %v16167_v0 = vld [vmem:[%s21720_s1 + $0x2eac] ss:$16 sps:$4 sm:$0xff]  }
 0x5b9   :  { %11696 = vmatprep.subr.bf16.mxu1 %v16092_v27  ;;  %v16164_v27 = vld [vmem:[%s21720_s1 + $0x2dac] ss:$16 sps:$4 sm:$0xff]  }
 0x5bb   :  { %11722 = vmatpush1.bf16.msra.mxu0 %v16093_v60 }
 0x5bc   :  { %11697 = vmatpush2.bf16.msra.mxu1 %v16090_v50  ;;  %11723 = vmatprep.subr.bf16.mxu0 %v16101_v14  ;;  %v16165_v14 = vld [vmem:[%s21720_s1 + $0x2ea8] ss:$16 sps:$4 sm:$0xff]  }
 0x5bd   :  { %11698 = vmatprep.subr.bf16.mxu1 %v16098_v18  ;;  %v16162_v18 = vld [vmem:[%s21720_s1 + $0x2da8] ss:$16 sps:$4 sm:$0xff]  }
 0x5bf   :  { %11724 = vmatpush1.bf16.msra.mxu0 %v16099_v41  ;;  %v16170_v41 = vld [vmem:[%s21720_s1 + $0x2d8c] ss:$16 sps:$4 sm:$0xff]  }
 0x5c0   :  { %11699 = vmatpush2.bf16.msra.mxu1 %v16096_v36  ;;  %11725 = vmatprep.subr.bf16.mxu0 %v16104_v39  ;;  %v16168_v39 = vld [vmem:[%s21720_s1 + $0x2d88] ss:$16 sps:$4 sm:$0xff]  }
 0x5c1   :  { %11750 = vmatprep.subr.bf16.mxu1 %v16107_v38  ;;  %v16171_v38 = vld [vmem:[%s21720_s1 + $0x2e88] ss:$16 sps:$4 sm:$0xff]  }
 0x5c3   :  { %v11456_v54 = vpop.f32.mrf.mxu1  ;;  %11701 = vmatmul.mubr.bf16.vlgmr.msra.gmra.mxu1 %v18789_v51  ;;  %11726 = vmatpush2.bf16.msra.mxu0 %v16102_v58  ;;  %v16116_v51 = vld [vmem:[%s21720_s1 + $0x2bac] ss:$16 sps:$4 sm:$0xff]  }
 0x5c4   :  { %v21319_v56 = vadd.f32 %v11456_v54, %v21215_v35  ;;  %11751 = vmatpush1.bf16.msra.mxu1 %v16105_v49  ;;  %11727 = vmatprep.subr.bf16.mxu0 %v16110_v62  ;;  %v16134_v35 = vld [vmem:[%s21720_s1 + $0x2b4c] ss:$16 sps:$4 sm:$0xff]   ;;  %v16174_v62 = vld [vmem:[%s21720_s1 + $0x2d68] ss:$16 sps:$4 sm:$0xff]  }
 0x5c5   :  { %v11458_v21 = vpop.f32.mrf.mxu1  ;;  %11752 = vmatprep.subr.bf16.mxu1 %v16113_v23  ;;  %11782 = vmatprep.mubr.bf16.mxu1 %v18810_v5  ;;  %v16125_v5 = vld [vmem:[%s21720_s1 + $0x2c8c] ss:$16 sps:$4 sm:$0xff]   ;;  %v16177_v23 = vld [vmem:[%s21720_s1 + $0x2e68] ss:$16 sps:$4 sm:$0xff]  }
 0x5c6   :  { %v21334_v25 = vadd.f32 %v11458_v21, %v21230_v33  ;;  %v16138_v33 = vld [vmem:[%s21720_s1 + $0x2b28] ss:$16 sps:$4 sm:$0xff]   ;;  %v16176_v58 = vld [vmem:[%s21720_s1 + $0x2d6c] ss:$16 sps:$4 sm:$0xff]  }
 0x5c7   :  { %v11460_v57 = vpop.f32.mrf.mxu1  ;;  %11728 = vmatpush2.bf16.msra.mxu0 %v16108_v53  ;;  %v16179_v49 = vld [vmem:[%s21720_s1 + $0x2e6c] ss:$16 sps:$4 sm:$0xff]   ;;  %v16180_v53 = vld [vmem:[%s21720_s1 + $0x2d48] ss:$16 sps:$4 sm:$0xff]  }
 0x5c8   :  { %11753 = vmatpush1.bf16.msra.mxu1 %v16111_v46  ;;  %11729 = vmatprep.subr.bf16.mxu0 %v16116_v51  ;;  %v16182_v54 = vld [vmem:[%s21720_s1 + $0x2d4c] ss:$16 sps:$4 sm:$0xff]   ;;  %v16183_v46 = vld [vmem:[%s21720_s1 + $0x2e48] ss:$16 sps:$4 sm:$0xff]  }
 0x5c9   :  { %v11461_v31 = vpop.f32.mrf.mxu1  ;;  %11754 = vmatprep.subr.bf16.mxu1 %v16119_v1  ;;  %v16188_v21 = vld [vmem:[%s21720_s1 + $0x2d2c] ss:$16 sps:$4 sm:$0xff]   ;;  %v16186_v1 = vld [vmem:[%s21720_s1 + $0x2d28] ss:$16 sps:$4 sm:$0xff]  }
 0x5ca   :  { %v16191_v51 = vld [vmem:[%s21720_s1 + $0x2e2c] ss:$16 sps:$4 sm:$0xff]   ;;  %v16195_v31 = vld [vmem:[%s21720_s1 + $0x2e08] ss:$16 sps:$4 sm:$0xff]  }
 0x5cb   :  { %11730 = vmatpush2.bf16.msra.mxu0 %v16114_v34  ;;  %v16194_v57 = vld [vmem:[%s21720_s1 + $0x2d0c] ss:$16 sps:$4 sm:$0xff]  }
 0x5cc   :  { %11755 = vmatpush1.bf16.msra.mxu1 %v16117_v7  ;;  %11731 = vmatprep.subr.bf16.mxu0 %v16122_v12  ;;  %v16197_v34 = vld [vmem:[%s21720_s1 + $0x2e0c] ss:$16 sps:$4 sm:$0xff]   ;;  %v16192_v7 = vld [vmem:[%s21720_s1 + $0x2d08] ss:$16 sps:$4 sm:$0xff]  }
 0x5cd   :  { %11756 = vmatprep.subr.bf16.mxu1 %v16125_v5  ;;  %v16200_v12 = vld [vmem:[%s21720_s1 + $0x2fec] ss:$16 sps:$4 sm:$0xff]  }
 0x5ce   :  { %v16203_v5 = vld [vmem:[%s21720_s1 + $0x30ec] ss:$16 sps:$4 sm:$0xff]  }
 0x5cf   :  { %11732 = vmatpush2.bf16.msra.mxu0 %v16120_v4  ;;  %v16198_v4 = vld [vmem:[%s21720_s1 + $0x2fe8] ss:$16 sps:$4 sm:$0xff]  }
 0x5d0   :  { %11757 = vmatpush1.bf16.msra.mxu1 %v16123_v45  ;;  %11733 = vmatprep.subr.bf16.mxu0 %v16128_v59  ;;  %v16201_v45 = vld [vmem:[%s21720_s1 + $0x30e8] ss:$16 sps:$4 sm:$0xff]   ;;  %v16206_v59 = vld [vmem:[%s21720_s1 + $0x2fcc] ss:$16 sps:$4 sm:$0xff]  }
 0x5d1   :  { %11758 = vmatprep.subr.bf16.mxu1 %v16131_v24  ;;  %v16209_v24 = vld [vmem:[%s21720_s1 + $0x30cc] ss:$16 sps:$4 sm:$0xff]  }
 0x5d3   :  { %11734 = vmatpush2.bf16.msra.mxu0 %v16126_v63 }
 0x5d4   :  { %11759 = vmatpush1.bf16.msra.mxu1 %v16129_v47  ;;  %11735 = vmatprep.subr.bf16.mxu0 %v16134_v35  ;;  %v16204_v35 = vld [vmem:[%s21720_s1 + $0x2fc8] ss:$16 sps:$4 sm:$0xff]  }
 0x5d5   :  { %11760 = vmatprep.subr.bf16.mxu1 %v16137_v40  ;;  %v16207_v40 = vld [vmem:[%s21720_s1 + $0x30c8] ss:$16 sps:$4 sm:$0xff]  }
 0x5d7   :  { %11736 = vmatpush2.bf16.msra.mxu0 %v16132_v8 }
 0x5d8   :  { %11761 = vmatpush1.bf16.msra.mxu1 %v16135_v48  ;;  %11737 = vmatprep.subr.bf16.mxu0 %v16140_v37  ;;  %v16215_v48 = vld [vmem:[%s21720_s1 + $0x30ac] ss:$16 sps:$4 sm:$0xff]  }
 0x5d9   :  { %11762 = vmatprep.subr.bf16.mxu1 %v16143_v30 }
 0x5db   :  { %11738 = vmatpush2.bf16.msra.mxu0 %v16138_v33  ;;  %v16210_v33 = vld [vmem:[%s21720_s1 + $0x2fa8] ss:$16 sps:$4 sm:$0xff]  }
 0x5dc   :  { %11763 = vmatpush1.bf16.msra.mxu1 %v16141_v9  ;;  %11739 = vmatprep.subr.bf16.mxu0 %v16146_v55  ;;  %v16213_v9 = vld [vmem:[%s21720_s1 + $0x30a8] ss:$16 sps:$4 sm:$0xff]  }
 0x5dd   :  { %11764 = vmatprep.subr.bf16.mxu1 %v16149_v17  ;;  %v16218_v17 = vld [vmem:[%s21720_s1 + $0x2f8c] ss:$16 sps:$4 sm:$0xff]  }
 0x5df   :  { %11740 = vmatpush2.bf16.msra.mxu0 %v16144_v43  ;;  %v16216_v43 = vld [vmem:[%s21720_s1 + $0x2f88] ss:$16 sps:$4 sm:$0xff]  }
 0x5e0   :  { %11765 = vmatpush1.bf16.msra.mxu1 %v16147_v16  ;;  %11791 = vmatprep.subr.bf16.mxu0 %v16155_v2  ;;  %v16219_v16 = vld [vmem:[%s21720_s1 + $0x3088] ss:$16 sps:$4 sm:$0xff]   ;;  %v16227_v2 = vld [vmem:[%s21720_s1 + $0x306c] ss:$16 sps:$4 sm:$0xff]  }
 0x5e1   :  { %11766 = vmatprep.subr.bf16.mxu1 %v16152_v32  ;;  %v16224_v32 = vld [vmem:[%s21720_s1 + $0x2f6c] ss:$16 sps:$4 sm:$0xff]  }
 0x5e2   :  { %v11497_v26 = vpop.f32.mrf.mxu0  ;;  %11742 = vmatmul.mubr.bf16.vlgmr.msra.gmra.mxu0 %v21732_v10  ;;  %v16231_v10 = vld [vmem:[%s21720_s1 + $0x3048] ss:$16 sps:$4 sm:$0xff]  }
 0x5e3   :  { %v21423_v52 = vadd.f32 %v11497_v26, %v21319_v56  ;;  %11792 = vmatpush1.bf16.msra.mxu0 %v16153_v15  ;;  %11823 = vmatprep.mubr.bf16.mxu0 %v18830_v61  ;;  %v16173_v61 = vld [vmem:[%s21720_s1 + $0x2e8c] ss:$16 sps:$4 sm:$0xff]   ;;  %v16225_v15 = vld [vmem:[%s21720_s1 + $0x3068] ss:$16 sps:$4 sm:$0xff]  }
 0x5e4   :  { %11767 = vmatpush2.bf16.msra.mxu1 %v16150_v42  ;;  %v11499_v22 = vpop.f32.mrf.mxu0  ;;  %11793 = vmatprep.subr.bf16.mxu0 %v16161_v44  ;;  %v16185_v56 = vld [vmem:[%s21720_s1 + $0x2e4c] ss:$16 sps:$4 sm:$0xff]   ;;  %v16222_v42 = vld [vmem:[%s21720_s1 + $0x2f68] ss:$16 sps:$4 sm:$0xff]  }
 0x5e5   :  { %11768 = vmatprep.subr.bf16.mxu1 %v16158_v11  ;;  %v21438_v50 = vadd.f32 %v11499_v22, %v21334_v25  ;;  %v16189_v25 = vld [vmem:[%s21720_s1 + $0x2e28] ss:$16 sps:$4 sm:$0xff]   ;;  %v16230_v11 = vld [vmem:[%s21720_s1 + $0x2f4c] ss:$16 sps:$4 sm:$0xff]  }
 0x5e6   :  { %v11501_v60 = vpop.f32.mrf.mxu0  ;;  %v16233_v44 = vld [vmem:[%s21720_s1 + $0x304c] ss:$16 sps:$4 sm:$0xff]   ;;  %v16228_v26 = vld [vmem:[%s21720_s1 + $0x2f48] ss:$16 sps:$4 sm:$0xff]  }
 0x5e7   :  { %11794 = vmatpush1.bf16.msra.mxu0 %v16159_v19  ;;  %v16234_v19 = vld [vmem:[%s21720_s1 + $0x2f28] ss:$16 sps:$4 sm:$0xff]  }
 0x5e8   :  { %11769 = vmatpush2.bf16.msra.mxu1 %v16156_v28  ;;  %v11502_v36 = vpop.f32.mrf.mxu0  ;;  %11795 = vmatprep.subr.bf16.mxu0 %v16167_v0  ;;  %v16239_v28 = vld [vmem:[%s21720_s1 + $0x302c] ss:$16 sps:$4 sm:$0xff]   ;;  %v16237_v22 = vld [vmem:[%s21720_s1 + $0x3028] ss:$16 sps:$4 sm:$0xff]  }
 0x5e9   :  { %11770 = vmatprep.subr.bf16.mxu1 %v16164_v27  ;;  %v16242_v27 = vld [vmem:[%s21720_s1 + $0x2f0c] ss:$16 sps:$4 sm:$0xff]   ;;  %v16243_v60 = vld [vmem:[%s21720_s1 + $0x3008] ss:$16 sps:$4 sm:$0xff]  }
 0x5ea   :  { %v16245_v0 = vld [vmem:[%s21720_s1 + $0x300c] ss:$16 sps:$4 sm:$0xff]  }
 0x5eb   :  { %11796 = vmatpush1.bf16.msra.mxu0 %v16165_v14  ;;  %v11874_v14 = vmax.f32 %v19771_v6, 0.0  ;;  %v16247_v36 = vld [vmem:[%s21722_s3 + $0x38] sm:$0xff]   ;;  %v16249_v6 = vld [vmem:[%s21722_s3 + $0x30] sm:$0xff]  }
 0x5ec   :  { %11771 = vmatpush2.bf16.msra.mxu1 %v16162_v18  ;;  %11797 = vmatprep.subr.bf16.mxu0 %v16173_v61  ;;  %v16246_v18 = vld [vmem:[%s21722_s3 + $0x78] sm:$0xff]  }
 0x5ed   :  { %11772 = vmatprep.subr.bf16.mxu1 %v16170_v41  ;;  %v16248_v41 = vld [vmem:[%s21722_s3 + $0x70] sm:$0xff]   ;;  %v11878_v61 = vpack.c.bf16 %v11874_v14, %v11874_v14 }
 0x5ef   :  { %11798 = vmatpush1.bf16.msra.mxu0 %v16171_v38  ;;  %v21733_v38 = vld [vmem:[#allocation7_spill] sm:$0xff] }
 0x5f0   :  { %11773 = vmatpush2.bf16.msra.mxu1 %v16168_v39  ;;  %11799 = vmatprep.subr.bf16.mxu0 %v16179_v49 }
 0x5f1   :  { %11774 = vmatprep.subr.bf16.mxu1 %v16176_v58 }
 0x5f3   :  { %11800 = vmatpush1.bf16.msra.mxu0 %v16177_v23 }
 0x5f4   :  { %11775 = vmatpush2.bf16.msra.mxu1 %v16174_v62  ;;  %11801 = vmatprep.subr.bf16.mxu0 %v16185_v56  ;;  %v16250_v62 = vld [vmem:[%s21722_s3 + $0x68] sm:$0xff]  }
 0x5f5   :  { %11776 = vmatprep.subr.bf16.mxu1 %v16182_v54 }
 0x5f7   :  { %11802 = vmatpush1.bf16.msra.mxu0 %v16183_v46  ;;  %v16253_v46 = vld [vmem:[%s21722_s3 + $0x20] sm:$0xff]  }
 0x5f8   :  { %11777 = vmatpush2.bf16.msra.mxu1 %v16180_v53  ;;  %11803 = vmatprep.subr.bf16.mxu0 %v16191_v51  ;;  %v16252_v53 = vld [vmem:[%s21722_s3 + $0x60] sm:$0xff]   ;;  %v16255_v51 = vld [vmem:[%s21722_s3 + $0x18] sm:$0xff]  }
 0x5f9   :  { %11778 = vmatprep.subr.bf16.mxu1 %v16188_v21  ;;  %v16254_v21 = vld [vmem:[%s21722_s3 + $0x58] sm:$0xff]  }
 0x5fb   :  { %11804 = vmatpush1.bf16.msra.mxu0 %v16189_v25  ;;  %v16257_v25 = vld [vmem:[%s21722_s3 + $0x10] sm:$0xff]  }
 0x5fc   :  { %11779 = vmatpush2.bf16.msra.mxu1 %v16186_v1  ;;  %11805 = vmatprep.subr.bf16.mxu0 %v16197_v34  ;;  %v16256_v1 = vld [vmem:[%s21722_s3 + $0x50] sm:$0xff]   ;;  %v16259_v34 = vld [vmem:[%s21722_s3 + $0x8] sm:$0xff]  }
 0x5fd   :  { %11780 = vmatprep.subr.bf16.mxu1 %v16194_v57  ;;  %v16258_v57 = vld [vmem:[%s21722_s3 + $0x48] sm:$0xff]  }
 0x5ff   :  { %11806 = vmatpush1.bf16.msra.mxu0 %v16195_v31  ;;  %v16261_v31 = vld [vmem:[%s21722_s3] sm:$0xff]  }
 0x600   :  { %11781 = vmatpush2.bf16.msra.mxu1 %v16192_v7  ;;  %11807 = vmatprep.subr.bf16.mxu0 %v16200_v12  ;;  %v16260_v7 = vld [vmem:[%s21722_s3 + $0x40] sm:$0xff]   ;;  %v11873_v12 = vmax.f32 %v19756_v13, 0.0  ;;  %v16264_v13 = vld [vmem:[%s21722_s3 + $0xf0] sm:$0xff]  }
 0x601   :  { %11832 = vmatprep.subr.bf16.mxu1 %v16203_v5 }
 0x602   :  { %v11877_v5 = vpack.c.bf16 %v11873_v12, %v11873_v12 }
 0x603   :  { %v11538_v63 = vpop.f32.mrf.mxu1  ;;  %11783 = vmatmul.mubr.bf16.vlgmr.msra.gmra.mxu1 %v19006_v20  ;;  %11808 = vmatpush2.bf16.msra.mxu0 %v16198_v4  ;;  %v16212_v20 = vld [vmem:[%s21720_s1 + $0x2fac] ss:$16 sps:$4 sm:$0xff]  }
 0x604   :  { %v21527_v47 = vadd.f32 %v11538_v63, %v21423_v52  ;;  %11833 = vmatpush1.bf16.msra.mxu1 %v16201_v45  ;;  %11809 = vmatprep.subr.bf16.mxu0 %v16206_v59  ;;  %v16236_v52 = vld [vmem:[%s21720_s1 + $0x2f2c] ss:$16 sps:$4 sm:$0xff]  }
 0x605   :  { %v11540_v8 = vpop.f32.mrf.mxu1  ;;  %11834 = vmatprep.subr.bf16.mxu1 %v16209_v24  ;;  %11864 = vmatprep.mubr.bf16.mxu1 %v16302_v3  ;;  %v16221_v3 = vld [vmem:[%s21720_s1 + $0x308c] ss:$16 sps:$4 sm:$0xff]  }
 0x606   :  { %v21542_v37 = vadd.f32 %v11540_v8, %v21438_v50  ;;  %v16240_v50 = vld [vmem:[%s21720_s1 + $0x2f08] ss:$16 sps:$4 sm:$0xff]   ;;  %v16265_v8 = vld [vmem:[%s21722_s3 + $0xb0] sm:$0xff]  }
 0x607   :  { %v11542_v30 = vpop.f32.mrf.mxu1  ;;  %11810 = vmatpush2.bf16.msra.mxu0 %v16204_v35  ;;  %v16262_v35 = vld [vmem:[%s21722_s3 + $0xf8] sm:$0xff]  }
 0x608   :  { %11835 = vmatpush1.bf16.msra.mxu1 %v16207_v40  ;;  %11811 = vmatprep.subr.bf16.mxu0 %v16212_v20  ;;  %v16263_v40 = vld [vmem:[%s21722_s3 + $0xb8] sm:$0xff]   ;;  %v16266_v20 = vld [vmem:[%s21722_s3 + $0xe8] sm:$0xff]   ;;  %v16269_v30 = vld [vmem:[%s21722_s3 + $0xa0] sm:$0xff]  }
 0x609   :  { %v11543_v55 = vpop.f32.mrf.mxu1  ;;  %11836 = vmatprep.subr.bf16.mxu1 %v16215_v48  ;;  %v16267_v48 = vld [vmem:[%s21722_s3 + $0xa8] sm:$0xff]  }
 0x60a   :  { %v16272_v55 = vld [vmem:[%s21722_s3 + $0xd0] sm:$0xff]  }
 0x60b   :  { %11812 = vmatpush2.bf16.msra.mxu0 %v16210_v33  ;;  %v16270_v33 = vld [vmem:[%s21722_s3 + $0xd8] sm:$0xff]  }
 0x60c   :  { %11837 = vmatpush1.bf16.msra.mxu1 %v16213_v9  ;;  %11813 = vmatprep.subr.bf16.mxu0 %v16218_v17  ;;  %v16271_v9 = vld [vmem:[%s21722_s3 + $0x98] sm:$0xff]   ;;  %v16273_v17 = vld [vmem:[%s21722_s3 + $0x90] sm:$0xff]  }
 0x60d   :  { %11838 = vmatprep.subr.bf16.mxu1 %v16221_v3 }
 0x60f   :  { %11814 = vmatpush2.bf16.msra.mxu0 %v16216_v43 }
 0x610   :  { %11839 = vmatpush1.bf16.msra.mxu1 %v16219_v16  ;;  %11815 = vmatprep.subr.bf16.mxu0 %v16224_v32  ;;  %v16274_v32 = vld [vmem:[%s21722_s3 + $0xc8] sm:$0xff]  }
 0x611   :  { %11840 = vmatprep.subr.bf16.mxu1 %v16227_v2 }
 0x613   :  { %11816 = vmatpush2.bf16.msra.mxu0 %v16222_v42  ;;  %v16275_v42 = vld [vmem:[%s21722_s3 + $0x88] sm:$0xff]  }
 0x614   :  { %11841 = vmatpush1.bf16.msra.mxu1 %v16225_v15  ;;  %11817 = vmatprep.subr.bf16.mxu0 %v16230_v11 }
 0x615   :  { %11842 = vmatprep.subr.bf16.mxu1 %v16233_v44  ;;  %v16276_v44 = vld [vmem:[%s21722_s3 + $0xc0] sm:$0xff]  }
 0x617   :  { %11818 = vmatpush2.bf16.msra.mxu0 %v16228_v26  ;;  %v16277_v26 = vld [vmem:[%s21722_s3 + $0x80] sm:$0xff]  }
 0x618   :  { %11843 = vmatpush1.bf16.msra.mxu1 %v16231_v10  ;;  %11819 = vmatprep.subr.bf16.mxu0 %v16236_v52 }
 0x619   :  { %11844 = vmatprep.subr.bf16.mxu1 %v16239_v28 }
 0x61b   :  { %11820 = vmatpush2.bf16.msra.mxu0 %v16234_v19 }
 0x61c   :  { %11845 = vmatpush1.bf16.msra.mxu1 %v16237_v22  ;;  %11821 = vmatprep.subr.bf16.mxu0 %v16242_v27 }
 0x61d   :  { %11846 = vmatprep.subr.bf16.mxu1 %v16245_v0 }
 0x61f   :  { %11822 = vmatpush2.bf16.msra.mxu0 %v16240_v50 }
 0x620   :  { %11847 = vmatpush1.bf16.msra.mxu1 %v16243_v60  ;;  %13841 = vmatprep.subr.bf16.mxu0 %v16246_v18 }
 0x621   :  { %13863 = vmatprep.subr.bf16.mxu1 %v16262_v35 }
 0x622   :  { %v11579_v39 = vpop.f32.mrf.mxu0  ;;  %11824 = vmatmul.mubr.bf16.vlgmr.msra.gmra.mxu0 %v21733_v38 }
 0x623   :  { %11865 = vmatmul.mubr.bf16.vlgmr.msra.gmra.mxu1 %v19140_v29  ;;  %v11580_v58 = vadd.f32 %v11579_v39, %v21527_v47  ;;  %13842 = vmatpush3.bf16.msra.mxu0 %v16247_v36  ;;  %v16251_v29 = vld [vmem:[%s21722_s3 + $0x28] sm:$0xff]  }
 0x624   :  { %12176 = vmatprep.mubr.bf16.mxu0 %v11878_v61  ;;  %v11581_v49 = vpop.f32.mrf.mxu0  ;;  %13843 = vmatprep.subr.bf16.mxu0 %v16248_v41 }
 0x625   :  { %v11582_v23 = vadd.f32 %v11581_v49, %v21542_v37  ;;  %13864 = vmatpush3.bf16.msra.mxu1 %v16263_v40  ;;  %v16268_v37 = vld [vmem:[%s21722_s3 + $0xe0] sm:$0xff]  }
 0x626   :  { %v11583_v54 = vpop.f32.mrf.mxu0  ;;  %13865 = vmatprep.subr.bf16.mxu1 %v16264_v13 }
 0x627   :  { %13844 = vmatpush3.bf16.msra.mxu0 %v16249_v6 }
 0x628   :  { %v11584_v56 = vpop.f32.mrf.mxu0  ;;  %13845 = vmatprep.subr.bf16.mxu0 %v16250_v62 }
 0x629   :  { %13866 = vmatpush3.bf16.msra.mxu1 %v16265_v8 }
 0x62a   :  { %13867 = vmatprep.subr.bf16.mxu1 %v16266_v20 }
 0x62b   :  { %13846 = vmatpush3.bf16.msra.mxu0 %v16251_v29 }
 0x62c   :  { %13847 = vmatprep.subr.bf16.mxu0 %v16252_v53 }
 0x62d   :  { %13868 = vmatpush3.bf16.msra.mxu1 %v16267_v48 }
 0x62e   :  { %13869 = vmatprep.subr.bf16.mxu1 %v16268_v37 }
 0x62f   :  { %13848 = vmatpush3.bf16.msra.mxu0 %v16253_v46 }
 0x630   :  { %13849 = vmatprep.subr.bf16.mxu0 %v16254_v21 }
 0x631   :  { %13870 = vmatpush3.bf16.msra.mxu1 %v16269_v30 }
 0x632   :  { %13871 = vmatprep.subr.bf16.mxu1 %v16270_v33 }
 0x633   :  { %13850 = vmatpush3.bf16.msra.mxu0 %v16255_v51 }
 0x634   :  { %13851 = vmatprep.subr.bf16.mxu0 %v16256_v1 }
 0x635   :  { %13872 = vmatpush3.bf16.msra.mxu1 %v16271_v9 }
 0x636   :  { %13873 = vmatprep.subr.bf16.mxu1 %v16272_v55 }
 0x637   :  { %13852 = vmatpush3.bf16.msra.mxu0 %v16257_v25 }
 0x638   :  { %13853 = vmatprep.subr.bf16.mxu0 %v16258_v57 }
 0x639   :  { %13874 = vmatpush3.bf16.msra.mxu1 %v16273_v17 }
 0x63a   :  { %13875 = vmatprep.subr.bf16.mxu1 %v16274_v32 }
 0x63b   :  { %13854 = vmatpush3.bf16.msra.mxu0 %v16259_v34 }
 0x63c   :  { %13855 = vmatprep.subr.bf16.mxu0 %v16260_v7 }
 0x63d   :  { %13876 = vmatpush3.bf16.msra.mxu1 %v16275_v42 }
 0x63e   :  { %13877 = vmatprep.subr.bf16.mxu1 %v16276_v44 }
 0x63f   :  { %13856 = vmatpush3.bf16.msra.mxu0 %v16261_v31 }
 0x641   :  { %13878 = vmatpush3.bf16.msra.mxu1 %v16277_v26 }
 0x642   :  { %12177 = vmatmul.mubr.bf16.vlgmr.msra.gmra.mxu0 %v11877_v5 }
 0x643   :  { %v11620_v4 = vpop.f32.mrf.mxu1 }
 0x644   :  { %v11621_v45 = vadd.f32 %v11620_v4, %v11580_v58 }
 0x645   :  { %v11622_v59 = vpop.f32.mrf.mxu1 }
 0x646   :  { %v11623_v24 = vadd.f32 %v11622_v59, %v11582_v23 }
 0x647   :  { %v11624_v63 = vpop.f32.mrf.mxu1 }
 0x649   :  { %v11625_v47 = vpop.f32.mrf.mxu1 }
 0x662   :  { %v11661_v3 = vpop.f32.mrf.mxu0 }
 0x663   :  { %v11662_v43 = vadd.f32 %v11661_v3, %v11621_v45 }
 0x664   :  { %v11663_v16 = vpop.f32.mrf.mxu0 }
 0x665   :  { %v11664_v2 = vadd.f32 %v11663_v16, %v11623_v24  ;;  %v13808_v24 = vld [vmem:[%s21723_s4] ss:$0 sm:$0xff] }
 0x666   :  { %v11665_v15 = vpop.f32.mrf.mxu0 }
 0x668   :  { %v11666_v11 = vpop.f32.mrf.mxu0 }
 0x683   :  { %v11702_v10 = vpop.f32.mrf.mxu1 }
 0x684   :  { %v11703_v52 = vadd.f32 %v11702_v10, %v11662_v43 }
 0x685   :  { %v11704_v28 = vpop.f32.mrf.mxu1 }
 0x686   :  { %v11705_v19 = vadd.f32 %v11704_v28, %v11664_v2 }
 0x687   :  { %v11706_v22 = vpop.f32.mrf.mxu1 }
 0x689   :  { %v11707_v27 = vpop.f32.mrf.mxu1 }
 0x6a2   :  { %v11743_v0 = vpop.f32.mrf.mxu0 }
 0x6a3   :  { %v11744_v39 = vadd.f32 %v11743_v0, %v11703_v52 }
 0x6a4   :  { %v11745_v50 = vpop.f32.mrf.mxu0 }
 0x6a5   :  { %v11746_v38 = vadd.f32 %v11745_v50, %v11705_v19 }
 0x6a6   :  { %v11747_v60 = vpop.f32.mrf.mxu0 }
 0x6a8   :  { %v11748_v18 = vpop.f32.mrf.mxu0 }
 0x6c3   :  { %v11784_v14 = vpop.f32.mrf.mxu1 }
 0x6c4   :  { %v11785_v58 = vadd.f32 %v11784_v14, %v11744_v39 }
 0x6c5   :  { %v11786_v36 = vpop.f32.mrf.mxu1 }
 0x6c6   :  { %v11787_v62 = vadd.f32 %v11786_v36, %v11746_v38 }
 0x6c7   :  { %v11788_v41 = vpop.f32.mrf.mxu1 }
 0x6c9   :  { %v11789_v61 = vpop.f32.mrf.mxu1 }
 0x6e2   :  { %v11825_v6 = vpop.f32.mrf.mxu0 }
 0x6e3   :  { %v11866_v49 = vpop.f32.mrf.mxu1  ;;  %v11826_v23 = vadd.f32 %v11825_v6, %v11785_v58 }
 0x6e4   :  { %v11827_v54 = vpop.f32.mrf.mxu0 }
 0x6e5   :  { %v11868_v29 = vpop.f32.mrf.mxu1  ;;  %v11867_v56 = vadd.f32 %v11866_v49, %v11826_v23  ;;  %v11828_v53 = vadd.f32 %v11827_v54, %v11787_v62 }
 0x6e6   :  { %v11829_v46 = vpop.f32.mrf.mxu0 }
 0x6e7   :  { %v11870_v21 = vpop.f32.mrf.mxu1  ;;  %v11869_v51 = vadd.f32 %v11868_v29, %v11828_v53  ;;  %v11875_v1 = vmax.f32 %v11867_v56, 0.0 }
 0x6e8   :  { %v11830_v25 = vpop.f32.mrf.mxu0 }
 0x6e9   :  { %v11871_v57 = vpop.f32.mrf.mxu1  ;;  %v11876_v34 = vmax.f32 %v11869_v51, 0.0  ;;  %v11879_v31 = vpack.c.bf16 %v11875_v1, %v11875_v1 }
 0x6eb   :  { %v11880_v7 = vpack.c.bf16 %v11876_v34, %v11876_v34 }
 0x6ed   :  { %12216 = vmatprep.mubr.bf16.mxu1 %v11880_v7 }
 0x6ee   :  { %12217 = vmatmul.mubr.bf16.vlgmr.msra.gmra.mxu1 %v11879_v31 }
 0x702   :  { %v13857_v12 = vpop.f32.mrf.mxu0 }
 0x704   :  { %v13858_v5 = vpop.f32.mrf.mxu0 }
 0x705   :  { %v13859_v4 = vadd.f32 %v13858_v5, %v13857_v12 }
 0x706   :  { %v13860_v45 = vpop.f32.mrf.mxu0 }
 0x707   :  { %v12179_v35 = vadd.f32 %v13859_v4, %v13808_v24 }
 0x708   :  { %v13861_v59 = vpop.f32.mrf.mxu0 }
 0x7ae   :  { %v13879_v63 = vpop.f32.mrf.mxu1 }
 0x7b0   :  { %v13880_v47 = vpop.f32.mrf.mxu1 }
 0x7b1   :  { %v13881_v40 = vadd.f32 %v13880_v47, %v13879_v63 }
 0x7b2   :  { %v13882_v13 = vpop.f32.mrf.mxu1 }
 0x7b3   :  { %v12219_v8 = vadd.f32 %v13881_v40, %v12179_v35 }
 0x7b4   :  { %v13883_v20 = vpop.f32.mrf.mxu1 }
 0x7b5   :  { %12224 = vst [vmem:[#allocation2] sm:$0x3] %v12219_v8 }
 0x7b6   :  { %16290 = shalt.err (!%p16287_p4)
}
 0x7b7   :  { %12234 = dma.vmem_to_hbm [thread:$0]  %s12232_s10, 32, %s21724_s5, [#allocation3]  }
 0x7b8   :  { %16299 = dma.done.wait [#allocation3], 32  }
 0x7b9   :  { %16300 = vsyncadd [#allocation3], 4294967264 }
 0x7ba   :  { %12238 = vsyncpa [#allocation3], 1 }

</bundles_post_ra>
